<compile_context>
chip_gen: v7x
topology: tpu7x:2x2x1
jax: 0.10.0
libtpu: 0.0.40
codegen_flags: <defaults>
</compile_context>

<pallas_src>
import functools

import jax
import jax.numpy as jnp
from jax.experimental import pallas as pl
from jax.experimental.pallas import tpu as pltpu

# ----------------------------- configuration --------------------------------
INPUT_NC = 3
OUTPUT_NC = 3
NGF = 8
NUM_DOWN = 5           # minimum for the UnetGenerator constructor
BATCH = 2
SPATIAL = 32           # must be >= 2**NUM_DOWN
BN_EPS = 1e-5
LRELU_SLOPE = 0.2


# -------- Pallas kernel: fused (affine+act) -> GEMM -> (+bias, tanh, BN stats) -----
def _fused_gemm_kernel(a_ref, w_ref, scale_ref, shift_ref, bias_ref,
                       out_ref, stats_ref, *, in_act, out_act):
    # Input-side fusion: per-K-column BatchNorm affine + activation applied to the
    # im2col patch tile while it is already in VMEM (no separate elementwise pass).
    a = a_ref[...].astype(jnp.float32) * scale_ref[...] + shift_ref[...]
    if in_act == "lrelu":
        a = jnp.where(a >= 0.0, a, LRELU_SLOPE * a)
    elif in_act == "relu":
        a = jnp.maximum(a, 0.0)
    # MXU matmul: bf16 operands, f32 accumulation.
    acc = jnp.dot(a.astype(w_ref.dtype), w_ref[...],
                  preferred_element_type=jnp.float32)
    acc = acc + bias_ref[...]
    # Per-output-channel sum / sum-of-squares for the BatchNorm that follows this
    # conv (saves a full HBM re-read of the conv output for the stats pass).
    stats_ref[0:1, :] = jnp.sum(acc, axis=0, keepdims=True)
    stats_ref[1:2, :] = jnp.sum(acc * acc, axis=0, keepdims=True)
    if out_act == "tanh":
        acc = jnp.tanh(acc)
    out_ref[...] = acc.astype(out_ref.dtype)


def fused_gemm(a, w, scale_k, shift_k, bias_n, in_act, out_act,
               out_dtype=jnp.bfloat16):
    """out = out_act(in_act(a * scale_k + shift_k) @ w + bias_n), plus per-column
    (sum, sum_sq) of the pre-activation output.

    a: (M, K) bf16 patches, w: (K, N), scale/shift: (K,), bias: (N,) or None.
    The whole problem fits comfortably in VMEM (M<=512, K<=1152, N<=256 for this
    network), so the grid is a single M block: no K reduction axis, no accumulator
    scratch, no init/finalize phase, no operand padding to tile multiples.
    """
    M, K = a.shape
    N = w.shape[1]

    w = w.astype(jnp.bfloat16)
    scale = scale_k.reshape(1, K).astype(jnp.float32)
    shift = shift_k.reshape(1, K).astype(jnp.float32)
    if bias_n is None:
        bias = jnp.zeros((1, N), jnp.float32)
    else:
        bias = bias_n.reshape(1, N).astype(jnp.float32)

    out, stats = pl.pallas_call(
        functools.partial(_fused_gemm_kernel, in_act=in_act, out_act=out_act),
        out_shape=(jax.ShapeDtypeStruct((M, N), out_dtype),
                   jax.ShapeDtypeStruct((2, N), jnp.float32)),
        grid_spec=pltpu.PrefetchScalarGridSpec(
            num_scalar_prefetch=0,
            grid=(1,),
            in_specs=[
                pl.BlockSpec((M, K), lambda i: (0, 0)),
                pl.BlockSpec((K, N), lambda i: (0, 0)),
                pl.BlockSpec((1, K), lambda i: (0, 0)),
                pl.BlockSpec((1, K), lambda i: (0, 0)),
                pl.BlockSpec((1, N), lambda i: (0, 0)),
            ],
            out_specs=(pl.BlockSpec((M, N), lambda i: (0, 0)),
                       pl.BlockSpec((2, N), lambda i: (0, 0))),
        ),
        compiler_params=pltpu.CompilerParams(
            dimension_semantics=("parallel",)),
    )(a, w, scale, shift, bias)

    return out, stats[0, :], stats[1, :]


# ------------------------------- layer glue ----------------------------------
def _pad_hw(x, scale_c, shift_c):
    """Pad H/W by 1 with the per-channel value v = -shift/scale, so that after the
    in-kernel affine+activation the border is exactly zero (PyTorch pads the
    normalized/activated conv input with zeros)."""
    B, H, W, C = x.shape
    v = (-shift_c / scale_c).astype(jnp.bfloat16)
    xp = jnp.broadcast_to(v, (B, H + 2, W + 2, C))
    return xp.at[:, 1:H + 1, 1:W + 1, :].set(x.astype(jnp.bfloat16))


def conv_down(x, w, scale_c, shift_c, in_act, out_dtype=jnp.bfloat16):
    """Conv2d(Cin, Cout, kernel_size=4, stride=2, padding=1, bias=False), fused with
    the preceding (BN affine +) activation; also returns BN batch stats of its own
    raw output.  w: torch layout (Cout, Cin, 4, 4)."""
    B, H, W, C = x.shape
    Cout = w.shape[0]
    Ho, Wo = H // 2, W // 2
    xp = _pad_hw(x, scale_c, shift_c)
    taps = [xp[:, kh:kh + 2 * Ho - 1:2, kw:kw + 2 * Wo - 1:2, :]
            for kh in range(4) for kw in range(4)]
    patches = jnp.stack(taps, axis=3).reshape(B * Ho * Wo, 16 * C)
    wmat = jnp.transpose(w, (2, 3, 1, 0)).reshape(16 * C, Cout)
    out, s1, s2 = fused_gemm(patches, wmat,
                             jnp.tile(scale_c, 16), jnp.tile(shift_c, 16),
                             None, in_act, "none", out_dtype)
    return out.reshape(B, Ho, Wo, Cout), s1, s2, float(B * Ho * Wo)


def _convT_as_k3_weight(w):
    """Rearrange a torch ConvTranspose2d(k=4,s=2,p=1) weight (Cin, Cout, 4, 4) into
    the weight of the equivalent sub-pixel formulation: a k=3 stride-1 VALID conv
    over the 1-padded input producing all four 2x2 output phases at once:
      out[2m+ph, 2n+pw, co] = sum_{th,tw,ci} xpad[m+th, n+tw, ci]
                                             * W[ci, co, 3+ph-2*th, 3+pw-2*tw]
    Returns (9*Cin, 4*Cout) with N ordered as (ph, pw, co)."""
    Cin, Cout = w.shape[0], w.shape[1]
    w3 = jnp.zeros((3, 3, Cin, 2, 2, Cout), jnp.float32)
    for th in range(3):
        for ph in range(2):
            kh = 3 + ph - 2 * th
            if not 0 <= kh <= 3:
                continue
            for tw in range(3):
                for pw in range(2):
                    kw = 3 + pw - 2 * tw
                    if not 0 <= kw <= 3:
                        continue
                    w3 = w3.at[th, tw, :, ph, pw, :].set(w[:, :, kh, kw])
    return w3.reshape(9 * Cin, 4 * Cout)


def conv_up(x, w, bias_c, scale_c, shift_c, in_act, out_act,
            out_dtype=jnp.bfloat16):
    """ConvTranspose2d(Cin, Cout, kernel_size=4, stride=2, padding=1), implemented
    as a sub-pixel k=3 stride-1 conv (no zero-dilated intermediate, 9*Cin instead of
    16*Cin patch columns), fused with the preceding BN affine + activation and the
    trailing Tanh / BN statistics.  w: torch layout (Cin, Cout, 4, 4)."""
    B, H, W, C = x.shape
    Cout = w.shape[1]
    xp = _pad_hw(x, scale_c, shift_c)
    taps = [xp[:, th:th + H, tw:tw + W, :] for th in range(3) for tw in range(3)]
    patches = jnp.stack(taps, axis=3).reshape(B * H * W, 9 * C)
    w3 = _convT_as_k3_weight(w)
    bias_n = None if bias_c is None else jnp.tile(bias_c, 4)
    out, s1, s2 = fused_gemm(patches, w3,
                             jnp.tile(scale_c, 9), jnp.tile(shift_c, 9),
                             bias_n, in_act, out_act, out_dtype)
    # depth-to-space: (B*H*W, 2*2*Cout) -> (B, 2H, 2W, Cout)
    out = out.reshape(B, H, W, 2, 2, Cout).transpose(0, 1, 3, 2, 4, 5)
    out = out.reshape(B, 2 * H, 2 * W, Cout)
    # fold the 4 phase copies of the per-channel stats together
    s1 = s1.reshape(4, Cout).sum(axis=0)
    s2 = s2.reshape(4, Cout).sum(axis=0)
    return out, s1, s2, float(B * H * W * 4)


def bn_affine(s1, s2, count, gamma, beta):
    """Training-mode BatchNorm (batch stats, biased variance) -> per-channel affine."""
    mean = s1 / count
    var = s2 / count - mean * mean
    scale = gamma * jax.lax.rsqrt(jnp.maximum(var, 0.0) + BN_EPS)
    shift = beta - mean * scale
    return scale, shift


# ----------------------------- parameter init -------------------------------
def _w(key, shape, scale=0.1):
    return jax.random.normal(key, shape, jnp.float32) * scale


def init_params(key):
    ngf = NGF
    ks = iter(jax.random.split(key, 11))
    p = {}
    # encoder (downconv) weights, outermost -> innermost; Conv2d layout (Cout,Cin,4,4)
    enc_ch = [(INPUT_NC, ngf), (ngf, ngf * 2), (ngf * 2, ngf * 4),
              (ngf * 4, ngf * 8), (ngf * 8, ngf * 8)]
    for i, (ci, co) in enumerate(enc_ch):
        p[f"enc{i}_w"] = _w(next(ks), (co, ci, 4, 4))
    # decoder (upconv) weights, innermost -> outermost; ConvTranspose2d layout (Cin,Cout,4,4)
    dec_ch = [(ngf * 8, ngf * 8), (ngf * 16, ngf * 4), (ngf * 8, ngf * 2),
              (ngf * 4, ngf), (ngf * 2, OUTPUT_NC)]
    for i, (ci, co) in enumerate(dec_ch):
        p[f"dec{i}_w"] = _w(next(ks), (ci, co, 4, 4))
    p["dec4_b"] = _w(next(ks), (OUTPUT_NC,))   # only the outermost upconv has a bias
    # BatchNorm gamma/beta (fresh torch module: ones / zeros)
    for name, c in [("bn_d1", ngf * 2), ("bn_d2", ngf * 4), ("bn_d3", ngf * 8),
                    ("bn_u0", ngf * 8), ("bn_u1", ngf * 4), ("bn_u2", ngf * 2),
                    ("bn_u3", ngf)]:
        p[name + "_g"] = jnp.ones((c,), jnp.float32)
        p[name + "_b"] = jnp.zeros((c,), jnp.float32)
    return p


# --------------------------- UnetGenerator forward ---------------------------
def unet_forward(params, x_nchw):
    ngf = NGF
    one = lambda c: jnp.ones((c,), jnp.float32)
    zero = lambda c: jnp.zeros((c,), jnp.float32)
    x0 = jnp.transpose(x_nchw, (0, 2, 3, 1)).astype(jnp.float32)   # -> NHWC

    # ------------------------------ encoder ------------------------------
    # outermost downconv: applied to the raw input, no norm afterwards
    d1, _, _, _ = conv_down(x0, params["enc0_w"], one(INPUT_NC), zero(INPUT_NC), "none")
    # L1 downconv: LeakyReLU(d1) (d1 has no norm), BatchNorm(ngf*2) on the output
    d2, s1, s2, n = conv_down(d1, params["enc1_w"], one(ngf), zero(ngf), "lrelu")
    sc_d2, sh_d2 = bn_affine(s1, s2, n, params["bn_d1_g"], params["bn_d1_b"])
    # L2 downconv
    d3, s1, s2, n = conv_down(d2, params["enc2_w"], sc_d2, sh_d2, "lrelu")
    sc_d3, sh_d3 = bn_affine(s1, s2, n, params["bn_d2_g"], params["bn_d2_b"])
    # L3 downconv
    d4, s1, s2, n = conv_down(d3, params["enc3_w"], sc_d3, sh_d3, "lrelu")
    sc_d4, sh_d4 = bn_affine(s1, s2, n, params["bn_d3_g"], params["bn_d3_b"])
    # innermost downconv: LeakyReLU(BN(d4)), no norm afterwards
    d5, _, _, _ = conv_down(d4, params["enc4_w"], sc_d4, sh_d4, "lrelu")

    # ------------------------------ decoder ------------------------------
    # innermost upconv: ReLU(d5), BatchNorm(ngf*8) on the output
    t5, s1, s2, n = conv_up(d5, params["dec0_w"], None, one(ngf * 8), zero(ngf * 8),
                            "relu", "none")
    sc_t5, sh_t5 = bn_affine(s1, s2, n, params["bn_u0_g"], params["bn_u0_b"])
    # L3 upconv: ReLU(cat([BN(d4), BN(t5)]))
    y = jnp.concatenate([d4, t5], axis=-1)
    sc = jnp.concatenate([sc_d4, sc_t5]); sh = jnp.concatenate([sh_d4, sh_t5])
    t4, s1, s2, n = conv_up(y, params["dec1_w"], None, sc, sh, "relu", "none")
    sc_t4, sh_t4 = bn_affine(s1, s2, n, params["bn_u1_g"], params["bn_u1_b"])
    # L2 upconv
    y = jnp.concatenate([d3, t4], axis=-1)
    sc = jnp.concatenate([sc_d3, sc_t4]); sh = jnp.concatenate([sh_d3, sh_t4])
    t3, s1, s2, n = conv_up(y, params["dec2_w"], None, sc, sh, "relu", "none")
    sc_t3, sh_t3 = bn_affine(s1, s2, n, params["bn_u2_g"], params["bn_u2_b"])
    # L1 upconv
    y = jnp.concatenate([d2, t3], axis=-1)
    sc = jnp.concatenate([sc_d2, sc_t3]); sh = jnp.concatenate([sh_d2, sh_t3])
    t2, s1, s2, n = conv_up(y, params["dec3_w"], None, sc, sh, "relu", "none")
    sc_t2, sh_t2 = bn_affine(s1, s2, n, params["bn_u3_g"], params["bn_u3_b"])
    # outermost upconv: ReLU(cat([d1 (raw), BN(t2)])) -> ConvT(+bias) -> Tanh
    y = jnp.concatenate([d1, t2], axis=-1)
    sc = jnp.concatenate([one(ngf), sc_t2]); sh = jnp.concatenate([zero(ngf), sh_t2])
    t1, _, _, _ = conv_up(y, params["dec4_w"], params["dec4_b"], sc, sh,
                          "relu", "tanh", out_dtype=jnp.float32)

    return jnp.transpose(t1, (0, 3, 1, 2))   # back to NCHW like PyTorch


# ---------------------------------- main -------------------------------------
if __name__ == "__main__":
    key = jax.random.PRNGKey(0)
    pkey, xkey = jax.random.split(key)
    params = init_params(pkey)
    x = jax.random.normal(xkey, (BATCH, INPUT_NC, SPATIAL, SPATIAL), jnp.float32)

    fwd = jax.jit(unet_forward)
    out = fwd(params, x)
    jax.block_until_ready(out)

    assert out.shape == (BATCH, OUTPUT_NC, SPATIAL, SPATIAL)
    assert bool(jnp.all(jnp.isfinite(out)))
    assert bool(jnp.all(jnp.abs(out) <= 1.0))

    print("KERNEL_OK")
</pallas_src>

<mosaic_0001>
module attributes {stable_mosaic.version = 11 : i64} {
  func.func @_fused_gemm_kernel(%arg0: i32, %arg1: memref<512x48xbf16, #tpu.memory_space<vmem>>, %arg2: memref<48x8xbf16, #tpu.memory_space<vmem>>, %arg3: memref<1x48xf32, #tpu.memory_space<vmem>>, %arg4: memref<1x48xf32, #tpu.memory_space<vmem>>, %arg5: memref<1x8xf32, #tpu.memory_space<vmem>>, %arg6: memref<512x8xbf16, #tpu.memory_space<vmem>>, %arg7: memref<2x8xf32, #tpu.memory_space<vmem>>) attributes {dimension_semantics = [#tpu.dimension_semantics<parallel>], iteration_bounds = array<i64: 1>, scalar_prefetch = 0 : i64, scratch_operands = 0 : i64, tpu.core_type = #tpu.core_type<tc>, window_params = [{pipeline_mode = #tpu.pipeline_mode<synchronous>, transform_indices = @transform_0, window_bounds = array<i64: 512, 48>}, {pipeline_mode = #tpu.pipeline_mode<synchronous>, transform_indices = @transform_1, window_bounds = array<i64: 48, 8>}, {pipeline_mode = #tpu.pipeline_mode<synchronous>, transform_indices = @transform_2, window_bounds = array<i64: 1, 48>}, {pipeline_mode = #tpu.pipeline_mode<synchronous>, transform_indices = @transform_3, window_bounds = array<i64: 1, 48>}, {pipeline_mode = #tpu.pipeline_mode<synchronous>, transform_indices = @transform_4, window_bounds = array<i64: 1, 8>}, {pipeline_mode = #tpu.pipeline_mode<synchronous>, transform_indices = @transform_5, window_bounds = array<i64: 512, 8>}, {pipeline_mode = #tpu.pipeline_mode<synchronous>, transform_indices = @transform_6, window_bounds = array<i64: 2, 8>}]} {
    %c0 = arith.constant 0 : index
    %c0_0 = arith.constant 0 : index
    %0 = vector.load %arg1[%c0, %c0_0] : memref<512x48xbf16, #tpu.memory_space<vmem>>, vector<512x48xbf16>
    %1 = arith.extf %0 : vector<512x48xbf16> to vector<512x48xf32>
    %c0_1 = arith.constant 0 : index
    %c0_2 = arith.constant 0 : index
    %2 = vector.load %arg3[%c0_1, %c0_2] : memref<1x48xf32, #tpu.memory_space<vmem>>, vector<1x48xf32>
    %3 = vector.broadcast %2 : vector<1x48xf32> to vector<512x48xf32>
    %4 = arith.mulf %1, %3 : vector<512x48xf32>
    %c0_3 = arith.constant 0 : index
    %c0_4 = arith.constant 0 : index
    %5 = vector.load %arg4[%c0_3, %c0_4] : memref<1x48xf32, #tpu.memory_space<vmem>>, vector<1x48xf32>
    %6 = vector.broadcast %5 : vector<1x48xf32> to vector<512x48xf32>
    %7 = arith.addf %4, %6 : vector<512x48xf32>
    %8 = arith.truncf %7 : vector<512x48xf32> to vector<512x48xbf16>
    %c0_5 = arith.constant 0 : index
    %c0_6 = arith.constant 0 : index
    %9 = vector.load %arg2[%c0_5, %c0_6] : memref<48x8xbf16, #tpu.memory_space<vmem>>, vector<48x8xbf16>
    %cst = arith.constant dense<0.000000e+00> : vector<512x8xf32>
    %10 = tpu.matmul %8, %9, %cst {dimension_numbers = #tpu.dot_dimension_numbers<[1], [0], [0], [1], [0, 0, 1, 1], [], []>} : vector<512x48xbf16>, vector<48x8xbf16>, vector<512x8xf32> -> vector<512x8xf32>
    %c0_7 = arith.constant 0 : index
    %c0_8 = arith.constant 0 : index
    %11 = vector.load %arg5[%c0_7, %c0_8] : memref<1x8xf32, #tpu.memory_space<vmem>>, vector<1x8xf32>
    %12 = vector.broadcast %11 : vector<1x8xf32> to vector<512x8xf32>
    %13 = arith.addf %10, %12 : vector<512x8xf32>
    %cst_9 = arith.constant dense<0.000000e+00> : vector<8xf32>
    %14 = vector.multi_reduction <add>, %13, %cst_9 [0] : vector<512x8xf32> to vector<8xf32>
    %15 = vector.shape_cast %14 : vector<8xf32> to vector<1x8xf32>
    %c0_10 = arith.constant 0 : index
    %c0_11 = arith.constant 0 : index
    %16 = vector.load %arg7[%c0_10, %c0_11] : memref<2x8xf32, #tpu.memory_space<vmem>>, vector<1x8xf32>
    tpu.vector_store %arg7[%c0_10, %c0_11], %15 {strides = array<i32>} : memref<2x8xf32, #tpu.memory_space<vmem>>, vector<1x8xf32>,
    %17 = arith.mulf %13, %13 : vector<512x8xf32>
    %cst_12 = arith.constant dense<0.000000e+00> : vector<8xf32>
    %18 = vector.multi_reduction <add>, %17, %cst_12 [0] : vector<512x8xf32> to vector<8xf32>
    %19 = vector.shape_cast %18 : vector<8xf32> to vector<1x8xf32>
    %c1 = arith.constant 1 : index
    %c0_13 = arith.constant 0 : index
    %20 = vector.load %arg7[%c1, %c0_13] : memref<2x8xf32, #tpu.memory_space<vmem>>, vector<1x8xf32>
    tpu.vector_store %arg7[%c1, %c0_13], %19 {strides = array<i32>} : memref<2x8xf32, #tpu.memory_space<vmem>>, vector<1x8xf32>,
    %21 = arith.truncf %13 : vector<512x8xf32> to vector<512x8xbf16>
    %c0_14 = arith.constant 0 : index
    %c0_15 = arith.constant 0 : index
    %22 = vector.load %arg6[%c0_14, %c0_15] : memref<512x8xbf16, #tpu.memory_space<vmem>>, vector<512x8xbf16>
    tpu.vector_store %arg6[%c0_14, %c0_15], %21 {strides = array<i32>} : memref<512x8xbf16, #tpu.memory_space<vmem>>, vector<512x8xbf16>,
    return
  }
  func.func @transform_0(%arg0: i32) -> (i32, i32) {
    %c0_i32 = arith.constant 0 : i32
    %c0_i32_0 = arith.constant 0 : i32
    %c0_i32_1 = arith.constant 0 : i32
    return %c0_i32, %c0_i32_0 : i32, i32
  }
  func.func @transform_1(%arg0: i32) -> (i32, i32) {
    %c0_i32 = arith.constant 0 : i32
    %c0_i32_0 = arith.constant 0 : i32
    %c0_i32_1 = arith.constant 0 : i32
    return %c0_i32, %c0_i32_0 : i32, i32
  }
  func.func @transform_2(%arg0: i32) -> (i32, i32) {
    %c0_i32 = arith.constant 0 : i32
    %c0_i32_0 = arith.constant 0 : i32
    %c0_i32_1 = arith.constant 0 : i32
    return %c0_i32, %c0_i32_0 : i32, i32
  }
  func.func @transform_3(%arg0: i32) -> (i32, i32) {
    %c0_i32 = arith.constant 0 : i32
    %c0_i32_0 = arith.constant 0 : i32
    %c0_i32_1 = arith.constant 0 : i32
    return %c0_i32, %c0_i32_0 : i32, i32
  }
  func.func @transform_4(%arg0: i32) -> (i32, i32) {
    %c0_i32 = arith.constant 0 : i32
    %c0_i32_0 = arith.constant 0 : i32
    %c0_i32_1 = arith.constant 0 : i32
    return %c0_i32, %c0_i32_0 : i32, i32
  }
  func.func @transform_5(%arg0: i32) -> (i32, i32) {
    %c0_i32 = arith.constant 0 : i32
    %c0_i32_0 = arith.constant 0 : i32
    %c0_i32_1 = arith.constant 0 : i32
    return %c0_i32, %c0_i32_0 : i32, i32
  }
  func.func @transform_6(%arg0: i32) -> (i32, i32) {
    %c0_i32 = arith.constant 0 : i32
    %c0_i32_0 = arith.constant 0 : i32
    %c0_i32_1 = arith.constant 0 : i32
    return %c0_i32, %c0_i32_0 : i32, i32
  }
}

module attributes {stable_mosaic.version = 11 : i64} {
  func.func @_fused_gemm_kernel(%arg0: i32, %arg1: memref<128x128xbf16, #tpu.memory_space<vmem>>, %arg2: memref<128x16xbf16, #tpu.memory_space<vmem>>, %arg3: memref<1x128xf32, #tpu.memory_space<vmem>>, %arg4: memref<1x128xf32, #tpu.memory_space<vmem>>, %arg5: memref<1x16xf32, #tpu.memory_space<vmem>>, %arg6: memref<128x16xbf16, #tpu.memory_space<vmem>>, %arg7: memref<2x16xf32, #tpu.memory_space<vmem>>) attributes {dimension_semantics = [#tpu.dimension_semantics<parallel>], iteration_bounds = array<i64: 1>, scalar_prefetch = 0 : i64, scratch_operands = 0 : i64, tpu.core_type = #tpu.core_type<tc>, window_params = [{pipeline_mode = #tpu.pipeline_mode<synchronous>, transform_indices = @transform_0, window_bounds = array<i64: 128, 128>}, {pipeline_mode = #tpu.pipeline_mode<synchronous>, transform_indices = @transform_1, window_bounds = array<i64: 128, 16>}, {pipeline_mode = #tpu.pipeline_mode<synchronous>, transform_indices = @transform_2, window_bounds = array<i64: 1, 128>}, {pipeline_mode = #tpu.pipeline_mode<synchronous>, transform_indices = @transform_3, window_bounds = array<i64: 1, 128>}, {pipeline_mode = #tpu.pipeline_mode<synchronous>, transform_indices = @transform_4, window_bounds = array<i64: 1, 16>}, {pipeline_mode = #tpu.pipeline_mode<synchronous>, transform_indices = @transform_5, window_bounds = array<i64: 128, 16>}, {pipeline_mode = #tpu.pipeline_mode<synchronous>, transform_indices = @transform_6, window_bounds = array<i64: 2, 16>}]} {
    %c0 = arith.constant 0 : index
    %c0_0 = arith.constant 0 : index
    %0 = vector.load %arg1[%c0, %c0_0] : memref<128x128xbf16, #tpu.memory_space<vmem>>, vector<128x128xbf16>
    %1 = arith.extf %0 : vector<128x128xbf16> to vector<128x128xf32>
    %c0_1 = arith.constant 0 : index
    %c0_2 = arith.constant 0 : index
    %2 = vector.load %arg3[%c0_1, %c0_2] : memref<1x128xf32, #tpu.memory_space<vmem>>, vector<1x128xf32>
    %3 = vector.broadcast %2 : vector<1x128xf32> to vector<128x128xf32>
    %4 = arith.mulf %1, %3 : vector<128x128xf32>
    %c0_3 = arith.constant 0 : index
    %c0_4 = arith.constant 0 : index
    %5 = vector.load %arg4[%c0_3, %c0_4] : memref<1x128xf32, #tpu.memory_space<vmem>>, vector<1x128xf32>
    %6 = vector.broadcast %5 : vector<1x128xf32> to vector<128x128xf32>
    %7 = arith.addf %4, %6 : vector<128x128xf32>
    %cst = arith.constant 0.000000e+00 : f32
    %8 = vector.broadcast %cst : f32 to vector<128x128xf32>
    %9 = arith.cmpf oge, %7, %8 : vector<128x128xf32>
    %cst_5 = arith.constant 2.000000e-01 : f32
    %10 = vector.broadcast %cst_5 : f32 to vector<128x128xf32>
    %11 = arith.mulf %10, %7 : vector<128x128xf32>
    %12 = arith.select %9, %7, %11 : vector<128x128xi1>, vector<128x128xf32>
    %13 = arith.truncf %12 : vector<128x128xf32> to vector<128x128xbf16>
    %c0_6 = arith.constant 0 : index
    %c0_7 = arith.constant 0 : index
    %14 = vector.load %arg2[%c0_6, %c0_7] : memref<128x16xbf16, #tpu.memory_space<vmem>>, vector<128x16xbf16>
    %cst_8 = arith.constant dense<0.000000e+00> : vector<128x16xf32>
    %15 = tpu.matmul %13, %14, %cst_8 {dimension_numbers = #tpu.dot_dimension_numbers<[1], [0], [0], [1], [0, 0, 1, 1], [], []>} : vector<128x128xbf16>, vector<128x16xbf16>, vector<128x16xf32> -> vector<128x16xf32>
    %c0_9 = arith.constant 0 : index
    %c0_10 = arith.constant 0 : index
    %16 = vector.load %arg5[%c0_9, %c0_10] : memref<1x16xf32, #tpu.memory_space<vmem>>, vector<1x16xf32>
    %17 = vector.broadcast %16 : vector<1x16xf32> to vector<128x16xf32>
    %18 = arith.addf %15, %17 : vector<128x16xf32>
    %cst_11 = arith.constant dense<0.000000e+00> : vector<16xf32>
    %19 = vector.multi_reduction <add>, %18, %cst_11 [0] : vector<128x16xf32> to vector<16xf32>
    %20 = vector.shape_cast %19 : vector<16xf32> to vector<1x16xf32>
    %c0_12 = arith.constant 0 : index
    %c0_13 = arith.constant 0 : index
    %21 = vector.load %arg7[%c0_12, %c0_13] : memref<2x16xf32, #tpu.memory_space<vmem>>, vector<1x16xf32>
    tpu.vector_store %arg7[%c0_12, %c0_13], %20 {strides = array<i32>} : memref<2x16xf32, #tpu.memory_space<vmem>>, vector<1x16xf32>,
    %22 = arith.mulf %18, %18 : vector<128x16xf32>
    %cst_14 = arith.constant dense<0.000000e+00> : vector<16xf32>
    %23 = vector.multi_reduction <add>, %22, %cst_14 [0] : vector<128x16xf32> to vector<16xf32>
    %24 = vector.shape_cast %23 : vector<16xf32> to vector<1x16xf32>
    %c1 = arith.constant 1 : index
    %c0_15 = arith.constant 0 : index
    %25 = vector.load %arg7[%c1, %c0_15] : memref<2x16xf32, #tpu.memory_space<vmem>>, vector<1x16xf32>
    tpu.vector_store %arg7[%c1, %c0_15], %24 {strides = array<i32>} : memref<2x16xf32, #tpu.memory_space<vmem>>, vector<1x16xf32>,
    %26 = arith.truncf %18 : vector<128x16xf32> to vector<128x16xbf16>
    %c0_16 = arith.constant 0 : index
    %c0_17 = arith.constant 0 : index
    %27 = vector.load %arg6[%c0_16, %c0_17] : memref<128x16xbf16, #tpu.memory_space<vmem>>, vector<128x16xbf16>
    tpu.vector_store %arg6[%c0_16, %c0_17], %26 {strides = array<i32>} : memref<128x16xbf16, #tpu.memory_space<vmem>>, vector<128x16xbf16>,
    return
  }
  func.func @transform_0(%arg0: i32) -> (i32, i32) {
    %c0_i32 = arith.constant 0 : i32
    %c0_i32_0 = arith.constant 0 : i32
    %c0_i32_1 = arith.constant 0 : i32
    return %c0_i32, %c0_i32_0 : i32, i32
  }
  func.func @transform_1(%arg0: i32) -> (i32, i32) {
    %c0_i32 = arith.constant 0 : i32
    %c0_i32_0 = arith.constant 0 : i32
    %c0_i32_1 = arith.constant 0 : i32
    return %c0_i32, %c0_i32_0 : i32, i32
  }
  func.func @transform_2(%arg0: i32) -> (i32, i32) {
    %c0_i32 = arith.constant 0 : i32
    %c0_i32_0 = arith.constant 0 : i32
    %c0_i32_1 = arith.constant 0 : i32
    return %c0_i32, %c0_i32_0 : i32, i32
  }
  func.func @transform_3(%arg0: i32) -> (i32, i32) {
    %c0_i32 = arith.constant 0 : i32
    %c0_i32_0 = arith.constant 0 : i32
    %c0_i32_1 = arith.constant 0 : i32
    return %c0_i32, %c0_i32_0 : i32, i32
  }
  func.func @transform_4(%arg0: i32) -> (i32, i32) {
    %c0_i32 = arith.constant 0 : i32
    %c0_i32_0 = arith.constant 0 : i32
    %c0_i32_1 = arith.constant 0 : i32
    return %c0_i32, %c0_i32_0 : i32, i32
  }
  func.func @transform_5(%arg0: i32) -> (i32, i32) {
    %c0_i32 = arith.constant 0 : i32
    %c0_i32_0 = arith.constant 0 : i32
    %c0_i32_1 = arith.constant 0 : i32
    return %c0_i32, %c0_i32_0 : i32, i32
  }
  func.func @transform_6(%arg0: i32) -> (i32, i32) {
    %c0_i32 = arith.constant 0 : i32
    %c0_i32_0 = arith.constant 0 : i32
    %c0_i32_1 = arith.constant 0 : i32
    return %c0_i32, %c0_i32_0 : i32, i32
  }
}

module attributes {stable_mosaic.version = 11 : i64} {
  func.func @_fused_gemm_kernel(%arg0: i32, %arg1: memref<32x256xbf16, #tpu.memory_space<vmem>>, %arg2: memref<256x32xbf16, #tpu.memory_space<vmem>>, %arg3: memref<1x256xf32, #tpu.memory_space<vmem>>, %arg4: memref<1x256xf32, #tpu.memory_space<vmem>>, %arg5: memref<1x32xf32, #tpu.memory_space<vmem>>, %arg6: memref<32x32xbf16, #tpu.memory_space<vmem>>, %arg7: memref<2x32xf32, #tpu.memory_space<vmem>>) attributes {dimension_semantics = [#tpu.dimension_semantics<parallel>], iteration_bounds = array<i64: 1>, scalar_prefetch = 0 : i64, scratch_operands = 0 : i64, tpu.core_type = #tpu.core_type<tc>, window_params = [{pipeline_mode = #tpu.pipeline_mode<synchronous>, transform_indices = @transform_0, window_bounds = array<i64: 32, 256>}, {pipeline_mode = #tpu.pipeline_mode<synchronous>, transform_indices = @transform_1, window_bounds = array<i64: 256, 32>}, {pipeline_mode = #tpu.pipeline_mode<synchronous>, transform_indices = @transform_2, window_bounds = array<i64: 1, 256>}, {pipeline_mode = #tpu.pipeline_mode<synchronous>, transform_indices = @transform_3, window_bounds = array<i64: 1, 256>}, {pipeline_mode = #tpu.pipeline_mode<synchronous>, transform_indices = @transform_4, window_bounds = array<i64: 1, 32>}, {pipeline_mode = #tpu.pipeline_mode<synchronous>, transform_indices = @transform_5, window_bounds = array<i64: 32, 32>}, {pipeline_mode = #tpu.pipeline_mode<synchronous>, transform_indices = @transform_6, window_bounds = array<i64: 2, 32>}]} {
    %c0 = arith.constant 0 : index
    %c0_0 = arith.constant 0 : index
    %0 = vector.load %arg1[%c0, %c0_0] : memref<32x256xbf16, #tpu.memory_space<vmem>>, vector<32x256xbf16>
    %1 = arith.extf %0 : vector<32x256xbf16> to vector<32x256xf32>
    %c0_1 = arith.constant 0 : index
    %c0_2 = arith.constant 0 : index
    %2 = vector.load %arg3[%c0_1, %c0_2] : memref<1x256xf32, #tpu.memory_space<vmem>>, vector<1x256xf32>
    %3 = vector.broadcast %2 : vector<1x256xf32> to vector<32x256xf32>
    %4 = arith.mulf %1, %3 : vector<32x256xf32>
    %c0_3 = arith.constant 0 : index
    %c0_4 = arith.constant 0 : index
    %5 = vector.load %arg4[%c0_3, %c0_4] : memref<1x256xf32, #tpu.memory_space<vmem>>, vector<1x256xf32>
    %6 = vector.broadcast %5 : vector<1x256xf32> to vector<32x256xf32>
    %7 = arith.addf %4, %6 : vector<32x256xf32>
    %cst = arith.constant 0.000000e+00 : f32
    %8 = vector.broadcast %cst : f32 to vector<32x256xf32>
    %9 = arith.cmpf oge, %7, %8 : vector<32x256xf32>
    %cst_5 = arith.constant 2.000000e-01 : f32
    %10 = vector.broadcast %cst_5 : f32 to vector<32x256xf32>
    %11 = arith.mulf %10, %7 : vector<32x256xf32>
    %12 = arith.select %9, %7, %11 : vector<32x256xi1>, vector<32x256xf32>
    %13 = arith.truncf %12 : vector<32x256xf32> to vector<32x256xbf16>
    %c0_6 = arith.constant 0 : index
    %c0_7 = arith.constant 0 : index
    %14 = vector.load %arg2[%c0_6, %c0_7] : memref<256x32xbf16, #tpu.memory_space<vmem>>, vector<256x32xbf16>
    %cst_8 = arith.constant dense<0.000000e+00> : vector<32x32xf32>
    %15 = tpu.matmul %13, %14, %cst_8 {dimension_numbers = #tpu.dot_dimension_numbers<[1], [0], [0], [1], [0, 0, 1, 1], [], []>} : vector<32x256xbf16>, vector<256x32xbf16>, vector<32x32xf32> -> vector<32x32xf32>
    %c0_9 = arith.constant 0 : index
    %c0_10 = arith.constant 0 : index
    %16 = vector.load %arg5[%c0_9, %c0_10] : memref<1x32xf32, #tpu.memory_space<vmem>>, vector<1x32xf32>
    %17 = vector.broadcast %16 : vector<1x32xf32> to vector<32x32xf32>
    %18 = arith.addf %15, %17 : vector<32x32xf32>
    %cst_11 = arith.constant dense<0.000000e+00> : vector<32xf32>
    %19 = vector.multi_reduction <add>, %18, %cst_11 [0] : vector<32x32xf32> to vector<32xf32>
    %20 = vector.shape_cast %19 : vector<32xf32> to vector<1x32xf32>
    %c0_12 = arith.constant 0 : index
    %c0_13 = arith.constant 0 : index
    %21 = vector.load %arg7[%c0_12, %c0_13] : memref<2x32xf32, #tpu.memory_space<vmem>>, vector<1x32xf32>
    tpu.vector_store %arg7[%c0_12, %c0_13], %20 {strides = array<i32>} : memref<2x32xf32, #tpu.memory_space<vmem>>, vector<1x32xf32>,
    %22 = arith.mulf %18, %18 : vector<32x32xf32>
    %cst_14 = arith.constant dense<0.000000e+00> : vector<32xf32>
    %23 = vector.multi_reduction <add>, %22, %cst_14 [0] : vector<32x32xf32> to vector<32xf32>
    %24 = vector.shape_cast %23 : vector<32xf32> to vector<1x32xf32>
    %c1 = arith.constant 1 : index
    %c0_15 = arith.constant 0 : index
    %25 = vector.load %arg7[%c1, %c0_15] : memref<2x32xf32, #tpu.memory_space<vmem>>, vector<1x32xf32>
    tpu.vector_store %arg7[%c1, %c0_15], %24 {strides = array<i32>} : memref<2x32xf32, #tpu.memory_space<vmem>>, vector<1x32xf32>,
    %26 = arith.truncf %18 : vector<32x32xf32> to vector<32x32xbf16>
    %c0_16 = arith.constant 0 : index
    %c0_17 = arith.constant 0 : index
    %27 = vector.load %arg6[%c0_16, %c0_17] : memref<32x32xbf16, #tpu.memory_space<vmem>>, vector<32x32xbf16>
    tpu.vector_store %arg6[%c0_16, %c0_17], %26 {strides = array<i32>} : memref<32x32xbf16, #tpu.memory_space<vmem>>, vector<32x32xbf16>,
    return
  }
  func.func @transform_0(%arg0: i32) -> (i32, i32) {
    %c0_i32 = arith.constant 0 : i32
    %c0_i32_0 = arith.constant 0 : i32
    %c0_i32_1 = arith.constant 0 : i32
    return %c0_i32, %c0_i32_0 : i32, i32
  }
  func.func @transform_1(%arg0: i32) -> (i32, i32) {
    %c0_i32 = arith.constant 0 : i32
    %c0_i32_0 = arith.constant 0 : i32
    %c0_i32_1 = arith.constant 0 : i32
    return %c0_i32, %c0_i32_0 : i32, i32
  }
  func.func @transform_2(%arg0: i32) -> (i32, i32) {
    %c0_i32 = arith.constant 0 : i32
    %c0_i32_0 = arith.constant 0 : i32
    %c0_i32_1 = arith.constant 0 : i32
    return %c0_i32, %c0_i32_0 : i32, i32
  }
  func.func @transform_3(%arg0: i32) -> (i32, i32) {
    %c0_i32 = arith.constant 0 : i32
    %c0_i32_0 = arith.constant 0 : i32
    %c0_i32_1 = arith.constant 0 : i32
    return %c0_i32, %c0_i32_0 : i32, i32
  }
  func.func @transform_4(%arg0: i32) -> (i32, i32) {
    %c0_i32 = arith.constant 0 : i32
    %c0_i32_0 = arith.constant 0 : i32
    %c0_i32_1 = arith.constant 0 : i32
    return %c0_i32, %c0_i32_0 : i32, i32
  }
  func.func @transform_5(%arg0: i32) -> (i32, i32) {
    %c0_i32 = arith.constant 0 : i32
    %c0_i32_0 = arith.constant 0 : i32
    %c0_i32_1 = arith.constant 0 : i32
    return %c0_i32, %c0_i32_0 : i32, i32
  }
  func.func @transform_6(%arg0: i32) -> (i32, i32) {
    %c0_i32 = arith.constant 0 : i32
    %c0_i32_0 = arith.constant 0 : i32
    %c0_i32_1 = arith.constant 0 : i32
    return %c0_i32, %c0_i32_0 : i32, i32
  }
}

module attributes {stable_mosaic.version = 11 : i64} {
  func.func @_fused_gemm_kernel(%arg0: i32, %arg1: memref<8x512xbf16, #tpu.memory_space<vmem>>, %arg2: memref<512x64xbf16, #tpu.memory_space<vmem>>, %arg3: memref<1x512xf32, #tpu.memory_space<vmem>>, %arg4: memref<1x512xf32, #tpu.memory_space<vmem>>, %arg5: memref<1x64xf32, #tpu.memory_space<vmem>>, %arg6: memref<8x64xbf16, #tpu.memory_space<vmem>>, %arg7: memref<2x64xf32, #tpu.memory_space<vmem>>) attributes {dimension_semantics = [#tpu.dimension_semantics<parallel>], iteration_bounds = array<i64: 1>, scalar_prefetch = 0 : i64, scratch_operands = 0 : i64, tpu.core_type = #tpu.core_type<tc>, window_params = [{pipeline_mode = #tpu.pipeline_mode<synchronous>, transform_indices = @transform_0, window_bounds = array<i64: 8, 512>}, {pipeline_mode = #tpu.pipeline_mode<synchronous>, transform_indices = @transform_1, window_bounds = array<i64: 512, 64>}, {pipeline_mode = #tpu.pipeline_mode<synchronous>, transform_indices = @transform_2, window_bounds = array<i64: 1, 512>}, {pipeline_mode = #tpu.pipeline_mode<synchronous>, transform_indices = @transform_3, window_bounds = array<i64: 1, 512>}, {pipeline_mode = #tpu.pipeline_mode<synchronous>, transform_indices = @transform_4, window_bounds = array<i64: 1, 64>}, {pipeline_mode = #tpu.pipeline_mode<synchronous>, transform_indices = @transform_5, window_bounds = array<i64: 8, 64>}, {pipeline_mode = #tpu.pipeline_mode<synchronous>, transform_indices = @transform_6, window_bounds = array<i64: 2, 64>}]} {
    %c0 = arith.constant 0 : index
    %c0_0 = arith.constant 0 : index
    %0 = vector.load %arg1[%c0, %c0_0] : memref<8x512xbf16, #tpu.memory_space<vmem>>, vector<8x512xbf16>
    %1 = arith.extf %0 : vector<8x512xbf16> to vector<8x512xf32>
    %c0_1 = arith.constant 0 : index
    %c0_2 = arith.constant 0 : index
    %2 = vector.load %arg3[%c0_1, %c0_2] : memref<1x512xf32, #tpu.memory_space<vmem>>, vector<1x512xf32>
    %3 = vector.broadcast %2 : vector<1x512xf32> to vector<8x512xf32>
    %4 = arith.mulf %1, %3 : vector<8x512xf32>
    %c0_3 = arith.constant 0 : index
    %c0_4 = arith.constant 0 : index
    %5 = vector.load %arg4[%c0_3, %c0_4] : memref<1x512xf32, #tpu.memory_space<vmem>>, vector<1x512xf32>
    %6 = vector.broadcast %5 : vector<1x512xf32> to vector<8x512xf32>
    %7 = arith.addf %4, %6 : vector<8x512xf32>
    %cst = arith.constant 0.000000e+00 : f32
    %8 = vector.broadcast %cst : f32 to vector<8x512xf32>
    %9 = arith.cmpf oge, %7, %8 : vector<8x512xf32>
    %cst_5 = arith.constant 2.000000e-01 : f32
    %10 = vector.broadcast %cst_5 : f32 to vector<8x512xf32>
    %11 = arith.mulf %10, %7 : vector<8x512xf32>
    %12 = arith.select %9, %7, %11 : vector<8x512xi1>, vector<8x512xf32>
    %13 = arith.truncf %12 : vector<8x512xf32> to vector<8x512xbf16>
    %c0_6 = arith.constant 0 : index
    %c0_7 = arith.constant 0 : index
    %14 = vector.load %arg2[%c0_6, %c0_7] : memref<512x64xbf16, #tpu.memory_space<vmem>>, vector<512x64xbf16>
    %cst_8 = arith.constant dense<0.000000e+00> : vector<8x64xf32>
    %15 = tpu.matmul %13, %14, %cst_8 {dimension_numbers = #tpu.dot_dimension_numbers<[1], [0], [0], [1], [0, 0, 1, 1], [], []>} : vector<8x512xbf16>, vector<512x64xbf16>, vector<8x64xf32> -> vector<8x64xf32>
    %c0_9 = arith.constant 0 : index
    %c0_10 = arith.constant 0 : index
    %16 = vector.load %arg5[%c0_9, %c0_10] : memref<1x64xf32, #tpu.memory_space<vmem>>, vector<1x64xf32>
    %17 = vector.broadcast %16 : vector<1x64xf32> to vector<8x64xf32>
    %18 = arith.addf %15, %17 : vector<8x64xf32>
    %cst_11 = arith.constant dense<0.000000e+00> : vector<64xf32>
    %19 = vector.multi_reduction <add>, %18, %cst_11 [0] : vector<8x64xf32> to vector<64xf32>
    %20 = vector.shape_cast %19 : vector<64xf32> to vector<1x64xf32>
    %c0_12 = arith.constant 0 : index
    %c0_13 = arith.constant 0 : index
    %21 = vector.load %arg7[%c0_12, %c0_13] : memref<2x64xf32, #tpu.memory_space<vmem>>, vector<1x64xf32>
    tpu.vector_store %arg7[%c0_12, %c0_13], %20 {strides = array<i32>} : memref<2x64xf32, #tpu.memory_space<vmem>>, vector<1x64xf32>,
    %22 = arith.mulf %18, %18 : vector<8x64xf32>
    %cst_14 = arith.constant dense<0.000000e+00> : vector<64xf32>
    %23 = vector.multi_reduction <add>, %22, %cst_14 [0] : vector<8x64xf32> to vector<64xf32>
    %24 = vector.shape_cast %23 : vector<64xf32> to vector<1x64xf32>
    %c1 = arith.constant 1 : index
    %c0_15 = arith.constant 0 : index
    %25 = vector.load %arg7[%c1, %c0_15] : memref<2x64xf32, #tpu.memory_space<vmem>>, vector<1x64xf32>
    tpu.vector_store %arg7[%c1, %c0_15], %24 {strides = array<i32>} : memref<2x64xf32, #tpu.memory_space<vmem>>, vector<1x64xf32>,
    %26 = arith.truncf %18 : vector<8x64xf32> to vector<8x64xbf16>
    %c0_16 = arith.constant 0 : index
    %c0_17 = arith.constant 0 : index
    %27 = vector.load %arg6[%c0_16, %c0_17] : memref<8x64xbf16, #tpu.memory_space<vmem>>, vector<8x64xbf16>
    tpu.vector_store %arg6[%c0_16, %c0_17], %26 {strides = array<i32>} : memref<8x64xbf16, #tpu.memory_space<vmem>>, vector<8x64xbf16>,
    return
  }
  func.func @transform_0(%arg0: i32) -> (i32, i32) {
    %c0_i32 = arith.constant 0 : i32
    %c0_i32_0 = arith.constant 0 : i32
    %c0_i32_1 = arith.constant 0 : i32
    return %c0_i32, %c0_i32_0 : i32, i32
  }
  func.func @transform_1(%arg0: i32) -> (i32, i32) {
    %c0_i32 = arith.constant 0 : i32
    %c0_i32_0 = arith.constant 0 : i32
    %c0_i32_1 = arith.constant 0 : i32
    return %c0_i32, %c0_i32_0 : i32, i32
  }
  func.func @transform_2(%arg0: i32) -> (i32, i32) {
    %c0_i32 = arith.constant 0 : i32
    %c0_i32_0 = arith.constant 0 : i32
    %c0_i32_1 = arith.constant 0 : i32
    return %c0_i32, %c0_i32_0 : i32, i32
  }
  func.func @transform_3(%arg0: i32) -> (i32, i32) {
    %c0_i32 = arith.constant 0 : i32
    %c0_i32_0 = arith.constant 0 : i32
    %c0_i32_1 = arith.constant 0 : i32
    return %c0_i32, %c0_i32_0 : i32, i32
  }
  func.func @transform_4(%arg0: i32) -> (i32, i32) {
    %c0_i32 = arith.constant 0 : i32
    %c0_i32_0 = arith.constant 0 : i32
    %c0_i32_1 = arith.constant 0 : i32
    return %c0_i32, %c0_i32_0 : i32, i32
  }
  func.func @transform_5(%arg0: i32) -> (i32, i32) {
    %c0_i32 = arith.constant 0 : i32
    %c0_i32_0 = arith.constant 0 : i32
    %c0_i32_1 = arith.constant 0 : i32
    return %c0_i32, %c0_i32_0 : i32, i32
  }
  func.func @transform_6(%arg0: i32) -> (i32, i32) {
    %c0_i32 = arith.constant 0 : i32
    %c0_i32_0 = arith.constant 0 : i32
    %c0_i32_1 = arith.constant 0 : i32
    return %c0_i32, %c0_i32_0 : i32, i32
  }
}

module attributes {stable_mosaic.version = 11 : i64} {
  func.func @_fused_gemm_kernel(%arg0: i32, %arg1: memref<2x1024xbf16, #tpu.memory_space<vmem>>, %arg2: memref<1024x64xbf16, #tpu.memory_space<vmem>>, %arg3: memref<1x1024xf32, #tpu.memory_space<vmem>>, %arg4: memref<1x1024xf32, #tpu.memory_space<vmem>>, %arg5: memref<1x64xf32, #tpu.memory_space<vmem>>, %arg6: memref<2x64xbf16, #tpu.memory_space<vmem>>, %arg7: memref<2x64xf32, #tpu.memory_space<vmem>>) attributes {dimension_semantics = [#tpu.dimension_semantics<parallel>], iteration_bounds = array<i64: 1>, scalar_prefetch = 0 : i64, scratch_operands = 0 : i64, tpu.core_type = #tpu.core_type<tc>, window_params = [{pipeline_mode = #tpu.pipeline_mode<synchronous>, transform_indices = @transform_0, window_bounds = array<i64: 2, 1024>}, {pipeline_mode = #tpu.pipeline_mode<synchronous>, transform_indices = @transform_1, window_bounds = array<i64: 1024, 64>}, {pipeline_mode = #tpu.pipeline_mode<synchronous>, transform_indices = @transform_2, window_bounds = array<i64: 1, 1024>}, {pipeline_mode = #tpu.pipeline_mode<synchronous>, transform_indices = @transform_3, window_bounds = array<i64: 1, 1024>}, {pipeline_mode = #tpu.pipeline_mode<synchronous>, transform_indices = @transform_4, window_bounds = array<i64: 1, 64>}, {pipeline_mode = #tpu.pipeline_mode<synchronous>, transform_indices = @transform_5, window_bounds = array<i64: 2, 64>}, {pipeline_mode = #tpu.pipeline_mode<synchronous>, transform_indices = @transform_6, window_bounds = array<i64: 2, 64>}]} {
    %c0 = arith.constant 0 : index
    %c0_0 = arith.constant 0 : index
    %0 = vector.load %arg1[%c0, %c0_0] : memref<2x1024xbf16, #tpu.memory_space<vmem>>, vector<2x1024xbf16>
    %1 = arith.extf %0 : vector<2x1024xbf16> to vector<2x1024xf32>
    %c0_1 = arith.constant 0 : index
    %c0_2 = arith.constant 0 : index
    %2 = vector.load %arg3[%c0_1, %c0_2] : memref<1x1024xf32, #tpu.memory_space<vmem>>, vector<1x1024xf32>
    %3 = vector.broadcast %2 : vector<1x1024xf32> to vector<2x1024xf32>
    %4 = arith.mulf %1, %3 : vector<2x1024xf32>
    %c0_3 = arith.constant 0 : index
    %c0_4 = arith.constant 0 : index
    %5 = vector.load %arg4[%c0_3, %c0_4] : memref<1x1024xf32, #tpu.memory_space<vmem>>, vector<1x1024xf32>
    %6 = vector.broadcast %5 : vector<1x1024xf32> to vector<2x1024xf32>
    %7 = arith.addf %4, %6 : vector<2x1024xf32>
    %cst = arith.constant 0.000000e+00 : f32
    %8 = vector.broadcast %cst : f32 to vector<2x1024xf32>
    %9 = arith.cmpf oge, %7, %8 : vector<2x1024xf32>
    %cst_5 = arith.constant 2.000000e-01 : f32
    %10 = vector.broadcast %cst_5 : f32 to vector<2x1024xf32>
    %11 = arith.mulf %10, %7 : vector<2x1024xf32>
    %12 = arith.select %9, %7, %11 : vector<2x1024xi1>, vector<2x1024xf32>
    %13 = arith.truncf %12 : vector<2x1024xf32> to vector<2x1024xbf16>
    %c0_6 = arith.constant 0 : index
    %c0_7 = arith.constant 0 : index
    %14 = vector.load %arg2[%c0_6, %c0_7] : memref<1024x64xbf16, #tpu.memory_space<vmem>>, vector<1024x64xbf16>
    %cst_8 = arith.constant dense<0.000000e+00> : vector<2x64xf32>
    %15 = tpu.matmul %13, %14, %cst_8 {dimension_numbers = #tpu.dot_dimension_numbers<[1], [0], [0], [1], [0, 0, 1, 1], [], []>} : vector<2x1024xbf16>, vector<1024x64xbf16>, vector<2x64xf32> -> vector<2x64xf32>
    %c0_9 = arith.constant 0 : index
    %c0_10 = arith.constant 0 : index
    %16 = vector.load %arg5[%c0_9, %c0_10] : memref<1x64xf32, #tpu.memory_space<vmem>>, vector<1x64xf32>
    %17 = vector.broadcast %16 : vector<1x64xf32> to vector<2x64xf32>
    %18 = arith.addf %15, %17 : vector<2x64xf32>
    %cst_11 = arith.constant dense<0.000000e+00> : vector<64xf32>
    %19 = vector.multi_reduction <add>, %18, %cst_11 [0] : vector<2x64xf32> to vector<64xf32>
    %20 = vector.shape_cast %19 : vector<64xf32> to vector<1x64xf32>
    %c0_12 = arith.constant 0 : index
    %c0_13 = arith.constant 0 : index
    %21 = vector.load %arg7[%c0_12, %c0_13] : memref<2x64xf32, #tpu.memory_space<vmem>>, vector<1x64xf32>
    tpu.vector_store %arg7[%c0_12, %c0_13], %20 {strides = array<i32>} : memref<2x64xf32, #tpu.memory_space<vmem>>, vector<1x64xf32>,
    %22 = arith.mulf %18, %18 : vector<2x64xf32>
    %cst_14 = arith.constant dense<0.000000e+00> : vector<64xf32>
    %23 = vector.multi_reduction <add>, %22, %cst_14 [0] : vector<2x64xf32> to vector<64xf32>
    %24 = vector.shape_cast %23 : vector<64xf32> to vector<1x64xf32>
    %c1 = arith.constant 1 : index
    %c0_15 = arith.constant 0 : index
    %25 = vector.load %arg7[%c1, %c0_15] : memref<2x64xf32, #tpu.memory_space<vmem>>, vector<1x64xf32>
    tpu.vector_store %arg7[%c1, %c0_15], %24 {strides = array<i32>} : memref<2x64xf32, #tpu.memory_space<vmem>>, vector<1x64xf32>,
    %26 = arith.truncf %18 : vector<2x64xf32> to vector<2x64xbf16>
    %c0_16 = arith.constant 0 : index
    %c0_17 = arith.constant 0 : index
    %27 = vector.load %arg6[%c0_16, %c0_17] : memref<2x64xbf16, #tpu.memory_space<vmem>>, vector<2x64xbf16>
    tpu.vector_store %arg6[%c0_16, %c0_17], %26 {strides = array<i32>} : memref<2x64xbf16, #tpu.memory_space<vmem>>, vector<2x64xbf16>,
    return
  }
  func.func @transform_0(%arg0: i32) -> (i32, i32) {
    %c0_i32 = arith.constant 0 : i32
    %c0_i32_0 = arith.constant 0 : i32
    %c0_i32_1 = arith.constant 0 : i32
    return %c0_i32, %c0_i32_0 : i32, i32
  }
  func.func @transform_1(%arg0: i32) -> (i32, i32) {
    %c0_i32 = arith.constant 0 : i32
    %c0_i32_0 = arith.constant 0 : i32
    %c0_i32_1 = arith.constant 0 : i32
    return %c0_i32, %c0_i32_0 : i32, i32
  }
  func.func @transform_2(%arg0: i32) -> (i32, i32) {
    %c0_i32 = arith.constant 0 : i32
    %c0_i32_0 = arith.constant 0 : i32
    %c0_i32_1 = arith.constant 0 : i32
    return %c0_i32, %c0_i32_0 : i32, i32
  }
  func.func @transform_3(%arg0: i32) -> (i32, i32) {
    %c0_i32 = arith.constant 0 : i32
    %c0_i32_0 = arith.constant 0 : i32
    %c0_i32_1 = arith.constant 0 : i32
    return %c0_i32, %c0_i32_0 : i32, i32
  }
  func.func @transform_4(%arg0: i32) -> (i32, i32) {
    %c0_i32 = arith.constant 0 : i32
    %c0_i32_0 = arith.constant 0 : i32
    %c0_i32_1 = arith.constant 0 : i32
    return %c0_i32, %c0_i32_0 : i32, i32
  }
  func.func @transform_5(%arg0: i32) -> (i32, i32) {
    %c0_i32 = arith.constant 0 : i32
    %c0_i32_0 = arith.constant 0 : i32
    %c0_i32_1 = arith.constant 0 : i32
    return %c0_i32, %c0_i32_0 : i32, i32
  }
  func.func @transform_6(%arg0: i32) -> (i32, i32) {
    %c0_i32 = arith.constant 0 : i32
    %c0_i32_0 = arith.constant 0 : i32
    %c0_i32_1 = arith.constant 0 : i32
    return %c0_i32, %c0_i32_0 : i32, i32
  }
}

module attributes {stable_mosaic.version = 11 : i64} {
  func.func @_fused_gemm_kernel(%arg0: i32, %arg1: memref<2x576xbf16, #tpu.memory_space<vmem>>, %arg2: memref<576x256xbf16, #tpu.memory_space<vmem>>, %arg3: memref<1x576xf32, #tpu.memory_space<vmem>>, %arg4: memref<1x576xf32, #tpu.memory_space<vmem>>, %arg5: memref<1x256xf32, #tpu.memory_space<vmem>>, %arg6: memref<2x256xbf16, #tpu.memory_space<vmem>>, %arg7: memref<2x256xf32, #tpu.memory_space<vmem>>) attributes {dimension_semantics = [#tpu.dimension_semantics<parallel>], iteration_bounds = array<i64: 1>, scalar_prefetch = 0 : i64, scratch_operands = 0 : i64, tpu.core_type = #tpu.core_type<tc>, window_params = [{pipeline_mode = #tpu.pipeline_mode<synchronous>, transform_indices = @transform_0, window_bounds = array<i64: 2, 576>}, {pipeline_mode = #tpu.pipeline_mode<synchronous>, transform_indices = @transform_1, window_bounds = array<i64: 576, 256>}, {pipeline_mode = #tpu.pipeline_mode<synchronous>, transform_indices = @transform_2, window_bounds = array<i64: 1, 576>}, {pipeline_mode = #tpu.pipeline_mode<synchronous>, transform_indices = @transform_3, window_bounds = array<i64: 1, 576>}, {pipeline_mode = #tpu.pipeline_mode<synchronous>, transform_indices = @transform_4, window_bounds = array<i64: 1, 256>}, {pipeline_mode = #tpu.pipeline_mode<synchronous>, transform_indices = @transform_5, window_bounds = array<i64: 2, 256>}, {pipeline_mode = #tpu.pipeline_mode<synchronous>, transform_indices = @transform_6, window_bounds = array<i64: 2, 256>}]} {
    %c0 = arith.constant 0 : index
    %c0_0 = arith.constant 0 : index
    %0 = vector.load %arg1[%c0, %c0_0] : memref<2x576xbf16, #tpu.memory_space<vmem>>, vector<2x576xbf16>
    %1 = arith.extf %0 : vector<2x576xbf16> to vector<2x576xf32>
    %c0_1 = arith.constant 0 : index
    %c0_2 = arith.constant 0 : index
    %2 = vector.load %arg3[%c0_1, %c0_2] : memref<1x576xf32, #tpu.memory_space<vmem>>, vector<1x576xf32>
    %3 = vector.broadcast %2 : vector<1x576xf32> to vector<2x576xf32>
    %4 = arith.mulf %1, %3 : vector<2x576xf32>
    %c0_3 = arith.constant 0 : index
    %c0_4 = arith.constant 0 : index
    %5 = vector.load %arg4[%c0_3, %c0_4] : memref<1x576xf32, #tpu.memory_space<vmem>>, vector<1x576xf32>
    %6 = vector.broadcast %5 : vector<1x576xf32> to vector<2x576xf32>
    %7 = arith.addf %4, %6 : vector<2x576xf32>
    %cst = arith.constant 0.000000e+00 : f32
    %8 = vector.broadcast %cst : f32 to vector<2x576xf32>
    %9 = arith.maximumf %7, %8 : vector<2x576xf32>
    %10 = arith.truncf %9 : vector<2x576xf32> to vector<2x576xbf16>
    %c0_5 = arith.constant 0 : index
    %c0_6 = arith.constant 0 : index
    %11 = vector.load %arg2[%c0_5, %c0_6] : memref<576x256xbf16, #tpu.memory_space<vmem>>, vector<576x256xbf16>
    %cst_7 = arith.constant dense<0.000000e+00> : vector<2x256xf32>
    %12 = tpu.matmul %10, %11, %cst_7 {dimension_numbers = #tpu.dot_dimension_numbers<[1], [0], [0], [1], [0, 0, 1, 1], [], []>} : vector<2x576xbf16>, vector<576x256xbf16>, vector<2x256xf32> -> vector<2x256xf32>
    %c0_8 = arith.constant 0 : index
    %c0_9 = arith.constant 0 : index
    %13 = vector.load %arg5[%c0_8, %c0_9] : memref<1x256xf32, #tpu.memory_space<vmem>>, vector<1x256xf32>
    %14 = vector.broadcast %13 : vector<1x256xf32> to vector<2x256xf32>
    %15 = arith.addf %12, %14 : vector<2x256xf32>
    %cst_10 = arith.constant dense<0.000000e+00> : vector<256xf32>
    %16 = vector.multi_reduction <add>, %15, %cst_10 [0] : vector<2x256xf32> to vector<256xf32>
    %17 = vector.shape_cast %16 : vector<256xf32> to vector<1x256xf32>
    %c0_11 = arith.constant 0 : index
    %c0_12 = arith.constant 0 : index
    %18 = vector.load %arg7[%c0_11, %c0_12] : memref<2x256xf32, #tpu.memory_space<vmem>>, vector<1x256xf32>
    tpu.vector_store %arg7[%c0_11, %c0_12], %17 {strides = array<i32>} : memref<2x256xf32, #tpu.memory_space<vmem>>, vector<1x256xf32>,
    %19 = arith.mulf %15, %15 : vector<2x256xf32>
    %cst_13 = arith.constant dense<0.000000e+00> : vector<256xf32>
    %20 = vector.multi_reduction <add>, %19, %cst_13 [0] : vector<2x256xf32> to vector<256xf32>
    %21 = vector.shape_cast %20 : vector<256xf32> to vector<1x256xf32>
    %c1 = arith.constant 1 : index
    %c0_14 = arith.constant 0 : index
    %22 = vector.load %arg7[%c1, %c0_14] : memref<2x256xf32, #tpu.memory_space<vmem>>, vector<1x256xf32>
    tpu.vector_store %arg7[%c1, %c0_14], %21 {strides = array<i32>} : memref<2x256xf32, #tpu.memory_space<vmem>>, vector<1x256xf32>,
    %23 = arith.truncf %15 : vector<2x256xf32> to vector<2x256xbf16>
    %c0_15 = arith.constant 0 : index
    %c0_16 = arith.constant 0 : index
    %24 = vector.load %arg6[%c0_15, %c0_16] : memref<2x256xbf16, #tpu.memory_space<vmem>>, vector<2x256xbf16>
    tpu.vector_store %arg6[%c0_15, %c0_16], %23 {strides = array<i32>} : memref<2x256xbf16, #tpu.memory_space<vmem>>, vector<2x256xbf16>,
    return
  }
  func.func @transform_0(%arg0: i32) -> (i32, i32) {
    %c0_i32 = arith.constant 0 : i32
    %c0_i32_0 = arith.constant 0 : i32
    %c0_i32_1 = arith.constant 0 : i32
    return %c0_i32, %c0_i32_0 : i32, i32
  }
  func.func @transform_1(%arg0: i32) -> (i32, i32) {
    %c0_i32 = arith.constant 0 : i32
    %c0_i32_0 = arith.constant 0 : i32
    %c0_i32_1 = arith.constant 0 : i32
    return %c0_i32, %c0_i32_0 : i32, i32
  }
  func.func @transform_2(%arg0: i32) -> (i32, i32) {
    %c0_i32 = arith.constant 0 : i32
    %c0_i32_0 = arith.constant 0 : i32
    %c0_i32_1 = arith.constant 0 : i32
    return %c0_i32, %c0_i32_0 : i32, i32
  }
  func.func @transform_3(%arg0: i32) -> (i32, i32) {
    %c0_i32 = arith.constant 0 : i32
    %c0_i32_0 = arith.constant 0 : i32
    %c0_i32_1 = arith.constant 0 : i32
    return %c0_i32, %c0_i32_0 : i32, i32
  }
  func.func @transform_4(%arg0: i32) -> (i32, i32) {
    %c0_i32 = arith.constant 0 : i32
    %c0_i32_0 = arith.constant 0 : i32
    %c0_i32_1 = arith.constant 0 : i32
    return %c0_i32, %c0_i32_0 : i32, i32
  }
  func.func @transform_5(%arg0: i32) -> (i32, i32) {
    %c0_i32 = arith.constant 0 : i32
    %c0_i32_0 = arith.constant 0 : i32
    %c0_i32_1 = arith.constant 0 : i32
    return %c0_i32, %c0_i32_0 : i32, i32
  }
  func.func @transform_6(%arg0: i32) -> (i32, i32) {
    %c0_i32 = arith.constant 0 : i32
    %c0_i32_0 = arith.constant 0 : i32
    %c0_i32_1 = arith.constant 0 : i32
    return %c0_i32, %c0_i32_0 : i32, i32
  }
}

module attributes {stable_mosaic.version = 11 : i64} {
  func.func @_fused_gemm_kernel(%arg0: i32, %arg1: memref<8x1152xbf16, #tpu.memory_space<vmem>>, %arg2: memref<1152x128xbf16, #tpu.memory_space<vmem>>, %arg3: memref<1x1152xf32, #tpu.memory_space<vmem>>, %arg4: memref<1x1152xf32, #tpu.memory_space<vmem>>, %arg5: memref<1x128xf32, #tpu.memory_space<vmem>>, %arg6: memref<8x128xbf16, #tpu.memory_space<vmem>>, %arg7: memref<2x128xf32, #tpu.memory_space<vmem>>) attributes {dimension_semantics = [#tpu.dimension_semantics<parallel>], iteration_bounds = array<i64: 1>, scalar_prefetch = 0 : i64, scratch_operands = 0 : i64, tpu.core_type = #tpu.core_type<tc>, window_params = [{pipeline_mode = #tpu.pipeline_mode<synchronous>, transform_indices = @transform_0, window_bounds = array<i64: 8, 1152>}, {pipeline_mode = #tpu.pipeline_mode<synchronous>, transform_indices = @transform_1, window_bounds = array<i64: 1152, 128>}, {pipeline_mode = #tpu.pipeline_mode<synchronous>, transform_indices = @transform_2, window_bounds = array<i64: 1, 1152>}, {pipeline_mode = #tpu.pipeline_mode<synchronous>, transform_indices = @transform_3, window_bounds = array<i64: 1, 1152>}, {pipeline_mode = #tpu.pipeline_mode<synchronous>, transform_indices = @transform_4, window_bounds = array<i64: 1, 128>}, {pipeline_mode = #tpu.pipeline_mode<synchronous>, transform_indices = @transform_5, window_bounds = array<i64: 8, 128>}, {pipeline_mode = #tpu.pipeline_mode<synchronous>, transform_indices = @transform_6, window_bounds = array<i64: 2, 128>}]} {
    %c0 = arith.constant 0 : index
    %c0_0 = arith.constant 0 : index
    %0 = vector.load %arg1[%c0, %c0_0] : memref<8x1152xbf16, #tpu.memory_space<vmem>>, vector<8x1152xbf16>
    %1 = arith.extf %0 : vector<8x1152xbf16> to vector<8x1152xf32>
    %c0_1 = arith.constant 0 : index
    %c0_2 = arith.constant 0 : index
    %2 = vector.load %arg3[%c0_1, %c0_2] : memref<1x1152xf32, #tpu.memory_space<vmem>>, vector<1x1152xf32>
    %3 = vector.broadcast %2 : vector<1x1152xf32> to vector<8x1152xf32>
    %4 = arith.mulf %1, %3 : vector<8x1152xf32>
    %c0_3 = arith.constant 0 : index
    %c0_4 = arith.constant 0 : index
    %5 = vector.load %arg4[%c0_3, %c0_4] : memref<1x1152xf32, #tpu.memory_space<vmem>>, vector<1x1152xf32>
    %6 = vector.broadcast %5 : vector<1x1152xf32> to vector<8x1152xf32>
    %7 = arith.addf %4, %6 : vector<8x1152xf32>
    %cst = arith.constant 0.000000e+00 : f32
    %8 = vector.broadcast %cst : f32 to vector<8x1152xf32>
    %9 = arith.maximumf %7, %8 : vector<8x1152xf32>
    %10 = arith.truncf %9 : vector<8x1152xf32> to vector<8x1152xbf16>
    %c0_5 = arith.constant 0 : index
    %c0_6 = arith.constant 0 : index
    %11 = vector.load %arg2[%c0_5, %c0_6] : memref<1152x128xbf16, #tpu.memory_space<vmem>>, vector<1152x128xbf16>
    %cst_7 = arith.constant dense<0.000000e+00> : vector<8x128xf32>
    %12 = tpu.matmul %10, %11, %cst_7 {dimension_numbers = #tpu.dot_dimension_numbers<[1], [0], [0], [1], [0, 0, 1, 1], [], []>} : vector<8x1152xbf16>, vector<1152x128xbf16>, vector<8x128xf32> -> vector<8x128xf32>
    %c0_8 = arith.constant 0 : index
    %c0_9 = arith.constant 0 : index
    %13 = vector.load %arg5[%c0_8, %c0_9] : memref<1x128xf32, #tpu.memory_space<vmem>>, vector<1x128xf32>
    %14 = vector.broadcast %13 : vector<1x128xf32> to vector<8x128xf32>
    %15 = arith.addf %12, %14 : vector<8x128xf32>
    %cst_10 = arith.constant dense<0.000000e+00> : vector<128xf32>
    %16 = vector.multi_reduction <add>, %15, %cst_10 [0] : vector<8x128xf32> to vector<128xf32>
    %17 = vector.shape_cast %16 : vector<128xf32> to vector<1x128xf32>
    %c0_11 = arith.constant 0 : index
    %c0_12 = arith.constant 0 : index
    %18 = vector.load %arg7[%c0_11, %c0_12] : memref<2x128xf32, #tpu.memory_space<vmem>>, vector<1x128xf32>
    tpu.vector_store %arg7[%c0_11, %c0_12], %17 {strides = array<i32>} : memref<2x128xf32, #tpu.memory_space<vmem>>, vector<1x128xf32>,
    %19 = arith.mulf %15, %15 : vector<8x128xf32>
    %cst_13 = arith.constant dense<0.000000e+00> : vector<128xf32>
    %20 = vector.multi_reduction <add>, %19, %cst_13 [0] : vector<8x128xf32> to vector<128xf32>
    %21 = vector.shape_cast %20 : vector<128xf32> to vector<1x128xf32>
    %c1 = arith.constant 1 : index
    %c0_14 = arith.constant 0 : index
    %22 = vector.load %arg7[%c1, %c0_14] : memref<2x128xf32, #tpu.memory_space<vmem>>, vector<1x128xf32>
    tpu.vector_store %arg7[%c1, %c0_14], %21 {strides = array<i32>} : memref<2x128xf32, #tpu.memory_space<vmem>>, vector<1x128xf32>,
    %23 = arith.truncf %15 : vector<8x128xf32> to vector<8x128xbf16>
    %c0_15 = arith.constant 0 : index
    %c0_16 = arith.constant 0 : index
    %24 = vector.load %arg6[%c0_15, %c0_16] : memref<8x128xbf16, #tpu.memory_space<vmem>>, vector<8x128xbf16>
    tpu.vector_store %arg6[%c0_15, %c0_16], %23 {strides = array<i32>} : memref<8x128xbf16, #tpu.memory_space<vmem>>, vector<8x128xbf16>,
    return
  }
  func.func @transform_0(%arg0: i32) -> (i32, i32) {
    %c0_i32 = arith.constant 0 : i32
    %c0_i32_0 = arith.constant 0 : i32
    %c0_i32_1 = arith.constant 0 : i32
    return %c0_i32, %c0_i32_0 : i32, i32
  }
  func.func @transform_1(%arg0: i32) -> (i32, i32) {
    %c0_i32 = arith.constant 0 : i32
    %c0_i32_0 = arith.constant 0 : i32
    %c0_i32_1 = arith.constant 0 : i32
    return %c0_i32, %c0_i32_0 : i32, i32
  }
  func.func @transform_2(%arg0: i32) -> (i32, i32) {
    %c0_i32 = arith.constant 0 : i32
    %c0_i32_0 = arith.constant 0 : i32
    %c0_i32_1 = arith.constant 0 : i32
    return %c0_i32, %c0_i32_0 : i32, i32
  }
  func.func @transform_3(%arg0: i32) -> (i32, i32) {
    %c0_i32 = arith.constant 0 : i32
    %c0_i32_0 = arith.constant 0 : i32
    %c0_i32_1 = arith.constant 0 : i32
    return %c0_i32, %c0_i32_0 : i32, i32
  }
  func.func @transform_4(%arg0: i32) -> (i32, i32) {
    %c0_i32 = arith.constant 0 : i32
    %c0_i32_0 = arith.constant 0 : i32
    %c0_i32_1 = arith.constant 0 : i32
    return %c0_i32, %c0_i32_0 : i32, i32
  }
  func.func @transform_5(%arg0: i32) -> (i32, i32) {
    %c0_i32 = arith.constant 0 : i32
    %c0_i32_0 = arith.constant 0 : i32
    %c0_i32_1 = arith.constant 0 : i32
    return %c0_i32, %c0_i32_0 : i32, i32
  }
  func.func @transform_6(%arg0: i32) -> (i32, i32) {
    %c0_i32 = arith.constant 0 : i32
    %c0_i32_0 = arith.constant 0 : i32
    %c0_i32_1 = arith.constant 0 : i32
    return %c0_i32, %c0_i32_0 : i32, i32
  }
}

module attributes {stable_mosaic.version = 11 : i64} {
  func.func @_fused_gemm_kernel(%arg0: i32, %arg1: memref<32x576xbf16, #tpu.memory_space<vmem>>, %arg2: memref<576x64xbf16, #tpu.memory_space<vmem>>, %arg3: memref<1x576xf32, #tpu.memory_space<vmem>>, %arg4: memref<1x576xf32, #tpu.memory_space<vmem>>, %arg5: memref<1x64xf32, #tpu.memory_space<vmem>>, %arg6: memref<32x64xbf16, #tpu.memory_space<vmem>>, %arg7: memref<2x64xf32, #tpu.memory_space<vmem>>) attributes {dimension_semantics = [#tpu.dimension_semantics<parallel>], iteration_bounds = array<i64: 1>, scalar_prefetch = 0 : i64, scratch_operands = 0 : i64, tpu.core_type = #tpu.core_type<tc>, window_params = [{pipeline_mode = #tpu.pipeline_mode<synchronous>, transform_indices = @transform_0, window_bounds = array<i64: 32, 576>}, {pipeline_mode = #tpu.pipeline_mode<synchronous>, transform_indices = @transform_1, window_bounds = array<i64: 576, 64>}, {pipeline_mode = #tpu.pipeline_mode<synchronous>, transform_indices = @transform_2, window_bounds = array<i64: 1, 576>}, {pipeline_mode = #tpu.pipeline_mode<synchronous>, transform_indices = @transform_3, window_bounds = array<i64: 1, 576>}, {pipeline_mode = #tpu.pipeline_mode<synchronous>, transform_indices = @transform_4, window_bounds = array<i64: 1, 64>}, {pipeline_mode = #tpu.pipeline_mode<synchronous>, transform_indices = @transform_5, window_bounds = array<i64: 32, 64>}, {pipeline_mode = #tpu.pipeline_mode<synchronous>, transform_indices = @transform_6, window_bounds = array<i64: 2, 64>}]} {
    %c0 = arith.constant 0 : index
    %c0_0 = arith.constant 0 : index
    %0 = vector.load %arg1[%c0, %c0_0] : memref<32x576xbf16, #tpu.memory_space<vmem>>, vector<32x576xbf16>
    %1 = arith.extf %0 : vector<32x576xbf16> to vector<32x576xf32>
    %c0_1 = arith.constant 0 : index
    %c0_2 = arith.constant 0 : index
    %2 = vector.load %arg3[%c0_1, %c0_2] : memref<1x576xf32, #tpu.memory_space<vmem>>, vector<1x576xf32>
    %3 = vector.broadcast %2 : vector<1x576xf32> to vector<32x576xf32>
    %4 = arith.mulf %1, %3 : vector<32x576xf32>
    %c0_3 = arith.constant 0 : index
    %c0_4 = arith.constant 0 : index
    %5 = vector.load %arg4[%c0_3, %c0_4] : memref<1x576xf32, #tpu.memory_space<vmem>>, vector<1x576xf32>
    %6 = vector.broadcast %5 : vector<1x576xf32> to vector<32x576xf32>
    %7 = arith.addf %4, %6 : vector<32x576xf32>
    %cst = arith.constant 0.000000e+00 : f32
    %8 = vector.broadcast %cst : f32 to vector<32x576xf32>
    %9 = arith.maximumf %7, %8 : vector<32x576xf32>
    %10 = arith.truncf %9 : vector<32x576xf32> to vector<32x576xbf16>
    %c0_5 = arith.constant 0 : index
    %c0_6 = arith.constant 0 : index
    %11 = vector.load %arg2[%c0_5, %c0_6] : memref<576x64xbf16, #tpu.memory_space<vmem>>, vector<576x64xbf16>
    %cst_7 = arith.constant dense<0.000000e+00> : vector<32x64xf32>
    %12 = tpu.matmul %10, %11, %cst_7 {dimension_numbers = #tpu.dot_dimension_numbers<[1], [0], [0], [1], [0, 0, 1, 1], [], []>} : vector<32x576xbf16>, vector<576x64xbf16>, vector<32x64xf32> -> vector<32x64xf32>
    %c0_8 = arith.constant 0 : index
    %c0_9 = arith.constant 0 : index
    %13 = vector.load %arg5[%c0_8, %c0_9] : memref<1x64xf32, #tpu.memory_space<vmem>>, vector<1x64xf32>
    %14 = vector.broadcast %13 : vector<1x64xf32> to vector<32x64xf32>
    %15 = arith.addf %12, %14 : vector<32x64xf32>
    %cst_10 = arith.constant dense<0.000000e+00> : vector<64xf32>
    %16 = vector.multi_reduction <add>, %15, %cst_10 [0] : vector<32x64xf32> to vector<64xf32>
    %17 = vector.shape_cast %16 : vector<64xf32> to vector<1x64xf32>
    %c0_11 = arith.constant 0 : index
    %c0_12 = arith.constant 0 : index
    %18 = vector.load %arg7[%c0_11, %c0_12] : memref<2x64xf32, #tpu.memory_space<vmem>>, vector<1x64xf32>
    tpu.vector_store %arg7[%c0_11, %c0_12], %17 {strides = array<i32>} : memref<2x64xf32, #tpu.memory_space<vmem>>, vector<1x64xf32>,
    %19 = arith.mulf %15, %15 : vector<32x64xf32>
    %cst_13 = arith.constant dense<0.000000e+00> : vector<64xf32>
    %20 = vector.multi_reduction <add>, %19, %cst_13 [0] : vector<32x64xf32> to vector<64xf32>
    %21 = vector.shape_cast %20 : vector<64xf32> to vector<1x64xf32>
    %c1 = arith.constant 1 : index
    %c0_14 = arith.constant 0 : index
    %22 = vector.load %arg7[%c1, %c0_14] : memref<2x64xf32, #tpu.memory_space<vmem>>, vector<1x64xf32>
    tpu.vector_store %arg7[%c1, %c0_14], %21 {strides = array<i32>} : memref<2x64xf32, #tpu.memory_space<vmem>>, vector<1x64xf32>,
    %23 = arith.truncf %15 : vector<32x64xf32> to vector<32x64xbf16>
    %c0_15 = arith.constant 0 : index
    %c0_16 = arith.constant 0 : index
    %24 = vector.load %arg6[%c0_15, %c0_16] : memref<32x64xbf16, #tpu.memory_space<vmem>>, vector<32x64xbf16>
    tpu.vector_store %arg6[%c0_15, %c0_16], %23 {strides = array<i32>} : memref<32x64xbf16, #tpu.memory_space<vmem>>, vector<32x64xbf16>,
    return
  }
  func.func @transform_0(%arg0: i32) -> (i32, i32) {
    %c0_i32 = arith.constant 0 : i32
    %c0_i32_0 = arith.constant 0 : i32
    %c0_i32_1 = arith.constant 0 : i32
    return %c0_i32, %c0_i32_0 : i32, i32
  }
  func.func @transform_1(%arg0: i32) -> (i32, i32) {
    %c0_i32 = arith.constant 0 : i32
    %c0_i32_0 = arith.constant 0 : i32
    %c0_i32_1 = arith.constant 0 : i32
    return %c0_i32, %c0_i32_0 : i32, i32
  }
  func.func @transform_2(%arg0: i32) -> (i32, i32) {
    %c0_i32 = arith.constant 0 : i32
    %c0_i32_0 = arith.constant 0 : i32
    %c0_i32_1 = arith.constant 0 : i32
    return %c0_i32, %c0_i32_0 : i32, i32
  }
  func.func @transform_3(%arg0: i32) -> (i32, i32) {
    %c0_i32 = arith.constant 0 : i32
    %c0_i32_0 = arith.constant 0 : i32
    %c0_i32_1 = arith.constant 0 : i32
    return %c0_i32, %c0_i32_0 : i32, i32
  }
  func.func @transform_4(%arg0: i32) -> (i32, i32) {
    %c0_i32 = arith.constant 0 : i32
    %c0_i32_0 = arith.constant 0 : i32
    %c0_i32_1 = arith.constant 0 : i32
    return %c0_i32, %c0_i32_0 : i32, i32
  }
  func.func @transform_5(%arg0: i32) -> (i32, i32) {
    %c0_i32 = arith.constant 0 : i32
    %c0_i32_0 = arith.constant 0 : i32
    %c0_i32_1 = arith.constant 0 : i32
    return %c0_i32, %c0_i32_0 : i32, i32
  }
  func.func @transform_6(%arg0: i32) -> (i32, i32) {
    %c0_i32 = arith.constant 0 : i32
    %c0_i32_0 = arith.constant 0 : i32
    %c0_i32_1 = arith.constant 0 : i32
    return %c0_i32, %c0_i32_0 : i32, i32
  }
}

module attributes {stable_mosaic.version = 11 : i64} {
  func.func @_fused_gemm_kernel(%arg0: i32, %arg1: memref<128x288xbf16, #tpu.memory_space<vmem>>, %arg2: memref<288x32xbf16, #tpu.memory_space<vmem>>, %arg3: memref<1x288xf32, #tpu.memory_space<vmem>>, %arg4: memref<1x288xf32, #tpu.memory_space<vmem>>, %arg5: memref<1x32xf32, #tpu.memory_space<vmem>>, %arg6: memref<128x32xbf16, #tpu.memory_space<vmem>>, %arg7: memref<2x32xf32, #tpu.memory_space<vmem>>) attributes {dimension_semantics = [#tpu.dimension_semantics<parallel>], iteration_bounds = array<i64: 1>, scalar_prefetch = 0 : i64, scratch_operands = 0 : i64, tpu.core_type = #tpu.core_type<tc>, window_params = [{pipeline_mode = #tpu.pipeline_mode<synchronous>, transform_indices = @transform_0, window_bounds = array<i64: 128, 288>}, {pipeline_mode = #tpu.pipeline_mode<synchronous>, transform_indices = @transform_1, window_bounds = array<i64: 288, 32>}, {pipeline_mode = #tpu.pipeline_mode<synchronous>, transform_indices = @transform_2, window_bounds = array<i64: 1, 288>}, {pipeline_mode = #tpu.pipeline_mode<synchronous>, transform_indices = @transform_3, window_bounds = array<i64: 1, 288>}, {pipeline_mode = #tpu.pipeline_mode<synchronous>, transform_indices = @transform_4, window_bounds = array<i64: 1, 32>}, {pipeline_mode = #tpu.pipeline_mode<synchronous>, transform_indices = @transform_5, window_bounds = array<i64: 128, 32>}, {pipeline_mode = #tpu.pipeline_mode<synchronous>, transform_indices = @transform_6, window_bounds = array<i64: 2, 32>}]} {
    %c0 = arith.constant 0 : index
    %c0_0 = arith.constant 0 : index
    %0 = vector.load %arg1[%c0, %c0_0] : memref<128x288xbf16, #tpu.memory_space<vmem>>, vector<128x288xbf16>
    %1 = arith.extf %0 : vector<128x288xbf16> to vector<128x288xf32>
    %c0_1 = arith.constant 0 : index
    %c0_2 = arith.constant 0 : index
    %2 = vector.load %arg3[%c0_1, %c0_2] : memref<1x288xf32, #tpu.memory_space<vmem>>, vector<1x288xf32>
    %3 = vector.broadcast %2 : vector<1x288xf32> to vector<128x288xf32>
    %4 = arith.mulf %1, %3 : vector<128x288xf32>
    %c0_3 = arith.constant 0 : index
    %c0_4 = arith.constant 0 : index
    %5 = vector.load %arg4[%c0_3, %c0_4] : memref<1x288xf32, #tpu.memory_space<vmem>>, vector<1x288xf32>
    %6 = vector.broadcast %5 : vector<1x288xf32> to vector<128x288xf32>
    %7 = arith.addf %4, %6 : vector<128x288xf32>
    %cst = arith.constant 0.000000e+00 : f32
    %8 = vector.broadcast %cst : f32 to vector<128x288xf32>
    %9 = arith.maximumf %7, %8 : vector<128x288xf32>
    %10 = arith.truncf %9 : vector<128x288xf32> to vector<128x288xbf16>
    %c0_5 = arith.constant 0 : index
    %c0_6 = arith.constant 0 : index
    %11 = vector.load %arg2[%c0_5, %c0_6] : memref<288x32xbf16, #tpu.memory_space<vmem>>, vector<288x32xbf16>
    %cst_7 = arith.constant dense<0.000000e+00> : vector<128x32xf32>
    %12 = tpu.matmul %10, %11, %cst_7 {dimension_numbers = #tpu.dot_dimension_numbers<[1], [0], [0], [1], [0, 0, 1, 1], [], []>} : vector<128x288xbf16>, vector<288x32xbf16>, vector<128x32xf32> -> vector<128x32xf32>
    %c0_8 = arith.constant 0 : index
    %c0_9 = arith.constant 0 : index
    %13 = vector.load %arg5[%c0_8, %c0_9] : memref<1x32xf32, #tpu.memory_space<vmem>>, vector<1x32xf32>
    %14 = vector.broadcast %13 : vector<1x32xf32> to vector<128x32xf32>
    %15 = arith.addf %12, %14 : vector<128x32xf32>
    %cst_10 = arith.constant dense<0.000000e+00> : vector<32xf32>
    %16 = vector.multi_reduction <add>, %15, %cst_10 [0] : vector<128x32xf32> to vector<32xf32>
    %17 = vector.shape_cast %16 : vector<32xf32> to vector<1x32xf32>
    %c0_11 = arith.constant 0 : index
    %c0_12 = arith.constant 0 : index
    %18 = vector.load %arg7[%c0_11, %c0_12] : memref<2x32xf32, #tpu.memory_space<vmem>>, vector<1x32xf32>
    tpu.vector_store %arg7[%c0_11, %c0_12], %17 {strides = array<i32>} : memref<2x32xf32, #tpu.memory_space<vmem>>, vector<1x32xf32>,
    %19 = arith.mulf %15, %15 : vector<128x32xf32>
    %cst_13 = arith.constant dense<0.000000e+00> : vector<32xf32>
    %20 = vector.multi_reduction <add>, %19, %cst_13 [0] : vector<128x32xf32> to vector<32xf32>
    %21 = vector.shape_cast %20 : vector<32xf32> to vector<1x32xf32>
    %c1 = arith.constant 1 : index
    %c0_14 = arith.constant 0 : index
    %22 = vector.load %arg7[%c1, %c0_14] : memref<2x32xf32, #tpu.memory_space<vmem>>, vector<1x32xf32>
    tpu.vector_store %arg7[%c1, %c0_14], %21 {strides = array<i32>} : memref<2x32xf32, #tpu.memory_space<vmem>>, vector<1x32xf32>,
    %23 = arith.truncf %15 : vector<128x32xf32> to vector<128x32xbf16>
    %c0_15 = arith.constant 0 : index
    %c0_16 = arith.constant 0 : index
    %24 = vector.load %arg6[%c0_15, %c0_16] : memref<128x32xbf16, #tpu.memory_space<vmem>>, vector<128x32xbf16>
    tpu.vector_store %arg6[%c0_15, %c0_16], %23 {strides = array<i32>} : memref<128x32xbf16, #tpu.memory_space<vmem>>, vector<128x32xbf16>,
    return
  }
  func.func @transform_0(%arg0: i32) -> (i32, i32) {
    %c0_i32 = arith.constant 0 : i32
    %c0_i32_0 = arith.constant 0 : i32
    %c0_i32_1 = arith.constant 0 : i32
    return %c0_i32, %c0_i32_0 : i32, i32
  }
  func.func @transform_1(%arg0: i32) -> (i32, i32) {
    %c0_i32 = arith.constant 0 : i32
    %c0_i32_0 = arith.constant 0 : i32
    %c0_i32_1 = arith.constant 0 : i32
    return %c0_i32, %c0_i32_0 : i32, i32
  }
  func.func @transform_2(%arg0: i32) -> (i32, i32) {
    %c0_i32 = arith.constant 0 : i32
    %c0_i32_0 = arith.constant 0 : i32
    %c0_i32_1 = arith.constant 0 : i32
    return %c0_i32, %c0_i32_0 : i32, i32
  }
  func.func @transform_3(%arg0: i32) -> (i32, i32) {
    %c0_i32 = arith.constant 0 : i32
    %c0_i32_0 = arith.constant 0 : i32
    %c0_i32_1 = arith.constant 0 : i32
    return %c0_i32, %c0_i32_0 : i32, i32
  }
  func.func @transform_4(%arg0: i32) -> (i32, i32) {
    %c0_i32 = arith.constant 0 : i32
    %c0_i32_0 = arith.constant 0 : i32
    %c0_i32_1 = arith.constant 0 : i32
    return %c0_i32, %c0_i32_0 : i32, i32
  }
  func.func @transform_5(%arg0: i32) -> (i32, i32) {
    %c0_i32 = arith.constant 0 : i32
    %c0_i32_0 = arith.constant 0 : i32
    %c0_i32_1 = arith.constant 0 : i32
    return %c0_i32, %c0_i32_0 : i32, i32
  }
  func.func @transform_6(%arg0: i32) -> (i32, i32) {
    %c0_i32 = arith.constant 0 : i32
    %c0_i32_0 = arith.constant 0 : i32
    %c0_i32_1 = arith.constant 0 : i32
    return %c0_i32, %c0_i32_0 : i32, i32
  }
}

module attributes {stable_mosaic.version = 11 : i64} {
  func.func @_fused_gemm_kernel(%arg0: i32, %arg1: memref<512x144xbf16, #tpu.memory_space<vmem>>, %arg2: memref<144x12xbf16, #tpu.memory_space<vmem>>, %arg3: memref<1x144xf32, #tpu.memory_space<vmem>>, %arg4: memref<1x144xf32, #tpu.memory_space<vmem>>, %arg5: memref<1x12xf32, #tpu.memory_space<vmem>>, %arg6: memref<512x12xf32, #tpu.memory_space<vmem>>, %arg7: memref<2x12xf32, #tpu.memory_space<vmem>>) attributes {dimension_semantics = [#tpu.dimension_semantics<parallel>], iteration_bounds = array<i64: 1>, scalar_prefetch = 0 : i64, scratch_operands = 0 : i64, tpu.core_type = #tpu.core_type<tc>, window_params = [{pipeline_mode = #tpu.pipeline_mode<synchronous>, transform_indices = @transform_0, window_bounds = array<i64: 512, 144>}, {pipeline_mode = #tpu.pipeline_mode<synchronous>, transform_indices = @transform_1, window_bounds = array<i64: 144, 12>}, {pipeline_mode = #tpu.pipeline_mode<synchronous>, transform_indices = @transform_2, window_bounds = array<i64: 1, 144>}, {pipeline_mode = #tpu.pipeline_mode<synchronous>, transform_indices = @transform_3, window_bounds = array<i64: 1, 144>}, {pipeline_mode = #tpu.pipeline_mode<synchronous>, transform_indices = @transform_4, window_bounds = array<i64: 1, 12>}, {pipeline_mode = #tpu.pipeline_mode<synchronous>, transform_indices = @transform_5, window_bounds = array<i64: 512, 12>}, {pipeline_mode = #tpu.pipeline_mode<synchronous>, transform_indices = @transform_6, window_bounds = array<i64: 2, 12>}]} {
    %c0 = arith.constant 0 : index
    %c0_0 = arith.constant 0 : index
    %0 = vector.load %arg1[%c0, %c0_0] : memref<512x144xbf16, #tpu.memory_space<vmem>>, vector<512x144xbf16>
    %1 = arith.extf %0 : vector<512x144xbf16> to vector<512x144xf32>
    %c0_1 = arith.constant 0 : index
    %c0_2 = arith.constant 0 : index
    %2 = vector.load %arg3[%c0_1, %c0_2] : memref<1x144xf32, #tpu.memory_space<vmem>>, vector<1x144xf32>
    %3 = vector.broadcast %2 : vector<1x144xf32> to vector<512x144xf32>
    %4 = arith.mulf %1, %3 : vector<512x144xf32>
    %c0_3 = arith.constant 0 : index
    %c0_4 = arith.constant 0 : index
    %5 = vector.load %arg4[%c0_3, %c0_4] : memref<1x144xf32, #tpu.memory_space<vmem>>, vector<1x144xf32>
    %6 = vector.broadcast %5 : vector<1x144xf32> to vector<512x144xf32>
    %7 = arith.addf %4, %6 : vector<512x144xf32>
    %cst = arith.constant 0.000000e+00 : f32
    %8 = vector.broadcast %cst : f32 to vector<512x144xf32>
    %9 = arith.maximumf %7, %8 : vector<512x144xf32>
    %10 = arith.truncf %9 : vector<512x144xf32> to vector<512x144xbf16>
    %c0_5 = arith.constant 0 : index
    %c0_6 = arith.constant 0 : index
    %11 = vector.load %arg2[%c0_5, %c0_6] : memref<144x12xbf16, #tpu.memory_space<vmem>>, vector<144x12xbf16>
    %cst_7 = arith.constant dense<0.000000e+00> : vector<512x12xf32>
    %12 = tpu.matmul %10, %11, %cst_7 {dimension_numbers = #tpu.dot_dimension_numbers<[1], [0], [0], [1], [0, 0, 1, 1], [], []>} : vector<512x144xbf16>, vector<144x12xbf16>, vector<512x12xf32> -> vector<512x12xf32>
    %c0_8 = arith.constant 0 : index
    %c0_9 = arith.constant 0 : index
    %13 = vector.load %arg5[%c0_8, %c0_9] : memref<1x12xf32, #tpu.memory_space<vmem>>, vector<1x12xf32>
    %14 = vector.broadcast %13 : vector<1x12xf32> to vector<512x12xf32>
    %15 = arith.addf %12, %14 : vector<512x12xf32>
    %cst_10 = arith.constant dense<0.000000e+00> : vector<12xf32>
    %16 = vector.multi_reduction <add>, %15, %cst_10 [0] : vector<512x12xf32> to vector<12xf32>
    %17 = vector.shape_cast %16 : vector<12xf32> to vector<1x12xf32>
    %c0_11 = arith.constant 0 : index
    %c0_12 = arith.constant 0 : index
    %18 = vector.load %arg7[%c0_11, %c0_12] : memref<2x12xf32, #tpu.memory_space<vmem>>, vector<1x12xf32>
    tpu.vector_store %arg7[%c0_11, %c0_12], %17 {strides = array<i32>} : memref<2x12xf32, #tpu.memory_space<vmem>>, vector<1x12xf32>,
    %19 = arith.mulf %15, %15 : vector<512x12xf32>
    %cst_13 = arith.constant dense<0.000000e+00> : vector<12xf32>
    %20 = vector.multi_reduction <add>, %19, %cst_13 [0] : vector<512x12xf32> to vector<12xf32>
    %21 = vector.shape_cast %20 : vector<12xf32> to vector<1x12xf32>
    %c1 = arith.constant 1 : index
    %c0_14 = arith.constant 0 : index
    %22 = vector.load %arg7[%c1, %c0_14] : memref<2x12xf32, #tpu.memory_space<vmem>>, vector<1x12xf32>
    tpu.vector_store %arg7[%c1, %c0_14], %21 {strides = array<i32>} : memref<2x12xf32, #tpu.memory_space<vmem>>, vector<1x12xf32>,
    %23 = math.tanh %15 : vector<512x12xf32>
    %c0_15 = arith.constant 0 : index
    %c0_16 = arith.constant 0 : index
    %24 = vector.load %arg6[%c0_15, %c0_16] : memref<512x12xf32, #tpu.memory_space<vmem>>, vector<512x12xf32>
    tpu.vector_store %arg6[%c0_15, %c0_16], %23 {strides = array<i32>} : memref<512x12xf32, #tpu.memory_space<vmem>>, vector<512x12xf32>,
    return
  }
  func.func @transform_0(%arg0: i32) -> (i32, i32) {
    %c0_i32 = arith.constant 0 : i32
    %c0_i32_0 = arith.constant 0 : i32
    %c0_i32_1 = arith.constant 0 : i32
    return %c0_i32, %c0_i32_0 : i32, i32
  }
  func.func @transform_1(%arg0: i32) -> (i32, i32) {
    %c0_i32 = arith.constant 0 : i32
    %c0_i32_0 = arith.constant 0 : i32
    %c0_i32_1 = arith.constant 0 : i32
    return %c0_i32, %c0_i32_0 : i32, i32
  }
  func.func @transform_2(%arg0: i32) -> (i32, i32) {
    %c0_i32 = arith.constant 0 : i32
    %c0_i32_0 = arith.constant 0 : i32
    %c0_i32_1 = arith.constant 0 : i32
    return %c0_i32, %c0_i32_0 : i32, i32
  }
  func.func @transform_3(%arg0: i32) -> (i32, i32) {
    %c0_i32 = arith.constant 0 : i32
    %c0_i32_0 = arith.constant 0 : i32
    %c0_i32_1 = arith.constant 0 : i32
    return %c0_i32, %c0_i32_0 : i32, i32
  }
  func.func @transform_4(%arg0: i32) -> (i32, i32) {
    %c0_i32 = arith.constant 0 : i32
    %c0_i32_0 = arith.constant 0 : i32
    %c0_i32_1 = arith.constant 0 : i32
    return %c0_i32, %c0_i32_0 : i32, i32
  }
  func.func @transform_5(%arg0: i32) -> (i32, i32) {
    %c0_i32 = arith.constant 0 : i32
    %c0_i32_0 = arith.constant 0 : i32
    %c0_i32_1 = arith.constant 0 : i32
    return %c0_i32, %c0_i32_0 : i32, i32
  }
  func.func @transform_6(%arg0: i32) -> (i32, i32) {
    %c0_i32 = arith.constant 0 : i32
    %c0_i32_0 = arith.constant 0 : i32
    %c0_i32_1 = arith.constant 0 : i32
    return %c0_i32, %c0_i32_0 : i32, i32
  }
}

</mosaic_0001>

<bundles_post_ra>
// kernel: tile.83
= control target key start
LH: loop header
LB: loop body
LE: loop exit
PB: predicated region body
PF: predicated region fallthrough
CT: control target
= control target key end

     0   :  { %s20_s0 = inlined_call_operand.<no memory space> [shape: f32[], index: 0, kind: input, shape index: {}]   ;;  %s21_s1 = inlined_call_operand.vmem [shape: f32[1,48], index: 1, kind: output, shape index: {}]  }
   0x1   :  { %v2_v0 = vstv %s20_s0 }
   0x2   :  { %3 = vst [vmem:[%s21_s1] sm:$0x1] %v2_v0 }

// kernel: unet_forward.11
= control target key start
LH: loop header
LB: loop body
LE: loop exit
PB: predicated region body
PF: predicated region fallthrough
CT: control target
= control target key end

     0   :  { %vm357_vm0 = vcmask 392192   ;;  %s2972_s0 = inlined_call_operand.vmem [shape: bf16[512,48], index: 0, kind: input, shape index: {}]   ;;  %s2973_s1 = inlined_call_operand.vmem [shape: bf16[48,8], index: 1, kind: input, shape index: {}]   ;;  %s2974_s2 = inlined_call_operand.vmem [shape: f32[1,48], index: 2, kind: input, shape index: {}]   ;;  %s2975_s3 = inlined_call_operand.vmem [shape: f32[1,48], index: 3, kind: input, shape index: {}]   ;;  %s2976_s4 = inlined_call_operand.vmem [shape: f32[1,8], index: 4, kind: input, shape index: {}]   ;;  %s2977_s5 = inlined_call_operand.vmem [shape: bf16[512,8], index: 5, kind: output, shape index: {0}]   ;;  %s2978_s6 = inlined_call_operand.hbm [shape: f32[2,8], index: 6, kind: output, shape index: {1}]  }
   0x1   :  { %v1853_v0 = vld [vmem:[%s2973_s1] sm:$0xff]   ;;  %v1854_v1 = vld [vmem:[%s2973_s1 + $0x8] sm:$0xff]   ;;  %v1855_v2 = vld [vmem:[%s2973_s1 + $0x10] sm:$0xff]  }
   0x2   :  { %1776 = vmatprep.subr.bf16.mxu0 %v1853_v0  ;;  %1846 = vmatprep.subr.bf16.mxu1 %v1853_v0  ;;  %v1583_v3 = vld [vmem:[%s2972_s0] sm:$0xff]   ;;  %v1710_v7 = vld [vmem:[%s2972_s0 + $0x8] sm:$0xff]   ;;  %v1711_v8 = vld [vmem:[%s2972_s0 + $0x10] sm:$0xff]  }
   0x3   :  { %1777 = vmatpush3.bf16.msra.mxu0 %v1853_v0  ;;  %v1931_v4 = vld [vmem:[%s2974_s2] ss:$0 sm:$0xff]  ;;  %1849 = vmatpush3.bf16.msra.mxu1 %v1853_v0  ;;  %v1584_v5 = vunpack.c.l.bf16 %v1583_v3  ;;  %v1585_v6 = vunpack.c.h.bf16 %v1583_v3  ;;  %v1712_v9 = vld [vmem:[%s2972_s0 + $0x18] sm:$0xff]   ;;  %v1588_v11 = vunpack.c.l.bf16 %v1710_v7  ;;  %v1589_v12 = vunpack.c.h.bf16 %v1710_v7  ;;  %v1714_v26 = vld [vmem:[%s2972_s0 + $0x28] sm:$0xff]  }
   0x4   :  { %1778 = vmatprep.subr.bf16.mxu0 %v1854_v1  ;;  %1847 = vmatprep.subr.bf16.mxu1 %v1854_v1  ;;  %v1945_v10 = vld [vmem:[%s2975_s3] ss:$0 sm:$0xff]  ;;  %v1592_v13 = vunpack.c.l.bf16 %v1711_v8  ;;  %v1593_v14 = vunpack.c.h.bf16 %v1711_v8  ;;  %v1596_v17 = vunpack.c.l.bf16 %v1712_v9  ;;  %v1597_v18 = vunpack.c.h.bf16 %v1712_v9  ;;  %v1715_v39 = vld [vmem:[%s2972_s0 + $0x30] sm:$0xff]   ;;  %v1716_v43 = vld [vmem:[%s2972_s0 + $0x38] sm:$0xff]  }
   0x5   :  { %v159_v15 = vmul.f32 %v1584_v5, %v1931_v4  ;;  %v160_v16 = vmul.f32 %v1585_v6, %v1931_v4  ;;  %v161_v19 = vmul.f32 %v1588_v11, %v1931_v4  ;;  %v162_v20 = vmul.f32 %v1589_v12, %v1931_v4  ;;  %v1713_v23 = vld [vmem:[%s2972_s0 + $0x20] sm:$0xff]  }
   0x6   :  { %v163_v21 = vmul.f32 %v1592_v13, %v1931_v4  ;;  %v164_v22 = vmul.f32 %v1593_v14, %v1931_v4  ;;  %v165_v32 = vmul.f32 %v1596_v17, %v1931_v4  ;;  %v166_v33 = vmul.f32 %v1597_v18, %v1931_v4  ;;  %v1717_v48 = vld [vmem:[%s2972_s0 + $0x40] sm:$0xff]  }
   0x7   :  { %1779 = vmatpush3.bf16.msra.mxu0 %v1854_v1  ;;  %v230_v24 = vadd.f32 %v1945_v10, %v159_v15  ;;  %v231_v25 = vadd.f32 %v1945_v10, %v160_v16  ;;  %v232_v27 = vadd.f32 %v1945_v10, %v161_v19  ;;  %v233_v28 = vadd.f32 %v1945_v10, %v162_v20 }
   0x8   :  { %1780 = vmatprep.subr.bf16.mxu0 %v1855_v2  ;;  %v234_v29 = vadd.f32 %v1945_v10, %v163_v21  ;;  %v235_v30 = vadd.f32 %v1945_v10, %v164_v22  ;;  %1850 = vmatpush3.bf16.msra.mxu1 %v1854_v1  ;;  %v1600_v34 = vunpack.c.l.bf16 %v1713_v23  ;;  %v1601_v37 = vunpack.c.h.bf16 %v1713_v23 }
   0x9   :  { %v294_v31 = vpack.c.bf16 %v231_v25, %v230_v24  ;;  %1848 = vmatprep.subr.bf16.mxu1 %v1855_v2  ;;  %v295_v35 = vpack.c.bf16 %v233_v28, %v232_v27  ;;  %v1604_v38 = vunpack.c.l.bf16 %v1714_v26  ;;  %v1605_v41 = vunpack.c.h.bf16 %v1714_v26 }
   0xa   :  { %v296_v36 = vpack.c.bf16 %v235_v30, %v234_v29  ;;  %v167_v40 = vmul.f32 %v1600_v34, %v1931_v4  ;;  %v168_v42 = vmul.f32 %v1601_v37, %v1931_v4  ;;  %v236_v44 = vadd.f32 %v1945_v10, %v165_v32 }
   0xb   :  { %1781 = vmatpush3.bf16.msra.mxu0 %v1855_v2  ;;  %1782 = vmatprep.mubr.msk.bf16.mxu0 %vm357_vm0, %v294_v31  ;;  %v237_v45 = vadd.f32 %v1945_v10, %v166_v33  ;;  %v169_v46 = vmul.f32 %v1604_v38, %v1931_v4  ;;  %v1608_v47 = vunpack.c.l.bf16 %v1715_v39 }
   0xc   :  { %1851 = vmatpush3.bf16.msra.mxu1 %v1855_v2 }
   0xe   :  { %1783 = vmatmul.mubr.msk.bf16.vlgmr.msra.gmra.mrb[0].mxu0 %vm357_vm0, %v295_v35 }
   0xf   :  { %12 = vsyncpa [#allocation3], 0  ;;  %1786 = vmatprep.mubr.msk.bf16.mxu0 %vm357_vm0, %v296_v36  ;;  %v238_v49 = vadd.f32 %v1945_v10, %v167_v40  ;;  %v239_v50 = vadd.f32 %v1945_v10, %v168_v42  ;;  %v1609_v51 = vunpack.c.h.bf16 %v1715_v39  ;;  %v1718_v52 = vld [vmem:[%s2972_s0 + $0x48] sm:$0xff]   ;;  %v170_v53 = vmul.f32 %v1605_v41, %v1931_v4  ;;  %v1719_v56 = vld [vmem:[%s2972_s0 + $0x50] sm:$0xff]  }
  0x10   :  { %v1612_v54 = vunpack.c.l.bf16 %v1716_v43  ;;  %v1613_v55 = vunpack.c.h.bf16 %v1716_v43  ;;  %v1616_v57 = vunpack.c.l.bf16 %v1717_v48  ;;  %v1617_v58 = vunpack.c.h.bf16 %v1717_v48  ;;  %v1720_v3 = vld [vmem:[%s2972_s0 + $0x58] sm:$0xff]   ;;  %v1721_v9 = vld [vmem:[%s2972_s0 + $0x60] sm:$0xff]   ;;  %v1722_v25 = vld [vmem:[%s2972_s0 + $0x68] sm:$0xff]  }
  0x11   :  { %v297_v59 = vpack.c.bf16 %v237_v45, %v236_v44  ;;  %v240_v60 = vadd.f32 %v1945_v10, %v169_v46  ;;  %v171_v61 = vmul.f32 %v1608_v47, %v1931_v4  ;;  %v1620_v62 = vunpack.c.l.bf16 %v1718_v52  ;;  %v1725_v38 = vld [vmem:[%s2972_s0 + $0x80] sm:$0xff]   ;;  %v2051_v43 = vld [vmem:[%s2972_s0 + $0x70] sm:$0xff]   ;;  %v1726_v44 = vld [vmem:[%s2972_s0 + $0x88] sm:$0xff]  }
  0x12   :  { %v298_v63 = vpack.c.bf16 %v239_v50, %v238_v49  ;;  %v172_v0 = vmul.f32 %v1609_v51, %v1931_v4  ;;  %v1621_v1 = vunpack.c.h.bf16 %v1718_v52  ;;  %v1624_v2 = vunpack.c.l.bf16 %v1719_v56  ;;  %v1727_v49 = vld [vmem:[%s2972_s0 + $0x90] sm:$0xff]  }
  0x13   :  { %v241_v5 = vadd.f32 %v1945_v10, %v170_v53  ;;  %v173_v6 = vmul.f32 %v1612_v54, %v1931_v4  ;;  %v174_v7 = vmul.f32 %v1613_v55, %v1931_v4  ;;  %v1625_v8 = vunpack.c.h.bf16 %v1719_v56 }
  0x14   :  { %v175_v11 = vmul.f32 %v1616_v57, %v1931_v4  ;;  %v176_v12 = vmul.f32 %v1617_v58, %v1931_v4  ;;  %v177_v13 = vmul.f32 %v1620_v62, %v1931_v4  ;;  %v178_v14 = vmul.f32 %v1621_v1, %v1931_v4  ;;  %v1728_v58 = vld [vmem:[%s2972_s0 + $0x98] sm:$0xff]  }
  0x15   :  { %v179_v15 = vmul.f32 %v1624_v2, %v1931_v4  ;;  %v180_v16 = vmul.f32 %v1625_v8, %v1931_v4  ;;  %v1628_v17 = vunpack.c.l.bf16 %v1720_v3  ;;  %v242_v18 = vadd.f32 %v1945_v10, %v171_v61 }
  0x16   :  { %1787 = vmatmul.mubr.msk.bf16.gmra.mrb[4].mxu0 %vm357_vm0, %v297_v59  ;;  %v243_v19 = vadd.f32 %v1945_v10, %v172_v0  ;;  %v1629_v20 = vunpack.c.h.bf16 %v1720_v3  ;;  %v1632_v21 = vunpack.c.l.bf16 %v1721_v9  ;;  %v299_v22 = vpack.c.bf16 %v241_v5, %v240_v60 }
  0x17   :  { %1790 = vmatprep.mubr.msk.bf16.mxu0 %vm357_vm0, %v298_v63  ;;  %v244_v23 = vadd.f32 %v1945_v10, %v173_v6  ;;  %v245_v24 = vadd.f32 %v1945_v10, %v174_v7  ;;  %v2021_v26 = vadd.f32 %v1945_v10, %v175_v11  ;;  %v2024_v27 = vadd.f32 %v1945_v10, %v176_v12  ;;  %v1729_v63 = vld [vmem:[%s2972_s0 + $0xa0] sm:$0xff]  }
  0x18   :  { %v2027_v28 = vadd.f32 %v1945_v10, %v177_v13  ;;  %v2030_v29 = vadd.f32 %v1945_v10, %v178_v14  ;;  %v2033_v30 = vadd.f32 %v1945_v10, %v179_v15  ;;  %v2036_v31 = vadd.f32 %v1945_v10, %v180_v16  ;;  %v1730_v15 = vld [vmem:[%s2972_s0 + $0xa8] sm:$0xff]  }
  0x19   :  { %v181_v32 = vmul.f32 %v1628_v17, %v1931_v4  ;;  %v1633_v33 = vunpack.c.h.bf16 %v1721_v9  ;;  %v300_v34 = vpack.c.bf16 %v243_v19, %v242_v18  ;;  %v182_v35 = vmul.f32 %v1629_v20, %v1931_v4  ;;  %v2096_v9 = vld [vmem:[%s2972_s0 + $0x78] sm:$0xff]  }
  0x1a   :  { %v183_v36 = vmul.f32 %v1632_v21, %v1931_v4  ;;  %v1636_v37 = vunpack.c.l.bf16 %v1722_v25  ;;  %v1637_v39 = vunpack.c.h.bf16 %v1722_v25  ;;  %v301_v40 = vpack.c.bf16 %v245_v24, %v244_v23  ;;  %v1731_v24 = vld [vmem:[%s2972_s0 + $0xb0] sm:$0xff]  }
  0x1b   :  { %v302_v41 = vpack.c.bf16 %v2024_v27, %v2021_v26  ;;  %v303_v42 = vpack.c.bf16 %v2030_v29, %v2027_v28  ;;  %v304_v45 = vpack.c.bf16 %v2036_v31, %v2033_v30  ;;  %v2060_v46 = vadd.f32 %v1945_v10, %v181_v32 }
  0x1c   :  { %v184_v47 = vmul.f32 %v1633_v33, %v1931_v4  ;;  %v1648_v48 = vunpack.c.l.bf16 %v1725_v38  ;;  %v2068_v50 = vadd.f32 %v1945_v10, %v182_v35  ;;  %v2071_v51 = vadd.f32 %v1945_v10, %v183_v36  ;;  %v1732_v33 = vld [vmem:[%s2972_s0 + $0xb8] sm:$0xff]  }
  0x1d   :  { %v185_v52 = vmul.f32 %v1636_v37, %v1931_v4  ;;  %v1649_v53 = vunpack.c.h.bf16 %v1725_v38  ;;  %v186_v54 = vmul.f32 %v1637_v39, %v1931_v4  ;;  %v1640_v55 = vunpack.c.l.bf16 %v2051_v43 }
  0x1e   :  { %1791 = vmatmul.mubr.msk.bf16.gmra.mrb[8].mxu0 %vm357_vm0, %v299_v22  ;;  %v191_v56 = vmul.f32 %v1648_v48, %v1931_v4  ;;  %v1652_v57 = vunpack.c.l.bf16 %v1726_v44  ;;  %v1641_v59 = vunpack.c.h.bf16 %v2051_v43  ;;  %v1653_v61 = vunpack.c.h.bf16 %v1726_v44 }
  0x1f   :  { %1794 = vmatprep.mubr.msk.bf16.mxu0 %vm357_vm0, %v300_v34  ;;  %v192_v60 = vmul.f32 %v1649_v53, %v1931_v4  ;;  %v1656_v62 = vunpack.c.l.bf16 %v1727_v49  ;;  %v2086_v0 = vadd.f32 %v1945_v10, %v184_v47  ;;  %v1657_v3 = vunpack.c.h.bf16 %v1727_v49  ;;  %v1733_v49 = vld [vmem:[%s2972_s0 + $0xc0] sm:$0xff]  }
  0x20   :  { %v262_v1 = vadd.f32 %v1945_v10, %v191_v56  ;;  %v193_v2 = vmul.f32 %v1652_v57, %v1931_v4  ;;  %v194_v6 = vmul.f32 %v1653_v61, %v1931_v4  ;;  %v1660_v8 = vunpack.c.l.bf16 %v1728_v58 }
  0x21   :  { %v263_v5 = vadd.f32 %v1945_v10, %v192_v60  ;;  %v195_v7 = vmul.f32 %v1656_v62, %v1931_v4  ;;  %v196_v12 = vmul.f32 %v1657_v3, %v1931_v4  ;;  %v1661_v13 = vunpack.c.h.bf16 %v1728_v58 }
  0x22   :  { %v264_v11 = vadd.f32 %v1945_v10, %v193_v2  ;;  %v1664_v14 = vunpack.c.l.bf16 %v1729_v63  ;;  %v265_v17 = vadd.f32 %v1945_v10, %v194_v6  ;;  %v197_v19 = vmul.f32 %v1660_v8, %v1931_v4  ;;  %v1736_v6 = vld [vmem:[%s2972_s0 + $0xd8] sm:$0xff]  }
  0x23   :  { %v310_v16 = vpack.c.bf16 %v263_v5, %v262_v1  ;;  %v266_v18 = vadd.f32 %v1945_v10, %v195_v7  ;;  %v267_v20 = vadd.f32 %v1945_v10, %v196_v12  ;;  %v198_v21 = vmul.f32 %v1661_v13, %v1931_v4 }
  0x24   :  { %v1665_v22 = vunpack.c.h.bf16 %v1729_v63  ;;  %v199_v23 = vmul.f32 %v1664_v14, %v1931_v4  ;;  %v1644_v25 = vunpack.c.l.bf16 %v2096_v9  ;;  %v311_v26 = vpack.c.bf16 %v265_v17, %v264_v11  ;;  %v1735_v11 = vld [vmem:[%s2972_s0 + $0xd0] sm:$0xff]   ;;  %v1738_v17 = vld [vmem:[%s2972_s0 + $0xe8] sm:$0xff]  }
  0x25   :  { %1814 = vmatprep.mubr.msk.bf16.mxu1 %vm357_vm0, %v310_v16  ;;  %v1668_v27 = vunpack.c.l.bf16 %v1730_v15  ;;  %v1669_v32 = vunpack.c.h.bf16 %v1730_v15  ;;  %v312_v34 = vpack.c.bf16 %v267_v20, %v266_v18  ;;  %v268_v35 = vadd.f32 %v1945_v10, %v197_v19 }
  0x26   :  { %1795 = vmatmul.mubr.msk.bf16.gmra.mrb[12].mxu0 %vm357_vm0, %v301_v40  ;;  %v269_v36 = vadd.f32 %v1945_v10, %v198_v21  ;;  %v200_v37 = vmul.f32 %v1665_v22, %v1931_v4  ;;  %1815 = vmatmul.mubr.msk.bf16.vlgmr.msra.gmra.mrb[0].mxu1 %vm357_vm0, %v311_v26  ;;  %v1672_v40 = vunpack.c.l.bf16 %v1731_v24  ;;  %v270_v43 = vadd.f32 %v1945_v10, %v199_v23  ;;  %v1739_v26 = vld [vmem:[%s2972_s0 + $0xf0] sm:$0xff]  }
  0x27   :  { %1798 = vmatprep.mubr.msk.bf16.mxu0 %vm357_vm0, %v302_v41  ;;  %v201_v38 = vmul.f32 %v1668_v27, %v1931_v4  ;;  %v202_v39 = vmul.f32 %v1669_v32, %v1931_v4  ;;  %v1673_v41 = vunpack.c.h.bf16 %v1731_v24  ;;  %1818 = vmatprep.mubr.msk.bf16.mxu1 %vm357_vm0, %v312_v34  ;;  %v1676_v47 = vunpack.c.l.bf16 %v1732_v33 }
  0x28   :  { %v271_v44 = vadd.f32 %v1945_v10, %v200_v37  ;;  %v1677_v48 = vunpack.c.h.bf16 %v1732_v33  ;;  %v2132_v53 = vadd.f32 %v1945_v10, %v185_v52  ;;  %v1645_v56 = vunpack.c.h.bf16 %v2096_v9 }
  0x29   :  { %v203_v57 = vmul.f32 %v1672_v40, %v1931_v4  ;;  %v204_v58 = vmul.f32 %v1673_v41, %v1931_v4  ;;  %v2138_v60 = vadd.f32 %v1945_v10, %v186_v54  ;;  %v187_v61 = vmul.f32 %v1640_v55, %v1931_v4 }
  0x2a   :  { %v188_v62 = vmul.f32 %v1641_v59, %v1931_v4  ;;  %v313_v63 = vpack.c.bf16 %v269_v36, %v268_v35  ;;  %v272_v1 = vadd.f32 %v1945_v10, %v201_v38  ;;  %v273_v2 = vadd.f32 %v1945_v10, %v202_v39  ;;  %v1740_v35 = vld [vmem:[%s2972_s0 + $0xf8] sm:$0xff]  }
  0x2b   :  { %v205_v52 = vmul.f32 %v1676_v47, %v1931_v4  ;;  %v1680_v3 = vunpack.c.l.bf16 %v1733_v49  ;;  %v305_v54 = vpack.c.bf16 %v2068_v50, %v2060_v46  ;;  %v306_v55 = vpack.c.bf16 %v2086_v0, %v2071_v51  ;;  %v2169_v50 = vld [vmem:[%s2972_s0 + $0xc8] sm:$0xff]   ;;  %v1737_v51 = vld [vmem:[%s2972_s0 + $0xe0] sm:$0xff]  }
  0x2c   :  { %v314_v59 = vpack.c.bf16 %v271_v44, %v270_v43  ;;  %v206_v5 = vmul.f32 %v1677_v48, %v1931_v4  ;;  %v2162_v28 = vmul.f32 %v1644_v25, %v1931_v4  ;;  %v274_v29 = vadd.f32 %v1945_v10, %v203_v57 }
  0x2d   :  { %v1681_v46 = vunpack.c.h.bf16 %v1733_v49  ;;  %v307_v30 = vpack.c.bf16 %v2138_v60, %v2132_v53  ;;  %v2177_v31 = vadd.f32 %v1945_v10, %v187_v61  ;;  %v190_v0 = vmul.f32 %v1645_v56, %v1931_v4 }
  0x2e   :  { %1799 = vmatmul.mubr.msk.bf16.gmra.mrb[16].mxu0 %vm357_vm0, %v303_v42  ;;  %v275_v42 = vadd.f32 %v1945_v10, %v204_v58  ;;  %1819 = vmatmul.mubr.msk.bf16.gmra.mrb[4].mxu1 %vm357_vm0, %v313_v63  ;;  %v315_v7 = vpack.c.bf16 %v273_v2, %v272_v1  ;;  %v2185_v8 = vadd.f32 %v1945_v10, %v205_v52  ;;  %v1692_v12 = vunpack.c.l.bf16 %v1736_v6 }
  0x2f   :  { %1802 = vmatprep.mubr.msk.bf16.mxu0 %vm357_vm0, %v304_v45  ;;  %v2180_v45 = vadd.f32 %v1945_v10, %v188_v62  ;;  %v207_v9 = vmul.f32 %v1680_v3, %v1931_v4  ;;  %1822 = vmatprep.mubr.msk.bf16.mxu1 %vm357_vm0, %v314_v59  ;;  %v277_v13 = vadd.f32 %v1945_v10, %v206_v5  ;;  %v1684_v14 = vunpack.c.l.bf16 %v2169_v50 }
  0x30   :  { %v1693_v15 = vunpack.c.h.bf16 %v1736_v6  ;;  %v1696_v16 = vunpack.c.l.bf16 %v1737_v51  ;;  %v316_v18 = vpack.c.bf16 %v275_v42, %v274_v29  ;;  %v208_v19 = vmul.f32 %v1681_v46, %v1931_v4 }
  0x31   :  { %v1685_v20 = vunpack.c.h.bf16 %v2169_v50  ;;  %v213_v21 = vmul.f32 %v1692_v12, %v1931_v4  ;;  %v1688_v22 = vunpack.c.l.bf16 %v1735_v11  ;;  %v1697_v24 = vunpack.c.h.bf16 %v1737_v51 }
  0x32   :  { %v214_v23 = vmul.f32 %v1693_v15, %v1931_v4  ;;  %v215_v25 = vmul.f32 %v1696_v16, %v1931_v4  ;;  %v278_v27 = vadd.f32 %v1945_v10, %v207_v9  ;;  %v1700_v33 = vunpack.c.l.bf16 %v1738_v17 }
  0x33   :  { %v284_v32 = vadd.f32 %v1945_v10, %v213_v21  ;;  %v1701_v34 = vunpack.c.h.bf16 %v1738_v17  ;;  %v1689_v36 = vunpack.c.h.bf16 %v1735_v11  ;;  %v216_v38 = vmul.f32 %v1697_v24, %v1931_v4 }
  0x34   :  { %v285_v37 = vadd.f32 %v1945_v10, %v214_v23  ;;  %v286_v39 = vadd.f32 %v1945_v10, %v215_v25  ;;  %v217_v40 = vmul.f32 %v1700_v33, %v1931_v4  ;;  %v1704_v43 = vunpack.c.l.bf16 %v1739_v26 }
  0x35   :  { %v218_v41 = vmul.f32 %v1701_v34, %v1931_v4  ;;  %v1705_v44 = vunpack.c.h.bf16 %v1739_v26  ;;  %v287_v48 = vadd.f32 %v1945_v10, %v216_v38  ;;  %v1708_v49 = vunpack.c.l.bf16 %v1740_v35 }
  0x36   :  { %1803 = vmatmul.mubr.msk.bf16.gmra.mrb[20].mxu0 %vm357_vm0, %v305_v54  ;;  %v321_v47 = vpack.c.bf16 %v285_v37, %v284_v32  ;;  %v1709_v56 = vunpack.c.h.bf16 %v1740_v35  ;;  %1823 = vmatmul.mubr.msk.bf16.gmra.mrb[8].mxu1 %vm357_vm0, %v315_v7  ;;  %v288_v57 = vadd.f32 %v1945_v10, %v217_v40  ;;  %v219_v61 = vmul.f32 %v1704_v43, %v1931_v4 }
  0x37   :  { %1806 = vmatprep.mubr.msk.bf16.mxu0 %vm357_vm0, %v306_v55  ;;  %v289_v58 = vadd.f32 %v1945_v10, %v218_v41  ;;  %v220_v62 = vmul.f32 %v1705_v44, %v1931_v4  ;;  %1826 = vmatprep.mubr.msk.bf16.mxu1 %vm357_vm0, %v316_v18  ;;  %v279_v63 = vadd.f32 %v1945_v10, %v208_v19  ;;  %vm1333_vm1 = vcmask 60416  }
  0x38   :  { %v322_v1 = vpack.c.bf16 %v287_v48, %v286_v39  ;;  %v221_v2 = vmul.f32 %v1708_v49, %v1931_v4  ;;  %v222_v52 = vmul.f32 %v1709_v56, %v1931_v4  ;;  %v308_v3 = vpack.c.bf16 %v2180_v45, %v2177_v31 }
  0x39   :  { %v323_v54 = vpack.c.bf16 %v289_v58, %v288_v57  ;;  %v290_v55 = vadd.f32 %v1945_v10, %v219_v61  ;;  %v291_v59 = vadd.f32 %v1945_v10, %v220_v62  ;;  %v260_v5 = vadd.f32 %v1945_v10, %v2162_v28 }
  0x3a   :  { %v261_v6 = vadd.f32 %v1945_v10, %v190_v0  ;;  %v292_v29 = vadd.f32 %v1945_v10, %v221_v2  ;;  %v293_v42 = vadd.f32 %v1945_v10, %v222_v52  ;;  %v317_v46 = vpack.c.bf16 %v277_v13, %v2185_v8 }
  0x3b   :  { %v209_v50 = vmul.f32 %v1684_v14, %v1931_v4  ;;  %v210_v51 = vmul.f32 %v1685_v20, %v1931_v4  ;;  %v324_v31 = vpack.c.bf16 %v291_v59, %v290_v55  ;;  %v318_v45 = vpack.c.bf16 %v279_v63, %v278_v27 }
  0x3c   :  { %v211_v28 = vmul.f32 %v1688_v22, %v1931_v4  ;;  %v212_v0 = vmul.f32 %v1689_v36, %v1931_v4  ;;  %v325_v7 = vpack.c.bf16 %v293_v42, %v292_v29  ;;  %v309_v11 = vpack.c.bf16 %v261_v6, %v260_v5 }
  0x3d   :  { %v280_v8 = vadd.f32 %v1945_v10, %v209_v50  ;;  %v281_v9 = vadd.f32 %v1945_v10, %v210_v51  ;;  %vm743_vm2 = vcmask 64512   ;;  %vm877_vm3 = vcmask 57344  }
  0x3e   :  { %1807 = vmatmul.mubr.msk.bf16.gmra.mrb[24].mxu0 %vm357_vm0, %v307_v30  ;;  %1827 = vmatmul.mubr.msk.bf16.gmra.mrb[12].mxu1 %vm357_vm0, %v317_v46  ;;  %v282_v53 = vadd.f32 %v1945_v10, %v211_v28  ;;  %v283_v60 = vadd.f32 %v1945_v10, %v212_v0  ;;  %v2263_v10 = vld [vmem:[%s2976_s4] ss:$0 sm:$0xff] }
  0x3f   :  { %1810 = vmatprep.mubr.msk.bf16.mxu0 %vm357_vm0, %v308_v3  ;;  %1830 = vmatprep.mubr.msk.bf16.mxu1 %vm357_vm0, %v318_v45  ;;  %v319_v30 = vpack.c.bf16 %v281_v9, %v280_v8 }
  0x40   :  { %v320_v4 = vpack.c.bf16 %v283_v60, %v282_v53 }
  0x46   :  { %1811 = vmatmul.mubr.msk.bf16.gmra.mrb[28].mxu0 %vm357_vm0, %v309_v11  ;;  %1831 = vmatmul.mubr.msk.bf16.gmra.mrb[16].mxu1 %vm357_vm0, %v319_v30 }
  0x47   :  { %1834 = vmatprep.mubr.msk.bf16.mxu1 %vm357_vm0, %v320_v4 }
  0x4e   :  { %1835 = vmatmul.mubr.msk.bf16.gmra.mrb[20].mxu1 %vm357_vm0, %v321_v47 }
  0x4f   :  { %1838 = vmatprep.mubr.msk.bf16.mxu1 %vm357_vm0, %v322_v1 }
  0x56   :  { %1839 = vmatmul.mubr.msk.bf16.gmra.mrb[24].mxu1 %vm357_vm0, %v323_v54 }
  0x57   :  { %1842 = vmatprep.mubr.msk.bf16.mxu1 %vm357_vm0, %v324_v31 }
  0x5e   :  { %1843 = vmatmul.mubr.msk.bf16.gmra.mrb[28].mxu1 %vm357_vm0, %v325_v7 }
  0xe1   :  { %v1784_v12 = vpop.f32.mrb[0].mxu0 }
  0xe2   :  { %v497_v13 = vadd.f32 %v1784_v12, %v2263_v10  ;;  %v488_v14 = vpop.f32.mrb[1].mxu0 }
  0xe3   :  { %v489_v15 = vadd.f32 %v2263_v10, %v488_v14  ;;  %v1785_v16 = vpop.f32.mrb[2].mxu0 }
  0xe4   :  { %v1520_v17 = vpack.c.bf16 %v497_v13, %v497_v13  ;;  %v500_v18 = vadd.f32 %v1785_v16, %v2263_v10  ;;  %v491_v19 = vpop.f32.mrb[3].mxu0  ;;  %v881_v23 = vmul.f32 %v497_v13, %v497_v13  ;;  %v747_v35 = vsel %vm743_vm2, %v497_v13, 0.0 }
  0xe5   :  { %v879_v20 = vmul.f32 %v489_v15, %v489_v15  ;;  %v1518_v21 = vpack.c.bf16 %v489_v15, %v489_v15  ;;  %v492_v22 = vadd.f32 %v2263_v10, %v491_v19  ;;  %v744_v25 = vsel %vm743_vm2, %v489_v15, 0.0 }
  0xe6   :  { %1336 = vst.msk [vmem:[%s2977_s5 + $0x8] sm:$0xf] %vm1333_vm1, %v1520_v17  ;;  %v1521_v24 = vpack.c.bf16 %v500_v18, %v500_v18  ;;  %v882_v33 = vmul.f32 %v500_v18, %v500_v18  ;;  %v946_v44 = vsel %vm743_vm2, %v881_v23, 0.0  ;;  %v749_v49 = vsel %vm743_vm2, %v500_v18, 0.0 }
  0xe7   :  { %1334 = vst.msk [vmem:[%s2977_s5] sm:$0xf] %vm1333_vm1, %v1518_v21  ;;  %v745_v26 = vsel %vm743_vm2, %v492_v22, 0.0  ;;  %v880_v27 = vmul.f32 %v492_v22, %v492_v22  ;;  %v1519_v32 = vpack.c.bf16 %v492_v22, %v492_v22  ;;  %v943_v36 = vsel %vm743_vm2, %v879_v20, 0.0 }
  0xe8   :  { %1337 = vst.msk [vmem:[%s2977_s5 + $0xc] sm:$0xf] %vm1333_vm1, %v1521_v24  ;;  %v746_v34 = vadd.f32 %v745_v26, %v744_v25  ;;  %v948_v56 = vsel %vm743_vm2, %v882_v33, 0.0 }
  0xe9   :  { %v944_v37 = vsel %vm743_vm2, %v880_v27, 0.0  ;;  %1335 = vst.msk [vmem:[%s2977_s5 + $0x4] sm:$0xf] %vm1333_vm1, %v1519_v32  ;;  %v1788_v38 = vpop.f32.mrb[4].mxu0 }
  0xea   :  { %v748_v39 = vadd.f32 %v747_v35, %v746_v34  ;;  %v945_v40 = vadd.f32 %v944_v37, %v943_v36  ;;  %v513_v41 = vadd.f32 %v1788_v38, %v2263_v10  ;;  %v504_v43 = vpop.f32.mrb[5].mxu0 }
  0xeb   :  { %v505_v47 = vadd.f32 %v2263_v10, %v504_v43  ;;  %v1789_v48 = vpop.f32.mrb[6].mxu0 }
  0xec   :  { %v947_v57 = vadd.f32 %v946_v44, %v945_v40  ;;  %v1524_v58 = vpack.c.bf16 %v513_v41, %v513_v41  ;;  %v507_v61 = vpop.f32.mrb[7].mxu0  ;;  %v750_v62 = vadd.f32 %v749_v49, %v748_v39  ;;  %v516_v3 = vadd.f32 %v1789_v48, %v2263_v10 }
  0xed   :  { %v751_v63 = vsel %vm743_vm2, %v505_v47, 0.0  ;;  %v883_v1 = vmul.f32 %v505_v47, %v505_v47  ;;  %v1522_v2 = vpack.c.bf16 %v505_v47, %v505_v47  ;;  %v508_v54 = vadd.f32 %v2263_v10, %v507_v61 }
  0xee   :  { %1340 = vst.msk [vmem:[%s2977_s5 + $0x18] sm:$0xf] %vm1333_vm1, %v1524_v58  ;;  %v949_v52 = vadd.f32 %v948_v56, %v947_v57  ;;  %v752_v55 = vadd.f32 %v751_v63, %v750_v62  ;;  %v885_v5 = vmul.f32 %v513_v41, %v513_v41  ;;  %v1525_v29 = vpack.c.bf16 %v516_v3, %v516_v3 }
  0xef   :  { %v950_v59 = vsel %vm743_vm2, %v883_v1, 0.0  ;;  %1338 = vst.msk [vmem:[%s2977_s5 + $0x10] sm:$0xf] %vm1333_vm1, %v1522_v2  ;;  %v753_v42 = vsel %vm743_vm2, %v508_v54, 0.0  ;;  %v884_v46 = vmul.f32 %v508_v54, %v508_v54  ;;  %v1523_v50 = vpack.c.bf16 %v508_v54, %v508_v54 }
  0xf0   :  { %v951_v6 = vadd.f32 %v950_v59, %v949_v52  ;;  %1341 = vst.msk [vmem:[%s2977_s5 + $0x1c] sm:$0xf] %vm1333_vm1, %v1525_v29  ;;  %v754_v31 = vadd.f32 %v753_v42, %v752_v55  ;;  %v755_v0 = vsel %vm743_vm2, %v513_v41, 0.0  ;;  %v886_v7 = vmul.f32 %v516_v3, %v516_v3 }
  0xf1   :  { %v1792_v51 = vpop.f32.mrb[8].mxu0  ;;  %v952_v8 = vsel %vm743_vm2, %v884_v46, 0.0  ;;  %1339 = vst.msk [vmem:[%s2977_s5 + $0x14] sm:$0xf] %vm1333_vm1, %v1523_v50  ;;  %v954_v53 = vsel %vm743_vm2, %v885_v5, 0.0  ;;  %v757_v60 = vsel %vm743_vm2, %v516_v3, 0.0 }
  0xf2   :  { %v529_v45 = vadd.f32 %v1792_v51, %v2263_v10  ;;  %v520_v28 = vpop.f32.mrb[9].mxu0  ;;  %v756_v30 = vadd.f32 %v755_v0, %v754_v31  ;;  %v953_v4 = vadd.f32 %v952_v8, %v951_v6  ;;  %v956_v20 = vsel %vm743_vm2, %v886_v7, 0.0 }
  0xf3   :  { %v521_v9 = vadd.f32 %v2263_v10, %v520_v28  ;;  %v1793_v11 = vpop.f32.mrb[10].mxu0 }
  0xf4   :  { %v523_v12 = vpop.f32.mrb[11].mxu0  ;;  %v1528_v13 = vpack.c.bf16 %v529_v45, %v529_v45  ;;  %v955_v17 = vadd.f32 %v954_v53, %v953_v4  ;;  %v758_v18 = vadd.f32 %v757_v60, %v756_v30  ;;  %v532_v19 = vadd.f32 %v1793_v11, %v2263_v10 }
  0xf5   :  { %v759_v14 = vsel %vm743_vm2, %v521_v9, 0.0  ;;  %v887_v15 = vmul.f32 %v521_v9, %v521_v9  ;;  %v1526_v16 = vpack.c.bf16 %v521_v9, %v521_v9  ;;  %v524_v22 = vadd.f32 %v2263_v10, %v523_v12 }
  0xf6   :  { %1344 = vst.msk [vmem:[%s2977_s5 + $0x28] sm:$0xf] %vm1333_vm1, %v1528_v13  ;;  %v889_v23 = vmul.f32 %v529_v45, %v529_v45  ;;  %v760_v24 = vadd.f32 %v759_v14, %v758_v18  ;;  %v957_v25 = vadd.f32 %v956_v20, %v955_v17  ;;  %v1529_v26 = vpack.c.bf16 %v532_v19, %v532_v19 }
  0xf7   :  { %v958_v21 = vsel %vm743_vm2, %v887_v15, 0.0  ;;  %1342 = vst.msk [vmem:[%s2977_s5 + $0x20] sm:$0xf] %vm1333_vm1, %v1526_v16  ;;  %v761_v27 = vsel %vm743_vm2, %v524_v22, 0.0  ;;  %v888_v32 = vmul.f32 %v524_v22, %v524_v22  ;;  %v1527_v33 = vpack.c.bf16 %v524_v22, %v524_v22 }
  0xf8   :  { %v959_v35 = vadd.f32 %v958_v21, %v957_v25  ;;  %v762_v36 = vadd.f32 %v761_v27, %v760_v24  ;;  %v763_v39 = vsel %vm743_vm2, %v529_v45, 0.0  ;;  %v890_v40 = vmul.f32 %v532_v19, %v532_v19  ;;  %1345 = vst.msk [vmem:[%s2977_s5 + $0x2c] sm:$0xf] %vm1333_vm1, %v1529_v26 }
  0xf9   :  { %v1796_v34 = vpop.f32.mrb[12].mxu0  ;;  %v960_v41 = vsel %vm743_vm2, %v888_v32, 0.0  ;;  %1343 = vst.msk [vmem:[%s2977_s5 + $0x24] sm:$0xf] %vm1333_vm1, %v1527_v33  ;;  %v962_v47 = vsel %vm743_vm2, %v889_v23, 0.0  ;;  %v765_v48 = vsel %vm743_vm2, %v532_v19, 0.0 }
  0xfa   :  { %v545_v37 = vadd.f32 %v1796_v34, %v2263_v10  ;;  %v536_v38 = vpop.f32.mrb[13].mxu0  ;;  %v764_v49 = vadd.f32 %v763_v39, %v762_v36  ;;  %v961_v56 = vadd.f32 %v960_v41, %v959_v35  ;;  %v1816_v58 = vpop.f32.mrb[0].mxu1  ;;  %v964_v59 = vsel %vm743_vm2, %v890_v40, 0.0 }
  0xfb   :  { %v537_v43 = vadd.f32 %v2263_v10, %v536_v38  ;;  %v1797_v44 = vpop.f32.mrb[14].mxu0  ;;  %v2351_v2 = vpop.f32.mrb[1].mxu1  ;;  %v2383_v13 = vadd.f32 %v1816_v58, %v2263_v10 }
  0xfc   :  { %v539_v57 = vpop.f32.mrb[15].mxu0  ;;  %v1532_v61 = vpack.c.bf16 %v545_v37, %v545_v37  ;;  %v963_v52 = vadd.f32 %v962_v47, %v961_v56  ;;  %v766_v3 = vadd.f32 %v765_v48, %v764_v49  ;;  %v548_v54 = vadd.f32 %v1797_v44, %v2263_v10  ;;  %v2354_v55 = vpop.f32.mrb[2].mxu1 }
  0xfd   :  { %v767_v62 = vsel %vm743_vm2, %v537_v43, 0.0  ;;  %v891_v63 = vmul.f32 %v537_v43, %v537_v43  ;;  %v1530_v1 = vpack.c.bf16 %v537_v43, %v537_v43  ;;  %v540_v6 = vadd.f32 %v2263_v10, %v539_v57  ;;  %v2367_v29 = vpop.f32.mrb[3].mxu1 }
  0xfe   :  { %1348 = vst.msk [vmem:[%s2977_s5 + $0x38] sm:$0xf] %vm1333_vm1, %v1532_v61  ;;  %v893_v42 = vmul.f32 %v545_v37, %v545_v37  ;;  %v768_v46 = vadd.f32 %v767_v62, %v766_v3  ;;  %v965_v50 = vadd.f32 %v964_v59, %v963_v52  ;;  %v1533_v51 = vpack.c.bf16 %v548_v54, %v548_v54 }
  0xff   :  { %v966_v5 = vsel %vm743_vm2, %v891_v63, 0.0  ;;  %1346 = vst.msk [vmem:[%s2977_s5 + $0x30] sm:$0xf] %vm1333_vm1, %v1530_v1  ;;  %v769_v31 = vsel %vm743_vm2, %v540_v6, 0.0  ;;  %v892_v45 = vmul.f32 %v540_v6, %v540_v6  ;;  %v1531_v28 = vpack.c.bf16 %v540_v6, %v540_v6 }
 0x100   :  { %v771_v7 = vsel %vm743_vm2, %v545_v37, 0.0  ;;  %v967_v8 = vadd.f32 %v966_v5, %v965_v50  ;;  %v770_v9 = vadd.f32 %v769_v31, %v768_v46  ;;  %v894_v60 = vmul.f32 %v548_v54, %v548_v54  ;;  %1349 = vst.msk [vmem:[%s2977_s5 + $0x3c] sm:$0xf] %vm1333_vm1, %v1533_v51 }
 0x101   :  { %v1800_v0 = vpop.f32.mrb[16].mxu0  ;;  %v968_v30 = vsel %vm743_vm2, %v892_v45, 0.0  ;;  %1347 = vst.msk [vmem:[%s2977_s5 + $0x34] sm:$0xf] %vm1333_vm1, %v1531_v28  ;;  %v970_v14 = vsel %vm743_vm2, %v893_v42, 0.0  ;;  %v773_v15 = vsel %vm743_vm2, %v548_v54, 0.0  ;;  %v1552_v36 = vpack.c.bf16 %v2383_v13, %v2383_v13 }
 0x102   :  { %v561_v11 = vadd.f32 %v1800_v0, %v2263_v10  ;;  %v552_v53 = vpop.f32.mrb[17].mxu0  ;;  %v772_v16 = vadd.f32 %v771_v7, %v770_v9  ;;  %v969_v17 = vadd.f32 %v968_v30, %v967_v8  ;;  %v2387_v19 = vpop.f32.mrb[4].mxu1  ;;  %v972_v33 = vsel %vm743_vm2, %v894_v60, 0.0 }
 0x103   :  { %v553_v4 = vadd.f32 %v2263_v10, %v552_v53  ;;  %v1801_v12 = vpop.f32.mrb[18].mxu0  ;;  %v2390_v24 = vpop.f32.mrb[5].mxu1  ;;  %1368 = vst.msk [vmem:[%s2977_s5 + $0x88] sm:$0xf] %vm1333_vm1, %v1552_v36  ;;  %v2418_v61 = vadd.f32 %v2263_v10, %v2351_v2 }
 0x104   :  { %v555_v18 = vpop.f32.mrb[19].mxu0  ;;  %v1536_v20 = vpack.c.bf16 %v561_v11, %v561_v11  ;;  %v971_v25 = vadd.f32 %v970_v14, %v969_v17  ;;  %v774_v26 = vadd.f32 %v773_v15, %v772_v16  ;;  %v564_v27 = vadd.f32 %v1801_v12, %v2263_v10  ;;  %v2393_v32 = vpop.f32.mrb[6].mxu1 }
 0x105   :  { %v775_v21 = vsel %vm743_vm2, %v553_v4, 0.0  ;;  %v895_v22 = vmul.f32 %v553_v4, %v553_v4  ;;  %v1534_v23 = vpack.c.bf16 %v553_v4, %v553_v4  ;;  %v556_v35 = vadd.f32 %v2263_v10, %v555_v18  ;;  %v2408_v37 = vpop.f32.mrb[7].mxu1 }
 0x106   :  { %1352 = vst.msk [vmem:[%s2977_s5 + $0x48] sm:$0xf] %vm1333_vm1, %v1536_v20  ;;  %v897_v38 = vmul.f32 %v561_v11, %v561_v11  ;;  %v776_v39 = vadd.f32 %v775_v21, %v774_v26  ;;  %v973_v40 = vadd.f32 %v972_v33, %v971_v25  ;;  %v1537_v41 = vpack.c.bf16 %v564_v27, %v564_v27 }
 0x107   :  { %v974_v34 = vsel %vm743_vm2, %v895_v22, 0.0  ;;  %1350 = vst.msk [vmem:[%s2977_s5 + $0x40] sm:$0xf] %vm1333_vm1, %v1534_v23  ;;  %v777_v43 = vsel %vm743_vm2, %v556_v35, 0.0  ;;  %v896_v44 = vmul.f32 %v556_v35, %v556_v35  ;;  %v1535_v47 = vpack.c.bf16 %v556_v35, %v556_v35 }
 0x108   :  { %v975_v49 = vadd.f32 %v974_v34, %v973_v40  ;;  %v778_v56 = vadd.f32 %v777_v43, %v776_v39  ;;  %v779_v62 = vsel %vm743_vm2, %v561_v11, 0.0  ;;  %v898_v63 = vmul.f32 %v564_v27, %v564_v27  ;;  %1353 = vst.msk [vmem:[%s2977_s5 + $0x4c] sm:$0xf] %vm1333_vm1, %v1537_v41 }
 0x109   :  { %v1804_v48 = vpop.f32.mrb[20].mxu0  ;;  %v976_v1 = vsel %vm743_vm2, %v896_v44, 0.0  ;;  %1351 = vst.msk [vmem:[%s2977_s5 + $0x44] sm:$0xf] %vm1333_vm1, %v1535_v47  ;;  %v978_v2 = vsel %vm743_vm2, %v897_v38, 0.0  ;;  %v781_v54 = vsel %vm743_vm2, %v564_v27, 0.0  ;;  %v1550_v60 = vpack.c.bf16 %v2418_v61, %v2418_v61 }
 0x10a   :  { %v577_v57 = vadd.f32 %v1804_v48, %v2263_v10  ;;  %v568_v58 = vpop.f32.mrb[21].mxu0  ;;  %v780_v59 = vadd.f32 %v779_v62, %v778_v56  ;;  %v977_v5 = vadd.f32 %v976_v1, %v975_v49  ;;  %v2433_v42 = vpop.f32.mrb[8].mxu1  ;;  %v980_v9 = vsel %vm743_vm2, %v898_v63, 0.0 }
 0x10b   :  { %v569_v52 = vadd.f32 %v2263_v10, %v568_v58  ;;  %v1805_v3 = vpop.f32.mrb[22].mxu0  ;;  %v2436_v45 = vpop.f32.mrb[9].mxu1  ;;  %1366 = vst.msk [vmem:[%s2977_s5 + $0x80] sm:$0xf] %vm1333_vm1, %v1550_v60 }
 0x10c   :  { %v571_v6 = vpop.f32.mrb[23].mxu0  ;;  %v1540_v46 = vpack.c.bf16 %v577_v57, %v577_v57  ;;  %v979_v28 = vadd.f32 %v978_v2, %v977_v5  ;;  %v782_v0 = vadd.f32 %v781_v54, %v780_v59  ;;  %v580_v7 = vadd.f32 %v1805_v3, %v2263_v10  ;;  %v2439_v8 = vpop.f32.mrb[10].mxu1 }
 0x10d   :  { %v783_v50 = vsel %vm743_vm2, %v569_v52, 0.0  ;;  %v899_v51 = vmul.f32 %v569_v52, %v569_v52  ;;  %v1538_v31 = vpack.c.bf16 %v569_v52, %v569_v52  ;;  %v572_v53 = vadd.f32 %v2263_v10, %v571_v6  ;;  %v2454_v30 = vpop.f32.mrb[11].mxu1 }
 0x10e   :  { %1356 = vst.msk [vmem:[%s2977_s5 + $0x58] sm:$0xf] %vm1333_vm1, %v1540_v46  ;;  %v901_v4 = vmul.f32 %v577_v57, %v577_v57  ;;  %v784_v12 = vadd.f32 %v783_v50, %v782_v0  ;;  %v981_v14 = vadd.f32 %v980_v9, %v979_v28  ;;  %v1541_v15 = vpack.c.bf16 %v580_v7, %v580_v7 }
 0x10f   :  { %v982_v11 = vsel %vm743_vm2, %v899_v51, 0.0  ;;  %1354 = vst.msk [vmem:[%s2977_s5 + $0x50] sm:$0xf] %vm1333_vm1, %v1538_v31  ;;  %v785_v16 = vsel %vm743_vm2, %v572_v53, 0.0  ;;  %v900_v17 = vmul.f32 %v572_v53, %v572_v53  ;;  %v1539_v18 = vpack.c.bf16 %v572_v53, %v572_v53 }
 0x110   :  { %v983_v21 = vadd.f32 %v982_v11, %v981_v14  ;;  %v786_v22 = vadd.f32 %v785_v16, %v784_v12  ;;  %v787_v26 = vsel %vm743_vm2, %v577_v57, 0.0  ;;  %v902_v27 = vmul.f32 %v580_v7, %v580_v7  ;;  %1357 = vst.msk [vmem:[%s2977_s5 + $0x5c] sm:$0xf] %vm1333_vm1, %v1541_v15 }
 0x111   :  { %v1808_v20 = vpop.f32.mrb[24].mxu0  ;;  %v984_v33 = vsel %vm743_vm2, %v900_v17, 0.0  ;;  %1355 = vst.msk [vmem:[%s2977_s5 + $0x54] sm:$0xf] %vm1333_vm1, %v1539_v18  ;;  %v986_v36 = vsel %vm743_vm2, %v901_v4, 0.0  ;;  %v789_v38 = vsel %vm743_vm2, %v580_v7, 0.0  ;;  %v2496_v2 = vadd.f32 %v2354_v55, %v2263_v10 }
 0x112   :  { %v593_v23 = vadd.f32 %v1808_v20, %v2263_v10  ;;  %v584_v25 = vpop.f32.mrb[25].mxu0  ;;  %v788_v39 = vadd.f32 %v787_v26, %v786_v22  ;;  %v985_v40 = vadd.f32 %v984_v33, %v983_v21  ;;  %v2475_v43 = vpop.f32.mrb[12].mxu1  ;;  %v988_v1 = vsel %vm743_vm2, %v902_v27, 0.0 }
 0x113   :  { %v585_v34 = vadd.f32 %v2263_v10, %v584_v25  ;;  %v1809_v35 = vpop.f32.mrb[26].mxu0  ;;  %v2478_v56 = vpop.f32.mrb[13].mxu1  ;;  %v1553_v14 = vpack.c.bf16 %v2496_v2, %v2496_v2 }
 0x114   :  { %v587_v41 = vpop.f32.mrb[27].mxu0  ;;  %v1544_v44 = vpack.c.bf16 %v593_v23, %v593_v23  ;;  %v987_v57 = vadd.f32 %v986_v36, %v985_v40  ;;  %v790_v58 = vadd.f32 %v789_v38, %v788_v39  ;;  %v596_v62 = vadd.f32 %v1809_v35, %v2263_v10  ;;  %v2481_v63 = vpop.f32.mrb[14].mxu1 }
 0x115   :  { %v791_v47 = vsel %vm743_vm2, %v585_v34, 0.0  ;;  %v903_v48 = vmul.f32 %v585_v34, %v585_v34  ;;  %v1542_v49 = vpack.c.bf16 %v585_v34, %v585_v34  ;;  %v588_v3 = vadd.f32 %v2263_v10, %v587_v41  ;;  %v2498_v54 = vpop.f32.mrb[15].mxu1  ;;  %1369 = vst.msk [vmem:[%s2977_s5 + $0x8c] sm:$0xf] %vm1333_vm1, %v1553_v14 }
 0x116   :  { %1360 = vst.msk [vmem:[%s2977_s5 + $0x68] sm:$0xf] %vm1333_vm1, %v1544_v44  ;;  %v905_v59 = vmul.f32 %v593_v23, %v593_v23  ;;  %v792_v5 = vadd.f32 %v791_v47, %v790_v58  ;;  %v989_v6 = vadd.f32 %v988_v1, %v987_v57  ;;  %v1545_v46 = vpack.c.bf16 %v596_v62, %v596_v62 }
 0x117   :  { %v990_v52 = vsel %vm743_vm2, %v903_v48, 0.0  ;;  %1358 = vst.msk [vmem:[%s2977_s5 + $0x60] sm:$0xf] %vm1333_vm1, %v1542_v49  ;;  %v793_v50 = vsel %vm743_vm2, %v588_v3, 0.0  ;;  %v904_v51 = vmul.f32 %v588_v3, %v588_v3  ;;  %v1543_v31 = vpack.c.bf16 %v588_v3, %v588_v3 }
 0x118   :  { %v795_v0 = vsel %vm743_vm2, %v593_v23, 0.0  ;;  %v991_v7 = vadd.f32 %v990_v52, %v989_v6  ;;  %v794_v9 = vadd.f32 %v793_v50, %v792_v5  ;;  %v906_v55 = vmul.f32 %v596_v62, %v596_v62  ;;  %1361 = vst.msk [vmem:[%s2977_s5 + $0x6c] sm:$0xf] %vm1333_vm1, %v1545_v46 }
 0x119   :  { %v1812_v28 = vpop.f32.mrb[28].mxu0  ;;  %v992_v60 = vsel %vm743_vm2, %v904_v51, 0.0  ;;  %1359 = vst.msk [vmem:[%s2977_s5 + $0x64] sm:$0xf] %vm1333_vm1, %v1543_v31  ;;  %v994_v15 = vsel %vm743_vm2, %v905_v59, 0.0  ;;  %v797_v16 = vsel %vm743_vm2, %v596_v62, 0.0  ;;  %v620_v41 = vadd.f32 %v2263_v10, %v2367_v29 }
 0x11a   :  { %v609_v11 = vadd.f32 %v1812_v28, %v2263_v10  ;;  %v600_v53 = vpop.f32.mrb[29].mxu0  ;;  %v796_v17 = vadd.f32 %v795_v0, %v794_v9  ;;  %v993_v18 = vadd.f32 %v992_v60, %v991_v7  ;;  %v2517_v21 = vpop.f32.mrb[16].mxu1  ;;  %v996_v38 = vsel %vm743_vm2, %v906_v55, 0.0 }
 0x11b   :  { %v601_v4 = vadd.f32 %v2263_v10, %v600_v53  ;;  %v1813_v12 = vpop.f32.mrb[30].mxu0  ;;  %v2524_v27 = vpop.f32.mrb[17].mxu1  ;;  %v911_v57 = vmul.f32 %v2418_v61, %v2418_v61  ;;  %v1551_v46 = vpack.c.bf16 %v620_v41, %v620_v41  ;;  %v2559_v50 = vadd.f32 %v2387_v19, %v2263_v10 }
 0x11c   :  { %v603_v20 = vpop.f32.mrb[31].mxu0  ;;  %v1548_v22 = vpack.c.bf16 %v609_v11, %v609_v11  ;;  %v995_v33 = vadd.f32 %v994_v15, %v993_v18  ;;  %v798_v34 = vadd.f32 %v797_v16, %v796_v17  ;;  %v612_v35 = vadd.f32 %v1813_v12, %v2263_v10  ;;  %v2527_v36 = vpop.f32.mrb[18].mxu1 }
 0x11d   :  { %v799_v23 = vsel %vm743_vm2, %v601_v4, 0.0  ;;  %v907_v25 = vmul.f32 %v601_v4, %v601_v4  ;;  %v1546_v26 = vpack.c.bf16 %v601_v4, %v601_v4  ;;  %v604_v40 = vadd.f32 %v2263_v10, %v603_v20  ;;  %v2542_v44 = vpop.f32.mrb[19].mxu1  ;;  %1367 = vst.msk [vmem:[%s2977_s5 + $0x84] sm:$0xf] %vm1333_vm1, %v1551_v46 }
 0x11e   :  { %1364 = vst.msk [vmem:[%s2977_s5 + $0x78] sm:$0xf] %vm1333_vm1, %v1548_v22  ;;  %v909_v47 = vmul.f32 %v609_v11, %v609_v11  ;;  %v800_v48 = vadd.f32 %v799_v23, %v798_v34  ;;  %v997_v49 = vadd.f32 %v996_v38, %v995_v33  ;;  %v1549_v58 = vpack.c.bf16 %v612_v35, %v612_v35 }
 0x11f   :  { %v998_v39 = vsel %vm743_vm2, %v907_v25, 0.0  ;;  %1362 = vst.msk [vmem:[%s2977_s5 + $0x70] sm:$0xf] %vm1333_vm1, %v1546_v26  ;;  %v801_v62 = vsel %vm743_vm2, %v604_v40, 0.0  ;;  %v908_v1 = vmul.f32 %v604_v40, %v604_v40  ;;  %v1547_v52 = vpack.c.bf16 %v604_v40, %v604_v40 }
 0x120   :  { %v803_v3 = vsel %vm743_vm2, %v609_v11, 0.0  ;;  %v999_v59 = vadd.f32 %v998_v39, %v997_v49  ;;  %v910_v5 = vmul.f32 %v612_v35, %v612_v35  ;;  %v802_v6 = vadd.f32 %v801_v62, %v800_v48  ;;  %1365 = vst.msk [vmem:[%s2977_s5 + $0x7c] sm:$0xf] %vm1333_vm1, %v1549_v58 }
 0x121   :  { %v1000_v29 = vsel %vm743_vm2, %v908_v1, 0.0  ;;  %1363 = vst.msk [vmem:[%s2977_s5 + $0x74] sm:$0xf] %vm1333_vm1, %v1547_v52  ;;  %v633_v51 = vadd.f32 %v2263_v10, %v2390_v24  ;;  %v807_v0 = vsel %vm743_vm2, %v2418_v61, 0.0  ;;  %v2567_v7 = vadd.f32 %v2393_v32, %v2263_v10  ;;  %v2569_v9 = vpop.f32.mrb[20].mxu1 }
 0x122   :  { %v804_v31 = vadd.f32 %v803_v3, %v802_v6  ;;  %v1001_v28 = vadd.f32 %v1000_v29, %v999_v59  ;;  %v1002_v11 = vsel %vm743_vm2, %v909_v47, 0.0  ;;  %v805_v53 = vsel %vm743_vm2, %v612_v35, 0.0  ;;  %v2581_v61 = vpop.f32.mrb[21].mxu1 }
 0x123   :  { %v1556_v19 = vpack.c.bf16 %v2559_v50, %v2559_v50  ;;  %v636_v24 = vadd.f32 %v2263_v10, %v2408_v37  ;;  %v1554_v60 = vpack.c.bf16 %v633_v51, %v633_v51  ;;  %v2583_v4 = vpop.f32.mrb[22].mxu1  ;;  %v1004_v12 = vsel %vm743_vm2, %v910_v5, 0.0 }
 0x124   :  { %v1003_v32 = vadd.f32 %v1002_v11, %v1001_v28  ;;  %v806_v55 = vadd.f32 %v805_v53, %v804_v31  ;;  %v1006_v14 = vsel %vm743_vm2, %v911_v57, 0.0  ;;  %v912_v15 = vmul.f32 %v620_v41, %v620_v41  ;;  %v2593_v16 = vpop.f32.mrb[23].mxu1 }
 0x125   :  { %1372 = vst.msk [vmem:[%s2977_s5 + $0x98] sm:$0xf] %vm1333_vm1, %v1556_v19  ;;  %v1557_v37 = vpack.c.bf16 %v2567_v7, %v2567_v7  ;;  %v913_v17 = vmul.f32 %v2383_v13, %v2383_v13  ;;  %v914_v22 = vmul.f32 %v2496_v2, %v2496_v2  ;;  %1370 = vst.msk [vmem:[%s2977_s5 + $0x90] sm:$0xf] %vm1333_vm1, %v1554_v60  ;;  %v809_v23 = vsel %vm743_vm2, %v620_v41, 0.0 }
 0x126   :  { %v808_v18 = vadd.f32 %v807_v0, %v806_v55  ;;  %v1005_v20 = vadd.f32 %v1004_v12, %v1003_v32  ;;  %v915_v25 = vmul.f32 %v633_v51, %v633_v51  ;;  %v1555_v26 = vpack.c.bf16 %v636_v24, %v636_v24 }
 0x127   :  { %1373 = vst.msk [vmem:[%s2977_s5 + $0x9c] sm:$0xf] %vm1333_vm1, %v1557_v37  ;;  %v2610_v33 = vadd.f32 %v2433_v42, %v2263_v10  ;;  %v649_v38 = vadd.f32 %v2263_v10, %v2436_v45  ;;  %v2616_v39 = vadd.f32 %v2439_v8, %v2263_v10  ;;  %v811_v40 = vsel %vm743_vm2, %v2383_v13, 0.0 }
 0x128   :  { %v1007_v34 = vadd.f32 %v1006_v14, %v1005_v20  ;;  %v810_v35 = vadd.f32 %v809_v23, %v808_v18  ;;  %v1008_v41 = vsel %vm743_vm2, %v912_v15, 0.0  ;;  %1371 = vst.msk [vmem:[%s2977_s5 + $0x94] sm:$0xf] %vm1333_vm1, %v1555_v26  ;;  %v1010_v47 = vsel %vm743_vm2, %v913_v17, 0.0 }
 0x129   :  { %v1560_v42 = vpack.c.bf16 %v2610_v33, %v2610_v33  ;;  %v2628_v49 = vpop.f32.mrb[24].mxu1  ;;  %v813_v8 = vsel %vm743_vm2, %v2496_v2, 0.0  ;;  %v1012_v13 = vsel %vm743_vm2, %v914_v22, 0.0  ;;  %v815_v57 = vsel %vm743_vm2, %v633_v51, 0.0 }
 0x12a   :  { %v812_v45 = vadd.f32 %v811_v40, %v810_v35  ;;  %v1009_v48 = vadd.f32 %v1008_v41, %v1007_v34  ;;  %v1558_v58 = vpack.c.bf16 %v649_v38, %v649_v38  ;;  %v2638_v62 = vpop.f32.mrb[25].mxu1  ;;  %v1014_v3 = vsel %vm743_vm2, %v915_v25, 0.0 }
 0x12b   :  { %1376 = vst.msk [vmem:[%s2977_s5 + $0xa8] sm:$0xf] %vm1333_vm1, %v1560_v42  ;;  %v1561_v59 = vpack.c.bf16 %v2616_v39, %v2616_v39  ;;  %v2643_v2 = vpop.f32.mrb[26].mxu1  ;;  %v916_v5 = vmul.f32 %v636_v24, %v636_v24  ;;  %v652_v6 = vadd.f32 %v2263_v10, %v2454_v30  ;;  %v2653_v29 = vadd.f32 %v2475_v43, %v2263_v10 }
 0x12c   :  { %v1011_v1 = vadd.f32 %v1010_v47, %v1009_v48  ;;  %v814_v52 = vadd.f32 %v813_v8, %v812_v45  ;;  %1374 = vst.msk [vmem:[%s2977_s5 + $0xa0] sm:$0xf] %vm1333_vm1, %v1558_v58  ;;  %v665_v46 = vadd.f32 %v2263_v10, %v2478_v56  ;;  %v2657_v51 = vpop.f32.mrb[27].mxu1  ;;  %v917_v31 = vmul.f32 %v2559_v50, %v2559_v50 }
 0x12d   :  { %v918_v11 = vmul.f32 %v2567_v7, %v2567_v7  ;;  %1377 = vst.msk [vmem:[%s2977_s5 + $0xac] sm:$0xf] %vm1333_vm1, %v1561_v59  ;;  %v817_v30 = vsel %vm743_vm2, %v636_v24, 0.0  ;;  %v919_v43 = vmul.f32 %v649_v38, %v649_v38  ;;  %v1559_v53 = vpack.c.bf16 %v652_v6, %v652_v6 }
 0x12e   :  { %v816_v28 = vadd.f32 %v815_v57, %v814_v52  ;;  %v1013_v0 = vadd.f32 %v1012_v13, %v1011_v1  ;;  %v2670_v56 = vadd.f32 %v2481_v63, %v2263_v10  ;;  %v1564_v55 = vpack.c.bf16 %v2653_v29, %v2653_v29 }
 0x12f   :  { %v2676_v60 = vadd.f32 %v2263_v10, %v2498_v54  ;;  %v819_v12 = vsel %vm743_vm2, %v2559_v50, 0.0  ;;  %v1016_v24 = vsel %vm743_vm2, %v916_v5, 0.0  ;;  %1375 = vst.msk [vmem:[%s2977_s5 + $0xa4] sm:$0xf] %vm1333_vm1, %v1559_v53  ;;  %v1562_v63 = vpack.c.bf16 %v665_v46, %v665_v46 }
 0x130   :  { %v1015_v19 = vadd.f32 %v1014_v3, %v1013_v0  ;;  %v818_v32 = vadd.f32 %v817_v30, %v816_v28  ;;  %v1018_v14 = vsel %vm743_vm2, %v917_v31, 0.0  ;;  %1380 = vst.msk [vmem:[%s2977_s5 + $0xb8] sm:$0xf] %vm1333_vm1, %v1564_v55  ;;  %v821_v50 = vsel %vm743_vm2, %v2567_v7, 0.0 }
 0x131   :  { %v2690_v54 = vpop.f32.mrb[28].mxu1  ;;  %v1020_v17 = vsel %vm743_vm2, %v918_v11, 0.0  ;;  %v823_v18 = vsel %vm743_vm2, %v649_v38, 0.0  ;;  %1378 = vst.msk [vmem:[%s2977_s5 + $0xb0] sm:$0xf] %vm1333_vm1, %v1562_v63  ;;  %v1565_v20 = vpack.c.bf16 %v2670_v56, %v2670_v56  ;;  %v1022_v26 = vsel %vm743_vm2, %v919_v43, 0.0 }
 0x132   :  { %v820_v15 = vadd.f32 %v819_v12, %v818_v32  ;;  %v1017_v37 = vadd.f32 %v1016_v24, %v1015_v19  ;;  %v2702_v22 = vpop.f32.mrb[29].mxu1  ;;  %v1563_v7 = vpack.c.bf16 %v2676_v60, %v2676_v60  ;;  %v920_v35 = vmul.f32 %v652_v6, %v652_v6 }
 0x133   :  { %v2707_v34 = vpop.f32.mrb[30].mxu1  ;;  %1381 = vst.msk [vmem:[%s2977_s5 + $0xbc] sm:$0xf] %vm1333_vm1, %v1565_v20  ;;  %v2715_v38 = vadd.f32 %v2517_v21, %v2263_v10  ;;  %v681_v40 = vadd.f32 %v2263_v10, %v2524_v27  ;;  %v2721_v41 = vadd.f32 %v2527_v36, %v2263_v10  ;;  %v921_v47 = vmul.f32 %v2610_v33, %v2610_v33 }
 0x134   :  { %v1019_v23 = vadd.f32 %v1018_v14, %v1017_v37  ;;  %v822_v25 = vadd.f32 %v821_v50, %v820_v15  ;;  %v2723_v42 = vpop.f32.mrb[31].mxu1  ;;  %1379 = vst.msk [vmem:[%s2977_s5 + $0xb4] sm:$0xf] %vm1333_vm1, %v1563_v7  ;;  %v825_v21 = vsel %vm743_vm2, %v652_v6, 0.0  ;;  %v2736_v36 = vadd.f32 %v2263_v10, %v2542_v44 }
 0x135   :  { %v1568_v27 = vpack.c.bf16 %v2715_v38, %v2715_v38  ;;  %v827_v8 = vsel %vm743_vm2, %v2610_v33, 0.0  ;;  %v1566_v58 = vpack.c.bf16 %v681_v40, %v681_v40  ;;  %v922_v1 = vmul.f32 %v2616_v39, %v2616_v39 }
 0x136   :  { %v824_v45 = vadd.f32 %v823_v18, %v822_v25  ;;  %v1021_v48 = vadd.f32 %v1020_v17, %v1019_v23  ;;  %v1024_v52 = vsel %vm743_vm2, %v920_v35, 0.0  ;;  %v923_v3 = vmul.f32 %v665_v46, %v665_v46 }
 0x137   :  { %1384 = vst.msk [vmem:[%s2977_s5 + $0xc8] sm:$0xf] %vm1333_vm1, %v1568_v27  ;;  %v1569_v44 = vpack.c.bf16 %v2721_v41, %v2721_v41  ;;  %v1026_v59 = vsel %vm743_vm2, %v921_v47, 0.0  ;;  %v829_v33 = vsel %vm743_vm2, %v2616_v39, 0.0  ;;  %1382 = vst.msk [vmem:[%s2977_s5 + $0xc0] sm:$0xf] %vm1333_vm1, %v1566_v58  ;;  %v924_v28 = vmul.f32 %v2676_v60, %v2676_v60 }
 0x138   :  { %v1023_v13 = vadd.f32 %v1022_v26, %v1021_v48  ;;  %v826_v57 = vadd.f32 %v825_v21, %v824_v45  ;;  %v831_v31 = vsel %vm743_vm2, %v665_v46, 0.0  ;;  %v1567_v39 = vpack.c.bf16 %v2736_v36, %v2736_v36 }
 0x139   :  { %1385 = vst.msk [vmem:[%s2977_s5 + $0xcc] sm:$0xf] %vm1333_vm1, %v1569_v44  ;;  %v2767_v0 = vadd.f32 %v2569_v9, %v2263_v10  ;;  %v2771_v46 = vadd.f32 %v2263_v10, %v2581_v61  ;;  %v2775_v43 = vadd.f32 %v2583_v4, %v2263_v10  ;;  %v1028_v53 = vsel %vm743_vm2, %v922_v1, 0.0 }
 0x13a   :  { %v828_v5 = vadd.f32 %v827_v8, %v826_v57  ;;  %v1025_v6 = vadd.f32 %v1024_v52, %v1023_v13  ;;  %v1030_v19 = vsel %vm743_vm2, %v923_v3, 0.0  ;;  %1383 = vst.msk [vmem:[%s2977_s5 + $0xc4] sm:$0xf] %vm1333_vm1, %v1567_v39  ;;  %v925_v61 = vmul.f32 %v2653_v29, %v2653_v29 }
 0x13b   :  { %v1572_v9 = vpack.c.bf16 %v2767_v0, %v2767_v0  ;;  %v835_v4 = vsel %vm743_vm2, %v2653_v29, 0.0  ;;  %v926_v12 = vmul.f32 %v2670_v56, %v2670_v56  ;;  %v833_v24 = vsel %vm743_vm2, %v2676_v60, 0.0 }
 0x13c   :  { %v1027_v11 = vadd.f32 %v1026_v59, %v1025_v6  ;;  %v830_v30 = vadd.f32 %v829_v33, %v828_v5  ;;  %v1570_v63 = vpack.c.bf16 %v2771_v46, %v2771_v46  ;;  %v1032_v37 = vsel %vm743_vm2, %v924_v28, 0.0 }
 0x13d   :  { %1388 = vst.msk [vmem:[%s2977_s5 + $0xd8] sm:$0xf] %vm1333_vm1, %v1572_v9  ;;  %v1573_v29 = vpack.c.bf16 %v2775_v43, %v2775_v43  ;;  %v927_v50 = vmul.f32 %v681_v40, %v681_v40  ;;  %v700_v60 = vadd.f32 %v2263_v10, %v2593_v16  ;;  %v2810_v17 = vadd.f32 %v2628_v49, %v2263_v10 }
 0x13e   :  { %v832_v32 = vadd.f32 %v831_v31, %v830_v30  ;;  %v1029_v55 = vadd.f32 %v1028_v53, %v1027_v11  ;;  %1386 = vst.msk [vmem:[%s2977_s5 + $0xd0] sm:$0xf] %vm1333_vm1, %v1570_v63  ;;  %v2814_v18 = vadd.f32 %v2263_v10, %v2638_v62  ;;  %v1034_v20 = vsel %vm743_vm2, %v925_v61, 0.0 }
 0x13f   :  { %v837_v23 = vsel %vm743_vm2, %v2670_v56, 0.0  ;;  %1389 = vst.msk [vmem:[%s2977_s5 + $0xdc] sm:$0xf] %vm1333_vm1, %v1573_v29  ;;  %v839_v16 = vsel %vm743_vm2, %v681_v40, 0.0  ;;  %v928_v49 = vmul.f32 %v2736_v36, %v2736_v36  ;;  %v1571_v7 = vpack.c.bf16 %v700_v60, %v700_v60 }
 0x140   :  { %v1031_v14 = vadd.f32 %v1030_v19, %v1029_v55  ;;  %v834_v15 = vadd.f32 %v833_v24, %v832_v32  ;;  %v2828_v62 = vadd.f32 %v2643_v2, %v2263_v10  ;;  %v1576_v56 = vpack.c.bf16 %v2810_v17, %v2810_v17 }
 0x141   :  { %v2834_v45 = vadd.f32 %v2263_v10, %v2657_v51  ;;  %v1036_v48 = vsel %vm743_vm2, %v926_v12, 0.0  ;;  %v1038_v40 = vsel %vm743_vm2, %v927_v50, 0.0  ;;  %1387 = vst.msk [vmem:[%s2977_s5 + $0xd4] sm:$0xf] %vm1333_vm1, %v1571_v7  ;;  %v1574_v2 = vpack.c.bf16 %v2814_v18, %v2814_v18 }
 0x142   :  { %v836_v25 = vadd.f32 %v835_v4, %v834_v15  ;;  %v1033_v26 = vadd.f32 %v1032_v37, %v1031_v14  ;;  %v929_v21 = vmul.f32 %v2715_v38, %v2715_v38  ;;  %1392 = vst.msk [vmem:[%s2977_s5 + $0xe8] sm:$0xf] %vm1333_vm1, %v1576_v56  ;;  %v843_v51 = vsel %vm743_vm2, %v2715_v38, 0.0 }
 0x143   :  { %v930_v13 = vmul.f32 %v2721_v41, %v2721_v41  ;;  %v841_v57 = vsel %vm743_vm2, %v2736_v36, 0.0  ;;  %1390 = vst.msk [vmem:[%s2977_s5 + $0xe0] sm:$0xf] %vm1333_vm1, %v1574_v2  ;;  %v1577_v58 = vpack.c.bf16 %v2828_v62, %v2828_v62  ;;  %v1040_v3 = vsel %vm743_vm2, %v928_v49, 0.0 }
 0x144   :  { %v1035_v35 = vadd.f32 %v1034_v20, %v1033_v26  ;;  %v838_v47 = vadd.f32 %v837_v23, %v836_v25  ;;  %v1575_v38 = vpack.c.bf16 %v2834_v45, %v2834_v45  ;;  %v931_v44 = vmul.f32 %v2771_v46, %v2771_v46 }
 0x145   :  { %1393 = vst.msk [vmem:[%s2977_s5 + $0xec] sm:$0xf] %vm1333_vm1, %v1577_v58  ;;  %v2873_v36 = vadd.f32 %v2690_v54, %v2263_v10  ;;  %v729_v59 = vadd.f32 %v2263_v10, %v2702_v22  ;;  %v2879_v33 = vadd.f32 %v2707_v34, %v2263_v10  ;;  %v1042_v5 = vsel %vm743_vm2, %v929_v21, 0.0 }
 0x146   :  { %v840_v27 = vadd.f32 %v839_v16, %v838_v47  ;;  %v1037_v8 = vadd.f32 %v1036_v48, %v1035_v35  ;;  %1391 = vst.msk [vmem:[%s2977_s5 + $0xe4] sm:$0xf] %vm1333_vm1, %v1575_v38  ;;  %v845_v54 = vsel %vm743_vm2, %v2721_v41, 0.0  ;;  %v847_v28 = vsel %vm743_vm2, %v2771_v46, 0.0 }
 0x147   :  { %v1580_v22 = vpack.c.bf16 %v2873_v36, %v2873_v36  ;;  %v732_v34 = vadd.f32 %v2263_v10, %v2723_v42  ;;  %v1578_v30 = vpack.c.bf16 %v729_v59, %v729_v59  ;;  %v1044_v53 = vsel %vm743_vm2, %v930_v13, 0.0 }
 0x148   :  { %v1039_v1 = vadd.f32 %v1038_v40, %v1037_v8  ;;  %v842_v52 = vadd.f32 %v841_v57, %v840_v27  ;;  %v1046_v19 = vsel %vm743_vm2, %v931_v44, 0.0  ;;  %v932_v9 = vmul.f32 %v700_v60, %v700_v60 }
 0x149   :  { %1396 = vst.msk [vmem:[%s2977_s5 + $0xf8] sm:$0xf] %vm1333_vm1, %v1580_v22  ;;  %v1581_v41 = vpack.c.bf16 %v2879_v33, %v2879_v33  ;;  %1394 = vst.msk [vmem:[%s2977_s5 + $0xf0] sm:$0xf] %vm1333_vm1, %v1578_v30  ;;  %v933_v10 = vmul.f32 %v2767_v0, %v2767_v0  ;;  %v849_v42 = vsel %vm743_vm2, %v700_v60, 0.0  ;;  %v1579_v32 = vpack.c.bf16 %v732_v34, %v732_v34 }
 0x14a   :  { %v844_v6 = vadd.f32 %v843_v51, %v842_v52  ;;  %v1041_v31 = vadd.f32 %v1040_v3, %v1039_v1  ;;  %v851_v12 = vsel %vm743_vm2, %v2767_v0, 0.0  ;;  %v934_v24 = vmul.f32 %v2775_v43, %v2775_v43 }
 0x14b   :  { %1397 = vst.msk [vmem:[%s2977_s5 + $0xfc] sm:$0xf] %vm1333_vm1, %v1581_v41  ;;  %v1048_v63 = vsel %vm743_vm2, %v932_v9, 0.0  ;;  %v935_v14 = vmul.f32 %v2814_v18, %v2814_v18  ;;  %1395 = vst.msk [vmem:[%s2977_s5 + $0xf4] sm:$0xf] %vm1333_vm1, %v1579_v32  ;;  %v1050_v29 = vsel %vm743_vm2, %v933_v10, 0.0  ;;  %v936_v26 = vmul.f32 %v2834_v45, %v2834_v45 }
 0x14c   :  { %v1043_v39 = vadd.f32 %v1042_v5, %v1041_v31  ;;  %v846_v11 = vadd.f32 %v845_v54, %v844_v6  ;;  %v853_v0 = vsel %vm743_vm2, %v2775_v43, 0.0  ;;  %v855_v50 = vsel %vm743_vm2, %v2814_v18, 0.0  ;;  %s1880_s5 = smov [#allocation2]  }
 0x14d   :  { %v1052_v23 = vsel %vm743_vm2, %v934_v24, 0.0  ;;  %v1054_v25 = vsel %vm743_vm2, %v935_v14, 0.0  ;;  %v937_v7 = vmul.f32 %v2810_v17, %v2810_v17  ;;  %v857_v43 = vsel %vm743_vm2, %v2834_v45, 0.0  ;;  %s1406_s26 = sshll.u32 %s1880_s5, 4  ;;  %s1407_s26 = int_to_ptr.vmem [resolvable:$true] %s1406_s26 }
 0x14e   :  { %v848_v46 = vadd.f32 %v847_v28, %v846_v11  ;;  %v1045_v61 = vadd.f32 %v1044_v53, %v1043_v39  ;;  %v859_v18 = vsel %vm743_vm2, %v2810_v17, 0.0  ;;  %v938_v56 = vmul.f32 %v2828_v62, %v2828_v62  ;;  %s1856_s27 = scalar_lea.vmem %s1407_s26, 32  ;;  %p1861_p1 = scmp.lt.s32.totalorder %s1407_s26, %s1407_s26 }
 0x14f   :  { %v1056_v48 = vsel %vm743_vm2, %v936_v26, 0.0  ;;  %v939_v40 = vmul.f32 %v729_v59, %v729_v59  ;;  %v1058_v27 = vsel %vm743_vm2, %v937_v7, 0.0  ;;  %v861_v8 = vsel %vm743_vm2, %v2828_v62, 0.0  ;;  %p1857_p0 = scmp.ne.s32.totalorder %s1407_s26, %s1856_s27  ;;  %p1862_p2 = scmp.lt.s32.totalorder %s1856_s27, %s1856_s27 }
 0x150   :  { %v1047_v55 = vadd.f32 %v1046_v19, %v1045_v61  ;;  %v850_v4 = vadd.f32 %v849_v42, %v848_v46  ;;  %v863_v45 = vsel %vm743_vm2, %v729_v59, 0.0  ;;  %v1060_v57 = vsel %vm743_vm2, %v938_v56, 0.0 }
 0x151   :  { %v1062_v17 = vsel %vm743_vm2, %v939_v40, 0.0  ;;  %v940_v58 = vmul.f32 %v732_v34, %v732_v34  ;;  %v941_v3 = vmul.f32 %v2873_v36, %v2873_v36  ;;  %v865_v38 = vsel %vm743_vm2, %v732_v34, 0.0  ;;  %p1863_p3 = por %p1862_p2, %p1861_p1 }
 0x152   :  { %v852_v15 = vadd.f32 %v851_v12, %v850_v4  ;;  %v1049_v37 = vadd.f32 %v1048_v63, %v1047_v55  ;;  %v867_v62 = vsel %vm743_vm2, %v2873_v36, 0.0  ;;  %v942_v59 = vmul.f32 %v2879_v33, %v2879_v33 }
 0x153   :  { %v1064_v6 = vsel %vm743_vm2, %v940_v58, 0.0  ;;  %v1066_v28 = vsel %vm743_vm2, %v941_v3, 0.0  ;;  %v869_v22 = vsel %vm743_vm2, %v2879_v33, 0.0  ;;  %p1864_p4 = pnand %p1863_p3, %p1857_p0 }
 0x154   :  { %v1051_v60 = vadd.f32 %v1050_v29, %v1049_v37  ;;  %v854_v20 = vadd.f32 %v853_v0, %v852_v15  ;;  %v1068_v34 = vsel %vm743_vm2, %v942_v59, 0.0 }
 0x156   :  { %v856_v16 = vadd.f32 %v855_v50, %v854_v20  ;;  %v1053_v49 = vadd.f32 %v1052_v23, %v1051_v60 }
 0x158   :  { %v1055_v35 = vadd.f32 %v1054_v25, %v1053_v49  ;;  %v858_v47 = vadd.f32 %v857_v43, %v856_v16 }
 0x15a   :  { %v860_v2 = vadd.f32 %v859_v18, %v858_v47  ;;  %v1057_v21 = vadd.f32 %v1056_v48, %v1055_v35 }
 0x15c   :  { %v1059_v51 = vadd.f32 %v1058_v27, %v1057_v21  ;;  %v862_v13 = vadd.f32 %v861_v8, %v860_v2 }
 0x15e   :  { %v864_v1 = vadd.f32 %v863_v45, %v862_v13  ;;  %v1061_v52 = vadd.f32 %v1060_v57, %v1059_v51 }
 0x160   :  { %v1063_v44 = vadd.f32 %v1062_v17, %v1061_v52  ;;  %v866_v5 = vadd.f32 %v865_v38, %v864_v1 }
 0x162   :  { %v868_v31 = vadd.f32 %v867_v62, %v866_v5  ;;  %v1065_v54 = vadd.f32 %v1064_v6, %v1063_v44 }
 0x164   :  { %v870_v39 = vadd.f32 %v869_v22, %v868_v31  ;;  %v1067_v11 = vadd.f32 %v1066_v28, %v1065_v54 }
 0x166   :  { %v871_v30 = vrot.slane %v870_v39, 4  ;;  %v1069_v53 = vadd.f32 %v1068_v34, %v1067_v11 }
 0x168   :  { %v872_v19 = vadd.f32 %v871_v30, %v870_v39  ;;  %v1070_v36 = vrot.slane %v1069_v53, 4 }
 0x16a   :  { %v873_v9 = vrot.slane %v872_v19, 2  ;;  %v1071_v41 = vadd.f32 %v1070_v36, %v1069_v53 }
 0x16c   :  { %v874_v46 = vadd.f32 %v873_v9, %v872_v19  ;;  %v1072_v61 = vrot.slane %v1071_v41, 2 }
 0x16e   :  { %v875_v10 = vrot.slane %v874_v46, 1  ;;  %v1073_v42 = vadd.f32 %v1072_v61, %v1071_v41 }
 0x170   :  { %v876_v32 = vadd.f32 %v875_v10, %v874_v46  ;;  %v1074_v55 = vrot.slane %v1073_v42, 1 }
 0x172   :  { %878 = vst.msk [vmem:[#allocation2] sm:$0x1] %vm877_vm3, %v876_v32  ;;  %v1075_v33 = vadd.f32 %v1074_v55, %v1073_v42 }
 0x174   :  { %1076 = vst.msk [vmem:[#allocation2 + $0x1] sm:$0x1] %vm877_vm3, %v1075_v33 }
 0x175   :  { %1867 = shalt.err (!%p1864_p4)
}
 0x176   :  { %s1868_s30 = scalar_lea.hbm %s2978_s6, 32 }
 0x177   :  { %p1869_p5 = scmp.ne.s32.totalorder %s2978_s6, %s1868_s30  ;;  %p1872_p6 = scmp.lt.u32.totalorder %s1868_s30, %s2978_s6 }
 0x179   :  { %p1874_p7 = pnand %p1872_p6, %p1869_p5 }
 0x17b   :  { %1877 = shalt.err (!%p1874_p7)
}
 0x17c   :  { %1409 = dma.vmem_to_hbm [thread:$0]  %s1407_s26, 32, %s2978_s6, [#allocation3]  }
 0x17d   :  { %1878 = dma.done.wait [#allocation3], 32  }
 0x17e   :  { %1879 = vsyncadd [#allocation3], 4294967264 }
 0x17f   :  { %1415 = vsyncpa [#allocation3], 1 }

// kernel: unet_forward.12
= control target key start
LH: loop header
LB: loop body
LE: loop exit
PB: predicated region body
PF: predicated region fallthrough
CT: control target
= control target key end

     0   :  { %s951_s1 = inlined_call_operand.vmem [shape: bf16[128,16], index: 1, kind: input, shape index: {}]   ;;  %s952_s0 = inlined_call_operand.vmem [shape: bf16[128,128], index: 0, kind: input, shape index: {}]   ;;  %s953_s2 = inlined_call_operand.vmem [shape: f32[1,128], index: 2, kind: input, shape index: {}]   ;;  %s954_s3 = inlined_call_operand.vmem [shape: f32[1,128], index: 3, kind: input, shape index: {}]   ;;  %s955_s4 = inlined_call_operand.vmem [shape: f32[1,16], index: 4, kind: input, shape index: {}]   ;;  %s956_s5 = inlined_call_operand.vmem [shape: bf16[128,16], index: 5, kind: output, shape index: {0}]   ;;  %s957_s6 = inlined_call_operand.vmem [shape: f32[2,16], index: 6, kind: output, shape index: {1}]  }
   0x1   :  { %v654_v0 = vld [vmem:[%s951_s1] sm:$0xff]   ;;  %v655_v1 = vld [vmem:[%s951_s1 + $0x8] sm:$0xff]   ;;  %v656_v2 = vld [vmem:[%s951_s1 + $0x10] sm:$0xff]  }
   0x2   :  { %606 = vmatprep.subr.bf16.mxu0 %v654_v0  ;;  %638 = vmatprep.subr.bf16.mxu1 %v654_v0  ;;  %v657_v3 = vld [vmem:[%s951_s1 + $0x18] sm:$0xff]   ;;  %v552_v4 = vld [vmem:[%s952_s0] sm:$0xff]   ;;  %v583_v8 = vld [vmem:[%s952_s0 + $0x8] sm:$0xff]  }
   0x3   :  { %607 = vmatpush3.bf16.msra.mxu0 %v654_v0  ;;  %646 = vmatpush3.bf16.msra.mxu1 %v654_v0  ;;  %v715_v5 = vld [vmem:[%s953_s2] ss:$0 sm:$0xff]  ;;  %v553_v6 = vunpack.c.l.bf16 %v552_v4  ;;  %v554_v7 = vunpack.c.h.bf16 %v552_v4  ;;  %v584_v9 = vld [vmem:[%s952_s0 + $0x10] sm:$0xff]   ;;  %v585_v10 = vld [vmem:[%s952_s0 + $0x18] sm:$0xff]   ;;  %v557_v12 = vunpack.c.l.bf16 %v583_v8  ;;  %v558_v13 = vunpack.c.h.bf16 %v583_v8 }
   0x4   :  { %608 = vmatprep.subr.bf16.mxu0 %v655_v1  ;;  %639 = vmatprep.subr.bf16.mxu1 %v655_v1  ;;  %v729_v11 = vld [vmem:[%s954_s3] ss:$0 sm:$0xff]  ;;  %v561_v14 = vunpack.c.l.bf16 %v584_v9  ;;  %v562_v15 = vunpack.c.h.bf16 %v584_v9  ;;  %v565_v19 = vunpack.c.l.bf16 %v585_v10  ;;  %v566_v24 = vunpack.c.h.bf16 %v585_v10  ;;  %v659_v29 = vld [vmem:[%s951_s1 + $0x28] sm:$0xff]   ;;  %v660_v49 = vld [vmem:[%s951_s1 + $0x30] sm:$0xff]  }
   0x5   :  { %v586_v16 = vld [vmem:[%s952_s0 + $0x20] sm:$0xff]   ;;  %v62_v17 = vmul.f32 %v553_v6, %v715_v5  ;;  %v63_v18 = vmul.f32 %v554_v7, %v715_v5  ;;  %v64_v21 = vmul.f32 %v557_v12, %v715_v5  ;;  %v65_v22 = vmul.f32 %v558_v13, %v715_v5  ;;  %v587_v45 = vld [vmem:[%s952_s0 + $0x28] sm:$0xff]   ;;  %v588_v56 = vld [vmem:[%s952_s0 + $0x30] sm:$0xff]  }
   0x6   :  { %v658_v20 = vld [vmem:[%s951_s1 + $0x20] sm:$0xff]   ;;  %v66_v23 = vmul.f32 %v561_v14, %v715_v5  ;;  %v67_v27 = vmul.f32 %v562_v15, %v715_v5  ;;  %v569_v28 = vunpack.c.l.bf16 %v586_v16  ;;  %v68_v33 = vmul.f32 %v565_v19, %v715_v5  ;;  %v661_v63 = vld [vmem:[%s951_s1 + $0x38] sm:$0xff]  }
   0x7   :  { %609 = vmatpush3.bf16.msra.mxu0 %v655_v1  ;;  %647 = vmatpush3.bf16.msra.mxu1 %v655_v1  ;;  %v85_v25 = vadd.f32 %v729_v11, %v62_v17  ;;  %v86_v26 = vadd.f32 %v729_v11, %v63_v18  ;;  %v87_v30 = vadd.f32 %v729_v11, %v64_v21  ;;  %v570_v50 = vunpack.c.h.bf16 %v586_v16  ;;  %v589_v4 = vld [vmem:[%s952_s0 + $0x38] sm:$0xff]  }
   0x8   :  { %610 = vmatprep.subr.bf16.mxu0 %v656_v2  ;;  %640 = vmatprep.subr.bf16.mxu1 %v656_v2  ;;  %v88_v31 = vadd.f32 %v729_v11, %v65_v22  ;;  %v89_v32 = vadd.f32 %v729_v11, %v66_v23  ;;  %v90_v40 = vadd.f32 %v729_v11, %v67_v27  ;;  %v573_v55 = vunpack.c.l.bf16 %v587_v45 }
   0x9   :  { %vm101_vm0 = vcmp.ge.f32.partialorder %v85_v25, 0.0  ;;  %vm102_vm1 = vcmp.ge.f32.partialorder %v86_v26, 0.0  ;;  %v117_v34 = vmul.f32 0.2, %v85_v25  ;;  %v118_v35 = vmul.f32 0.2, %v86_v26 }
   0xa   :  { %vm103_vm2 = vcmp.ge.f32.partialorder %v87_v30, 0.0  ;;  %vm104_vm3 = vcmp.ge.f32.partialorder %v88_v31, 0.0  ;;  %v119_v36 = vmul.f32 0.2, %v87_v30  ;;  %v120_v37 = vmul.f32 0.2, %v88_v31 }
   0xb   :  { %611 = vmatpush3.bf16.msra.mxu0 %v656_v2  ;;  %648 = vmatpush3.bf16.msra.mxu1 %v656_v2  ;;  %v133_v38 = vsel %vm101_vm0, %v85_v25, %v117_v34  ;;  %v134_v39 = vsel %vm102_vm1, %v86_v26, %v118_v35  ;;  %v69_v41 = vmul.f32 %v566_v24, %v715_v5  ;;  %vm105_vm4 = vcmp.ge.f32.partialorder %v89_v32, 0.0 }
   0xc   :  { %612 = vmatprep.subr.bf16.mxu0 %v657_v3  ;;  %641 = vmatprep.subr.bf16.mxu1 %v657_v3  ;;  %v149_v42 = vpack.c.bf16 %v134_v39, %v133_v38  ;;  %v754_v43 = vsel %vm103_vm2, %v87_v30, %v119_v36  ;;  %v121_v44 = vmul.f32 0.2, %v89_v32  ;;  %v759_v46 = vsel %vm104_vm3, %v88_v31, %v120_v37 }
   0xd   :  { %vm106_vm5 = vcmp.ge.f32.partialorder %v90_v40, 0.0  ;;  %v122_v47 = vmul.f32 0.2, %v90_v40  ;;  %v762_v48 = vadd.f32 %v729_v11, %v68_v33  ;;  %v70_v51 = vmul.f32 %v569_v28, %v715_v5 }
   0xe   :  { %622 = vmatprep.mubr.bf16.mxu0 %v149_v42  ;;  %v768_v52 = vsel %vm105_vm4, %v89_v32, %v121_v44  ;;  %v773_v54 = vadd.f32 %v729_v11, %v69_v41  ;;  %v150_v57 = vpack.c.bf16 %v759_v46, %v754_v43  ;;  %v71_v58 = vmul.f32 %v570_v50, %v715_v5 }
   0xf   :  { %613 = vmatpush3.bf16.msra.mxu0 %v657_v3  ;;  %649 = vmatpush3.bf16.msra.mxu1 %v657_v3  ;;  %v770_v53 = vsel %vm106_vm5, %v90_v40, %v122_v47  ;;  %v123_v59 = vmul.f32 0.2, %v762_v48  ;;  %v93_v60 = vadd.f32 %v729_v11, %v70_v51  ;;  %v574_v61 = vunpack.c.h.bf16 %v587_v45 }
  0x10   :  { %614 = vmatprep.subr.bf16.mxu0 %v658_v20  ;;  %642 = vmatprep.subr.bf16.mxu1 %v658_v20  ;;  %v72_v62 = vmul.f32 %v573_v55, %v715_v5  ;;  %v151_v0 = vpack.c.bf16 %v770_v53, %v768_v52  ;;  %vm107_vm6 = vcmp.ge.f32.partialorder %v762_v48, 0.0  ;;  %v94_v1 = vadd.f32 %v729_v11, %v71_v58 }
  0x11   :  { %v577_v2 = vunpack.c.l.bf16 %v588_v56  ;;  %v578_v3 = vunpack.c.h.bf16 %v588_v56  ;;  %v124_v6 = vmul.f32 0.2, %v773_v54  ;;  %vm109_vm7 = vcmp.ge.f32.partialorder %v93_v60, 0.0 }
  0x12   :  { %v125_v7 = vmul.f32 0.2, %v93_v60  ;;  %v73_v8 = vmul.f32 %v574_v61, %v715_v5  ;;  %vm110_vm8 = vcmp.ge.f32.partialorder %v94_v1, 0.0  ;;  %v126_v9 = vmul.f32 0.2, %v94_v1 }
  0x13   :  { %615 = vmatpush3.bf16.msra.mxu0 %v658_v20  ;;  %650 = vmatpush3.bf16.msra.mxu1 %v658_v20  ;;  %v95_v10 = vadd.f32 %v729_v11, %v72_v62  ;;  %v74_v12 = vmul.f32 %v577_v2, %v715_v5  ;;  %v75_v15 = vmul.f32 %v578_v3, %v715_v5  ;;  %v581_v16 = vunpack.c.l.bf16 %v589_v4 }
  0x14   :  { %616 = vmatprep.subr.bf16.mxu0 %v659_v29  ;;  %643 = vmatprep.subr.bf16.mxu1 %v659_v29  ;;  %v141_v13 = vsel %vm109_vm7, %v93_v60, %v125_v7  ;;  %v96_v14 = vadd.f32 %v729_v11, %v73_v8  ;;  %v142_v17 = vsel %vm110_vm8, %v94_v1, %v126_v9  ;;  %v582_v25 = vunpack.c.h.bf16 %v589_v4 }
  0x15   :  { %vm111_vm9 = vcmp.ge.f32.partialorder %v95_v10, 0.0  ;;  %v127_v18 = vmul.f32 0.2, %v95_v10  ;;  %v97_v19 = vadd.f32 %v729_v11, %v74_v12  ;;  %v153_v20 = vpack.c.bf16 %v142_v17, %v141_v13 }
  0x16   :  { %vm112_vm10 = vcmp.ge.f32.partialorder %v96_v14, 0.0  ;;  %v128_v21 = vmul.f32 0.2, %v96_v14  ;;  %v98_v22 = vadd.f32 %v729_v11, %v75_v15  ;;  %v76_v28 = vmul.f32 %v581_v16, %v715_v5 }
  0x17   :  { %617 = vmatpush3.bf16.msra.mxu0 %v659_v29  ;;  %651 = vmatpush3.bf16.msra.mxu1 %v659_v29  ;;  %v143_v23 = vsel %vm111_vm9, %v95_v10, %v127_v18  ;;  %vm113_vm11 = vcmp.ge.f32.partialorder %v97_v19, 0.0  ;;  %v129_v24 = vmul.f32 0.2, %v97_v19  ;;  %vm108_vm13 = vcmp.ge.f32.partialorder %v773_v54, 0.0 }
  0x18   :  { %618 = vmatprep.subr.bf16.mxu0 %v660_v49  ;;  %644 = vmatprep.subr.bf16.mxu1 %v660_v49  ;;  %v144_v26 = vsel %vm112_vm10, %v96_v14, %v128_v21  ;;  %vm114_vm12 = vcmp.ge.f32.partialorder %v98_v22, 0.0  ;;  %v130_v27 = vmul.f32 0.2, %v98_v22  ;;  %v77_v31 = vmul.f32 %v582_v25, %v715_v5 }
  0x19   :  { %630 = vmatprep.mubr.bf16.mxu1 %v153_v20  ;;  %v154_v29 = vpack.c.bf16 %v144_v26, %v143_v23  ;;  %v145_v30 = vsel %vm113_vm11, %v97_v19, %v129_v24  ;;  %v99_v33 = vadd.f32 %v729_v11, %v76_v28  ;;  %v139_v36 = vsel %vm107_vm6, %v762_v48, %v123_v59 }
  0x1a   :  { %v146_v32 = vsel %vm114_vm12, %v98_v22, %v130_v27  ;;  %v100_v35 = vadd.f32 %v729_v11, %v77_v31  ;;  %v140_v37 = vsel %vm108_vm13, %v773_v54, %v124_v6  ;;  %v814_v11 = vld [vmem:[%s955_s4] ss:$0 sm:$0xff]  ;;  %vm483_vm0 = vcmask 125952  }
  0x1b   :  { %619 = vmatpush3.bf16.msra.mxu0 %v660_v49  ;;  %652 = vmatpush3.bf16.msra.mxu1 %v660_v49  ;;  %v155_v34 = vpack.c.bf16 %v146_v32, %v145_v30  ;;  %vm115_vm14 = vcmp.ge.f32.partialorder %v99_v33, 0.0  ;;  %v131_v38 = vmul.f32 0.2, %v99_v33  ;;  %v152_v40 = vpack.c.bf16 %v140_v37, %v139_v36 }
  0x1c   :  { %620 = vmatprep.subr.bf16.mxu0 %v661_v63  ;;  %645 = vmatprep.subr.bf16.mxu1 %v661_v63  ;;  %vm116_vm15 = vcmp.ge.f32.partialorder %v100_v35, 0.0  ;;  %v132_v5 = vmul.f32 0.2, %v100_v35  ;;  %vm325_vm1 = vcmask 130048   ;;  %vm363_vm2 = vcmask 122880  }
  0x1d   :  { %v147_v39 = vsel %vm115_vm14, %v99_v33, %v131_v38 }
  0x1e   :  { %v148_v41 = vsel %vm116_vm15, %v100_v35, %v132_v5 }
  0x1f   :  { %621 = vmatpush3.bf16.msra.mxu0 %v661_v63  ;;  %653 = vmatpush3.bf16.msra.mxu1 %v661_v63  ;;  %v156_v42 = vpack.c.bf16 %v148_v41, %v147_v39 }
  0x22   :  { %623 = vmatmul.mubr.bf16.vlgmr.msra.gmra.mrb[0].mxu0 %v150_v57  ;;  %631 = vmatmul.mubr.bf16.vlgmr.msra.gmra.mrb[0].mxu1 %v154_v29 }
  0x23   :  { %626 = vmatprep.mubr.bf16.mxu0 %v151_v0  ;;  %634 = vmatprep.mubr.bf16.mxu1 %v155_v34 }
  0x2a   :  { %627 = vmatmul.mubr.bf16.gmra.mrb[4].mxu0 %v152_v40  ;;  %635 = vmatmul.mubr.bf16.gmra.mrb[4].mxu1 %v156_v42 }
  0xf5   :  { %v624_v43 = vpop.f32.mrb[0].mxu0  ;;  %v632_v44 = vpop.f32.mrb[0].mxu1 }
  0xf6   :  { %v271_v45 = vadd.f32 %v624_v43, %v814_v11  ;;  %v262_v46 = vpop.f32.mrb[1].mxu0  ;;  %v294_v47 = vpop.f32.mrb[1].mxu1  ;;  %v823_v58 = vadd.f32 %v632_v44, %v814_v11 }
  0xf7   :  { %v263_v48 = vadd.f32 %v814_v11, %v262_v46  ;;  %v625_v49 = vpop.f32.mrb[2].mxu0  ;;  %v633_v50 = vpop.f32.mrb[2].mxu1  ;;  %v830_v61 = vadd.f32 %v814_v11, %v294_v47 }
  0xf8   :  { %v537_v51 = vpack.c.bf16 %v271_v45, %v271_v45  ;;  %v274_v52 = vadd.f32 %v625_v49, %v814_v11  ;;  %v265_v53 = vpop.f32.mrb[3].mxu0  ;;  %v819_v54 = vpop.f32.mrb[3].mxu1  ;;  %v367_v59 = vmul.f32 %v271_v45, %v271_v45  ;;  %v329_v4 = vsel %vm325_vm1, %v271_v45, 0.0 }
  0xf9   :  { %v365_v55 = vmul.f32 %v263_v48, %v263_v48  ;;  %v535_v56 = vpack.c.bf16 %v263_v48, %v263_v48  ;;  %v266_v57 = vadd.f32 %v814_v11, %v265_v53  ;;  %v326_v62 = vsel %vm325_vm1, %v263_v48, 0.0 }
  0xfa   :  { %486 = vst.msk [vmem:[%s956_s5 + $0x8] sm:$0xf] %vm483_vm0, %v537_v51  ;;  %v538_v60 = vpack.c.bf16 %v274_v52, %v274_v52  ;;  %v368_v2 = vmul.f32 %v274_v52, %v274_v52  ;;  %v545_v9 = vpack.c.bf16 %v823_v58, %v823_v58  ;;  %v384_v17 = vsel %vm325_vm1, %v367_v59, 0.0 }
  0xfb   :  { %484 = vst.msk [vmem:[%s956_s5] sm:$0xf] %vm483_vm0, %v535_v56  ;;  %v327_v63 = vsel %vm325_vm1, %v266_v57, 0.0  ;;  %v366_v0 = vmul.f32 %v266_v57, %v266_v57  ;;  %v536_v1 = vpack.c.bf16 %v266_v57, %v266_v57  ;;  %v381_v6 = vsel %vm325_vm1, %v365_v55, 0.0 }
  0xfc   :  { %487 = vst.msk [vmem:[%s956_s5 + $0xc] sm:$0xf] %vm483_vm0, %v538_v60  ;;  %v328_v3 = vadd.f32 %v327_v63, %v326_v62  ;;  %494 = vst.msk [vmem:[%s956_s5 + $0x28] sm:$0xf] %vm483_vm0, %v545_v9  ;;  %v543_v20 = vpack.c.bf16 %v830_v61, %v830_v61  ;;  %v331_v22 = vsel %vm325_vm1, %v274_v52, 0.0  ;;  %v386_v23 = vsel %vm325_vm1, %v368_v2, 0.0 }
  0xfd   :  { %v382_v7 = vsel %vm325_vm1, %v366_v0, 0.0  ;;  %485 = vst.msk [vmem:[%s956_s5 + $0x4] sm:$0xf] %vm483_vm0, %v536_v1  ;;  %v628_v8 = vpop.f32.mrb[4].mxu0  ;;  %v636_v10 = vpop.f32.mrb[4].mxu1  ;;  %v306_v35 = vadd.f32 %v633_v50, %v814_v11  ;;  %v373_v39 = vmul.f32 %v830_v61, %v830_v61  ;;  %v298_v47 = vadd.f32 %v814_v11, %v819_v54 }
  0xfe   :  { %v330_v12 = vadd.f32 %v329_v4, %v328_v3  ;;  %v383_v13 = vadd.f32 %v382_v7, %v381_v6  ;;  %v287_v14 = vadd.f32 %v628_v8, %v814_v11  ;;  %v278_v15 = vpop.f32.mrb[5].mxu0  ;;  %v310_v16 = vpop.f32.mrb[5].mxu1  ;;  %492 = vst.msk [vmem:[%s956_s5 + $0x20] sm:$0xf] %vm483_vm0, %v543_v20  ;;  %v319_v50 = vadd.f32 %v636_v10, %v814_v11 }
  0xff   :  { %v279_v18 = vadd.f32 %v814_v11, %v278_v15  ;;  %v629_v19 = vpop.f32.mrb[6].mxu0  ;;  %v637_v21 = vpop.f32.mrb[6].mxu1  ;;  %v546_v46 = vpack.c.bf16 %v306_v35, %v306_v35  ;;  %v311_v51 = vadd.f32 %v814_v11, %v310_v16  ;;  %v341_v55 = vsel %vm325_vm1, %v830_v61, 0.0 }
 0x100   :  { %v385_v24 = vadd.f32 %v384_v17, %v383_v13  ;;  %v541_v25 = vpack.c.bf16 %v287_v14, %v287_v14  ;;  %v281_v26 = vpop.f32.mrb[7].mxu0  ;;  %v313_v27 = vpop.f32.mrb[7].mxu1  ;;  %v332_v28 = vadd.f32 %v331_v22, %v330_v12  ;;  %v290_v33 = vadd.f32 %v629_v19, %v814_v11 }
 0x101   :  { %v333_v29 = vsel %vm325_vm1, %v279_v18, 0.0  ;;  %v369_v30 = vmul.f32 %v279_v18, %v279_v18  ;;  %v539_v31 = vpack.c.bf16 %v279_v18, %v279_v18  ;;  %v282_v34 = vadd.f32 %v814_v11, %v281_v26  ;;  %495 = vst.msk [vmem:[%s956_s5 + $0x2c] sm:$0xf] %vm483_vm0, %v546_v46 }
 0x102   :  { %490 = vst.msk [vmem:[%s956_s5 + $0x18] sm:$0xf] %vm483_vm0, %v541_v25  ;;  %v387_v32 = vadd.f32 %v386_v23, %v385_v24  ;;  %v334_v36 = vadd.f32 %v333_v29, %v332_v28  ;;  %v542_v5 = vpack.c.bf16 %v290_v33, %v290_v33  ;;  %v371_v40 = vmul.f32 %v287_v14, %v287_v14 }
 0x103   :  { %v388_v37 = vsel %vm325_vm1, %v369_v30, 0.0  ;;  %488 = vst.msk [vmem:[%s956_s5 + $0x10] sm:$0xf] %vm483_vm0, %v539_v31  ;;  %v335_v41 = vsel %vm325_vm1, %v282_v34, 0.0  ;;  %v370_v42 = vmul.f32 %v282_v34, %v282_v34  ;;  %v540_v43 = vpack.c.bf16 %v282_v34, %v282_v34 }
 0x104   :  { %v389_v38 = vadd.f32 %v388_v37, %v387_v32  ;;  %v337_v44 = vsel %vm325_vm1, %v287_v14, 0.0  ;;  %491 = vst.msk [vmem:[%s956_s5 + $0x1c] sm:$0xf] %vm483_vm0, %v542_v5  ;;  %v336_v45 = vadd.f32 %v335_v41, %v334_v36  ;;  %v372_v48 = vmul.f32 %v290_v33, %v290_v33 }
 0x105   :  { %v390_v49 = vsel %vm325_vm1, %v370_v42, 0.0  ;;  %489 = vst.msk [vmem:[%s956_s5 + $0x14] sm:$0xf] %vm483_vm0, %v540_v43  ;;  %v322_v54 = vadd.f32 %v637_v21, %v814_v11  ;;  %v392_v56 = vsel %vm325_vm1, %v371_v40, 0.0  ;;  %v339_v57 = vsel %vm325_vm1, %v290_v33, 0.0 }
 0x106   :  { %v338_v52 = vadd.f32 %v337_v44, %v336_v45  ;;  %v391_v53 = vadd.f32 %v390_v49, %v389_v38  ;;  %v544_v59 = vpack.c.bf16 %v298_v47, %v298_v47  ;;  %v549_v60 = vpack.c.bf16 %v319_v50, %v319_v50 }
 0x107   :  { %v394_v0 = vsel %vm325_vm1, %v372_v48, 0.0  ;;  %v396_v1 = vsel %vm325_vm1, %v373_v39, 0.0  ;;  %v374_v61 = vmul.f32 %v298_v47, %v298_v47  ;;  %v547_v2 = vpack.c.bf16 %v311_v51, %v311_v51 }
 0x108   :  { %v393_v62 = vadd.f32 %v392_v56, %v391_v53  ;;  %v340_v63 = vadd.f32 %v339_v57, %v338_v52  ;;  %493 = vst.msk [vmem:[%s956_s5 + $0x24] sm:$0xf] %vm483_vm0, %v544_v59  ;;  %498 = vst.msk [vmem:[%s956_s5 + $0x38] sm:$0xf] %vm483_vm0, %v549_v60  ;;  %v550_v6 = vpack.c.bf16 %v322_v54, %v322_v54  ;;  %v343_v8 = vsel %vm325_vm1, %v298_v47, 0.0 }
 0x109   :  { %v375_v7 = vmul.f32 %v823_v58, %v823_v58  ;;  %496 = vst.msk [vmem:[%s956_s5 + $0x30] sm:$0xf] %vm483_vm0, %v547_v2  ;;  %v314_v9 = vadd.f32 %v814_v11, %v313_v27  ;;  %v345_v10 = vsel %vm325_vm1, %v823_v58, 0.0  ;;  %v376_v14 = vmul.f32 %v306_v35, %v306_v35 }
 0x10a   :  { %v342_v3 = vadd.f32 %v341_v55, %v340_v63  ;;  %v395_v4 = vadd.f32 %v394_v0, %v393_v62  ;;  %499 = vst.msk [vmem:[%s956_s5 + $0x3c] sm:$0xf] %vm483_vm0, %v550_v6  ;;  %v398_v15 = vsel %vm325_vm1, %v374_v61, 0.0  ;;  %v377_v16 = vmul.f32 %v311_v51, %v311_v51 }
 0x10b   :  { %v548_v17 = vpack.c.bf16 %v314_v9, %v314_v9  ;;  %v400_v20 = vsel %vm325_vm1, %v375_v7, 0.0  ;;  %v347_v11 = vsel %vm325_vm1, %v306_v35, 0.0  ;;  %v349_v58 = vsel %vm325_vm1, %v311_v51, 0.0 }
 0x10c   :  { %v397_v12 = vadd.f32 %v396_v1, %v395_v4  ;;  %v344_v13 = vadd.f32 %v343_v8, %v342_v3  ;;  %v402_v23 = vsel %vm325_vm1, %v376_v14, 0.0  ;;  %v404_v24 = vsel %vm325_vm1, %v377_v16, 0.0 }
 0x10d   :  { %497 = vst.msk [vmem:[%s956_s5 + $0x34] sm:$0xf] %vm483_vm0, %v548_v17  ;;  %v378_v25 = vmul.f32 %v314_v9, %v314_v9  ;;  %v379_v28 = vmul.f32 %v319_v50, %v319_v50  ;;  %v351_v29 = vsel %vm325_vm1, %v314_v9, 0.0  ;;  %v353_v32 = vsel %vm325_vm1, %v319_v50, 0.0 }
 0x10e   :  { %v346_v18 = vadd.f32 %v345_v10, %v344_v13  ;;  %v399_v19 = vadd.f32 %v398_v15, %v397_v12  ;;  %v380_v33 = vmul.f32 %v322_v54, %v322_v54  ;;  %v355_v38 = vsel %vm325_vm1, %v322_v54, 0.0 }
 0x10f   :  { %v406_v34 = vsel %vm325_vm1, %v378_v25, 0.0  ;;  %v408_v37 = vsel %vm325_vm1, %v379_v28, 0.0 }
 0x110   :  { %v401_v21 = vadd.f32 %v400_v20, %v399_v19  ;;  %v348_v22 = vadd.f32 %v347_v11, %v346_v18  ;;  %v410_v40 = vsel %vm325_vm1, %v380_v33, 0.0 }
 0x112   :  { %v350_v26 = vadd.f32 %v349_v58, %v348_v22  ;;  %v403_v27 = vadd.f32 %v402_v23, %v401_v21 }
 0x114   :  { %v405_v30 = vadd.f32 %v404_v24, %v403_v27  ;;  %v352_v31 = vadd.f32 %v351_v29, %v350_v26 }
 0x116   :  { %v354_v35 = vadd.f32 %v353_v32, %v352_v31  ;;  %v407_v36 = vadd.f32 %v406_v34, %v405_v30 }
 0x118   :  { %v356_v5 = vadd.f32 %v355_v38, %v354_v35  ;;  %v409_v39 = vadd.f32 %v408_v37, %v407_v36 }
 0x11a   :  { %v357_v41 = vrot.slane %v356_v5, 4  ;;  %v411_v42 = vadd.f32 %v410_v40, %v409_v39 }
 0x11c   :  { %v358_v43 = vadd.f32 %v357_v41, %v356_v5  ;;  %v412_v44 = vrot.slane %v411_v42, 4 }
 0x11e   :  { %v359_v45 = vrot.slane %v358_v43, 2  ;;  %v413_v46 = vadd.f32 %v412_v44, %v411_v42 }
 0x120   :  { %v360_v47 = vadd.f32 %v359_v45, %v358_v43  ;;  %v414_v48 = vrot.slane %v413_v46, 2 }
 0x122   :  { %v361_v49 = vrot.slane %v360_v47, 1  ;;  %v415_v50 = vadd.f32 %v414_v48, %v413_v46 }
 0x124   :  { %v362_v51 = vadd.f32 %v361_v49, %v360_v47  ;;  %v416_v52 = vrot.slane %v415_v50, 1 }
 0x126   :  { %364 = vst.msk [vmem:[%s957_s6] sm:$0x1] %vm363_vm2, %v362_v51  ;;  %v417_v53 = vadd.f32 %v416_v52, %v415_v50 }
 0x128   :  { %418 = vst.msk [vmem:[%s957_s6 + $0x1] sm:$0x1] %vm363_vm2, %v417_v53 }

// kernel: tile.88
= control target key start
LH: loop header
LB: loop body
LE: loop exit
PB: predicated region body
PF: predicated region fallthrough
CT: control target
= control target key end

     0   :  { %s28_s0 = inlined_call_operand.vmem [shape: f32[16], index: 0, kind: input, shape index: {}]   ;;  %s29_s1 = inlined_call_operand.vmem [shape: f32[16,16], index: 1, kind: output, shape index: {}]  }
   0x1   :  { %v4_v0 = vld [vmem:[%s28_s0] ss:$0 sm:$0xff] }
   0x2   :  { %5 = vst [vmem:[%s29_s1] sm:$0xff] %v4_v0  ;;  %8 = vst [vmem:[%s29_s1 + $0x8] sm:$0xff] %v4_v0 }

// kernel: tile.93
= control target key start
LH: loop header
LB: loop body
LE: loop exit
PB: predicated region body
PF: predicated region fallthrough
CT: control target
= control target key end

     0   :  { %s7_s6 = smov 3  ;;  %s21_s9 = smov 3  ;;  %vm4_vm0 = vcmask 130048   ;;  %vm11_vm1 = vcmask 1048448   ;;  %vm18_vm2 = vcmask 917248   ;;  %vm25_vm3 = vcmask 786048   ;;  %s128_s0 = inlined_call_operand.vmem [shape: f32[16,16], index: 0, kind: input, shape index: {}]   ;;  %s129_s1 = inlined_call_operand.vmem [shape: f32[1,256], index: 1, kind: output, shape index: {}]  }
   0x1   :  { %v66_v0 = vld [vmem:[%s128_s0 + $0x7] ss:$8 sm:%s7_s6]   ;;  %s81_s10 = smov 112   ;;  %v68_v1 = vld [vmem:[%s128_s0 + $0x5] ss:$8 sm:%s21_s9]   ;;  %s14_s13 = smov 3 }
   0x2   :  { %9 = vrot.lane.b32.xlu0 %v66_v0, %s81_s10  ;;  %s82_s14 = smov 80   ;;  %v67_v2 = vld [vmem:[%s128_s0 + $0x6] ss:$8 sm:%s14_s13]   ;;  %s28_s17 = smov 3  ;;  %vm32_vm4 = vcmask 654848   ;;  %vm39_vm5 = vcmask 523648  }
   0x3   :  { %23 = vrot.lane.b32.xlu1 %v68_v1, %s82_s14  ;;  %v69_v3 = vld [vmem:[%s128_s0 + $0x4] ss:$8 sm:%s28_s17]   ;;  %s35_s20 = smov 3  ;;  %s42_s21 = smov 3  ;;  %vm46_vm6 = vcmask 392448   ;;  %vm53_vm7 = vcmask 261248  }
   0x4   :  { %s83_s22 = smov 96   ;;  %s84_s23 = smov 64   ;;  %v70_v4 = vld [vmem:[%s128_s0 + $0x3] ss:$8 sm:%s35_s20]   ;;  %v71_v5 = vld [vmem:[%s128_s0 + $0x2] ss:$8 sm:%s42_s21]  }
   0x5   :  { %s2_s26 = smov 3  ;;  %s49_s29 = smov 3 }
   0x6   :  { %16 = vrot.lane.b32.xlu0 %v67_v2, %s83_s22  ;;  %v3_v6 = vld [vmem:[%s128_s0] ss:$8 sm:%s2_s26]   ;;  %s85_s3 = smov 48   ;;  %s86_s4 = smov 32  }
   0x7   :  { %30 = vrot.lane.b32.xlu1 %v69_v3, %s84_s23  ;;  %5 = vst.msk [vmem:[#allocation0] ss:$8 sm:$0x3] %vm4_vm0, %v3_v6   ;;  %v72_v7 = vld [vmem:[%s128_s0 + $0x1] ss:$8 sm:%s49_s29]   ;;  %s87_s0 = smov 16  }
   0xa   :  { %37 = vrot.lane.b32.xlu0 %v70_v4, %s85_s3 }
   0xb   :  { %44 = vrot.lane.b32.xlu1 %v71_v5, %s86_s4 }
   0xe   :  { %51 = vrot.lane.b32.xlu0 %v72_v7, %s87_s0 }
  0x74   :  { %v10_v8 = vpop.permute.xlu0 %9  }
  0x75   :  { %12 = vst.msk [vmem:[#allocation0] ss:$8 sm:$0x3] %vm11_vm1, %v10_v8   ;;  %v24_v9 = vpop.permute.xlu1 %23  }
  0x78   :  { %v17_v10 = vpop.permute.xlu0 %16  }
  0x79   :  { %19 = vst.msk [vmem:[#allocation0] ss:$8 sm:$0x3] %vm18_vm2, %v17_v10   ;;  %v31_v11 = vpop.permute.xlu1 %30  }
  0x7a   :  { %26 = vst.msk [vmem:[#allocation0] ss:$8 sm:$0x3] %vm25_vm3, %v24_v9  }
  0x7b   :  { %33 = vst.msk [vmem:[#allocation0] ss:$8 sm:$0x3] %vm32_vm4, %v31_v11  }
  0x7c   :  { %v38_v12 = vpop.permute.xlu0 %37  }
  0x7d   :  { %40 = vst.msk [vmem:[#allocation0] ss:$8 sm:$0x3] %vm39_vm5, %v38_v12   ;;  %v45_v13 = vpop.permute.xlu1 %44  }
  0x7e   :  { %47 = vst.msk [vmem:[#allocation0] ss:$8 sm:$0x3] %vm46_vm6, %v45_v13  }
  0x80   :  { %v52_v14 = vpop.permute.xlu0 %51  }
  0x81   :  { %54 = vst.msk [vmem:[#allocation0] ss:$8 sm:$0x3] %vm53_vm7, %v52_v14  }
  0x88   :  { %v58_v15 = vld [vmem:[#allocation0] sm:$0x1]  ;;  %v62_v16 = vld [vmem:[#allocation0 + $0x8] sm:$0x1] }
  0x89   :  { %60 = vst [vmem:[%s129_s1] sm:$0x1] %v58_v15  ;;  %73 = vst [vmem:[%s129_s1 + $0x1] sm:$0x1] %v62_v16 }

// kernel: unet_forward.13
= control target key start
LH: loop header
LB: loop body
LE: loop exit
PB: predicated region body
PF: predicated region fallthrough
CT: control target
= control target key end

     0   :  { %v37_v5 = vlaneseq  ;;  %vm287_vm8 = vcmask 261120   ;;  %vm337_vm9 = vcmask 257024   ;;  %vm301_vm10 = vcmask 253952   ;;  %s571_s1 = inlined_call_operand.vmem [shape: bf16[256,32], index: 1, kind: input, shape index: {}]   ;;  %s572_s0 = inlined_call_operand.vmem [shape: bf16[32,256], index: 0, kind: input, shape index: {}]   ;;  %s573_s2 = inlined_call_operand.vmem [shape: f32[1,256], index: 2, kind: input, shape index: {}]   ;;  %s574_s3 = inlined_call_operand.vmem [shape: f32[1,256], index: 3, kind: input, shape index: {}]   ;;  %s575_s4 = inlined_call_operand.vmem [shape: f32[1,32], index: 4, kind: input, shape index: {}]   ;;  %s576_s5 = inlined_call_operand.vmem [shape: bf16[32,32], index: 5, kind: output, shape index: {0}]   ;;  %s577_s6 = inlined_call_operand.vmem [shape: f32[2,32], index: 6, kind: output, shape index: {1}]  }
   0x1   :  { %v419_v0 = vld [vmem:[%s571_s1 + $0x40] sm:$0xff]   ;;  %v421_v2 = vld [vmem:[%s571_s1 + $0x48] sm:$0xff]   ;;  %v423_v4 = vld [vmem:[%s571_s1 + $0x50] sm:$0xff]  }
   0x2   :  { %v420_v1 = vld [vmem:[%s571_s1] sm:$0xff]   ;;  %375 = vmatprep.subr.bf16.mxu0 %v419_v0  ;;  %403 = vmatprep.subr.bf16.mxu1 %v419_v0  ;;  %v422_v3 = vld [vmem:[%s571_s1 + $0x8] sm:$0xff]   ;;  %v424_v6 = vld [vmem:[%s571_s1 + $0x10] sm:$0xff]   ;;  %v38_v8 = vshrl.u32 %v37_v5, 7 }
   0x3   :  { %376 = vmatpush3.bf16.msra.mxu0 %v420_v1  ;;  %411 = vmatpush3.bf16.msra.mxu1 %v420_v1  ;;  %v425_v7 = vld [vmem:[%s571_s1 + $0x58] sm:$0xff]   ;;  %v427_v10 = vld [vmem:[%s571_s1 + $0x60] sm:$0xff]   ;;  %v429_v14 = vld [vmem:[%s571_s1 + $0x68] sm:$0xff]  }
   0x4   :  { %377 = vmatprep.subr.bf16.mxu0 %v421_v2  ;;  %404 = vmatprep.subr.bf16.mxu1 %v421_v2  ;;  %v426_v9 = vld [vmem:[%s571_s1 + $0x18] sm:$0xff]   ;;  %v39_v11 = vsub.s32 0, %v38_v8  ;;  %v428_v12 = vld [vmem:[%s571_s1 + $0x20] sm:$0xff]   ;;  %v43_v13 = vsub.s32 1, %v38_v8  ;;  %v24_v16 = vld [vmem:[%s572_s0 + $0x8] sm:$0xff] }
   0x5   :  { %v23_v15 = vld [vmem:[%s572_s0] sm:$0xff]  ;;  %v29_v20 = vunpack.c.l.bf16 %v24_v16  ;;  %v30_v21 = vunpack.c.h.bf16 %v24_v16  ;;  %v25_v23 = vld [vmem:[%s572_s0 + $0x10] sm:$0xff]  ;;  %v26_v24 = vld [vmem:[%s572_s0 + $0x18] sm:$0xff] }
   0x6   :  { %v35_v17 = vld [vmem:[%s573_s2] sm:$0x3]  ;;  %v27_v18 = vunpack.c.l.bf16 %v23_v15  ;;  %v28_v19 = vunpack.c.h.bf16 %v23_v15  ;;  %v430_v29 = vld [vmem:[%s571_s1 + $0x28] sm:$0xff]   ;;  %v31_v30 = vunpack.c.l.bf16 %v25_v23  ;;  %v32_v31 = vunpack.c.h.bf16 %v25_v23  ;;  %v431_v34 = vld [vmem:[%s571_s1 + $0x70] sm:$0xff]  }
   0x7   :  { %378 = vmatpush3.bf16.msra.mxu0 %v422_v3  ;;  %412 = vmatpush3.bf16.msra.mxu1 %v422_v3  ;;  %v55_v22 = vld [vmem:[%s574_s3] sm:$0x3]  ;;  %v40_v25 = vrot.slane %v35_v17, %v39_v11  ;;  %v44_v26 = vrot.slane %v35_v17, %v43_v13  ;;  %v33_v32 = vunpack.c.l.bf16 %v26_v24  ;;  %v34_v33 = vunpack.c.h.bf16 %v26_v24  ;;  %v432_v46 = vld [vmem:[%s571_s1 + $0x30] sm:$0xff]   ;;  %v433_v47 = vld [vmem:[%s571_s1 + $0x78] sm:$0xff]  }
   0x8   :  { %379 = vmatprep.subr.bf16.mxu0 %v423_v4  ;;  %405 = vmatprep.subr.bf16.mxu1 %v423_v4  ;;  %v60_v27 = vrot.slane %v55_v22, %v39_v11  ;;  %v64_v28 = vrot.slane %v55_v22, %v43_v13  ;;  %v434_v57 = vld [vmem:[%s571_s1 + $0x38] sm:$0xff]   ;;  %v350_v11 = vld [vmem:[%s575_s4] ss:$0 sm:$0xff] }
   0x9   :  { %v48_v35 = vmul.f32 %v44_v26, %v28_v19  ;;  %v50_v36 = vmul.f32 %v44_v26, %v30_v21  ;;  %v47_v37 = vmul.f32 %v40_v25, %v27_v18  ;;  %v49_v38 = vmul.f32 %v40_v25, %v29_v20 }
   0xa   :  { %v52_v39 = vmul.f32 %v44_v26, %v32_v31  ;;  %v54_v40 = vmul.f32 %v44_v26, %v34_v33  ;;  %v51_v41 = vmul.f32 %v40_v25, %v31_v30  ;;  %v53_v45 = vmul.f32 %v40_v25, %v33_v32 }
   0xb   :  { %380 = vmatpush3.bf16.msra.mxu0 %v424_v6  ;;  %413 = vmatpush3.bf16.msra.mxu1 %v424_v6  ;;  %v68_v42 = vadd.f32 %v64_v28, %v48_v35  ;;  %v70_v43 = vadd.f32 %v64_v28, %v50_v36  ;;  %v67_v44 = vadd.f32 %v60_v27, %v47_v37 }
   0xc   :  { %381 = vmatprep.subr.bf16.mxu0 %v425_v7  ;;  %406 = vmatprep.subr.bf16.mxu1 %v425_v7  ;;  %v69_v48 = vadd.f32 %v60_v27, %v49_v38  ;;  %v72_v49 = vadd.f32 %v64_v28, %v52_v39  ;;  %v74_v50 = vadd.f32 %v64_v28, %v54_v40 }
   0xd   :  { %vm76_vm0 = vcmp.ge.f32.partialorder %v68_v42, 0.0  ;;  %vm78_vm1 = vcmp.ge.f32.partialorder %v70_v43, 0.0  ;;  %v84_v51 = vmul.f32 0.2, %v68_v42  ;;  %v86_v52 = vmul.f32 0.2, %v70_v43 }
   0xe   :  { %vm75_vm2 = vcmp.ge.f32.partialorder %v67_v44, 0.0  ;;  %vm77_vm3 = vcmp.ge.f32.partialorder %v69_v48, 0.0  ;;  %v83_v53 = vmul.f32 0.2, %v67_v44  ;;  %v85_v54 = vmul.f32 0.2, %v69_v48 }
   0xf   :  { %382 = vmatpush3.bf16.msra.mxu0 %v426_v9  ;;  %414 = vmatpush3.bf16.msra.mxu1 %v426_v9  ;;  %v92_v55 = vsel %vm76_vm0, %v68_v42, %v84_v51  ;;  %v94_v56 = vsel %vm78_vm1, %v70_v43, %v86_v52  ;;  %vm80_vm4 = vcmp.ge.f32.partialorder %v72_v49, 0.0  ;;  %vm82_vm5 = vcmp.ge.f32.partialorder %v74_v50, 0.0 }
  0x10   :  { %383 = vmatprep.subr.bf16.mxu0 %v427_v10  ;;  %407 = vmatprep.subr.bf16.mxu1 %v427_v10  ;;  %v100_v58 = vpack.c.bf16 %v94_v56, %v92_v55  ;;  %v91_v59 = vsel %vm75_vm2, %v67_v44, %v83_v53  ;;  %v93_v60 = vsel %vm77_vm3, %v69_v48, %v85_v54  ;;  %v88_v61 = vmul.f32 0.2, %v72_v49 }
  0x11   :  { %v90_v62 = vmul.f32 0.2, %v74_v50  ;;  %v71_v63 = vadd.f32 %v60_v27, %v51_v41  ;;  %v73_v0 = vadd.f32 %v60_v27, %v53_v45  ;;  %v99_v1 = vpack.c.bf16 %v93_v60, %v91_v59 }
  0x12   :  { %270 = vmatprep.mubr.bf16.mxu0 %v100_v58  ;;  %v96_v2 = vsel %vm80_vm4, %v72_v49, %v88_v61 }
  0x13   :  { %384 = vmatpush3.bf16.msra.mxu0 %v428_v12  ;;  %415 = vmatpush3.bf16.msra.mxu1 %v428_v12  ;;  %v98_v3 = vsel %vm82_vm5, %v74_v50, %v90_v62  ;;  %vm79_vm6 = vcmp.ge.f32.partialorder %v71_v63, 0.0  ;;  %vm81_vm7 = vcmp.ge.f32.partialorder %v73_v0, 0.0  ;;  %v87_v4 = vmul.f32 0.2, %v71_v63 }
  0x14   :  { %385 = vmatprep.subr.bf16.mxu0 %v429_v14  ;;  %408 = vmatprep.subr.bf16.mxu1 %v429_v14  ;;  %v102_v5 = vpack.c.bf16 %v98_v3, %v96_v2  ;;  %v89_v6 = vmul.f32 0.2, %v73_v0 }
  0x15   :  { %v95_v7 = vsel %vm79_vm6, %v71_v63, %v87_v4 }
  0x16   :  { %278 = vmatprep.mubr.bf16.mxu1 %v102_v5  ;;  %v97_v8 = vsel %vm81_vm7, %v73_v0, %v89_v6 }
  0x17   :  { %386 = vmatpush3.bf16.msra.mxu0 %v430_v29  ;;  %416 = vmatpush3.bf16.msra.mxu1 %v430_v29  ;;  %v101_v9 = vpack.c.bf16 %v97_v8, %v95_v7 }
  0x18   :  { %387 = vmatprep.subr.bf16.mxu0 %v431_v34  ;;  %409 = vmatprep.subr.bf16.mxu1 %v431_v34 }
  0x1b   :  { %388 = vmatpush3.bf16.msra.mxu0 %v432_v46  ;;  %417 = vmatpush3.bf16.msra.mxu1 %v432_v46 }
  0x1c   :  { %389 = vmatprep.subr.bf16.mxu0 %v433_v47  ;;  %410 = vmatprep.subr.bf16.mxu1 %v433_v47 }
  0x1f   :  { %390 = vmatpush3.bf16.msra.mxu0 %v434_v57  ;;  %418 = vmatpush3.bf16.msra.mxu1 %v434_v57 }
  0x22   :  { %271 = vmatmul.mubr.bf16.vlgmr.msra.gmra.mrb[0].mxu0 %v99_v1  ;;  %279 = vmatmul.mubr.bf16.vlgmr.msra.gmra.mrb[0].mxu1 %v101_v9 }
  0xf5   :  { %v391_v10 = vpop.f32.mrb[0].mxu0  ;;  %v397_v14 = vpop.f32.mrb[0].mxu1 }
  0xf6   :  { %v392_v12 = vpop.f32.mrb[1].mxu0  ;;  %v398_v16 = vpop.f32.mrb[1].mxu1 }
  0xf7   :  { %v393_v13 = vadd.f32 %v392_v12, %v391_v10  ;;  %v394_v15 = vpop.f32.mrb[2].mxu0  ;;  %v399_v19 = vadd.f32 %v398_v16, %v397_v14  ;;  %v400_v21 = vpop.f32.mrb[2].mxu1 }
  0xf8   :  { %v395_v17 = vpop.f32.mrb[3].mxu0  ;;  %v401_v22 = vpop.f32.mrb[3].mxu1 }
  0xf9   :  { %v273_v18 = vadd.f32 %v393_v13, %v350_v11  ;;  %v396_v20 = vadd.f32 %v395_v17, %v394_v15  ;;  %v281_v25 = vadd.f32 %v399_v19, %v350_v11  ;;  %v402_v27 = vadd.f32 %v401_v22, %v400_v21 }
  0xfb   :  { %v303_v23 = vmul.f32 %v273_v18, %v273_v18  ;;  %v371_v24 = vpack.c.bf16 %v273_v18, %v273_v18  ;;  %v276_v26 = vadd.f32 %v396_v20, %v350_v11  ;;  %v288_v28 = vsel %vm287_vm8, %v273_v18, 0.0 }
  0xfc   :  { %v291_v29 = vsel %vm287_vm8, %v281_v25, 0.0  ;;  %v305_v30 = vmul.f32 %v281_v25, %v281_v25  ;;  %v373_v31 = vpack.c.bf16 %v281_v25, %v281_v25  ;;  %v284_v35 = vadd.f32 %v402_v27, %v350_v11 }
  0xfd   :  { %338 = vst.msk [vmem:[%s576_s5] sm:$0xf] %vm337_vm9, %v371_v24  ;;  %v289_v32 = vsel %vm287_vm8, %v276_v26, 0.0  ;;  %v304_v33 = vmul.f32 %v276_v26, %v276_v26  ;;  %v372_v34 = vpack.c.bf16 %v276_v26, %v276_v26  ;;  %v307_v36 = vsel %vm287_vm8, %v303_v23, 0.0 }
  0xfe   :  { %340 = vst.msk [vmem:[%s576_s5 + $0x8] sm:$0xf] %vm337_vm9, %v373_v31  ;;  %v290_v37 = vadd.f32 %v289_v32, %v288_v28  ;;  %v310_v38 = vsel %vm287_vm8, %v305_v30, 0.0  ;;  %v306_v40 = vmul.f32 %v284_v35, %v284_v35  ;;  %v374_v41 = vpack.c.bf16 %v284_v35, %v284_v35 }
  0xff   :  { %v308_v39 = vsel %vm287_vm8, %v304_v33, 0.0  ;;  %339 = vst.msk [vmem:[%s576_s5 + $0x4] sm:$0xf] %vm337_vm9, %v372_v34  ;;  %v293_v44 = vsel %vm287_vm8, %v284_v35, 0.0 }
 0x100   :  { %v309_v42 = vadd.f32 %v308_v39, %v307_v36  ;;  %v292_v43 = vadd.f32 %v291_v29, %v290_v37  ;;  %341 = vst.msk [vmem:[%s576_s5 + $0xc] sm:$0xf] %vm337_vm9, %v374_v41  ;;  %v312_v47 = vsel %vm287_vm8, %v306_v40, 0.0 }
 0x102   :  { %v294_v45 = vadd.f32 %v293_v44, %v292_v43  ;;  %v311_v46 = vadd.f32 %v310_v38, %v309_v42 }
 0x104   :  { %v295_v48 = vrot.slane %v294_v45, 4  ;;  %v313_v49 = vadd.f32 %v312_v47, %v311_v46 }
 0x106   :  { %v296_v50 = vadd.f32 %v295_v48, %v294_v45  ;;  %v314_v51 = vrot.slane %v313_v49, 4 }
 0x108   :  { %v297_v52 = vrot.slane %v296_v50, 2  ;;  %v315_v53 = vadd.f32 %v314_v51, %v313_v49 }
 0x10a   :  { %v298_v54 = vadd.f32 %v297_v52, %v296_v50  ;;  %v316_v55 = vrot.slane %v315_v53, 2 }
 0x10c   :  { %v299_v56 = vrot.slane %v298_v54, 1  ;;  %v317_v57 = vadd.f32 %v316_v55, %v315_v53 }
 0x10e   :  { %v300_v58 = vadd.f32 %v299_v56, %v298_v54  ;;  %v318_v59 = vrot.slane %v317_v57, 1 }
 0x110   :  { %302 = vst.msk [vmem:[%s577_s6] sm:$0x1] %vm301_vm10, %v300_v58  ;;  %v319_v60 = vadd.f32 %v318_v59, %v317_v57 }
 0x112   :  { %320 = vst.msk [vmem:[%s577_s6 + $0x1] sm:$0x1] %vm301_vm10, %v319_v60 }

// kernel: tile.98
= control target key start
LH: loop header
LB: loop body
LE: loop exit
PB: predicated region body
PF: predicated region fallthrough
CT: control target
= control target key end

     0   :  { %s28_s0 = inlined_call_operand.vmem [shape: f32[32], index: 0, kind: input, shape index: {}]   ;;  %s29_s1 = inlined_call_operand.vmem [shape: f32[16,32], index: 1, kind: output, shape index: {}]  }
   0x1   :  { %v4_v0 = vld [vmem:[%s28_s0] ss:$0 sm:$0xff] }
   0x2   :  { %5 = vst [vmem:[%s29_s1] sm:$0xff] %v4_v0  ;;  %8 = vst [vmem:[%s29_s1 + $0x8] sm:$0xff] %v4_v0 }

// kernel: tile.103
= control target key start
LH: loop header
LB: loop body
LE: loop exit
PB: predicated region body
PF: predicated region fallthrough
CT: control target
= control target key end

     0   :  { %s57_s8 = smov 96   ;;  %vm3_vm0 = vcmask 261120   ;;  %s59_s15 = smov 64   ;;  %vm9_vm1 = vcmask 1048320   ;;  %vm15_vm2 = vcmask 785920   ;;  %vm21_vm3 = vcmask 523520   ;;  %s94_s0 = inlined_call_operand.vmem [shape: f32[16,32], index: 0, kind: input, shape index: {}]   ;;  %s95_s1 = inlined_call_operand.vmem [shape: f32[1,512], index: 1, kind: output, shape index: {}]  }
   0x1   :  { %v48_v0 = vld [vmem:[%s94_s0 + $0x3] ss:$4 sm:$0xf]   ;;  %v49_v1 = vld [vmem:[%s94_s0 + $0x2] ss:$4 sm:$0xf]  }
   0x2   :  { %7 = vrot.lane.b32.xlu0 %v48_v0, %s57_s8  ;;  %v50_v2 = vld [vmem:[%s94_s0 + $0x1] ss:$4 sm:$0xf]   ;;  %v2_v3 = vld [vmem:[%s94_s0] ss:$4 sm:$0xf]  }
   0x3   :  { %s58_s0 = smov 32   ;;  %4 = vst.msk [vmem:[#allocation0] ss:$8 sm:$0xf] %vm3_vm0, %v2_v3  }
   0x4   :  { %19 = vrot.lane.b32.xlu1 %v50_v2, %s58_s0 }
   0x6   :  { %13 = vrot.lane.b32.xlu0 %v49_v1, %s59_s15 }
  0x74   :  { %v8_v4 = vpop.permute.xlu0 %7  }
  0x75   :  { %10 = vst.msk [vmem:[#allocation0] ss:$8 sm:$0xf] %vm9_vm1, %v8_v4  }
  0x76   :  { %v20_v5 = vpop.permute.xlu1 %19  }
  0x78   :  { %v14_v6 = vpop.permute.xlu0 %13  }
  0x79   :  { %16 = vst.msk [vmem:[#allocation0] ss:$8 sm:$0xf] %vm15_vm2, %v14_v6  }
  0x7a   :  { %22 = vst.msk [vmem:[#allocation0] ss:$8 sm:$0xf] %vm21_vm3, %v20_v5  }
  0x81   :  { %v26_v7 = vld [vmem:[#allocation0] sm:$0x1]  ;;  %v30_v8 = vld [vmem:[#allocation0 + $0x8] sm:$0x1]  ;;  %v35_v9 = vld [vmem:[#allocation0 + $0x10] sm:$0x1] }
  0x82   :  { %28 = vst [vmem:[%s95_s1] sm:$0x1] %v26_v7  ;;  %51 = vst [vmem:[%s95_s1 + $0x1] sm:$0x1] %v30_v8  ;;  %v41_v10 = vld [vmem:[#allocation0 + $0x18] sm:$0x1] }
  0x83   :  { %52 = vst [vmem:[%s95_s1 + $0x2] sm:$0x1] %v35_v9  ;;  %53 = vst [vmem:[%s95_s1 + $0x3] sm:$0x1] %v41_v10 }

// kernel: tile.108
= control target key start
LH: loop header
LB: loop body
LE: loop exit
PB: predicated region body
PF: predicated region fallthrough
CT: control target
= control target key end

     0   :  { %s28_s0 = inlined_call_operand.vmem [shape: f32[64], index: 0, kind: input, shape index: {}]   ;;  %s29_s1 = inlined_call_operand.vmem [shape: f32[16,64], index: 1, kind: output, shape index: {}]  }
   0x1   :  { %v4_v0 = vld [vmem:[%s28_s0] ss:$0 sm:$0xff] }
   0x2   :  { %5 = vst [vmem:[%s29_s1] sm:$0xff] %v4_v0  ;;  %8 = vst [vmem:[%s29_s1 + $0x8] sm:$0xff] %v4_v0 }

// kernel: tile.113
= control target key start
LH: loop header
LB: loop body
LE: loop exit
PB: predicated region body
PF: predicated region fallthrough
CT: control target
= control target key end

     0   :  { %vm3_vm0 = vcmask 523264   ;;  %vm10_vm1 = vcmask 1048064   ;;  %s116_s0 = inlined_call_operand.vmem [shape: f32[16,64], index: 0, kind: input, shape index: {}]   ;;  %s117_s1 = inlined_call_operand.vmem [shape: f32[1,1024], index: 1, kind: output, shape index: {}]  }
   0x1   :  { %v66_v0 = vld [vmem:[%s116_s0 + $0x1] ss:$2 sm:$0xff]   ;;  %v2_v1 = vld [vmem:[%s116_s0] ss:$2 sm:$0xff]   ;;  %s75_s0 = smov 64  }
   0x2   :  { %8 = vrot.lane.b32.xlu0 %v66_v0, %s75_s0  ;;  %4 = vst.msk [vmem:[#allocation0] ss:$8 sm:$0xf] %vm3_vm0, %v2_v1   ;;  %5 = vst.msk [vmem:[#allocation0] ss:$8 sm:$0xf0] %vm3_vm0, %v2_v1  }
  0x74   :  { %v9_v2 = vpop.permute.xlu0 %8  }
  0x75   :  { %11 = vst.msk [vmem:[#allocation0] ss:$8 sm:$0xf] %vm10_vm1, %v9_v2   ;;  %12 = vst.msk [vmem:[#allocation0] ss:$8 sm:$0xf0] %vm10_vm1, %v9_v2  }
  0x7c   :  { %v16_v3 = vld [vmem:[#allocation0] sm:$0x1]  ;;  %v20_v4 = vld [vmem:[#allocation0 + $0x8] sm:$0x1]  ;;  %v25_v5 = vld [vmem:[#allocation0 + $0x10] sm:$0x1] }
  0x7d   :  { %18 = vst [vmem:[%s117_s1] sm:$0x1] %v16_v3  ;;  %67 = vst [vmem:[%s117_s1 + $0x1] sm:$0x1] %v20_v4  ;;  %v31_v6 = vld [vmem:[#allocation0 + $0x18] sm:$0x1] }
  0x7e   :  { %68 = vst [vmem:[%s117_s1 + $0x2] sm:$0x1] %v25_v5  ;;  %v37_v7 = vld [vmem:[#allocation0 + $0x20] sm:$0x1]  ;;  %v43_v8 = vld [vmem:[#allocation0 + $0x28] sm:$0x1] }
  0x7f   :  { %69 = vst [vmem:[%s117_s1 + $0x3] sm:$0x1] %v31_v6  ;;  %70 = vst [vmem:[%s117_s1 + $0x4] sm:$0x1] %v37_v7  ;;  %v49_v9 = vld [vmem:[#allocation0 + $0x30] sm:$0x1] }
  0x80   :  { %71 = vst [vmem:[%s117_s1 + $0x5] sm:$0x1] %v43_v8  ;;  %v55_v10 = vld [vmem:[#allocation0 + $0x38] sm:$0x1]  ;;  %72 = vst [vmem:[%s117_s1 + $0x6] sm:$0x1] %v49_v9 }
  0x81   :  { %73 = vst [vmem:[%s117_s1 + $0x7] sm:$0x1] %v55_v10 }

// kernel: unet_forward.14
= control target key start
LH: loop header
LB: loop body
LE: loop exit
PB: predicated region body
PF: predicated region fallthrough
CT: control target
= control target key end

     0   :  { %v31_v21 = vlaneseq  ;;  %vm440_vm4 = vcmask 523264   ;;  %vm460_vm5 = vcmask 519168   ;;  %vm448_vm6 = vcmask 516096   ;;  %s734_s1 = inlined_call_operand.vmem [shape: bf16[512,64], index: 1, kind: input, shape index: {}]   ;;  %s735_s0 = inlined_call_operand.vmem [shape: bf16[8,512], index: 0, kind: input, shape index: {}]   ;;  %s736_s2 = inlined_call_operand.vmem [shape: f32[1,512], index: 2, kind: input, shape index: {}]   ;;  %s737_s3 = inlined_call_operand.vmem [shape: f32[1,512], index: 3, kind: input, shape index: {}]   ;;  %s738_s4 = inlined_call_operand.vmem [shape: f32[1,64], index: 4, kind: input, shape index: {}]   ;;  %s739_s5 = inlined_call_operand.vmem [shape: bf16[8,64], index: 5, kind: output, shape index: {0}]   ;;  %s740_s6 = inlined_call_operand.vmem [shape: f32[2,64], index: 6, kind: output, shape index: {1}]  }
   0x1   :  { %v547_v0 = vld [vmem:[%s734_s1 + $0x40] sm:$0xff]   ;;  %v551_v4 = vld [vmem:[%s734_s1 + $0x48] sm:$0xff]   ;;  %v555_v8 = vld [vmem:[%s734_s1 + $0x50] sm:$0xff]  }
   0x2   :  { %v548_v1 = vld [vmem:[%s734_s1 + $0xc0] sm:$0xff]   ;;  %503 = vmatprep.subr.bf16.mxu0 %v547_v0  ;;  %v552_v5 = vld [vmem:[%s734_s1 + $0xc8] sm:$0xff]   ;;  %v556_v9 = vld [vmem:[%s734_s1 + $0xd0] sm:$0xff]   ;;  %v32_v26 = vshrl.u32 %v31_v21, 7 }
   0x3   :  { %v549_v2 = vld [vmem:[%s734_s1] sm:$0xff]   ;;  %525 = vmatprep.subr.bf16.mxu1 %v548_v1  ;;  %v553_v6 = vld [vmem:[%s734_s1 + $0x8] sm:$0xff]   ;;  %v557_v10 = vld [vmem:[%s734_s1 + $0x10] sm:$0xff]  }
   0x4   :  { %v550_v3 = vld [vmem:[%s734_s1 + $0x80] sm:$0xff]   ;;  %504 = vmatpush3.bf16.msra.mxu0 %v549_v2  ;;  %v554_v7 = vld [vmem:[%s734_s1 + $0x88] sm:$0xff]   ;;  %v558_v11 = vld [vmem:[%s734_s1 + $0x90] sm:$0xff]   ;;  %v37_v31 = vsub.s32 1, %v32_v26  ;;  %v45_v33 = vsub.s32 3, %v32_v26  ;;  %v33_v35 = vsub.s32 0, %v32_v26 }
   0x5   :  { %526 = vmatpush3.bf16.msra.mxu1 %v550_v3  ;;  %505 = vmatprep.subr.bf16.mxu0 %v551_v4  ;;  %v559_v12 = vld [vmem:[%s734_s1 + $0x58] sm:$0xff]   ;;  %v563_v16 = vld [vmem:[%s734_s1 + $0x60] sm:$0xff]   ;;  %v567_v20 = vld [vmem:[%s734_s1 + $0x68] sm:$0xff]   ;;  %v41_v37 = vsub.s32 2, %v32_v26 }
   0x6   :  { %527 = vmatprep.subr.bf16.mxu1 %v552_v5  ;;  %v560_v13 = vld [vmem:[%s734_s1 + $0xd8] sm:$0xff]   ;;  %v564_v17 = vld [vmem:[%s734_s1 + $0xe0] sm:$0xff]   ;;  %v568_v22 = vld [vmem:[%s734_s1 + $0xe8] sm:$0xff]  }
   0x7   :  { %v561_v14 = vld [vmem:[%s734_s1 + $0x18] sm:$0xff]   ;;  %v565_v18 = vld [vmem:[%s734_s1 + $0x20] sm:$0xff]   ;;  %v569_v23 = vld [vmem:[%s734_s1 + $0x28] sm:$0xff]  }
   0x8   :  { %506 = vmatpush3.bf16.msra.mxu0 %v553_v6  ;;  %v562_v15 = vld [vmem:[%s734_s1 + $0x98] sm:$0xff]   ;;  %v566_v19 = vld [vmem:[%s734_s1 + $0xa0] sm:$0xff]   ;;  %v570_v24 = vld [vmem:[%s734_s1 + $0xa8] sm:$0xff]  }
   0x9   :  { %528 = vmatpush3.bf16.msra.mxu1 %v554_v7  ;;  %507 = vmatprep.subr.bf16.mxu0 %v555_v8  ;;  %v571_v25 = vld [vmem:[%s734_s1 + $0x70] sm:$0xff]   ;;  %v575_v30 = vld [vmem:[%s734_s1 + $0x78] sm:$0xff]   ;;  %v23_v38 = vld [vmem:[%s735_s0] sm:$0xff] }
   0xa   :  { %529 = vmatprep.subr.bf16.mxu1 %v556_v9  ;;  %v572_v27 = vld [vmem:[%s734_s1 + $0xf0] sm:$0xff]   ;;  %v576_v32 = vld [vmem:[%s734_s1 + $0xf8] sm:$0xff]   ;;  %v29_v39 = vld [vmem:[%s736_s2] sm:$0xf]  ;;  %v25_v41 = vunpack.c.l.bf16 %v23_v38  ;;  %v26_v42 = vunpack.c.h.bf16 %v23_v38 }
   0xb   :  { %v573_v28 = vld [vmem:[%s734_s1 + $0x30] sm:$0xff]   ;;  %v577_v34 = vld [vmem:[%s734_s1 + $0x38] sm:$0xff]   ;;  %v55_v40 = vld [vmem:[%s737_s3] sm:$0xf]  ;;  %v38_v43 = vrot.slane %v29_v39, %v37_v31  ;;  %v46_v48 = vrot.slane %v29_v39, %v45_v33  ;;  %v34_v51 = vrot.slane %v29_v39, %v33_v35  ;;  %v42_v53 = vrot.slane %v29_v39, %v41_v37 }
   0xc   :  { %508 = vmatpush3.bf16.msra.mxu0 %v557_v10  ;;  %v574_v29 = vld [vmem:[%s734_s1 + $0xb0] sm:$0xff]   ;;  %v578_v36 = vld [vmem:[%s734_s1 + $0xb8] sm:$0xff]   ;;  %v64_v44 = vrot.slane %v55_v40, %v37_v31  ;;  %v24_v45 = vld [vmem:[%s735_s0 + $0x8] sm:$0xff]  ;;  %v72_v49 = vrot.slane %v55_v40, %v45_v33  ;;  %v60_v52 = vrot.slane %v55_v40, %v33_v35  ;;  %v68_v55 = vrot.slane %v55_v40, %v41_v37 }
   0xd   :  { %530 = vmatpush3.bf16.msra.mxu1 %v558_v11  ;;  %509 = vmatprep.subr.bf16.mxu0 %v559_v12  ;;  %v27_v46 = vunpack.c.l.bf16 %v24_v45  ;;  %v28_v47 = vunpack.c.h.bf16 %v24_v45  ;;  %v52_v50 = vmul.f32 %v38_v43, %v26_v42  ;;  %v51_v57 = vmul.f32 %v34_v51, %v25_v41  ;;  %v470_v12 = vld [vmem:[%s738_s4] ss:$0 sm:$0xff] }
   0xe   :  { %531 = vmatprep.subr.bf16.mxu1 %v560_v13 }
   0xf   :  { %v54_v54 = vmul.f32 %v46_v48, %v28_v47  ;;  %v78_v56 = vadd.f32 %v64_v44, %v52_v50  ;;  %v53_v58 = vmul.f32 %v42_v53, %v27_v46  ;;  %v77_v61 = vadd.f32 %v60_v52, %v51_v57 }
  0x10   :  { %510 = vmatpush3.bf16.msra.mxu0 %v561_v14 }
  0x11   :  { %532 = vmatpush3.bf16.msra.mxu1 %v562_v15  ;;  %511 = vmatprep.subr.bf16.mxu0 %v563_v16  ;;  %v80_v59 = vadd.f32 %v72_v49, %v54_v54  ;;  %vm82_vm0 = vcmp.ge.f32.partialorder %v78_v56, 0.0  ;;  %v86_v60 = vmul.f32 0.2, %v78_v56  ;;  %v79_v62 = vadd.f32 %v68_v55, %v53_v58 }
  0x12   :  { %533 = vmatprep.subr.bf16.mxu1 %v564_v17  ;;  %vm81_vm2 = vcmp.ge.f32.partialorder %v77_v61, 0.0  ;;  %v85_v1 = vmul.f32 0.2, %v77_v61 }
  0x13   :  { %vm84_vm1 = vcmp.ge.f32.partialorder %v80_v59, 0.0  ;;  %v88_v63 = vmul.f32 0.2, %v80_v59  ;;  %v90_v0 = vsel %vm82_vm0, %v78_v56, %v86_v60  ;;  %vm83_vm3 = vcmp.ge.f32.partialorder %v79_v62, 0.0 }
  0x14   :  { %512 = vmatpush3.bf16.msra.mxu0 %v565_v18  ;;  %v94_v2 = vpack.c.bf16 %v90_v0, %v90_v0  ;;  %v87_v4 = vmul.f32 0.2, %v79_v62  ;;  %v89_v6 = vsel %vm81_vm2, %v77_v61, %v85_v1 }
  0x15   :  { %534 = vmatpush3.bf16.msra.mxu1 %v566_v19  ;;  %513 = vmatprep.subr.bf16.mxu0 %v567_v20  ;;  %v92_v3 = vsel %vm84_vm1, %v80_v59, %v88_v63  ;;  %v93_v7 = vpack.c.bf16 %v89_v6, %v89_v6 }
  0x16   :  { %535 = vmatprep.subr.bf16.mxu1 %v568_v22  ;;  %v96_v5 = vpack.c.bf16 %v92_v3, %v92_v3  ;;  %392 = vmatprep.mubr.bf16.mxu0 %v94_v2  ;;  %v91_v8 = vsel %vm83_vm3, %v79_v62, %v87_v4 }
  0x17   :  { %v95_v9 = vpack.c.bf16 %v91_v8, %v91_v8 }
  0x18   :  { %514 = vmatpush3.bf16.msra.mxu0 %v569_v23  ;;  %432 = vmatprep.mubr.bf16.mxu1 %v96_v5 }
  0x19   :  { %536 = vmatpush3.bf16.msra.mxu1 %v570_v24  ;;  %515 = vmatprep.subr.bf16.mxu0 %v571_v25 }
  0x1a   :  { %537 = vmatprep.subr.bf16.mxu1 %v572_v27 }
  0x1c   :  { %516 = vmatpush3.bf16.msra.mxu0 %v573_v28 }
  0x1d   :  { %538 = vmatpush3.bf16.msra.mxu1 %v574_v29  ;;  %517 = vmatprep.subr.bf16.mxu0 %v575_v30 }
  0x1e   :  { %539 = vmatprep.subr.bf16.mxu1 %v576_v32 }
  0x20   :  { %518 = vmatpush3.bf16.msra.mxu0 %v577_v34 }
  0x21   :  { %540 = vmatpush3.bf16.msra.mxu1 %v578_v36 }
  0x23   :  { %393 = vmatmul.mubr.bf16.vlgmr.msra.gmra.mrb[0].mxu0 %v93_v7 }
  0x24   :  { %433 = vmatmul.mubr.bf16.vlgmr.msra.gmra.mrb[0].mxu1 %v95_v9 }
  0xf6   :  { %v519_v10 = vpop.f32.mrb[0].mxu0 }
  0xf7   :  { %v541_v11 = vpop.f32.mrb[0].mxu1  ;;  %v520_v13 = vpop.f32.mrb[1].mxu0 }
  0xf8   :  { %v521_v14 = vadd.f32 %v520_v13, %v519_v10  ;;  %v542_v15 = vpop.f32.mrb[1].mxu1  ;;  %v522_v16 = vpop.f32.mrb[2].mxu0 }
  0xf9   :  { %v543_v17 = vadd.f32 %v542_v15, %v541_v11  ;;  %v544_v18 = vpop.f32.mrb[2].mxu1  ;;  %v523_v19 = vpop.f32.mrb[3].mxu0 }
  0xfa   :  { %v395_v20 = vadd.f32 %v521_v14, %v470_v12  ;;  %v545_v21 = vpop.f32.mrb[3].mxu1 }
  0xfc   :  { %v435_v22 = vadd.f32 %v543_v17, %v395_v20 }
  0xfe   :  { %v441_v23 = vsel %vm440_vm4, %v435_v22, 0.0  ;;  %v450_v24 = vmul.f32 %v435_v22, %v435_v22  ;;  %v459_v25 = vpack.c.bf16 %v435_v22, %v435_v22 }
  0xff   :  { %v442_v26 = vrot.slane %v441_v23, 4 }
 0x100   :  { %v451_v27 = vsel %vm440_vm4, %v450_v24, 0.0  ;;  %461 = vst.msk [vmem:[%s739_s5] sm:$0xf] %vm460_vm5, %v459_v25 }
 0x101   :  { %v443_v28 = vadd.f32 %v442_v26, %v441_v23  ;;  %v452_v29 = vrot.slane %v451_v27, 4 }
 0x103   :  { %v444_v30 = vrot.slane %v443_v28, 2  ;;  %v453_v31 = vadd.f32 %v452_v29, %v451_v27 }
 0x105   :  { %v445_v32 = vadd.f32 %v444_v30, %v443_v28  ;;  %v454_v33 = vrot.slane %v453_v31, 2 }
 0x107   :  { %v446_v34 = vrot.slane %v445_v32, 1  ;;  %v455_v35 = vadd.f32 %v454_v33, %v453_v31 }
 0x109   :  { %v447_v36 = vadd.f32 %v446_v34, %v445_v32  ;;  %v456_v37 = vrot.slane %v455_v35, 1 }
 0x10b   :  { %449 = vst.msk [vmem:[%s740_s6] sm:$0x1] %vm448_vm6, %v447_v36  ;;  %v457_v38 = vadd.f32 %v456_v37, %v455_v35 }
 0x10d   :  { %458 = vst.msk [vmem:[%s740_s6 + $0x1] sm:$0x1] %vm448_vm6, %v457_v38 }

// kernel: unet_forward.20
= control target key start
LH: loop header
LB: loop body
LE: loop exit
PB: predicated region body
PF: predicated region fallthrough
CT: control target
= control target key end

     0   :  { %v31_v20 = vlaneseq  ;;  %v1228_v48 = vmov 1983009808   ;;  %s1517_s0 = inlined_call_operand.vmem [shape: bf16[2,1,1,9,64], index: 0, kind: input, shape index: {}, may-alias: {0,6}]   ;;  %s1518_s1 = inlined_call_operand.vmem [shape: bf16[2,1024], index: 1, kind: input, shape index: {}]   ;;  %s1519_s2 = inlined_call_operand.vmem [shape: bf16[1024,64], index: 2, kind: input, shape index: {}]   ;;  %s1520_s3 = inlined_call_operand.vmem [shape: f32[1,1024], index: 3, kind: input, shape index: {}]   ;;  %s1521_s4 = inlined_call_operand.vmem [shape: f32[1,1024], index: 4, kind: input, shape index: {}]   ;;  %s1522_s5 = inlined_call_operand.vmem [shape: f32[1,64], index: 5, kind: input, shape index: {}]   ;;  %s1523_s6 = inlined_call_operand.vmem [shape: bf16[2,1,1,9,64], index: 6, kind: output, shape index: {0}, may-alias: {0,6}]   ;;  %s1524_s7 = inlined_call_operand.hbm [shape: f32[2,64], index: 7, kind: output, shape index: {1}]  }
   0x1   :  { %v1140_v0 = vld [vmem:[%s1519_s2 + $0x40] sm:$0xff]   ;;  %v1144_v4 = vld [vmem:[%s1519_s2 + $0x48] sm:$0xff]   ;;  %v1148_v8 = vld [vmem:[%s1519_s2 + $0x50] sm:$0xff]   ;;  %v66_v49 = vunpack.c.l.s4 %v1228_v48 }
   0x2   :  { %v1141_v1 = vld [vmem:[%s1519_s2 + $0xc0] sm:$0xff]   ;;  %1050 = vmatprep.subr.bf16.mxu0 %v1140_v0  ;;  %v1145_v5 = vld [vmem:[%s1519_s2 + $0xc8] sm:$0xff]   ;;  %v1149_v9 = vld [vmem:[%s1519_s2 + $0xd0] sm:$0xff]   ;;  %v1342_v25 = vshrl.u32 %v31_v20, 7 }
   0x3   :  { %v1142_v2 = vld [vmem:[%s1519_s2] sm:$0xff]   ;;  %1072 = vmatprep.subr.bf16.mxu1 %v1141_v1  ;;  %v1146_v6 = vld [vmem:[%s1519_s2 + $0x8] sm:$0xff]   ;;  %v1150_v10 = vld [vmem:[%s1519_s2 + $0x10] sm:$0xff]   ;;  %v67_v59 = vunpack.c.0.s8 %v66_v49 }
   0x4   :  { %v1143_v3 = vld [vmem:[%s1519_s2 + $0x80] sm:$0xff]   ;;  %1051 = vmatpush3.bf16.msra.mxu0 %v1142_v2  ;;  %v1147_v7 = vld [vmem:[%s1519_s2 + $0x88] sm:$0xff]   ;;  %v1151_v11 = vld [vmem:[%s1519_s2 + $0x90] sm:$0xff]   ;;  %v33_v30 = vsub.s32 0, %v1342_v25  ;;  %v37_v32 = vsub.s32 1, %v1342_v25  ;;  %v41_v34 = vsub.s32 2, %v1342_v25 }
   0x5   :  { %1073 = vmatpush3.bf16.msra.mxu1 %v1143_v3  ;;  %1052 = vmatprep.subr.bf16.mxu0 %v1144_v4  ;;  %v1152_v12 = vld [vmem:[%s1519_s2 + $0x58] sm:$0xff]   ;;  %v1156_v16 = vld [vmem:[%s1519_s2 + $0x60] sm:$0xff]   ;;  %v1160_v21 = vld [vmem:[%s1519_s2 + $0x68] sm:$0xff]   ;;  %v45_v36 = vsub.s32 3, %v1342_v25  ;;  %v49_v40 = vsub.s32 4, %v1342_v25  ;;  %v53_v41 = vsub.s32 5, %v1342_v25  ;;  %v1392_v63 = vsub.s32 %v67_v59, %v1342_v25 }
   0x6   :  { %1074 = vmatprep.subr.bf16.mxu1 %v1145_v5  ;;  %v1153_v13 = vld [vmem:[%s1519_s2 + $0xd8] sm:$0xff]   ;;  %v1157_v17 = vld [vmem:[%s1519_s2 + $0xe0] sm:$0xff]   ;;  %v1161_v22 = vld [vmem:[%s1519_s2 + $0xe8] sm:$0xff]   ;;  %v57_v45 = vsub.s32 6, %v1342_v25  ;;  %v61_v56 = vsub.s32 7, %v1342_v25 }
   0x7   :  { %v1154_v14 = vld [vmem:[%s1519_s2 + $0x18] sm:$0xff]   ;;  %v1158_v18 = vld [vmem:[%s1519_s2 + $0x20] sm:$0xff]   ;;  %v1162_v23 = vld [vmem:[%s1519_s2 + $0x28] sm:$0xff]  }
   0x8   :  { %1053 = vmatpush3.bf16.msra.mxu0 %v1146_v6  ;;  %v1155_v15 = vld [vmem:[%s1519_s2 + $0x98] sm:$0xff]   ;;  %v1159_v19 = vld [vmem:[%s1519_s2 + $0xa0] sm:$0xff]   ;;  %v1163_v24 = vld [vmem:[%s1519_s2 + $0xa8] sm:$0xff]  }
   0x9   :  { %1075 = vmatpush3.bf16.msra.mxu1 %v1147_v7  ;;  %1054 = vmatprep.subr.bf16.mxu0 %v1148_v8  ;;  %v1164_v26 = vld [vmem:[%s1519_s2 + $0x70] sm:$0xff]   ;;  %v1168_v31 = vld [vmem:[%s1519_s2 + $0x78] sm:$0xff]   ;;  %v29_v38 = vld [vmem:[%s1520_s3] sm:$0xff] }
   0xa   :  { %1076 = vmatprep.subr.bf16.mxu1 %v1149_v9  ;;  %v1165_v27 = vld [vmem:[%s1519_s2 + $0xf0] sm:$0xff]   ;;  %v1169_v33 = vld [vmem:[%s1519_s2 + $0xf8] sm:$0xff]   ;;  %v101_v39 = vld [vmem:[%s1521_s4] sm:$0xff]  ;;  %v34_v42 = vrot.slane %v29_v38, %v33_v30  ;;  %v38_v43 = vrot.slane %v29_v38, %v37_v32  ;;  %v42_v46 = vrot.slane %v29_v38, %v41_v34  ;;  %v46_v47 = vrot.slane %v29_v38, %v45_v36 }
   0xb   :  { %v1166_v28 = vld [vmem:[%s1519_s2 + $0x30] sm:$0xff]   ;;  %v1170_v35 = vld [vmem:[%s1519_s2 + $0x38] sm:$0xff]   ;;  %v1172_v44 = vld [vmem:[%s1519_s2 + $0x140] sm:$0xff]   ;;  %v106_v50 = vrot.slane %v101_v39, %v33_v30  ;;  %v110_v53 = vrot.slane %v101_v39, %v37_v32  ;;  %v114_v54 = vrot.slane %v101_v39, %v41_v34  ;;  %v118_v55 = vrot.slane %v101_v39, %v45_v36 }
   0xc   :  { %1055 = vmatpush3.bf16.msra.mxu0 %v1150_v10  ;;  %v1167_v29 = vld [vmem:[%s1519_s2 + $0xb0] sm:$0xff]   ;;  %v1171_v37 = vld [vmem:[%s1519_s2 + $0xb8] sm:$0xff]   ;;  %v1173_v51 = vld [vmem:[%s1519_s2 + $0x1c0] sm:$0xff]   ;;  %v63_v57 = vcombine.low %v34_v42, %v38_v43  ;;  %v64_v58 = vcombine.low %v42_v46, %v46_v47  ;;  %v50_v0 = vrot.slane %v29_v38, %v49_v40  ;;  %v54_v1 = vrot.slane %v29_v38, %v53_v41 }
   0xd   :  { %1077 = vmatpush3.bf16.msra.mxu1 %v1151_v11  ;;  %1056 = vmatprep.subr.bf16.mxu0 %v1152_v12  ;;  %v26_v52 = vld [vmem:[%s1518_s1] sm:$0xff]  ;;  %v135_v60 = vcombine.low %v106_v50, %v110_v53  ;;  %v136_v61 = vcombine.low %v114_v54, %v118_v55  ;;  %v58_v2 = vrot.slane %v29_v38, %v57_v45  ;;  %v1177_v42 = vld [vmem:[%s1519_s2 + $0x1c8] sm:$0xff]   ;;  %v1181_v47 = vld [vmem:[%s1519_s2 + $0x1d0] sm:$0xff]  }
   0xe   :  { %1078 = vmatprep.subr.bf16.mxu1 %v1153_v13  ;;  %v27_v62 = vunpack.c.l.bf16 %v26_v52  ;;  %v62_v3 = vrot.slane %v29_v38, %v61_v56  ;;  %v71_v4 = vrot.slane %v63_v57, %v1392_v63  ;;  %v78_v5 = vrot.slane %v64_v58, %v1392_v63  ;;  %v1178_v43 = vld [vmem:[%s1519_s2 + $0x108] sm:$0xff]   ;;  %v1182_v48 = vld [vmem:[%s1519_s2 + $0x110] sm:$0xff]   ;;  %v1184_v49 = vld [vmem:[%s1519_s2 + $0x158] sm:$0xff]  }
   0xf   :  { %v143_v6 = vrot.slane %v135_v60, %v1392_v63  ;;  %v150_v7 = vrot.slane %v136_v61, %v1392_v63  ;;  %v80_v10 = vcombine.low %v50_v0, %v54_v1  ;;  %v122_v12 = vrot.slane %v101_v39, %v49_v40  ;;  %v1179_v46 = vld [vmem:[%s1519_s2 + $0x188] sm:$0xff]   ;;  %v1183_v50 = vld [vmem:[%s1519_s2 + $0x190] sm:$0xff]  }
  0x10   :  { %1057 = vmatpush3.bf16.msra.mxu0 %v1154_v14  ;;  %v79_v8 = vcombine.low %v71_v4, %v78_v5  ;;  %v81_v11 = vcombine.low %v58_v2, %v62_v3  ;;  %v126_v14 = vrot.slane %v101_v39, %v53_v41  ;;  %v1175_v41 = vld [vmem:[%s1519_s2 + $0x180] sm:$0xff]  }
  0x11   :  { %1079 = vmatpush3.bf16.msra.mxu1 %v1155_v15  ;;  %1058 = vmatprep.subr.bf16.mxu0 %v1156_v16  ;;  %v151_v9 = vcombine.low %v143_v6, %v150_v7  ;;  %v130_v15 = vrot.slane %v101_v39, %v57_v45  ;;  %v134_v16 = vrot.slane %v101_v39, %v61_v56 }
  0x12   :  { %1080 = vmatprep.subr.bf16.mxu1 %v1157_v17  ;;  %v99_v13 = vmul.f32 %v79_v8, %v27_v62 }
  0x14   :  { %1059 = vmatpush3.bf16.msra.mxu0 %v1158_v18  ;;  %v171_v17 = vadd.f32 %v151_v9, %v99_v13  ;;  %v88_v18 = vrot.slane %v80_v10, %v1392_v63 }
  0x15   :  { %1081 = vmatpush3.bf16.msra.mxu1 %v1159_v19  ;;  %1060 = vmatprep.subr.bf16.mxu0 %v1160_v21  ;;  %v95_v19 = vrot.slane %v81_v11, %v1392_v63  ;;  %v152_v21 = vcombine.low %v122_v12, %v126_v14 }
  0x16   :  { %1082 = vmatprep.subr.bf16.mxu1 %v1161_v22  ;;  %vm173_vm0 = vcmp.ge.f32.partialorder %v171_v17, 0.0  ;;  %v175_v20 = vmul.f32 0.2, %v171_v17  ;;  %v153_v22 = vcombine.low %v130_v15, %v134_v16 }
  0x18   :  { %1061 = vmatpush3.bf16.msra.mxu0 %v1162_v23  ;;  %v177_v23 = vsel %vm173_vm0, %v171_v17, %v175_v20 }
  0x19   :  { %1083 = vmatpush3.bf16.msra.mxu1 %v1163_v24  ;;  %1062 = vmatprep.subr.bf16.mxu0 %v1164_v26  ;;  %v188_v24 = vrot.slane %v177_v23, %v1392_v63  ;;  %v181_v25 = vcombine.high %v177_v23, %v177_v23  ;;  %v28_v26 = vunpack.c.h.bf16 %v26_v52 }
  0x1a   :  { %1084 = vmatprep.subr.bf16.mxu1 %v1165_v27  ;;  %v96_v27 = vcombine.low %v88_v18, %v95_v19 }
  0x1b   :  { %v196_v30 = vcombine.high %v188_v24, %v188_v24  ;;  %v223_v32 = vpack.c.bf16 %v188_v24, %v188_v24 }
  0x1c   :  { %1063 = vmatpush3.bf16.msra.mxu0 %v1166_v28  ;;  %v160_v28 = vrot.slane %v152_v21, %v1392_v63  ;;  %v100_v38 = vmul.f32 %v96_v27, %v28_v26 }
  0x1d   :  { %1085 = vmatpush3.bf16.msra.mxu1 %v1167_v29  ;;  %1064 = vmatprep.subr.bf16.mxu0 %v1168_v31  ;;  %v167_v29 = vrot.slane %v153_v22, %v1392_v63  ;;  %v195_v31 = vrot.slane %v181_v25, %v1392_v63 }
  0x1e   :  { %1086 = vmatprep.subr.bf16.mxu1 %v1169_v33  ;;  %v224_v33 = vpack.c.bf16 %v196_v30, %v196_v30 }
  0x1f   :  { %v197_v34 = vcombine.high %v195_v31, %v195_v31  ;;  %v225_v36 = vpack.c.bf16 %v195_v31, %v195_v31  ;;  %v168_v39 = vcombine.low %v160_v28, %v167_v29 }
  0x20   :  { %1065 = vmatpush3.bf16.msra.mxu0 %v1170_v35  ;;  %v1174_v35 = vld [vmem:[%s1519_s2 + $0x100] sm:$0xff]   ;;  %782 = vmatprep.mubr.bf16.mxu0 %v224_v33 }
  0x21   :  { %1087 = vmatpush3.bf16.msra.mxu1 %v1171_v37  ;;  %1094 = vmatprep.subr.bf16.mxu0 %v1172_v44  ;;  %v1176_v37 = vld [vmem:[%s1519_s2 + $0x148] sm:$0xff]   ;;  %v226_v40 = vpack.c.bf16 %v197_v34, %v197_v34  ;;  %v1180_v44 = vld [vmem:[%s1519_s2 + $0x150] sm:$0xff]   ;;  %v172_v45 = vadd.f32 %v168_v39, %v100_v38 }
  0x22   :  { %1116 = vmatprep.subr.bf16.mxu1 %v1173_v51 }
  0x23   :  { %783 = vmatmul.mubr.bf16.vlgmr.msra.gmra.mrb[0].mxu0 %v223_v32  ;;  %822 = vmatprep.mubr.bf16.mxu1 %v226_v40  ;;  %vm174_vm1 = vcmp.ge.f32.partialorder %v172_v45, 0.0  ;;  %v176_v51 = vmul.f32 0.2, %v172_v45 }
  0x24   :  { %1095 = vmatpush3.bf16.msra.mxu0 %v1174_v35  ;;  %823 = vmatmul.mubr.bf16.vlgmr.msra.gmra.mrb[0].mxu1 %v225_v36 }
  0x25   :  { %1096 = vmatprep.subr.bf16.mxu0 %v1176_v37  ;;  %1117 = vmatpush3.bf16.msra.mxu1 %v1175_v41 }
  0x26   :  { %1118 = vmatprep.subr.bf16.mxu1 %v1177_v42 }
  0x28   :  { %1097 = vmatpush3.bf16.msra.mxu0 %v1178_v43 }
  0x29   :  { %1098 = vmatprep.subr.bf16.mxu0 %v1180_v44  ;;  %1119 = vmatpush3.bf16.msra.mxu1 %v1179_v46 }
  0x2a   :  { %14 = vsyncpa [#allocation4], 0  ;;  %1120 = vmatprep.subr.bf16.mxu1 %v1181_v47  ;;  %v1185_v52 = vld [vmem:[%s1519_s2 + $0x1d8] sm:$0xff]   ;;  %v178_v54 = vsel %vm174_vm1, %v172_v45, %v176_v51  ;;  %v1188_v55 = vld [vmem:[%s1519_s2 + $0x160] sm:$0xff]   ;;  %vm910_vm2 = vcmask 517120   ;;  %vm918_vm3 = vcmask 516096  }
  0x2b   :  { %v1186_v53 = vld [vmem:[%s1519_s2 + $0x118] sm:$0xff]   ;;  %v205_v56 = vrot.slane %v178_v54, %v1392_v63  ;;  %v198_v57 = vcombine.high %v178_v54, %v178_v54  ;;  %v1189_v59 = vld [vmem:[%s1519_s2 + $0x1e0] sm:$0xff]   ;;  %v1192_v0 = vld [vmem:[%s1519_s2 + $0x168] sm:$0xff]   ;;  %s1229_s30 = smov [#allocation3]  }
  0x2c   :  { %1099 = vmatpush3.bf16.msra.mxu0 %v1182_v48  ;;  %v1187_v58 = vld [vmem:[%s1519_s2 + $0x198] sm:$0xff]   ;;  %v1190_v62 = vld [vmem:[%s1519_s2 + $0x120] sm:$0xff]   ;;  %v1194_v5 = vld [vmem:[%s1519_s2 + $0x128] sm:$0xff]   ;;  %s970_s8 = sshll.u32 %s1229_s30, 4  ;;  %s971_s8 = int_to_ptr.vmem [resolvable:$true] %s970_s8 }
  0x2d   :  { %1100 = vmatprep.subr.bf16.mxu0 %v1184_v49  ;;  %1121 = vmatpush3.bf16.msra.mxu1 %v1183_v50  ;;  %v213_v60 = vcombine.high %v205_v56, %v205_v56  ;;  %v212_v61 = vrot.slane %v198_v57, %v1392_v63  ;;  %v1191_v3 = vld [vmem:[%s1519_s2 + $0x1a0] sm:$0xff]   ;;  %v1193_v63 = vld [vmem:[%s1519_s2 + $0x1e8] sm:$0xff]   ;;  %v1196_v6 = vld [vmem:[%s1519_s2 + $0x170] sm:$0xff]   ;;  %v227_v15 = vpack.c.bf16 %v205_v56, %v205_v56  ;;  %s1204_s9 = scalar_lea.vmem %s971_s8, 32  ;;  %p1209_p1 = scmp.lt.s32.totalorder %s971_s8, %s971_s8 }
  0x2e   :  { %1122 = vmatprep.subr.bf16.mxu1 %v1185_v52  ;;  %v1195_v7 = vld [vmem:[%s1519_s2 + $0x1a8] sm:$0xff]   ;;  %v1197_v8 = vld [vmem:[%s1519_s2 + $0x1f0] sm:$0xff]   ;;  %v1200_v10 = vld [vmem:[%s1519_s2 + $0x178] sm:$0xff]   ;;  %p1205_p0 = scmp.ne.s32.totalorder %s971_s8, %s1204_s9  ;;  %p1210_p2 = scmp.lt.s32.totalorder %s1204_s9, %s1204_s9 }
  0x2f   :  { %v228_v1 = vpack.c.bf16 %v213_v60, %v213_v60  ;;  %v214_v2 = vcombine.high %v212_v61, %v212_v61  ;;  %v1198_v9 = vld [vmem:[%s1519_s2 + $0x130] sm:$0xff]   ;;  %v1201_v12 = vld [vmem:[%s1519_s2 + $0x1f8] sm:$0xff]   ;;  %v229_v16 = vpack.c.bf16 %v212_v61, %v212_v61  ;;  %v984_v18 = vld [vmem:[%s1522_s5] ss:$0 sm:$0xff] }
  0x30   :  { %1101 = vmatpush3.bf16.msra.mxu0 %v1186_v53  ;;  %v1199_v11 = vld [vmem:[%s1519_s2 + $0x1b0] sm:$0xff]   ;;  %v1202_v13 = vld [vmem:[%s1519_s2 + $0x138] sm:$0xff]   ;;  %p1211_p3 = por %p1210_p2, %p1209_p1 }
  0x31   :  { %1102 = vmatprep.subr.bf16.mxu0 %v1188_v55  ;;  %1123 = vmatpush3.bf16.msra.mxu1 %v1187_v58  ;;  %v230_v4 = vpack.c.bf16 %v214_v2, %v214_v2  ;;  %v1203_v14 = vld [vmem:[%s1519_s2 + $0x1b8] sm:$0xff]  }
  0x32   :  { %1124 = vmatprep.subr.bf16.mxu1 %v1189_v59  ;;  %862 = vmatprep.mubr.bf16.mxu0 %v228_v1  ;;  %p1212_p4 = pnand %p1211_p3, %p1205_p0 }
  0x33   :  { %902 = vmatprep.mubr.bf16.mxu1 %v230_v4 }
  0x34   :  { %1103 = vmatpush3.bf16.msra.mxu0 %v1190_v62 }
  0x35   :  { %1104 = vmatprep.subr.bf16.mxu0 %v1192_v0  ;;  %1125 = vmatpush3.bf16.msra.mxu1 %v1191_v3 }
  0x36   :  { %1126 = vmatprep.subr.bf16.mxu1 %v1193_v63 }
  0x38   :  { %1105 = vmatpush3.bf16.msra.mxu0 %v1194_v5 }
  0x39   :  { %1106 = vmatprep.subr.bf16.mxu0 %v1196_v6  ;;  %1127 = vmatpush3.bf16.msra.mxu1 %v1195_v7 }
  0x3a   :  { %1128 = vmatprep.subr.bf16.mxu1 %v1197_v8 }
  0x3c   :  { %1107 = vmatpush3.bf16.msra.mxu0 %v1198_v9 }
  0x3d   :  { %1108 = vmatprep.subr.bf16.mxu0 %v1200_v10  ;;  %1129 = vmatpush3.bf16.msra.mxu1 %v1199_v11 }
  0x3e   :  { %1130 = vmatprep.subr.bf16.mxu1 %v1201_v12 }
  0x40   :  { %1109 = vmatpush3.bf16.msra.mxu0 %v1202_v13 }
  0x41   :  { %1131 = vmatpush3.bf16.msra.mxu1 %v1203_v14 }
  0x43   :  { %863 = vmatmul.mubr.bf16.vlgmr.msra.gmra.mrb[4].mxu0 %v227_v15 }
  0x44   :  { %903 = vmatmul.mubr.bf16.vlgmr.msra.gmra.mrb[4].mxu1 %v229_v16 }
  0xf6   :  { %v1066_v17 = vpop.f32.mrb[0].mxu0 }
  0xf7   :  { %v1067_v19 = vpop.f32.mrb[1].mxu0  ;;  %v1088_v20 = vpop.f32.mrb[0].mxu1 }
  0xf8   :  { %v1068_v21 = vadd.f32 %v1067_v19, %v1066_v17  ;;  %v1069_v22 = vpop.f32.mrb[2].mxu0  ;;  %v1089_v23 = vpop.f32.mrb[1].mxu1 }
  0xf9   :  { %v1070_v24 = vpop.f32.mrb[3].mxu0  ;;  %v1090_v26 = vadd.f32 %v1089_v23, %v1088_v20  ;;  %v1091_v27 = vpop.f32.mrb[2].mxu1 }
  0xfa   :  { %v785_v25 = vadd.f32 %v1068_v21, %v984_v18  ;;  %v1092_v28 = vpop.f32.mrb[3].mxu1 }
  0xfc   :  { %v825_v29 = vadd.f32 %v1090_v26, %v785_v25 }
 0x116   :  { %v1110_v30 = vpop.f32.mrb[4].mxu0 }
 0x117   :  { %v1111_v31 = vpop.f32.mrb[5].mxu0  ;;  %v1132_v32 = vpop.f32.mrb[4].mxu1 }
 0x118   :  { %v1112_v33 = vadd.f32 %v1111_v31, %v1110_v30  ;;  %v1113_v34 = vpop.f32.mrb[6].mxu0  ;;  %v1133_v35 = vpop.f32.mrb[5].mxu1 }
 0x119   :  { %v1114_v36 = vpop.f32.mrb[7].mxu0  ;;  %v1134_v38 = vadd.f32 %v1133_v35, %v1132_v32  ;;  %v1135_v39 = vpop.f32.mrb[6].mxu1 }
 0x11a   :  { %v865_v37 = vadd.f32 %v1112_v33, %v825_v29  ;;  %v1136_v40 = vpop.f32.mrb[7].mxu1 }
 0x11c   :  { %v905_v41 = vadd.f32 %v1134_v38, %v865_v37 }
 0x11e   :  { %v911_v42 = vsel %vm910_vm2, %v905_v41, 0.0  ;;  %v920_v43 = vmul.f32 %v905_v41, %v905_v41  ;;  %v929_v44 = vpack.c.bf16 %v905_v41, %v905_v41 }
 0x11f   :  { %v912_v45 = vrot.slane %v911_v42, 4 }
 0x120   :  { %v921_v46 = vsel %vm910_vm2, %v920_v43, 0.0  ;;  %930 = vst.msk [vmem:[#allocation2] sm:$0x1] %vm918_vm3, %v929_v44 }
 0x121   :  { %v913_v47 = vadd.f32 %v912_v45, %v911_v42  ;;  %v922_v48 = vrot.slane %v921_v46, 4 }
 0x123   :  { %v914_v49 = vrot.slane %v913_v47, 2  ;;  %v923_v50 = vadd.f32 %v922_v48, %v921_v46 }
 0x125   :  { %v915_v51 = vadd.f32 %v914_v49, %v913_v47  ;;  %v924_v52 = vrot.slane %v923_v50, 2 }
 0x127   :  { %v916_v53 = vrot.slane %v915_v51, 1  ;;  %v925_v54 = vadd.f32 %v924_v52, %v923_v50  ;;  %v948_v55 = vld [vmem:[#allocation2] sm:$0x1] }
 0x128   :  { %1049 = vst [vmem:[%s1523_s6 + $0x4] sm:$0x1] %v948_v55 }
 0x129   :  { %v917_v56 = vadd.f32 %v916_v53, %v915_v51  ;;  %v926_v57 = vrot.slane %v925_v54, 1 }
 0x12b   :  { %919 = vst.msk [vmem:[#allocation3] sm:$0x1] %vm918_vm3, %v917_v56  ;;  %v927_v58 = vadd.f32 %v926_v57, %v925_v54 }
 0x12d   :  { %928 = vst.msk [vmem:[#allocation3 + $0x1] sm:$0x1] %vm918_vm3, %v927_v58 }
 0x12e   :  { %1215 = shalt.err (!%p1212_p4)
}
 0x12f   :  { %s1216_s6 = scalar_lea.hbm %s1524_s7, 32 }
 0x130   :  { %p1217_p5 = scmp.ne.s32.totalorder %s1524_s7, %s1216_s6  ;;  %p1220_p6 = scmp.lt.u32.totalorder %s1216_s6, %s1524_s7 }
 0x132   :  { %p1222_p7 = pnand %p1220_p6, %p1217_p5 }
 0x134   :  { %1225 = shalt.err (!%p1222_p7)
}
 0x135   :  { %973 = dma.vmem_to_hbm [thread:$0]  %s971_s8, 32, %s1524_s7, [#allocation4]  }
 0x136   :  { %1226 = dma.done.wait [#allocation4], 32  }
 0x137   :  { %1227 = vsyncadd [#allocation4], 4294967264 }
 0x138   :  { %979 = vsyncpa [#allocation4], 1 }

// kernel: tile.80
= control target key start
LH: loop header
LB: loop body
LE: loop exit
PB: predicated region body
PF: predicated region fallthrough
CT: control target
= control target key end

     0   :  { %s44_s0 = inlined_call_operand.<no memory space> [shape: f32[], index: 0, kind: input, shape index: {}]   ;;  %s45_s1 = inlined_call_operand.vmem [shape: f32[1,576], index: 1, kind: output, shape index: {}]  }
   0x1   :  { %v2_v0 = vstv %s44_s0 }
   0x2   :  { %3 = vst [vmem:[%s45_s1] sm:$0x1] %v2_v0  ;;  %12 = vst [vmem:[%s45_s1 + $0x1] sm:$0x1] %v2_v0 }
   0x3   :  { %13 = vst [vmem:[%s45_s1 + $0x2] sm:$0x1] %v2_v0  ;;  %14 = vst [vmem:[%s45_s1 + $0x3] sm:$0x1] %v2_v0 }
   0x4   :  { %15 = vst [vmem:[%s45_s1 + $0x4] sm:$0x1] %v2_v0 }

// kernel: unet_forward.15
= control target key start
LH: loop header
LB: loop body
LE: loop exit
PB: predicated region body
PF: predicated region fallthrough
CT: control target
= control target key end

     0   :  { %v28_v32 = vlaneseq  ;;  %v1033_v38 = vmov 1983009808   ;;  %vm608_vm0 = vcmask 523264   ;;  %vm735_vm1 = vcmask 1041408   ;;  %s1355_s1 = inlined_call_operand.vmem [shape: bf16[576,256], index: 1, kind: input, shape index: {}]   ;;  %s1356_s2 = inlined_call_operand.vmem [shape: f32[1,576], index: 2, kind: input, shape index: {}]   ;;  %s1357_s3 = inlined_call_operand.vmem [shape: f32[1,576], index: 3, kind: input, shape index: {}]   ;;  %s1358_s0 = inlined_call_operand.vmem [shape: bf16[2,576], index: 0, kind: input, shape index: {}]   ;;  %s1359_s4 = inlined_call_operand.vmem [shape: f32[1,256], index: 4, kind: input, shape index: {}]   ;;  %s1360_s5 = inlined_call_operand.vmem [shape: bf16[2,256], index: 5, kind: output, shape index: {0}]   ;;  %s1361_s6 = inlined_call_operand.vmem [shape: f32[2,256], index: 6, kind: output, shape index: {1}]  }
   0x1   :  { %v925_v0 = vld [vmem:[%s1355_s1 + $0x104] ss:$8 sps:$4 sm:$0xff]   ;;  %v927_v1 = vld [vmem:[%s1355_s1 + $0x100] ss:$8 sps:$4 sm:$0xff]   ;;  %v928_v2 = vld [vmem:[%s1355_s1 + $0x114] ss:$8 sps:$4 sm:$0xff]   ;;  %v51_v39 = vunpack.c.l.s4 %v1033_v38 }
   0x2   :  { %653 = vmatprep.subr.bf16.mxu0 %v925_v0  ;;  %v930_v3 = vld [vmem:[%s1355_s1 + $0x110] ss:$8 sps:$4 sm:$0xff]   ;;  %v931_v4 = vld [vmem:[%s1355_s1 + $0x124] ss:$8 sps:$4 sm:$0xff]   ;;  %v936_v6 = vld [vmem:[%s1355_s1] ss:$8 sps:$4 sm:$0xff]  }
   0x3   :  { %654 = vmatpush1.bf16.msra.mxu0 %v927_v1  ;;  %v934_v5 = vld [vmem:[%s1355_s1 + $0x4] ss:$8 sps:$4 sm:$0xff]   ;;  %v933_v7 = vld [vmem:[%s1355_s1 + $0x120] ss:$8 sps:$4 sm:$0xff]   ;;  %v940_v8 = vld [vmem:[%s1355_s1 + $0x14] ss:$8 sps:$4 sm:$0xff]   ;;  %v52_v46 = vunpack.c.0.s8 %v51_v39 }
   0x4   :  { %655 = vmatprep.subr.bf16.mxu0 %v928_v2  ;;  %612 = vmatprep.subr.bf16.mxu1 %v934_v5  ;;  %v942_v9 = vld [vmem:[%s1355_s1 + $0x10] ss:$8 sps:$4 sm:$0xff]   ;;  %v937_v10 = vld [vmem:[%s1355_s1 + $0x134] ss:$8 sps:$4 sm:$0xff]   ;;  %v946_v12 = vld [vmem:[%s1355_s1 + $0x24] ss:$8 sps:$4 sm:$0xff]  }
   0x5   :  { %613 = vmatpush1.bf16.msra.mxu1 %v936_v6  ;;  %v939_v11 = vld [vmem:[%s1355_s1 + $0x130] ss:$8 sps:$4 sm:$0xff]   ;;  %v943_v13 = vld [vmem:[%s1355_s1 + $0x144] ss:$8 sps:$4 sm:$0xff]   ;;  %v948_v14 = vld [vmem:[%s1355_s1 + $0x20] ss:$8 sps:$4 sm:$0xff]  }
   0x6   :  { %614 = vmatprep.subr.bf16.mxu1 %v940_v8  ;;  %v952_v15 = vld [vmem:[%s1355_s1 + $0x34] ss:$8 sps:$4 sm:$0xff]   ;;  %v945_v16 = vld [vmem:[%s1355_s1 + $0x140] ss:$8 sps:$4 sm:$0xff]   ;;  %v954_v18 = vld [vmem:[%s1355_s1 + $0x30] ss:$8 sps:$4 sm:$0xff]  }
   0x7   :  { %656 = vmatpush1.bf16.msra.mxu0 %v930_v3  ;;  %v949_v17 = vld [vmem:[%s1355_s1 + $0x154] ss:$8 sps:$4 sm:$0xff]   ;;  %v958_v19 = vld [vmem:[%s1355_s1 + $0x44] ss:$8 sps:$4 sm:$0xff]   ;;  %v951_v20 = vld [vmem:[%s1355_s1 + $0x150] ss:$8 sps:$4 sm:$0xff]  }
   0x8   :  { %657 = vmatprep.subr.bf16.mxu0 %v931_v4  ;;  %v955_v21 = vld [vmem:[%s1355_s1 + $0x164] ss:$8 sps:$4 sm:$0xff]   ;;  %v960_v22 = vld [vmem:[%s1355_s1 + $0x40] ss:$8 sps:$4 sm:$0xff]   ;;  %v964_v23 = vld [vmem:[%s1355_s1 + $0x54] ss:$8 sps:$4 sm:$0xff]  }
   0x9   :  { %615 = vmatpush1.bf16.msra.mxu1 %v942_v9  ;;  %v957_v24 = vld [vmem:[%s1355_s1 + $0x160] ss:$8 sps:$4 sm:$0xff]   ;;  %v961_v25 = vld [vmem:[%s1355_s1 + $0x174] ss:$8 sps:$4 sm:$0xff]   ;;  %v966_v26 = vld [vmem:[%s1355_s1 + $0x50] ss:$8 sps:$4 sm:$0xff]  }
   0xa   :  { %616 = vmatprep.subr.bf16.mxu1 %v946_v12  ;;  %v970_v27 = vld [vmem:[%s1355_s1 + $0x64] ss:$8 sps:$4 sm:$0xff]   ;;  %v963_v28 = vld [vmem:[%s1355_s1 + $0x170] ss:$8 sps:$4 sm:$0xff]   ;;  %v972_v30 = vld [vmem:[%s1355_s1 + $0x60] ss:$8 sps:$4 sm:$0xff]  }
   0xb   :  { %658 = vmatpush1.bf16.msra.mxu0 %v933_v7  ;;  %v967_v29 = vld [vmem:[%s1355_s1 + $0x184] ss:$8 sps:$4 sm:$0xff]   ;;  %v976_v31 = vld [vmem:[%s1355_s1 + $0x74] ss:$8 sps:$4 sm:$0xff]   ;;  %v969_v33 = vld [vmem:[%s1355_s1 + $0x180] ss:$8 sps:$4 sm:$0xff]  }
   0xc   :  { %659 = vmatprep.subr.bf16.mxu0 %v937_v10  ;;  %v973_v34 = vld [vmem:[%s1355_s1 + $0x194] ss:$8 sps:$4 sm:$0xff]   ;;  %v978_v35 = vld [vmem:[%s1355_s1 + $0x70] ss:$8 sps:$4 sm:$0xff]   ;;  %v982_v36 = vld [vmem:[%s1355_s1 + $0x84] ss:$8 sps:$4 sm:$0xff]  }
   0xd   :  { %617 = vmatpush1.bf16.msra.mxu1 %v948_v14  ;;  %v1180_v37 = vshrl.u32 %v28_v32, 7  ;;  %v975_v40 = vld [vmem:[%s1355_s1 + $0x190] ss:$8 sps:$4 sm:$0xff]   ;;  %v979_v41 = vld [vmem:[%s1355_s1 + $0x1a4] ss:$8 sps:$4 sm:$0xff]   ;;  %vm770_vm2 = vcmp.lt.s32.totalorder %v28_v32, 256 }
   0xe   :  { %618 = vmatprep.subr.bf16.mxu1 %v952_v15  ;;  %v984_v42 = vld [vmem:[%s1355_s1 + $0x80] ss:$8 sps:$4 sm:$0xff]   ;;  %v988_v43 = vld [vmem:[%s1355_s1 + $0x94] ss:$8 sps:$4 sm:$0xff]   ;;  %v990_v51 = vld [vmem:[%s1355_s1 + $0x90] ss:$8 sps:$4 sm:$0xff]  }
   0xf   :  { %660 = vmatpush1.bf16.msra.mxu0 %v939_v11  ;;  %v1195_v44 = vsub.s32 0, %v1180_v37  ;;  %v1198_v45 = vsub.s32 1, %v1180_v37  ;;  %v981_v47 = vld [vmem:[%s1355_s1 + $0x1a0] ss:$8 sps:$4 sm:$0xff]   ;;  %v38_v48 = vsub.s32 2, %v1180_v37  ;;  %v42_v49 = vsub.s32 3, %v1180_v37 }
  0x10   :  { %661 = vmatprep.subr.bf16.mxu0 %v943_v13  ;;  %v985_v50 = vld [vmem:[%s1355_s1 + $0x1b4] ss:$8 sps:$4 sm:$0xff]   ;;  %v994_v52 = vld [vmem:[%s1355_s1 + $0xa4] ss:$8 sps:$4 sm:$0xff]   ;;  %v1225_v57 = vsub.s32 %v52_v46, %v1180_v37  ;;  %v987_v58 = vld [vmem:[%s1355_s1 + $0x1b0] ss:$8 sps:$4 sm:$0xff]  }
  0x11   :  { %619 = vmatpush1.bf16.msra.mxu1 %v954_v18  ;;  %v26_v53 = vld [vmem:[%s1356_s2] sm:$0x1f]  ;;  %v1000_v4 = vld [vmem:[%s1355_s1 + $0xb4] ss:$8 sps:$4 sm:$0xff]   ;;  %v1002_v13 = vld [vmem:[%s1355_s1 + $0xb0] ss:$8 sps:$4 sm:$0xff]  }
  0x12   :  { %620 = vmatprep.subr.bf16.mxu1 %v958_v19  ;;  %v1220_v54 = vld [vmem:[%s1357_s3] sm:$0x1f]  ;;  %v31_v55 = vrot.slane %v26_v53, %v1195_v44  ;;  %v35_v56 = vrot.slane %v26_v53, %v1198_v45  ;;  %v39_v59 = vrot.slane %v26_v53, %v38_v48  ;;  %v43_v60 = vrot.slane %v26_v53, %v42_v49  ;;  %v997_v15 = vld [vmem:[%s1355_s1 + $0x1d4] ss:$8 sps:$4 sm:$0xff]  }
  0x13   :  { %662 = vmatpush1.bf16.msra.mxu0 %v945_v16  ;;  %v81_v61 = vrot.slane %v1220_v54, %v1195_v44  ;;  %v996_v62 = vld [vmem:[%s1355_s1 + $0xa0] ss:$8 sps:$4 sm:$0xff]   ;;  %v85_v1 = vrot.slane %v1220_v54, %v1198_v45  ;;  %v89_v2 = vrot.slane %v1220_v54, %v38_v48  ;;  %v991_v3 = vld [vmem:[%s1355_s1 + $0x1c4] ss:$8 sps:$4 sm:$0xff]   ;;  %v93_v6 = vrot.slane %v1220_v54, %v42_v49  ;;  %v1024_v49 = vld [vmem:[%s1355_s1 + $0xf4] ss:$8 sps:$4 sm:$0xff]  }
  0x14   :  { %663 = vmatprep.subr.bf16.mxu0 %v949_v17  ;;  %v1238_v63 = vld [vmem:[%s1358_s0] sm:$0x1f]  ;;  %v48_v0 = vcombine.low %v31_v55, %v35_v56  ;;  %v49_v5 = vcombine.low %v39_v59, %v43_v60  ;;  %v46_v19 = vsub.s32 4, %v1180_v37  ;;  %v1026_v55 = vld [vmem:[%s1355_s1 + $0xf0] ss:$8 sps:$4 sm:$0xff]  }
  0x15   :  { %621 = vmatpush1.bf16.msra.mxu1 %v960_v22  ;;  %v98_v8 = vcombine.low %v81_v61, %v85_v1  ;;  %v24_v9 = vunpack.c.l.bf16 %v1238_v63  ;;  %v99_v11 = vcombine.low %v89_v2, %v93_v6  ;;  %v993_v12 = vld [vmem:[%s1355_s1 + $0x1c0] ss:$8 sps:$4 sm:$0xff]   ;;  %v1006_v16 = vld [vmem:[%s1355_s1 + $0xc4] ss:$8 sps:$4 sm:$0xff]   ;;  %v999_v22 = vld [vmem:[%s1355_s1 + $0x1d0] ss:$8 sps:$4 sm:$0xff]  }
  0x16   :  { %622 = vmatprep.subr.bf16.mxu1 %v964_v23  ;;  %v56_v7 = vrot.slane %v48_v0, %v1225_v57  ;;  %v63_v10 = vrot.slane %v49_v5, %v1225_v57  ;;  %v1008_v23 = vld [vmem:[%s1355_s1 + $0xc0] ss:$8 sps:$4 sm:$0xff]   ;;  %v1023_v56 = vld [vmem:[%s1355_s1 + $0x214] ss:$8 sps:$4 sm:$0xff]   ;;  %v1021_v60 = vld [vmem:[%s1355_s1 + $0x210] ss:$8 sps:$4 sm:$0xff]  }
  0x17   :  { %664 = vmatpush1.bf16.msra.mxu0 %v951_v20  ;;  %v106_v14 = vrot.slane %v98_v8, %v1225_v57  ;;  %v113_v18 = vrot.slane %v99_v11, %v1225_v57  ;;  %v1029_v61 = vld [vmem:[%s1355_s1 + $0x224] ss:$8 sps:$4 sm:$0xff]   ;;  %v1027_v0 = vld [vmem:[%s1355_s1 + $0x220] ss:$8 sps:$4 sm:$0xff]   ;;  %v1032_v1 = vld [vmem:[%s1355_s1 + $0x234] ss:$8 sps:$4 sm:$0xff]  }
  0x18   :  { %665 = vmatprep.subr.bf16.mxu0 %v955_v21  ;;  %v64_v17 = vcombine.low %v56_v7, %v63_v10  ;;  %v236_v5 = vld [vmem:[%s1359_s4] sm:$0x3] }
  0x19   :  { %623 = vmatpush1.bf16.msra.mxu1 %v966_v26  ;;  %v114_v21 = vcombine.low %v106_v14, %v113_v18  ;;  %v241_v6 = vrot.slane %v236_v5, %v1195_v44  ;;  %v245_v11 = vrot.slane %v236_v5, %v1198_v45 }
  0x1a   :  { %624 = vmatprep.subr.bf16.mxu1 %v970_v27  ;;  %v74_v20 = vmul.f32 %v64_v17, %v24_v9  ;;  %v47_v27 = vrot.slane %v26_v53, %v46_v19 }
  0x1b   :  { %666 = vmatpush1.bf16.msra.mxu0 %v957_v24  ;;  %v1003_v24 = vld [vmem:[%s1355_s1 + $0x1e4] ss:$8 sps:$4 sm:$0xff]  }
  0x1c   :  { %667 = vmatprep.subr.bf16.mxu0 %v961_v25  ;;  %v1012_v25 = vld [vmem:[%s1355_s1 + $0xd4] ss:$8 sps:$4 sm:$0xff]   ;;  %v124_v26 = vadd.f32 %v114_v21, %v74_v20  ;;  %v71_v38 = vrot.slane %v47_v27, %v1225_v57 }
  0x1d   :  { %625 = vmatpush1.bf16.msra.mxu1 %v972_v30  ;;  %v1014_v30 = vld [vmem:[%s1355_s1 + $0xd0] ss:$8 sps:$4 sm:$0xff]  }
  0x1e   :  { %626 = vmatprep.subr.bf16.mxu1 %v976_v31  ;;  %v1009_v31 = vld [vmem:[%s1355_s1 + $0x1f4] ss:$8 sps:$4 sm:$0xff]  }
  0x1f   :  { %668 = vmatpush1.bf16.msra.mxu0 %v963_v28  ;;  %v126_v28 = vmax.f32 %v124_v26, 0.0 }
  0x20   :  { %669 = vmatprep.subr.bf16.mxu0 %v967_v29  ;;  %v1005_v29 = vld [vmem:[%s1355_s1 + $0x1e0] ss:$8 sps:$4 sm:$0xff]  }
  0x21   :  { %627 = vmatpush1.bf16.msra.mxu1 %v978_v35  ;;  %v137_v35 = vrot.slane %v126_v28, %v1225_v57 }
  0x22   :  { %628 = vmatprep.subr.bf16.mxu1 %v982_v36  ;;  %v25_v36 = vunpack.c.h.bf16 %v1238_v63 }
  0x23   :  { %670 = vmatpush1.bf16.msra.mxu0 %v969_v33  ;;  %v130_v33 = vcombine.high %v126_v28, %v126_v28 }
  0x24   :  { %671 = vmatprep.subr.bf16.mxu0 %v973_v34  ;;  %v1018_v34 = vld [vmem:[%s1355_s1 + $0xe4] ss:$8 sps:$4 sm:$0xff]  }
  0x25   :  { %629 = vmatpush1.bf16.msra.mxu1 %v984_v42  ;;  %v144_v39 = vrot.slane %v130_v33, %v1225_v57  ;;  %v1011_v42 = vld [vmem:[%s1355_s1 + $0x1f0] ss:$8 sps:$4 sm:$0xff]  }
  0x26   :  { %630 = vmatprep.subr.bf16.mxu1 %v988_v43  ;;  %v1020_v43 = vld [vmem:[%s1355_s1 + $0xe0] ss:$8 sps:$4 sm:$0xff]  }
  0x27   :  { %672 = vmatpush1.bf16.msra.mxu0 %v975_v40  ;;  %v145_v40 = vcombine.high %v137_v35, %v137_v35  ;;  %v146_v46 = vcombine.high %v144_v39, %v144_v39 }
  0x28   :  { %673 = vmatprep.subr.bf16.mxu0 %v979_v41  ;;  %v97_v41 = vrot.slane %v1220_v54, %v46_v19  ;;  %v1015_v54 = vld [vmem:[%s1355_s1 + $0x200] ss:$8 sps:$4 sm:$0xff]  }
  0x29   :  { %631 = vmatpush1.bf16.msra.mxu1 %v990_v51  ;;  %v160_v48 = vpack.c.bf16 %v145_v40, %v145_v40  ;;  %v162_v51 = vpack.c.bf16 %v146_v46, %v146_v46 }
  0x2a   :  { %632 = vmatprep.subr.bf16.mxu1 %v994_v52  ;;  %v161_v52 = vpack.c.bf16 %v144_v39, %v144_v39  ;;  %v121_v53 = vrot.slane %v97_v41, %v1225_v57 }
  0x2b   :  { %674 = vmatpush1.bf16.msra.mxu0 %v981_v47  ;;  %v1017_v47 = vld [vmem:[%s1355_s1 + $0x204] ss:$8 sps:$4 sm:$0xff]   ;;  %644 = vmatprep.mubr.bf16.mxu1 %v160_v48 }
  0x2c   :  { %675 = vmatprep.subr.bf16.mxu0 %v985_v50  ;;  %v75_v50 = vmul.f32 %v71_v38, %v25_v36  ;;  %685 = vmatprep.mubr.bf16.mxu0 %v162_v51 }
  0x2d   :  { %633 = vmatpush1.bf16.msra.mxu1 %v996_v62  ;;  %v1034_v62 = vmov 0  }
  0x2e   :  { %634 = vmatprep.subr.bf16.mxu1 %v1000_v4  ;;  %v125_v59 = vadd.f32 %v121_v53, %v75_v50 }
  0x2f   :  { %676 = vmatpush1.bf16.msra.mxu0 %v987_v58  ;;  %v159_v58 = vpack.c.bf16 %v137_v35, %v137_v35 }
  0x30   :  { %677 = vmatprep.subr.bf16.mxu0 %v991_v3  ;;  %v127_v63 = vmax.f32 %v125_v59, 0.0  ;;  %v1030_v3 = vld [vmem:[%s1355_s1 + $0x230] ss:$8 sps:$4 sm:$0xff]  }
  0x31   :  { %635 = vmatpush1.bf16.msra.mxu1 %v1002_v13 }
  0x32   :  { %636 = vmatprep.subr.bf16.mxu1 %v1006_v16  ;;  %v153_v2 = vrot.slane %v127_v63, %v1225_v57 }
  0x33   :  { %678 = vmatpush1.bf16.msra.mxu0 %v993_v12  ;;  %v1035_v12 = vmov 1966171168  }
  0x34   :  { %679 = vmatprep.subr.bf16.mxu0 %v997_v15  ;;  %v163_v4 = vpack.c.bf16 %v153_v2, %v153_v2  ;;  %v754_v13 = vunpack.c.l.s4 %v1035_v12 }
  0x35   :  { %637 = vmatpush1.bf16.msra.mxu1 %v1008_v23 }
  0x36   :  { %638 = vmatprep.subr.bf16.mxu1 %v1012_v25  ;;  %v755_v15 = vunpack.c.0.s8 %v754_v13 }
  0x37   :  { %680 = vmatpush1.bf16.msra.mxu0 %v999_v22 }
  0x38   :  { %681 = vmatprep.subr.bf16.mxu0 %v1003_v24  ;;  %v758_v20 = vsub.s32 %v755_v15, %v1180_v37 }
  0x39   :  { %639 = vmatpush1.bf16.msra.mxu1 %v1014_v30 }
  0x3a   :  { %640 = vmatprep.subr.bf16.mxu1 %v1018_v34 }
  0x3b   :  { %682 = vmatpush1.bf16.msra.mxu0 %v1005_v29 }
  0x3c   :  { %683 = vmatprep.subr.bf16.mxu0 %v1009_v31 }
  0x3d   :  { %641 = vmatpush1.bf16.msra.mxu1 %v1020_v43 }
  0x3e   :  { %642 = vmatprep.subr.bf16.mxu1 %v1024_v49 }
  0x3f   :  { %684 = vmatpush1.bf16.msra.mxu0 %v1011_v42 }
  0x40   :  { %694 = vmatprep.subr.bf16.mxu0 %v1017_v47 }
  0x41   :  { %643 = vmatpush1.bf16.msra.mxu1 %v1026_v55 }
  0x42   :  { %686 = vmatmul.mubr.bf16.vlgmr.msra.gmra.mrb[0].mxu0 %v161_v52 }
  0x43   :  { %695 = vmatpush1.bf16.msra.mxu0 %v1015_v54  ;;  %726 = vmatprep.mubr.bf16.mxu0 %v1034_v62 }
  0x44   :  { %696 = vmatprep.subr.bf16.mxu0 %v1023_v56  ;;  %645 = vmatmul.mubr.bf16.vlgmr.msra.gmra.mrb[0].mxu1 %v159_v58 }
  0x47   :  { %697 = vmatpush1.bf16.msra.mxu0 %v1021_v60 }
  0x48   :  { %698 = vmatprep.subr.bf16.mxu0 %v1029_v61 }
  0x4b   :  { %699 = vmatpush1.bf16.msra.mxu0 %v1027_v0 }
  0x4c   :  { %700 = vmatprep.subr.bf16.mxu0 %v1032_v1 }
  0x4f   :  { %701 = vmatpush1.bf16.msra.mxu0 %v1030_v3 }
  0x52   :  { %910 = vmatmul.mubr.msk.bf16.vlgmr.msra.gmra.mrb[0].mxu0 %vm608_vm0, %v163_v4 }
 0x117   :  { %v646_v7 = vpop.f32.mrb[0].mxu1 }
 0x118   :  { %v647_v8 = vadd.f32 %v646_v7, %v241_v6  ;;  %v648_v9 = vpop.f32.mrb[1].mxu1 }
 0x119   :  { %v650_v57 = vpop.f32.mrb[2].mxu1  ;;  %v649_v14 = vadd.f32 %v648_v9, %v245_v11 }
 0x11a   :  { %v651_v10 = vpop.f32.mrb[3].mxu1 }
 0x125   :  { %v728_v16 = vpop.f32.mrb[0].mxu0 }
 0x126   :  { %v915_v17 = vadd.f32 %v728_v16, %v647_v8  ;;  %v730_v18 = vpop.f32.mrb[1].mxu0 }
 0x127   :  { %v917_v19 = vadd.f32 %v730_v18, %v649_v14  ;;  %v732_v21 = vpop.f32.mrb[2].mxu0 }
 0x128   :  { %v736_v44 = vsel %vm735_vm1, %v915_v17, 0.0  ;;  %v773_v22 = vmul.f32 %v915_v17, %v915_v17  ;;  %v733_v23 = vpop.f32.mrb[3].mxu0 }
 0x129   :  { %v737_v24 = vrot.slane %v736_v44, 4  ;;  %v743_v25 = vsel %vm735_vm1, %v917_v19, 0.0  ;;  %v774_v45 = vmul.f32 %v917_v19, %v917_v19  ;;  %v912_v26 = vpack.c.bf16 %v917_v19, %v915_v17 }
 0x12a   :  { %v775_v27 = vsel %vm735_vm1, %v773_v22, 0.0  ;;  %v744_v28 = vrot.slane %v743_v25, 4 }
 0x12b   :  { %v738_v29 = vadd.f32 %v737_v24, %v736_v44  ;;  %v776_v30 = vrot.slane %v775_v27, 4  ;;  %v782_v31 = vsel %vm735_vm1, %v774_v45, 0.0  ;;  %v820_v33 = vrot.slane %v912_v26, %v758_v20 }
 0x12c   :  { %v745_v34 = vadd.f32 %v744_v28, %v743_v25  ;;  %v783_v37 = vrot.slane %v782_v31, 4 }
 0x12d   :  { %v739_v35 = vrot.slane %v738_v29, 2  ;;  %v777_v36 = vadd.f32 %v776_v30, %v775_v27  ;;  %913 = vst.sshfl [vmem:[%s1360_s5] sm:$0x5 pattern:$0x73625140] %v820_v33 }
 0x12e   :  { %v746_v38 = vrot.slane %v745_v34, 2  ;;  %v784_v39 = vadd.f32 %v783_v37, %v782_v31 }
 0x12f   :  { %v740_v40 = vadd.f32 %v739_v35, %v738_v29  ;;  %v778_v41 = vrot.slane %v777_v36, 2 }
 0x130   :  { %v747_v42 = vadd.f32 %v746_v38, %v745_v34  ;;  %v785_v43 = vrot.slane %v784_v39, 2 }
 0x131   :  { %v741_v46 = vrot.slane %v740_v40, 1  ;;  %v779_v47 = vadd.f32 %v778_v41, %v777_v36 }
 0x132   :  { %v748_v48 = vrot.slane %v747_v42, 1  ;;  %v786_v49 = vadd.f32 %v785_v43, %v784_v39 }
 0x133   :  { %v742_v50 = vadd.f32 %v741_v46, %v740_v40  ;;  %v780_v51 = vrot.slane %v779_v47, 1 }
 0x134   :  { %v749_v52 = vadd.f32 %v748_v48, %v747_v42  ;;  %v787_v53 = vrot.slane %v786_v49, 1 }
 0x135   :  { %v781_v54 = vadd.f32 %v780_v51, %v779_v47 }
 0x136   :  { %v752_v55 = vcombine.low %v742_v50, %v749_v52  ;;  %v788_v56 = vadd.f32 %v787_v53, %v786_v49 }
 0x138   :  { %v759_v58 = vrot.slane %v752_v55, %v758_v20  ;;  %v791_v59 = vcombine.low %v781_v54, %v788_v56 }
 0x13a   :  { %v766_v60 = vrot.slane %v759_v58, %v758_v20  ;;  %v798_v61 = vrot.slane %v791_v59, %v758_v20 }
 0x13c   :  { %772 = vst.msk [vmem:[%s1361_s6] ss:$2 sm:$0x3] %vm770_vm2, %v766_v60  ;;  %v805_v62 = vrot.slane %v798_v61, %v758_v20 }
 0x13e   :  { %911 = vst.msk [vmem:[%s1361_s6 + $0x1] ss:$2 sm:$0x3] %vm770_vm2, %v805_v62 }

// kernel: squeeze.116
= control target key start
LH: loop header
LB: loop body
LE: loop exit
PB: predicated region body
PF: predicated region fallthrough
CT: control target
= control target key end

     0   :  { %vm7_vm0 = vcmask 523264   ;;  %s39_s0 = inlined_call_operand.vmem [shape: f32[256], index: 0, kind: input, shape index: {}]   ;;  %s40_s1 = inlined_call_operand.vmem [shape: f32[4,64], index: 1, kind: output, shape index: {}]  }
   0x1   :  { %v4_v0 = vld [vmem:[%s39_s0] sm:$0x3]  ;;  %s22_s0 = smov 64  }
   0x2   :  { %5 = vst [vmem:[#allocation1] sm:$0x3] %v4_v0 }
   0x9   :  { %v9_v1 = vld [vmem:[#allocation1] sm:$0x3]  }
   0xa   :  { %v6_v2 = vld [vmem:[#allocation1] sm:$0x3]   ;;  %10 = vrot.lane.b32.xlu0 %v9_v1, %s22_s0 }
   0xb   :  { %8 = vst.msk [vmem:[#allocation0] ss:$2 sm:$0x3] %vm7_vm0, %v6_v2  }
  0x7c   :  { %v11_v3 = vpop.permute.xlu0 %10  }
  0x7d   :  { %14 = vst.msk [vmem:[#allocation0 + $0x1] ss:$2 sm:$0x3] %vm7_vm0, %v11_v3  }
  0x84   :  { %v18_v4 = vld [vmem:[#allocation0] sm:$0xf] }
  0x85   :  { %20 = vst [vmem:[%s40_s1] sm:$0xf] %v18_v4 }

// kernel: unet_forward.16
= control target key start
LH: loop header
LB: loop body
LE: loop exit
PB: predicated region body
PF: predicated region fallthrough
CT: control target
= control target key end

     0   :  { %v41_v20 = vlaneseq  ;;  %vm1246_vm0 = vmmov 0   ;;  %s1567_s1 = inlined_call_operand.vmem [shape: bf16[1152,128], index: 1, kind: input, shape index: {}]   ;;  %s1568_s0 = inlined_call_operand.vmem [shape: bf16[8,1152], index: 0, kind: input, shape index: {}]   ;;  %s1569_s2 = inlined_call_operand.vmem [shape: f32[1,1152], index: 2, kind: input, shape index: {}]   ;;  %s1570_s3 = inlined_call_operand.vmem [shape: f32[1,1152], index: 3, kind: input, shape index: {}]   ;;  %s1571_s4 = inlined_call_operand.vmem [shape: f32[1,128], index: 4, kind: input, shape index: {}]   ;;  %s1572_s5 = inlined_call_operand.vmem [shape: bf16[8,128], index: 5, kind: output, shape index: {0}]   ;;  %s1573_s6 = inlined_call_operand.vmem [shape: f32[2,128], index: 6, kind: output, shape index: {1}]  }
   0x1   :  { %v1173_v0 = vld [vmem:[%s1567_s1 + $0x40] sm:$0xff]   ;;  %v1177_v4 = vld [vmem:[%s1567_s1 + $0x48] sm:$0xff]   ;;  %v1181_v8 = vld [vmem:[%s1567_s1 + $0x50] sm:$0xff]  }
   0x2   :  { %v1174_v1 = vld [vmem:[%s1567_s1] sm:$0xff]   ;;  %1054 = vmatprep.subr.bf16.mxu0 %v1173_v0  ;;  %v1178_v5 = vld [vmem:[%s1567_s1 + $0x8] sm:$0xff]   ;;  %v1182_v9 = vld [vmem:[%s1567_s1 + $0x10] sm:$0xff]   ;;  %v1354_v25 = vshrl.u32 %v41_v20, 7 }
   0x3   :  { %v1175_v2 = vld [vmem:[%s1567_s1 + $0xc0] sm:$0xff]   ;;  %1055 = vmatpush3.bf16.msra.mxu0 %v1174_v1  ;;  %v1179_v6 = vld [vmem:[%s1567_s1 + $0xc8] sm:$0xff]   ;;  %v1183_v10 = vld [vmem:[%s1567_s1 + $0xd0] sm:$0xff]  }
   0x4   :  { %v1176_v3 = vld [vmem:[%s1567_s1 + $0x80] sm:$0xff]   ;;  %1076 = vmatprep.subr.bf16.mxu1 %v1175_v2  ;;  %1056 = vmatprep.subr.bf16.mxu0 %v1177_v4  ;;  %v1180_v7 = vld [vmem:[%s1567_s1 + $0x88] sm:$0xff]   ;;  %v1184_v11 = vld [vmem:[%s1567_s1 + $0x90] sm:$0xff]   ;;  %v47_v30 = vsub.s32 1, %v1354_v25  ;;  %v43_v32 = vsub.s32 0, %v1354_v25  ;;  %v55_v34 = vsub.s32 3, %v1354_v25 }
   0x5   :  { %1077 = vmatpush3.bf16.msra.mxu1 %v1176_v3  ;;  %v1185_v12 = vld [vmem:[%s1567_s1 + $0x58] sm:$0xff]   ;;  %v1189_v16 = vld [vmem:[%s1567_s1 + $0x60] sm:$0xff]   ;;  %v1193_v21 = vld [vmem:[%s1567_s1 + $0x68] sm:$0xff]   ;;  %v51_v36 = vsub.s32 2, %v1354_v25 }
   0x6   :  { %1078 = vmatprep.subr.bf16.mxu1 %v1179_v6  ;;  %v1186_v13 = vld [vmem:[%s1567_s1 + $0x18] sm:$0xff]   ;;  %v1190_v17 = vld [vmem:[%s1567_s1 + $0x20] sm:$0xff]   ;;  %v1194_v22 = vld [vmem:[%s1567_s1 + $0x28] sm:$0xff]  }
   0x7   :  { %1057 = vmatpush3.bf16.msra.mxu0 %v1178_v5  ;;  %v1187_v14 = vld [vmem:[%s1567_s1 + $0xd8] sm:$0xff]   ;;  %v1191_v18 = vld [vmem:[%s1567_s1 + $0xe0] sm:$0xff]   ;;  %v1195_v23 = vld [vmem:[%s1567_s1 + $0xe8] sm:$0xff]  }
   0x8   :  { %1058 = vmatprep.subr.bf16.mxu0 %v1181_v8  ;;  %v1188_v15 = vld [vmem:[%s1567_s1 + $0x98] sm:$0xff]   ;;  %v1192_v19 = vld [vmem:[%s1567_s1 + $0xa0] sm:$0xff]   ;;  %v1196_v24 = vld [vmem:[%s1567_s1 + $0xa8] sm:$0xff]  }
   0x9   :  { %1079 = vmatpush3.bf16.msra.mxu1 %v1180_v7  ;;  %v1197_v26 = vld [vmem:[%s1567_s1 + $0x70] sm:$0xff]   ;;  %v1201_v31 = vld [vmem:[%s1567_s1 + $0x78] sm:$0xff]   ;;  %v23_v37 = vld [vmem:[%s1568_s0] sm:$0xff] }
   0xa   :  { %1080 = vmatprep.subr.bf16.mxu1 %v1183_v10  ;;  %v1198_v27 = vld [vmem:[%s1567_s1 + $0x30] sm:$0xff]   ;;  %v1202_v33 = vld [vmem:[%s1567_s1 + $0x38] sm:$0xff]   ;;  %v1387_v38 = vld [vmem:[%s1569_s2] sm:$0xff]  ;;  %v28_v40 = vunpack.c.l.bf16 %v23_v37  ;;  %v29_v41 = vunpack.c.h.bf16 %v23_v37 }
   0xb   :  { %1059 = vmatpush3.bf16.msra.mxu0 %v1182_v9  ;;  %v1199_v28 = vld [vmem:[%s1567_s1 + $0xf0] sm:$0xff]   ;;  %v1203_v35 = vld [vmem:[%s1567_s1 + $0xf8] sm:$0xff]   ;;  %v1392_v39 = vld [vmem:[%s1570_s3] sm:$0xff]  ;;  %v48_v42 = vrot.slane %v1387_v38, %v47_v30  ;;  %v44_v45 = vrot.slane %v1387_v38, %v43_v32  ;;  %v56_v48 = vrot.slane %v1387_v38, %v55_v34  ;;  %v52_v52 = vrot.slane %v1387_v38, %v51_v36 }
   0xc   :  { %1060 = vmatprep.subr.bf16.mxu0 %v1185_v12  ;;  %v1200_v29 = vld [vmem:[%s1567_s1 + $0xb0] sm:$0xff]   ;;  %v106_v43 = vrot.slane %v1392_v39, %v47_v30  ;;  %v1204_v44 = vld [vmem:[%s1567_s1 + $0xb8] sm:$0xff]   ;;  %v102_v46 = vrot.slane %v1392_v39, %v43_v32  ;;  %v1205_v47 = vld [vmem:[%s1567_s1 + $0x140] sm:$0xff]   ;;  %v114_v51 = vrot.slane %v1392_v39, %v55_v34  ;;  %v110_v56 = vrot.slane %v1392_v39, %v51_v36 }
   0xd   :  { %1081 = vmatpush3.bf16.msra.mxu1 %v1184_v11  ;;  %v87_v49 = vmul.f32 %v48_v42, %v29_v41  ;;  %v24_v50 = vld [vmem:[%s1568_s0 + $0x8] sm:$0xff]  ;;  %v86_v53 = vmul.f32 %v44_v45, %v28_v40  ;;  %v1207_v58 = vld [vmem:[%s1567_s1 + $0x1c0] sm:$0xff]   ;;  %v1219_v20 = vld [vmem:[%s1567_s1 + $0x1d8] sm:$0xff]  }
   0xe   :  { %1082 = vmatprep.subr.bf16.mxu1 %v1187_v14  ;;  %v30_v54 = vunpack.c.l.bf16 %v24_v50  ;;  %v31_v55 = vunpack.c.h.bf16 %v24_v50  ;;  %v1206_v3 = vld [vmem:[%s1567_s1 + $0x100] sm:$0xff]   ;;  %v1209_v8 = vld [vmem:[%s1567_s1 + $0x148] sm:$0xff]   ;;  %v1229_v34 = vld [vmem:[%s1567_s1 + $0x170] sm:$0xff]  }
   0xf   :  { %1061 = vmatpush3.bf16.msra.mxu0 %v1186_v13  ;;  %v145_v57 = vadd.f32 %v106_v43, %v87_v49  ;;  %v144_v59 = vadd.f32 %v102_v46, %v86_v53  ;;  %v1208_v7 = vld [vmem:[%s1567_s1 + $0x180] sm:$0xff]   ;;  %v1210_v11 = vld [vmem:[%s1567_s1 + $0x108] sm:$0xff]   ;;  %v1213_v13 = vld [vmem:[%s1567_s1 + $0x150] sm:$0xff]  }
  0x10   :  { %1062 = vmatprep.subr.bf16.mxu0 %v1189_v16  ;;  %v89_v60 = vmul.f32 %v56_v48, %v31_v55  ;;  %v88_v61 = vmul.f32 %v52_v52, %v30_v54  ;;  %v1211_v12 = vld [vmem:[%s1567_s1 + $0x1c8] sm:$0xff]   ;;  %v1215_v16 = vld [vmem:[%s1567_s1 + $0x1d0] sm:$0xff]   ;;  %v26_v49 = vld [vmem:[%s1568_s0 + $0x18] sm:$0xff] }
  0x11   :  { %1083 = vmatpush3.bf16.msra.mxu1 %v1188_v15  ;;  %v154_v62 = vmax.f32 %v145_v57, 0.0  ;;  %v153_v63 = vmax.f32 %v144_v59, 0.0  ;;  %v1212_v14 = vld [vmem:[%s1567_s1 + $0x188] sm:$0xff]   ;;  %v1214_v15 = vld [vmem:[%s1567_s1 + $0x110] sm:$0xff]   ;;  %v1234_v54 = vld [vmem:[%s1567_s1 + $0x138] sm:$0xff]  }
  0x12   :  { %1084 = vmatprep.subr.bf16.mxu1 %v1191_v18  ;;  %v147_v0 = vadd.f32 %v114_v51, %v89_v60  ;;  %v146_v1 = vadd.f32 %v110_v56, %v88_v61  ;;  %v1216_v18 = vld [vmem:[%s1567_s1 + $0x190] sm:$0xff]   ;;  %v1226_v30 = vld [vmem:[%s1567_s1 + $0x128] sm:$0xff]   ;;  %v35_v51 = vunpack.c.h.bf16 %v26_v49  ;;  %v1235_v57 = vld [vmem:[%s1567_s1 + $0x1f8] sm:$0xff]  }
  0x13   :  { %1063 = vmatpush3.bf16.msra.mxu0 %v1190_v17  ;;  %v163_v2 = vpack.c.bf16 %v154_v62, %v154_v62  ;;  %v162_v4 = vpack.c.bf16 %v153_v63, %v153_v63  ;;  %v1217_v17 = vld [vmem:[%s1567_s1 + $0x158] sm:$0xff]   ;;  %v1227_v32 = vld [vmem:[%s1567_s1 + $0x1e8] sm:$0xff]   ;;  %v1230_v36 = vld [vmem:[%s1567_s1 + $0x130] sm:$0xff]  }
  0x14   :  { %1064 = vmatprep.subr.bf16.mxu0 %v1193_v21  ;;  %v156_v5 = vmax.f32 %v147_v0, 0.0  ;;  %v155_v6 = vmax.f32 %v146_v1, 0.0  ;;  %v1221_v21 = vld [vmem:[%s1567_s1 + $0x160] sm:$0xff]   ;;  %v25_v41 = vld [vmem:[%s1568_s0 + $0x10] sm:$0xff] }
  0x15   :  { %1085 = vmatpush3.bf16.msra.mxu1 %v1192_v19  ;;  %786 = vmatprep.mubr.bf16.mxu0 %v163_v2  ;;  %v1218_v19 = vld [vmem:[%s1567_s1 + $0x118] sm:$0xff]   ;;  %v32_v45 = vunpack.c.l.bf16 %v25_v41  ;;  %v33_v46 = vunpack.c.h.bf16 %v25_v41  ;;  %v1232_v50 = vld [vmem:[%s1567_s1 + $0x1b0] sm:$0xff]  }
  0x16   :  { %1086 = vmatprep.subr.bf16.mxu1 %v1195_v23  ;;  %v165_v9 = vpack.c.bf16 %v156_v5, %v156_v5  ;;  %v164_v10 = vpack.c.bf16 %v155_v6, %v155_v6  ;;  %v1222_v23 = vld [vmem:[%s1567_s1 + $0x120] sm:$0xff]  }
  0x17   :  { %1065 = vmatpush3.bf16.msra.mxu0 %v1194_v22  ;;  %v1220_v22 = vld [vmem:[%s1567_s1 + $0x198] sm:$0xff]  }
  0x18   :  { %1066 = vmatprep.subr.bf16.mxu0 %v1197_v26  ;;  %826 = vmatprep.mubr.bf16.mxu1 %v165_v9  ;;  %v1225_v26 = vld [vmem:[%s1567_s1 + $0x168] sm:$0xff]  }
  0x19   :  { %1087 = vmatpush3.bf16.msra.mxu1 %v1196_v24  ;;  %v1223_v24 = vld [vmem:[%s1567_s1 + $0x1e0] sm:$0xff]  }
  0x1a   :  { %1088 = vmatprep.subr.bf16.mxu1 %v1199_v28  ;;  %v1224_v28 = vld [vmem:[%s1567_s1 + $0x1a0] sm:$0xff]  }
  0x1b   :  { %1067 = vmatpush3.bf16.msra.mxu0 %v1198_v27  ;;  %v63_v27 = vsub.s32 5, %v1354_v25 }
  0x1c   :  { %1068 = vmatprep.subr.bf16.mxu0 %v1201_v31  ;;  %v71_v31 = vsub.s32 7, %v1354_v25 }
  0x1d   :  { %1089 = vmatpush3.bf16.msra.mxu1 %v1200_v29  ;;  %v59_v29 = vsub.s32 4, %v1354_v25  ;;  %v64_v37 = vrot.slane %v1387_v38, %v63_v27 }
  0x1e   :  { %1090 = vmatprep.subr.bf16.mxu1 %v1203_v35  ;;  %v1228_v35 = vld [vmem:[%s1567_s1 + $0x1a8] sm:$0xff]   ;;  %v72_v42 = vrot.slane %v1387_v38, %v71_v31  ;;  %v130_v52 = vrot.slane %v1392_v39, %v71_v31 }
  0x1f   :  { %1069 = vmatpush3.bf16.msra.mxu0 %v1202_v33  ;;  %v67_v33 = vsub.s32 6, %v1354_v25  ;;  %v60_v40 = vrot.slane %v1387_v38, %v59_v29  ;;  %v1231_v25 = vld [vmem:[%s1567_s1 + $0x1f0] sm:$0xff]   ;;  %v118_v48 = vrot.slane %v1392_v39, %v59_v29  ;;  %v91_v55 = vmul.f32 %v64_v37, %v33_v46 }
  0x20   :  { %1098 = vmatprep.subr.bf16.mxu0 %v1205_v47  ;;  %v122_v47 = vrot.slane %v1392_v39, %v63_v27  ;;  %v981_v27 = vld [vmem:[%s1571_s4] ss:$0 sm:$0xff] }
  0x21   :  { %1091 = vmatpush3.bf16.msra.mxu1 %v1204_v44  ;;  %v68_v43 = vrot.slane %v1387_v38, %v67_v33  ;;  %v1233_v44 = vld [vmem:[%s1567_s1 + $0x178] sm:$0xff]   ;;  %v34_v38 = vunpack.c.l.bf16 %v26_v49  ;;  %v126_v53 = vrot.slane %v1392_v39, %v67_v33  ;;  %v90_v56 = vmul.f32 %v60_v40, %v32_v45 }
  0x22   :  { %1120 = vmatprep.subr.bf16.mxu1 %v1207_v58  ;;  %787 = vmatmul.mubr.bf16.vlgmr.msra.gmra.mrb[0].mxu0 %v162_v4  ;;  %v93_v58 = vmul.f32 %v72_v42, %v35_v51  ;;  %v149_v60 = vadd.f32 %v122_v47, %v91_v55  ;;  %v1236_v39 = vld [vmem:[%s1567_s1 + $0x1b8] sm:$0xff]  }
  0x23   :  { %1099 = vmatpush3.bf16.msra.mxu0 %v1206_v3  ;;  %v92_v59 = vmul.f32 %v68_v43, %v34_v38  ;;  %v148_v61 = vadd.f32 %v118_v48, %v90_v56  ;;  %v1237_v3 = vld [vmem:[%s1567_s1 + $0x200] sm:$0xff]  }
  0x24   :  { %1100 = vmatprep.subr.bf16.mxu0 %v1209_v8  ;;  %827 = vmatmul.mubr.bf16.vlgmr.msra.gmra.mrb[0].mxu1 %v164_v10  ;;  %v151_v62 = vadd.f32 %v130_v52, %v93_v58  ;;  %v158_v0 = vmax.f32 %v149_v60, 0.0  ;;  %v27_v10 = vld [vmem:[%s1568_s0 + $0x20] sm:$0xf] }
  0x25   :  { %1121 = vmatpush3.bf16.msra.mxu1 %v1208_v7  ;;  %v150_v63 = vadd.f32 %v126_v53, %v92_v59  ;;  %v157_v1 = vmax.f32 %v148_v61, 0.0  ;;  %v1245_v7 = vmov 0.0  }
  0x26   :  { %1122 = vmatprep.subr.bf16.mxu1 %v1211_v12  ;;  %v160_v2 = vmax.f32 %v151_v62, 0.0  ;;  %v167_v5 = vpack.c.bf16 %v158_v0, %v158_v0  ;;  %v36_v12 = vunpack.c.l.bf16 %v27_v10 }
  0x27   :  { %1101 = vmatpush3.bf16.msra.mxu0 %v1210_v11  ;;  %v159_v4 = vmax.f32 %v150_v63, 0.0  ;;  %v166_v6 = vpack.c.bf16 %v157_v1, %v157_v1  ;;  %v979_v11 = vld [vmem:[%s1569_s2 + $0x8] ss:$0 sm:$0xff] }
  0x28   :  { %1102 = vmatprep.subr.bf16.mxu0 %v1213_v13  ;;  %v169_v8 = vpack.c.bf16 %v160_v2, %v160_v2  ;;  %866 = vmatprep.mubr.bf16.mxu0 %v167_v5  ;;  %v980_v13 = vld [vmem:[%s1570_s3 + $0x8] ss:$0 sm:$0xff] }
  0x29   :  { %1123 = vmatpush3.bf16.msra.mxu1 %v1212_v14  ;;  %v168_v9 = vpack.c.bf16 %v159_v4, %v159_v4  ;;  %v1238_v14 = vld [vmem:[%s1567_s1 + $0x208] sm:$0xff]  }
  0x2a   :  { %1124 = vmatprep.subr.bf16.mxu1 %v1215_v16  ;;  %906 = vmatprep.mubr.bf16.mxu1 %v169_v8 }
  0x2b   :  { %1103 = vmatpush3.bf16.msra.mxu0 %v1214_v15  ;;  %v94_v15 = vmul.f32 %v979_v11, %v36_v12 }
  0x2c   :  { %1104 = vmatprep.subr.bf16.mxu0 %v1217_v17  ;;  %v1239_v17 = vld [vmem:[%s1567_s1 + $0x210] sm:$0xff]  }
  0x2d   :  { %1125 = vmatpush3.bf16.msra.mxu1 %v1216_v18  ;;  %v152_v16 = vadd.f32 %v980_v13, %v94_v15  ;;  %v1240_v18 = vld [vmem:[%s1567_s1 + $0x218] sm:$0xff]  }
  0x2e   :  { %1126 = vmatprep.subr.bf16.mxu1 %v1219_v20  ;;  %v1242_v20 = vld [vmem:[%s1567_s1 + $0x228] sm:$0xff]  }
  0x2f   :  { %1105 = vmatpush3.bf16.msra.mxu0 %v1218_v19  ;;  %v1241_v19 = vld [vmem:[%s1567_s1 + $0x220] sm:$0xff]  }
  0x30   :  { %1106 = vmatprep.subr.bf16.mxu0 %v1221_v21  ;;  %v1243_v21 = vld [vmem:[%s1567_s1 + $0x230] sm:$0xff]  }
  0x31   :  { %1127 = vmatpush3.bf16.msra.mxu1 %v1220_v22  ;;  %v161_v22 = vmax.f32 %v152_v16, 0.0 }
  0x32   :  { %1128 = vmatprep.subr.bf16.mxu1 %v1223_v24 }
  0x33   :  { %1107 = vmatpush3.bf16.msra.mxu0 %v1222_v23  ;;  %v1244_v23 = vld [vmem:[%s1567_s1 + $0x238] sm:$0xff]   ;;  %v170_v24 = vpack.c.bf16 %v161_v22, %v161_v22 }
  0x34   :  { %1108 = vmatprep.subr.bf16.mxu0 %v1225_v26 }
  0x35   :  { %1129 = vmatpush3.bf16.msra.mxu1 %v1224_v28 }
  0x36   :  { %1130 = vmatprep.subr.bf16.mxu1 %v1227_v32 }
  0x37   :  { %1109 = vmatpush3.bf16.msra.mxu0 %v1226_v30 }
  0x38   :  { %1110 = vmatprep.subr.bf16.mxu0 %v1229_v34 }
  0x39   :  { %1131 = vmatpush3.bf16.msra.mxu1 %v1228_v35 }
  0x3a   :  { %1132 = vmatprep.subr.bf16.mxu1 %v1231_v25 }
  0x3b   :  { %1111 = vmatpush3.bf16.msra.mxu0 %v1230_v36 }
  0x3c   :  { %1112 = vmatprep.subr.bf16.mxu0 %v1233_v44 }
  0x3d   :  { %1133 = vmatpush3.bf16.msra.mxu1 %v1232_v50 }
  0x3e   :  { %1134 = vmatprep.subr.bf16.mxu1 %v1235_v57 }
  0x3f   :  { %1113 = vmatpush3.bf16.msra.mxu0 %v1234_v54 }
  0x40   :  { %1151 = vmatprep.subr.bf16.mxu0 %v1245_v7 }
  0x41   :  { %1135 = vmatpush3.bf16.msra.mxu1 %v1236_v39 }
  0x42   :  { %867 = vmatmul.mubr.bf16.vlgmr.msra.gmra.mrb[4].mxu0 %v166_v6 }
  0x43   :  { %1152 = vmatpush3.bf16.msra.mxu0 %v1237_v3  ;;  %1167 = vmatprep.mubr.msk.bf16.mxu0 %vm1246_vm0, %v1245_v7 }
  0x44   :  { %907 = vmatmul.mubr.bf16.vlgmr.msra.gmra.mrb[4].mxu1 %v168_v9  ;;  %1153 = vmatprep.subr.bf16.mxu0 %v1245_v7 }
  0x47   :  { %1154 = vmatpush3.bf16.msra.mxu0 %v1238_v14 }
  0x48   :  { %1155 = vmatprep.subr.bf16.mxu0 %v1245_v7 }
  0x4b   :  { %1156 = vmatpush3.bf16.msra.mxu0 %v1239_v17 }
  0x4c   :  { %1157 = vmatprep.subr.bf16.mxu0 %v1245_v7 }
  0x4f   :  { %1158 = vmatpush3.bf16.msra.mxu0 %v1240_v18 }
  0x50   :  { %1159 = vmatprep.subr.bf16.mxu0 %v1245_v7 }
  0x53   :  { %1160 = vmatpush3.bf16.msra.mxu0 %v1241_v19 }
  0x54   :  { %1161 = vmatprep.subr.bf16.mxu0 %v1245_v7 }
  0x57   :  { %1162 = vmatpush3.bf16.msra.mxu0 %v1242_v20 }
  0x58   :  { %1163 = vmatprep.subr.bf16.mxu0 %v1245_v7 }
  0x5b   :  { %1164 = vmatpush3.bf16.msra.mxu0 %v1243_v21 }
  0x5c   :  { %1165 = vmatprep.subr.bf16.mxu0 %v1245_v7 }
  0x5f   :  { %1166 = vmatpush3.bf16.msra.mxu0 %v1244_v23 }
  0x62   :  { %1168 = vmatmul.mubr.bf16.vlgmr.msra.gmra.mrb[8].mxu0 %v170_v24 }
  0xf5   :  { %v1070_v26 = vpop.f32.mrb[0].mxu0 }
  0xf6   :  { %v1071_v28 = vpop.f32.mrb[1].mxu0 }
  0xf7   :  { %v1072_v29 = vadd.f32 %v1071_v28, %v1070_v26  ;;  %v1073_v30 = vpop.f32.mrb[2].mxu0  ;;  %v1092_v31 = vpop.f32.mrb[0].mxu1 }
  0xf8   :  { %v1074_v32 = vpop.f32.mrb[3].mxu0  ;;  %v1093_v34 = vpop.f32.mrb[1].mxu1 }
  0xf9   :  { %v789_v33 = vadd.f32 %v1072_v29, %v981_v27  ;;  %v1094_v35 = vadd.f32 %v1093_v34, %v1092_v31  ;;  %v1095_v36 = vpop.f32.mrb[2].mxu1 }
  0xfa   :  { %v1096_v37 = vpop.f32.mrb[3].mxu1 }
  0xfb   :  { %v829_v40 = vadd.f32 %v1094_v35, %v789_v33 }
 0x115   :  { %v1114_v25 = vpop.f32.mrb[4].mxu0 }
 0x116   :  { %v1115_v41 = vpop.f32.mrb[5].mxu0 }
 0x117   :  { %v1116_v42 = vadd.f32 %v1115_v41, %v1114_v25  ;;  %v1117_v43 = vpop.f32.mrb[6].mxu0  ;;  %v1136_v44 = vpop.f32.mrb[4].mxu1 }
 0x118   :  { %v1118_v45 = vpop.f32.mrb[7].mxu0  ;;  %v1137_v46 = vpop.f32.mrb[5].mxu1 }
 0x119   :  { %v869_v47 = vadd.f32 %v1116_v42, %v829_v40  ;;  %v1138_v48 = vadd.f32 %v1137_v46, %v1136_v44  ;;  %v1139_v49 = vpop.f32.mrb[6].mxu1 }
 0x11a   :  { %v1140_v50 = vpop.f32.mrb[7].mxu1 }
 0x11b   :  { %v909_v38 = vadd.f32 %v1138_v48, %v869_v47 }
 0x135   :  { %v948_v51 = vpop.f32.mrb[8].mxu0 }
 0x136   :  { %v949_v52 = vadd.f32 %v948_v51, %v909_v38  ;;  %v1169_v53 = vpop.f32.mrb[9].mxu0 }
 0x137   :  { %v951_v54 = vpop.f32.mrb[10].mxu0 }
 0x138   :  { %v954_v55 = vrot.slane %v949_v52, 4  ;;  %v961_v56 = vmul.f32 %v949_v52, %v949_v52  ;;  %v969_v57 = vpack.c.bf16 %v949_v52, %v949_v52  ;;  %v1170_v58 = vpop.f32.mrb[11].mxu0 }
 0x13a   :  { %v955_v59 = vadd.f32 %v954_v55, %v949_v52  ;;  %v962_v60 = vrot.slane %v961_v56, 4  ;;  %970 = vst [vmem:[%s1572_s5] sm:$0xf] %v969_v57 }
 0x13c   :  { %v956_v61 = vrot.slane %v955_v59, 2  ;;  %v963_v39 = vadd.f32 %v962_v60, %v961_v56 }
 0x13e   :  { %v957_v62 = vadd.f32 %v956_v61, %v955_v59  ;;  %v964_v63 = vrot.slane %v963_v39, 2 }
 0x140   :  { %v958_v0 = vrot.slane %v957_v62, 1  ;;  %v965_v1 = vadd.f32 %v964_v63, %v963_v39 }
 0x142   :  { %v959_v2 = vadd.f32 %v958_v0, %v957_v62  ;;  %v966_v3 = vrot.slane %v965_v1, 1 }
 0x144   :  { %960 = vst [vmem:[%s1573_s6] sm:$0x1] %v959_v2  ;;  %v967_v4 = vadd.f32 %v966_v3, %v965_v1 }
 0x146   :  { %968 = vst [vmem:[%s1573_s6 + $0x1] sm:$0x1] %v967_v4 }

// kernel: squeeze.134
= control target key start
LH: loop header
LB: loop body
LE: loop exit
PB: predicated region body
PF: predicated region fallthrough
CT: control target
= control target key end

     0   :  { %s37_s8 = smov 32   ;;  %vm7_vm0 = vcmask 261120   ;;  %s38_s9 = smov 64   ;;  %s55_s0 = inlined_call_operand.vmem [shape: f32[128], index: 0, kind: input, shape index: {}]   ;;  %s56_s1 = inlined_call_operand.vmem [shape: f32[4,32], index: 1, kind: output, shape index: {}]  }
   0x1   :  { %v4_v0 = vld [vmem:[%s55_s0] sm:$0x1]  ;;  %s36_s0 = smov 96  }
   0x2   :  { %5 = vst [vmem:[#allocation1] sm:$0x1] %v4_v0 }
   0x9   :  { %v9_v1 = vld [vmem:[#allocation1] sm:$0x1]  }
   0xa   :  { %v21_v2 = vld [vmem:[#allocation1] sm:$0x1]   ;;  %10 = vrot.lane.b32.xlu0 %v9_v1, %s36_s0 }
   0xb   :  { %22 = vrot.lane.b32.xlu1 %v21_v2, %s37_s8  ;;  %v6_v3 = vld [vmem:[#allocation1] sm:$0x1]  }
   0xc   :  { %v15_v4 = vld [vmem:[#allocation1] sm:$0x1]   ;;  %8 = vst.msk [vmem:[#allocation0] sm:$0x1] %vm7_vm0, %v6_v3  }
   0xe   :  { %16 = vrot.lane.b32.xlu0 %v15_v4, %s38_s9 }
  0x7c   :  { %v11_v5 = vpop.permute.xlu0 %10  }
  0x7d   :  { %v23_v6 = vpop.permute.xlu1 %22   ;;  %14 = vst.msk [vmem:[#allocation0 + $0x1] sm:$0x1] %vm7_vm0, %v11_v5  }
  0x7e   :  { %26 = vst.msk [vmem:[#allocation0 + $0x3] sm:$0x1] %vm7_vm0, %v23_v6  }
  0x80   :  { %v17_v7 = vpop.permute.xlu0 %16  }
  0x81   :  { %20 = vst.msk [vmem:[#allocation0 + $0x2] sm:$0x1] %vm7_vm0, %v17_v7  }
  0x88   :  { %v30_v8 = vld [vmem:[#allocation0] sm:$0xf] }
  0x89   :  { %32 = vst [vmem:[%s56_s1] sm:$0xf] %v30_v8 }

// kernel: tile.128
= control target key start
LH: loop header
LB: loop body
LE: loop exit
PB: predicated region body
PF: predicated region fallthrough
CT: control target
= control target key end

     0   :  { %s28_s0 = inlined_call_operand.vmem [shape: f32[64], index: 0, kind: input, shape index: {}]   ;;  %s29_s1 = inlined_call_operand.vmem [shape: f32[9,64], index: 1, kind: output, shape index: {}]  }
   0x1   :  { %v4_v0 = vld [vmem:[%s28_s0] ss:$0 sm:$0xff] }
   0x2   :  { %5 = vst [vmem:[%s29_s1] sm:$0xff] %v4_v0  ;;  %8 = vst [vmem:[%s29_s1 + $0x8] sm:$0xff] %v4_v0 }

// kernel: tile.133
= control target key start
LH: loop header
LB: loop body
LE: loop exit
PB: predicated region body
PF: predicated region fallthrough
CT: control target
= control target key end

     0   :  { %vm3_vm0 = vcmask 523264   ;;  %s51_s8 = smov 64   ;;  %vm11_vm1 = vcmask 1048064   ;;  %s83_s0 = inlined_call_operand.vmem [shape: f32[9,64], index: 0, kind: input, shape index: {}]   ;;  %s84_s1 = inlined_call_operand.vmem [shape: f32[1,576], index: 1, kind: output, shape index: {}]  }
   0x1   :  { %v45_v0 = vld [vmem:[%s83_s0 + $0x1] ss:$2 sm:$0xf]   ;;  %v2_v1 = vld [vmem:[%s83_s0] ss:$2 sm:$0x1f]  }
   0x2   :  { %9 = vrot.lane.b32.xlu0 %v45_v0, %s51_s8  ;;  %4 = vst.msk [vmem:[#allocation0] ss:$8 sm:$0xf] %vm3_vm0, %v2_v1   ;;  %6 = vst.msk [vmem:[#allocation0 + $0x1c] sm:$0x10] %vm3_vm0, %v2_v1  }
   0x9   :  { %v37_v2 = vld [vmem:[#allocation0 + $0x20] sm:$0x1] }
   0xa   :  { %49 = vst [vmem:[%s84_s1 + $0x4] sm:$0x1] %v37_v2 }
  0x74   :  { %v10_v3 = vpop.permute.xlu0 %9  }
  0x75   :  { %12 = vst.msk [vmem:[#allocation0] ss:$8 sm:$0xf] %vm11_vm1, %v10_v3  }
  0x7c   :  { %v16_v4 = vld [vmem:[#allocation0] sm:$0x1]  ;;  %v20_v5 = vld [vmem:[#allocation0 + $0x8] sm:$0x1]  ;;  %v25_v6 = vld [vmem:[#allocation0 + $0x10] sm:$0x1] }
  0x7d   :  { %18 = vst [vmem:[%s84_s1] sm:$0x1] %v16_v4  ;;  %46 = vst [vmem:[%s84_s1 + $0x1] sm:$0x1] %v20_v5  ;;  %v31_v7 = vld [vmem:[#allocation0 + $0x18] sm:$0x1] }
  0x7e   :  { %47 = vst [vmem:[%s84_s1 + $0x2] sm:$0x1] %v25_v6  ;;  %48 = vst [vmem:[%s84_s1 + $0x3] sm:$0x1] %v31_v7 }

// kernel: unet_forward.17
= control target key start
LH: loop header
LB: loop body
LE: loop exit
PB: predicated region body
PF: predicated region fallthrough
CT: control target
= control target key end

     0   :  { %v57_v20 = vlaneseq  ;;  %vm474_vm0 = vcmask 523264   ;;  %vm677_vm1 = vcmask 519168   ;;  %vm641_vm2 = vcmask 516096   ;;  %s1110_s1 = inlined_call_operand.vmem [shape: bf16[576,64], index: 1, kind: input, shape index: {}]   ;;  %s1111_s0 = inlined_call_operand.vmem [shape: bf16[32,576], index: 0, kind: input, shape index: {}]   ;;  %s1112_s2 = inlined_call_operand.vmem [shape: f32[1,576], index: 2, kind: input, shape index: {}]   ;;  %s1113_s3 = inlined_call_operand.vmem [shape: f32[1,576], index: 3, kind: input, shape index: {}]   ;;  %s1114_s4 = inlined_call_operand.vmem [shape: f32[1,64], index: 4, kind: input, shape index: {}]   ;;  %s1115_s5 = inlined_call_operand.vmem [shape: bf16[32,64], index: 5, kind: output, shape index: {0}]   ;;  %s1116_s6 = inlined_call_operand.vmem [shape: f32[2,64], index: 6, kind: output, shape index: {1}]  }
   0x1   :  { %v811_v0 = vld [vmem:[%s1110_s1 + $0x40] sm:$0xff]   ;;  %v815_v4 = vld [vmem:[%s1110_s1 + $0x48] sm:$0xff]   ;;  %v819_v8 = vld [vmem:[%s1110_s1 + $0x50] sm:$0xff]  }
   0x2   :  { %v812_v1 = vld [vmem:[%s1110_s1] sm:$0xff]   ;;  %737 = vmatprep.subr.bf16.mxu0 %v811_v0  ;;  %v816_v5 = vld [vmem:[%s1110_s1 + $0x8] sm:$0xff]   ;;  %v820_v9 = vld [vmem:[%s1110_s1 + $0x10] sm:$0xff]   ;;  %v954_v25 = vshrl.u32 %v57_v20, 7 }
   0x3   :  { %v813_v2 = vld [vmem:[%s1110_s1 + $0xc0] sm:$0xff]   ;;  %738 = vmatpush3.bf16.msra.mxu0 %v812_v1  ;;  %v817_v6 = vld [vmem:[%s1110_s1 + $0xc8] sm:$0xff]   ;;  %v821_v10 = vld [vmem:[%s1110_s1 + $0xd0] sm:$0xff]  }
   0x4   :  { %v814_v3 = vld [vmem:[%s1110_s1 + $0x80] sm:$0xff]   ;;  %765 = vmatprep.subr.bf16.mxu1 %v813_v2  ;;  %739 = vmatprep.subr.bf16.mxu0 %v815_v4  ;;  %v818_v7 = vld [vmem:[%s1110_s1 + $0x88] sm:$0xff]   ;;  %v822_v11 = vld [vmem:[%s1110_s1 + $0x90] sm:$0xff]   ;;  %v63_v30 = vsub.s32 1, %v954_v25  ;;  %v59_v32 = vsub.s32 0, %v954_v25  ;;  %v71_v34 = vsub.s32 3, %v954_v25 }
   0x5   :  { %766 = vmatpush3.bf16.msra.mxu1 %v814_v3  ;;  %v823_v12 = vld [vmem:[%s1110_s1 + $0x58] sm:$0xff]   ;;  %v827_v16 = vld [vmem:[%s1110_s1 + $0x60] sm:$0xff]   ;;  %v831_v21 = vld [vmem:[%s1110_s1 + $0x68] sm:$0xff]   ;;  %v67_v36 = vsub.s32 2, %v954_v25  ;;  %v75_v40 = vsub.s32 4, %v954_v25 }
   0x6   :  { %767 = vmatprep.subr.bf16.mxu1 %v817_v6  ;;  %v824_v13 = vld [vmem:[%s1110_s1 + $0x18] sm:$0xff]   ;;  %v828_v17 = vld [vmem:[%s1110_s1 + $0x20] sm:$0xff]   ;;  %v832_v22 = vld [vmem:[%s1110_s1 + $0x28] sm:$0xff]  }
   0x7   :  { %740 = vmatpush3.bf16.msra.mxu0 %v816_v5  ;;  %v825_v14 = vld [vmem:[%s1110_s1 + $0xd8] sm:$0xff]   ;;  %v829_v18 = vld [vmem:[%s1110_s1 + $0xe0] sm:$0xff]   ;;  %v833_v23 = vld [vmem:[%s1110_s1 + $0xe8] sm:$0xff]  }
   0x8   :  { %741 = vmatprep.subr.bf16.mxu0 %v819_v8  ;;  %v826_v15 = vld [vmem:[%s1110_s1 + $0x98] sm:$0xff]   ;;  %v830_v19 = vld [vmem:[%s1110_s1 + $0xa0] sm:$0xff]   ;;  %v834_v24 = vld [vmem:[%s1110_s1 + $0xa8] sm:$0xff]  }
   0x9   :  { %768 = vmatpush3.bf16.msra.mxu1 %v818_v7  ;;  %v835_v26 = vld [vmem:[%s1110_s1 + $0x70] sm:$0xff]   ;;  %v839_v31 = vld [vmem:[%s1110_s1 + $0x78] sm:$0xff]   ;;  %v23_v37 = vld [vmem:[%s1111_s0] sm:$0xff] }
   0xa   :  { %769 = vmatprep.subr.bf16.mxu1 %v821_v10  ;;  %v836_v27 = vld [vmem:[%s1110_s1 + $0x30] sm:$0xff]   ;;  %v840_v33 = vld [vmem:[%s1110_s1 + $0x38] sm:$0xff]   ;;  %v990_v39 = vld [vmem:[%s1112_s2] sm:$0x1f]  ;;  %v35_v41 = vunpack.c.l.bf16 %v23_v37  ;;  %v36_v42 = vunpack.c.h.bf16 %v23_v37 }
   0xb   :  { %742 = vmatpush3.bf16.msra.mxu0 %v820_v9  ;;  %v837_v28 = vld [vmem:[%s1110_s1 + $0xf0] sm:$0xff]   ;;  %v841_v35 = vld [vmem:[%s1110_s1 + $0xf8] sm:$0xff]   ;;  %v996_v45 = vld [vmem:[%s1113_s3] sm:$0x1f]  ;;  %v64_v46 = vrot.slane %v990_v39, %v63_v30  ;;  %v60_v49 = vrot.slane %v990_v39, %v59_v32  ;;  %v72_v54 = vrot.slane %v990_v39, %v71_v34  ;;  %v1021_v56 = vrot.slane %v990_v39, %v67_v36 }
   0xc   :  { %743 = vmatprep.subr.bf16.mxu0 %v823_v12  ;;  %v838_v29 = vld [vmem:[%s1110_s1 + $0xb0] sm:$0xff]   ;;  %v111_v47 = vrot.slane %v996_v45, %v63_v30  ;;  %v842_v48 = vld [vmem:[%s1110_s1 + $0xb8] sm:$0xff]   ;;  %v1005_v50 = vrot.slane %v996_v45, %v59_v32  ;;  %v843_v51 = vld [vmem:[%s1110_s1 + $0x100] sm:$0xff]   ;;  %v1018_v55 = vrot.slane %v996_v45, %v71_v34  ;;  %v1024_v57 = vrot.slane %v996_v45, %v67_v36 }
   0xd   :  { %770 = vmatpush3.bf16.msra.mxu1 %v822_v11  ;;  %v26_v38 = vld [vmem:[%s1111_s0 + $0x14] sm:$0xff]  ;;  %v24_v52 = vld [vmem:[%s1111_s0 + $0x8] sm:$0xff]  ;;  %v27_v53 = vld [vmem:[%s1111_s0 + $0x1c] sm:$0xff]  ;;  %v83_v58 = vmul.f32 %v64_v46, %v36_v42  ;;  %v82_v60 = vmul.f32 %v60_v49, %v35_v41 }
   0xe   :  { %771 = vmatprep.subr.bf16.mxu1 %v825_v14  ;;  %v40_v43 = vunpack.c.l.bf16 %v26_v38  ;;  %v41_v44 = vunpack.c.h.bf16 %v26_v38  ;;  %v37_v62 = vunpack.c.l.bf16 %v24_v52  ;;  %v38_v63 = vunpack.c.h.bf16 %v24_v52  ;;  %v29_v6 = vld [vmem:[%s1111_s0 + $0x28] sm:$0xff]  ;;  %v32_v11 = vld [vmem:[%s1111_s0 + $0x3c] sm:$0xff]  ;;  %v845_v52 = vld [vmem:[%s1110_s1 + $0x110] sm:$0xff]  }
   0xf   :  { %744 = vmatpush3.bf16.msra.mxu0 %v824_v13  ;;  %v42_v0 = vunpack.c.l.bf16 %v27_v53  ;;  %v43_v1 = vunpack.c.h.bf16 %v27_v53  ;;  %v130_v2 = vadd.f32 %v111_v47, %v83_v58  ;;  %v129_v4 = vadd.f32 %v1005_v50, %v82_v60  ;;  %v25_v60 = vld [vmem:[%s1111_s0 + $0x10] ss:$20 sps:$4 sm:$0xff]  }
  0x10   :  { %745 = vmatprep.subr.bf16.mxu0 %v827_v16  ;;  %v88_v59 = vmul.f32 %v64_v46, %v41_v44  ;;  %v87_v61 = vmul.f32 %v60_v49, %v40_v43  ;;  %v85_v7 = vmul.f32 %v72_v54, %v38_v63  ;;  %v84_v9 = vmul.f32 %v1021_v56, %v37_v62 }
  0x11   :  { %772 = vmatpush3.bf16.msra.mxu1 %v826_v15  ;;  %v90_v8 = vmul.f32 %v72_v54, %v43_v1  ;;  %v89_v10 = vmul.f32 %v1021_v56, %v42_v0  ;;  %v150_v12 = vmax.f32 %v130_v2, 0.0  ;;  %v149_v14 = vmax.f32 %v129_v4, 0.0 }
  0x12   :  { %773 = vmatprep.subr.bf16.mxu1 %v829_v18  ;;  %v135_v3 = vadd.f32 %v111_v47, %v88_v59  ;;  %v134_v5 = vadd.f32 %v1005_v50, %v87_v61  ;;  %v132_v16 = vadd.f32 %v1018_v55, %v85_v7  ;;  %v131_v18 = vadd.f32 %v1024_v57, %v84_v9 }
  0x13   :  { %746 = vmatpush3.bf16.msra.mxu0 %v828_v17  ;;  %v137_v17 = vadd.f32 %v1018_v55, %v90_v8  ;;  %v45_v34 = vunpack.c.l.bf16 %v29_v6  ;;  %v39_v4 = vunpack.c.l.bf16 %v25_v60  ;;  %v44_v9 = vunpack.c.h.bf16 %v25_v60 }
  0x14   :  { %747 = vmatprep.subr.bf16.mxu0 %v831_v21  ;;  %v155_v13 = vmax.f32 %v135_v3, 0.0  ;;  %v154_v15 = vmax.f32 %v134_v5, 0.0  ;;  %v31_v5 = vld [vmem:[%s1111_s0 + $0x38] ss:$20 sps:$4 sm:$0xff]  }
  0x15   :  { %774 = vmatpush3.bf16.msra.mxu1 %v830_v19  ;;  %v136_v19 = vadd.f32 %v1024_v57, %v89_v10  ;;  %v92_v44 = vmul.f32 %v60_v49, %v45_v34  ;;  %v76_v10 = vrot.slane %v990_v39, %v75_v40 }
  0x16   :  { %775 = vmatprep.subr.bf16.mxu1 %v833_v23  ;;  %v170_v20 = vpack.c.bf16 %v155_v13, %v150_v12  ;;  %v169_v21 = vpack.c.bf16 %v154_v15, %v149_v14  ;;  %v51_v23 = vunpack.c.h.bf16 %v32_v11  ;;  %v49_v15 = vunpack.c.l.bf16 %v31_v5 }
  0x17   :  { %748 = vmatpush3.bf16.msra.mxu0 %v832_v22  ;;  %v46_v22 = vunpack.c.h.bf16 %v29_v6  ;;  %v156_v30 = vmax.f32 %v136_v19, 0.0 }
  0x18   :  { %749 = vmatprep.subr.bf16.mxu0 %v835_v26  ;;  %v33_v26 = vld [vmem:[%s1111_s0 + $0x44] sm:$0xff]  ;;  %513 = vmatprep.mubr.bf16.mxu0 %v170_v20  ;;  %v96_v19 = vmul.f32 %v76_v10, %v49_v15 }
  0x19   :  { %776 = vmatpush3.bf16.msra.mxu1 %v834_v24  ;;  %v30_v24 = vld [vmem:[%s1111_s0 + $0x30] sm:$0xff]  ;;  %v93_v32 = vmul.f32 %v64_v46, %v46_v22  ;;  %v53_v41 = vunpack.c.h.bf16 %v33_v26  ;;  %v52_v59 = vunpack.c.l.bf16 %v33_v26 }
  0x1a   :  { %777 = vmatprep.subr.bf16.mxu1 %v837_v28  ;;  %v157_v28 = vmax.f32 %v137_v17, 0.0  ;;  %v48_v38 = vunpack.c.h.bf16 %v30_v24  ;;  %v47_v58 = vunpack.c.l.bf16 %v30_v24  ;;  %v54_v17 = vunpack.c.h.bf16 %v31_v5 }
  0x1b   :  { %750 = vmatpush3.bf16.msra.mxu0 %v836_v27  ;;  %v152_v27 = vmax.f32 %v132_v16, 0.0  ;;  %v140_v42 = vadd.f32 %v111_v47, %v93_v32  ;;  %v91_v16 = vmul.f32 %v76_v10, %v44_v9 }
  0x1c   :  { %751 = vmatprep.subr.bf16.mxu0 %v839_v31  ;;  %v844_v31 = vld [vmem:[%s1110_s1 + $0x108] sm:$0xff]   ;;  %v95_v53 = vmul.f32 %v72_v54, %v48_v38  ;;  %v94_v0 = vmul.f32 %v1021_v56, %v47_v58  ;;  %v101_v39 = vmul.f32 %v76_v10, %v54_v17 }
  0x1d   :  { %778 = vmatpush3.bf16.msra.mxu1 %v838_v29  ;;  %v151_v29 = vmax.f32 %v131_v18, 0.0  ;;  %v172_v36 = vpack.c.bf16 %v157_v28, %v152_v27 }
  0x1e   :  { %779 = vmatprep.subr.bf16.mxu1 %v841_v35  ;;  %v50_v35 = vunpack.c.l.bf16 %v32_v11  ;;  %v142_v62 = vadd.f32 %v1018_v55, %v95_v53  ;;  %v141_v7 = vadd.f32 %v1024_v57, %v94_v0  ;;  %v123_v11 = vrot.slane %v996_v45, %v75_v40 }
  0x1f   :  { %752 = vmatpush3.bf16.msra.mxu0 %v840_v33  ;;  %v98_v33 = vmul.f32 %v64_v46, %v51_v23  ;;  %v171_v37 = vpack.c.bf16 %v156_v30, %v151_v29  ;;  %562 = vmatprep.mubr.bf16.mxu1 %v172_v36  ;;  %v100_v46 = vmul.f32 %v72_v54, %v53_v41  ;;  %v690_v29 = vld [vmem:[%s1114_s4] ss:$0 sm:$0xff] }
  0x20   :  { %799 = vmatprep.subr.bf16.mxu0 %v843_v51  ;;  %v99_v54 = vmul.f32 %v1021_v56, %v52_v59  ;;  %v162_v6 = vmax.f32 %v142_v62, 0.0  ;;  %v846_v56 = vld [vmem:[%s1110_s1 + $0x118] sm:$0xff]   ;;  %v161_v13 = vmax.f32 %v141_v7, 0.0  ;;  %v143_v25 = vadd.f32 %v123_v11, %v96_v19 }
  0x21   :  { %780 = vmatpush3.bf16.msra.mxu1 %v842_v48  ;;  %v145_v43 = vadd.f32 %v111_v47, %v98_v33  ;;  %v97_v48 = vmul.f32 %v60_v49, %v50_v35  ;;  %v139_v47 = vadd.f32 %v1005_v50, %v92_v44  ;;  %v147_v63 = vadd.f32 %v1018_v55, %v100_v46 }
  0x22   :  { %514 = vmatmul.mubr.bf16.vlgmr.msra.gmra.mrb[0].mxu0 %v169_v21  ;;  %v146_v55 = vadd.f32 %v1024_v57, %v99_v54  ;;  %v86_v57 = vmul.f32 %v76_v10, %v39_v4  ;;  %v138_v21 = vadd.f32 %v123_v11, %v91_v16  ;;  %v148_v45 = vadd.f32 %v123_v11, %v101_v39 }
  0x23   :  { %800 = vmatpush3.bf16.msra.mxu0 %v843_v51  ;;  %v160_v51 = vmax.f32 %v140_v42, 0.0  ;;  %v165_v61 = vmax.f32 %v145_v43, 0.0  ;;  %v144_v49 = vadd.f32 %v1005_v50, %v97_v48  ;;  %v159_v2 = vmax.f32 %v139_v47, 0.0 }
  0x24   :  { %801 = vmatprep.subr.bf16.mxu0 %v844_v31  ;;  %563 = vmatmul.mubr.bf16.vlgmr.msra.gmra.mrb[0].mxu1 %v171_v37  ;;  %v167_v50 = vmax.f32 %v147_v63, 0.0  ;;  %v166_v14 = vmax.f32 %v146_v55, 0.0  ;;  %v133_v20 = vadd.f32 %v123_v11, %v86_v57  ;;  %v158_v40 = vmax.f32 %v138_v21, 0.0 }
  0x25   :  { %v175_v1 = vpack.c.bf16 %v165_v61, %v160_v51  ;;  %v164_v3 = vmax.f32 %v144_v49, 0.0  ;;  %v163_v23 = vmax.f32 %v143_v25, 0.0  ;;  %v168_v26 = vmax.f32 %v148_v45, 0.0 }
  0x26   :  { %v177_v12 = vpack.c.bf16 %v167_v50, %v162_v6  ;;  %v176_v18 = vpack.c.bf16 %v166_v14, %v161_v13  ;;  %v153_v22 = vmax.f32 %v133_v20, 0.0 }
  0x27   :  { %802 = vmatpush3.bf16.msra.mxu0 %v844_v31  ;;  %521 = vmatprep.mubr.bf16.mxu0 %v175_v1  ;;  %v174_v8 = vpack.c.bf16 %v164_v3, %v159_v2  ;;  %v178_v27 = vpack.c.bf16 %v168_v26, %v163_v23 }
  0x28   :  { %803 = vmatprep.subr.bf16.mxu0 %v845_v52  ;;  %570 = vmatprep.mubr.bf16.mxu1 %v177_v12  ;;  %v173_v24 = vpack.c.bf16 %v158_v40, %v153_v22 }
  0x2a   :  { %522 = vmatmul.mubr.bf16.gmra.mrb[4].mxu0 %v174_v8 }
  0x2b   :  { %804 = vmatpush3.bf16.msra.mxu0 %v845_v52  ;;  %807 = vmatprep.mubr.msk.bf16.mxu0 %vm474_vm0, %v173_v24 }
  0x2c   :  { %805 = vmatprep.subr.bf16.mxu0 %v846_v56  ;;  %571 = vmatmul.mubr.bf16.gmra.mrb[4].mxu1 %v176_v18 }
  0x2f   :  { %806 = vmatpush3.bf16.msra.mxu0 %v846_v56 }
  0x32   :  { %808 = vmatmul.mubr.msk.bf16.vlgmr.msra.gmra.mrb[8].mxu0 %vm474_vm0, %v178_v27 }
  0xf5   :  { %v753_v28 = vpop.f32.mrb[0].mxu0 }
  0xf6   :  { %v754_v30 = vpop.f32.mrb[1].mxu0 }
  0xf7   :  { %v755_v31 = vadd.f32 %v754_v30, %v753_v28  ;;  %v756_v32 = vpop.f32.mrb[2].mxu0  ;;  %v781_v33 = vpop.f32.mrb[0].mxu1 }
  0xf8   :  { %v757_v34 = vpop.f32.mrb[3].mxu0  ;;  %v782_v37 = vpop.f32.mrb[1].mxu1 }
  0xf9   :  { %v516_v35 = vadd.f32 %v755_v31, %v690_v29  ;;  %v758_v36 = vadd.f32 %v757_v34, %v756_v32  ;;  %v783_v38 = vadd.f32 %v782_v37, %v781_v33  ;;  %v784_v41 = vpop.f32.mrb[2].mxu1 }
  0xfa   :  { %v785_v43 = vpop.f32.mrb[3].mxu1 }
  0xfb   :  { %v519_v42 = vadd.f32 %v758_v36, %v690_v29  ;;  %v786_v44 = vadd.f32 %v785_v43, %v784_v41  ;;  %v565_v48 = vadd.f32 %v783_v38, %v516_v35 }
  0xfd   :  { %v759_v52 = vpop.f32.mrb[4].mxu0  ;;  %v568_v53 = vadd.f32 %v786_v44, %v519_v42 }
  0xfe   :  { %v760_v46 = vpop.f32.mrb[5].mxu0 }
  0xff   :  { %v761_v58 = vadd.f32 %v760_v46, %v759_v52  ;;  %v762_v59 = vpop.f32.mrb[6].mxu0  ;;  %v787_v60 = vpop.f32.mrb[4].mxu1 }
 0x100   :  { %v763_v51 = vpop.f32.mrb[7].mxu0  ;;  %v788_v49 = vpop.f32.mrb[5].mxu1 }
 0x101   :  { %v524_v61 = vadd.f32 %v761_v58, %v690_v29  ;;  %v764_v47 = vadd.f32 %v763_v51, %v762_v59  ;;  %v789_v62 = vadd.f32 %v788_v49, %v787_v60  ;;  %v790_v63 = vpop.f32.mrb[6].mxu1 }
 0x102   :  { %v791_v54 = vpop.f32.mrb[7].mxu1 }
 0x103   :  { %v527_v0 = vadd.f32 %v764_v47, %v690_v29  ;;  %v792_v1 = vadd.f32 %v791_v54, %v790_v63  ;;  %v573_v2 = vadd.f32 %v789_v62, %v524_v61 }
 0x105   :  { %v576_v3 = vadd.f32 %v792_v1, %v527_v0  ;;  %v809_v4 = vpop.f32.mrb[8].mxu0 }
 0x106   :  { %v622_v5 = vadd.f32 %v809_v4, %v573_v2  ;;  %v613_v6 = vpop.f32.mrb[9].mxu0 }
 0x107   :  { %v614_v50 = vadd.f32 %v613_v6, %v565_v48  ;;  %v810_v7 = vpop.f32.mrb[10].mxu0 }
 0x108   :  { %v735_v55 = vpack.c.bf16 %v622_v5, %v622_v5  ;;  %v625_v8 = vadd.f32 %v810_v7, %v576_v3  ;;  %v616_v56 = vpop.f32.mrb[11].mxu0  ;;  %v645_v12 = vmul.f32 %v622_v5, %v622_v5  ;;  %v631_v18 = vsel %vm474_vm0, %v622_v5, 0.0 }
 0x109   :  { %v643_v9 = vmul.f32 %v614_v50, %v614_v50  ;;  %v733_v10 = vpack.c.bf16 %v614_v50, %v614_v50  ;;  %v617_v11 = vadd.f32 %v616_v56, %v568_v53  ;;  %v628_v14 = vsel %vm474_vm0, %v614_v50, 0.0 }
 0x10a   :  { %680 = vst.msk [vmem:[%s1115_s5 + $0x8] sm:$0xf] %vm677_vm1, %v735_v55  ;;  %v736_v13 = vpack.c.bf16 %v625_v8, %v625_v8  ;;  %v646_v20 = vmul.f32 %v625_v8, %v625_v8  ;;  %v650_v22 = vsel %vm474_vm0, %v645_v12, 0.0  ;;  %v633_v40 = vsel %vm474_vm0, %v625_v8, 0.0 }
 0x10b   :  { %678 = vst.msk [vmem:[%s1115_s5] sm:$0xf] %vm677_vm1, %v733_v10  ;;  %v629_v15 = vsel %vm474_vm0, %v617_v11, 0.0  ;;  %v644_v57 = vmul.f32 %v617_v11, %v617_v11  ;;  %v734_v16 = vpack.c.bf16 %v617_v11, %v617_v11  ;;  %v647_v19 = vsel %vm474_vm0, %v643_v9, 0.0 }
 0x10c   :  { %681 = vst.msk [vmem:[%s1115_s5 + $0xc] sm:$0xf] %vm677_vm1, %v736_v13  ;;  %v630_v17 = vadd.f32 %v629_v15, %v628_v14  ;;  %v652_v24 = vsel %vm474_vm0, %v646_v20, 0.0 }
 0x10d   :  { %v648_v21 = vsel %vm474_vm0, %v644_v57, 0.0  ;;  %679 = vst.msk [vmem:[%s1115_s5 + $0x4] sm:$0xf] %vm677_vm1, %v734_v16 }
 0x10e   :  { %v632_v39 = vadd.f32 %v631_v18, %v630_v17  ;;  %v649_v25 = vadd.f32 %v648_v21, %v647_v19 }
 0x110   :  { %v634_v45 = vadd.f32 %v633_v40, %v632_v39  ;;  %v651_v23 = vadd.f32 %v650_v22, %v649_v25 }
 0x112   :  { %v635_v26 = vrot.slane %v634_v45, 4  ;;  %v653_v27 = vadd.f32 %v652_v24, %v651_v23 }
 0x114   :  { %v636_v28 = vadd.f32 %v635_v26, %v634_v45  ;;  %v654_v29 = vrot.slane %v653_v27, 4 }
 0x116   :  { %v637_v30 = vrot.slane %v636_v28, 2  ;;  %v655_v31 = vadd.f32 %v654_v29, %v653_v27 }
 0x118   :  { %v638_v32 = vadd.f32 %v637_v30, %v636_v28  ;;  %v656_v33 = vrot.slane %v655_v31, 2 }
 0x11a   :  { %v639_v34 = vrot.slane %v638_v32, 1  ;;  %v657_v35 = vadd.f32 %v656_v33, %v655_v31 }
 0x11c   :  { %v640_v36 = vadd.f32 %v639_v34, %v638_v32  ;;  %v658_v37 = vrot.slane %v657_v35, 1 }
 0x11e   :  { %642 = vst.msk [vmem:[%s1116_s6] sm:$0x1] %vm641_vm2, %v640_v36  ;;  %v659_v38 = vadd.f32 %v658_v37, %v657_v35 }
 0x120   :  { %660 = vst.msk [vmem:[%s1116_s6 + $0x1] sm:$0x1] %vm641_vm2, %v659_v38 }

// kernel: squeeze.152
= control target key start
LH: loop header
LB: loop body
LE: loop exit
PB: predicated region body
PF: predicated region fallthrough
CT: control target
= control target key end

     0   :  { %s37_s8 = smov 80   ;;  %vm7_vm0 = vcmask 130048   ;;  %s38_s9 = smov 96   ;;  %s55_s0 = inlined_call_operand.vmem [shape: f32[64], index: 0, kind: input, shape index: {}]   ;;  %s56_s1 = inlined_call_operand.vmem [shape: f32[4,16], index: 1, kind: output, shape index: {}]  }
   0x1   :  { %v4_v0 = vld [vmem:[%s55_s0] sm:$0x1]  ;;  %s36_s0 = smov 112  }
   0x2   :  { %5 = vst [vmem:[#allocation1] sm:$0x1] %v4_v0 }
   0x9   :  { %v9_v1 = vld [vmem:[#allocation1] sm:$0x1]  }
   0xa   :  { %v21_v2 = vld [vmem:[#allocation1] sm:$0x1]   ;;  %10 = vrot.lane.b32.xlu0 %v9_v1, %s36_s0 }
   0xb   :  { %22 = vrot.lane.b32.xlu1 %v21_v2, %s37_s8  ;;  %v6_v3 = vld [vmem:[#allocation1] sm:$0x1]  }
   0xc   :  { %v15_v4 = vld [vmem:[#allocation1] sm:$0x1]   ;;  %8 = vst.msk [vmem:[#allocation0] sm:$0x1] %vm7_vm0, %v6_v3  }
   0xe   :  { %16 = vrot.lane.b32.xlu0 %v15_v4, %s38_s9 }
  0x7c   :  { %v11_v5 = vpop.permute.xlu0 %10  }
  0x7d   :  { %v23_v6 = vpop.permute.xlu1 %22   ;;  %14 = vst.msk [vmem:[#allocation0 + $0x1] sm:$0x1] %vm7_vm0, %v11_v5  }
  0x7e   :  { %26 = vst.msk [vmem:[#allocation0 + $0x3] sm:$0x1] %vm7_vm0, %v23_v6  }
  0x80   :  { %v17_v7 = vpop.permute.xlu0 %16  }
  0x81   :  { %20 = vst.msk [vmem:[#allocation0 + $0x2] sm:$0x1] %vm7_vm0, %v17_v7  }
  0x88   :  { %v30_v8 = vld [vmem:[#allocation0] sm:$0xf] }
  0x89   :  { %32 = vst [vmem:[%s56_s1] sm:$0xf] %v30_v8 }

// kernel: tile.138
= control target key start
LH: loop header
LB: loop body
LE: loop exit
PB: predicated region body
PF: predicated region fallthrough
CT: control target
= control target key end

     0   :  { %s28_s0 = inlined_call_operand.vmem [shape: f32[32], index: 0, kind: input, shape index: {}]   ;;  %s29_s1 = inlined_call_operand.vmem [shape: f32[9,32], index: 1, kind: output, shape index: {}]  }
   0x1   :  { %v4_v0 = vld [vmem:[%s28_s0] ss:$0 sm:$0xff] }
   0x2   :  { %5 = vst [vmem:[%s29_s1] sm:$0xff] %v4_v0  ;;  %8 = vst [vmem:[%s29_s1 + $0x8] sm:$0xff] %v4_v0 }

// kernel: tile.143
= control target key start
LH: loop header
LB: loop body
LE: loop exit
PB: predicated region body
PF: predicated region fallthrough
CT: control target
= control target key end

     0   :  { %s6_s6 = smov 3  ;;  %s13_s11 = smov 3  ;;  %vm3_vm0 = vcmask 261120   ;;  %vm10_vm1 = vcmask 1048320   ;;  %vm17_vm2 = vcmask 785920   ;;  %vm24_vm3 = vcmask 523520   ;;  %s86_s0 = inlined_call_operand.vmem [shape: f32[9,32], index: 0, kind: input, shape index: {}]   ;;  %s87_s1 = inlined_call_operand.vmem [shape: f32[1,288], index: 1, kind: output, shape index: {}]  }
   0x1   :  { %v2_v0 = vld [vmem:[%s86_s0] ss:$4 sm:$0x7]   ;;  %v44_v1 = vld [vmem:[%s86_s0 + $0x3] ss:$4 sm:%s6_s6]   ;;  %s52_s12 = smov 96  }
   0x2   :  { %8 = vrot.lane.b32.xlu0 %v44_v1, %s52_s12  ;;  %s20_s13 = smov 3  ;;  %4 = vst.msk [vmem:[#allocation0] ss:$8 sm:$0x7] %vm3_vm0, %v2_v0   ;;  %v45_v2 = vld [vmem:[%s86_s0 + $0x2] ss:$4 sm:%s13_s11]  }
   0x3   :  { %v46_v3 = vld [vmem:[%s86_s0 + $0x1] ss:$4 sm:%s20_s13]   ;;  %s53_s0 = smov 32   ;;  %s54_s18 = smov 64  }
   0x4   :  { %22 = vrot.lane.b32.xlu1 %v46_v3, %s53_s0 }
   0x6   :  { %15 = vrot.lane.b32.xlu0 %v45_v2, %s54_s18 }
   0x9   :  { %v38_v4 = vld [vmem:[#allocation0 + $0x10] sm:$0x1] }
   0xa   :  { %48 = vst [vmem:[%s87_s1 + $0x2] sm:$0x1] %v38_v4 }
  0x74   :  { %v9_v5 = vpop.permute.xlu0 %8  }
  0x75   :  { %11 = vst.msk [vmem:[#allocation0] ss:$8 sm:$0x3] %vm10_vm1, %v9_v5  }
  0x76   :  { %v23_v6 = vpop.permute.xlu1 %22  }
  0x78   :  { %v16_v7 = vpop.permute.xlu0 %15  }
  0x79   :  { %18 = vst.msk [vmem:[#allocation0] ss:$8 sm:$0x3] %vm17_vm2, %v16_v7  }
  0x7a   :  { %25 = vst.msk [vmem:[#allocation0] ss:$8 sm:$0x3] %vm24_vm3, %v23_v6  }
  0x81   :  { %v29_v8 = vld [vmem:[#allocation0] sm:$0x1]  ;;  %v33_v9 = vld [vmem:[#allocation0 + $0x8] sm:$0x1] }
  0x82   :  { %31 = vst [vmem:[%s87_s1] sm:$0x1] %v29_v8  ;;  %47 = vst [vmem:[%s87_s1 + $0x1] sm:$0x1] %v33_v9 }

// kernel: unet_forward.18
= control target key start
LH: loop header
LB: loop body
LE: loop exit
PB: predicated region body
PF: predicated region fallthrough
CT: control target
= control target key end

     0   :  { %v105_v5 = vlaneseq  ;;  %vm456_vm0 = vcmask 261120   ;;  %vm832_vm1 = vcmask 257024   ;;  %vm712_vm2 = vcmask 253952   ;;  %s1474_s1 = inlined_call_operand.vmem [shape: bf16[288,32], index: 1, kind: input, shape index: {}]   ;;  %s1475_s0 = inlined_call_operand.vmem [shape: bf16[128,288], index: 0, kind: input, shape index: {}]   ;;  %s1476_s2 = inlined_call_operand.vmem [shape: f32[1,288], index: 2, kind: input, shape index: {}]   ;;  %s1477_s3 = inlined_call_operand.vmem [shape: f32[1,288], index: 3, kind: input, shape index: {}]   ;;  %s1478_s4 = inlined_call_operand.vmem [shape: f32[1,32], index: 4, kind: input, shape index: {}]   ;;  %s1479_s5 = inlined_call_operand.vmem [shape: bf16[128,32], index: 5, kind: output, shape index: {0}]   ;;  %s1480_s6 = inlined_call_operand.vmem [shape: f32[2,32], index: 6, kind: output, shape index: {1}]  }
   0x1   :  { %v1026_v0 = vld [vmem:[%s1474_s1 + $0x40] sm:$0xff]   ;;  %v1028_v2 = vld [vmem:[%s1474_s1 + $0x48] sm:$0xff]   ;;  %v1030_v4 = vld [vmem:[%s1474_s1 + $0x50] sm:$0xff]  }
   0x2   :  { %v1027_v1 = vld [vmem:[%s1474_s1] sm:$0xff]   ;;  %916 = vmatprep.subr.bf16.mxu0 %v1026_v0  ;;  %1010 = vmatprep.subr.bf16.mxu1 %v1026_v0  ;;  %v1029_v3 = vld [vmem:[%s1474_s1 + $0x8] sm:$0xff]   ;;  %v1031_v6 = vld [vmem:[%s1474_s1 + $0x10] sm:$0xff]   ;;  %v106_v8 = vshrl.u32 %v105_v5, 7 }
   0x3   :  { %917 = vmatpush3.bf16.msra.mxu0 %v1027_v1  ;;  %1018 = vmatpush3.bf16.msra.mxu1 %v1027_v1  ;;  %v1032_v7 = vld [vmem:[%s1474_s1 + $0x58] sm:$0xff]   ;;  %v1034_v10 = vld [vmem:[%s1474_s1 + $0x60] sm:$0xff]   ;;  %v1036_v14 = vld [vmem:[%s1474_s1 + $0x68] sm:$0xff]  }
   0x4   :  { %918 = vmatprep.subr.bf16.mxu0 %v1028_v2  ;;  %1011 = vmatprep.subr.bf16.mxu1 %v1028_v2  ;;  %v1033_v9 = vld [vmem:[%s1474_s1 + $0x18] sm:$0xff]   ;;  %v111_v11 = vsub.s32 1, %v106_v8  ;;  %v1035_v12 = vld [vmem:[%s1474_s1 + $0x20] sm:$0xff]   ;;  %v115_v13 = vsub.s32 2, %v106_v8  ;;  %v25_v16 = vld [vmem:[%s1475_s0 + $0xc] sm:$0xff]  ;;  %v107_v18 = vsub.s32 0, %v106_v8 }
   0x5   :  { %v23_v15 = vld [vmem:[%s1475_s0] sm:$0xff]  ;;  %v58_v21 = vunpack.c.l.bf16 %v25_v16  ;;  %v59_v22 = vunpack.c.h.bf16 %v25_v16  ;;  %v47_v24 = vld [vmem:[%s1475_s0 + $0x90] sm:$0xff]  ;;  %v1037_v26 = vld [vmem:[%s1474_s1 + $0x28] sm:$0xff]  }
   0x6   :  { %v103_v17 = vld [vmem:[%s1476_s2] sm:$0x7]  ;;  %v55_v19 = vunpack.c.l.bf16 %v23_v15  ;;  %v56_v20 = vunpack.c.h.bf16 %v23_v15  ;;  %v1144_v31 = vld [vmem:[%s1475_s0 + $0x18] sm:$0xff]  ;;  %v1149_v32 = vld [vmem:[%s1475_s0 + $0x24] sm:$0xff]  ;;  %v91_v34 = vunpack.c.l.bf16 %v47_v24  ;;  %v92_v35 = vunpack.c.h.bf16 %v47_v24 }
   0x7   :  { %919 = vmatpush3.bf16.msra.mxu0 %v1029_v3  ;;  %1019 = vmatpush3.bf16.msra.mxu1 %v1029_v3  ;;  %v168_v23 = vld [vmem:[%s1477_s3] sm:$0x7]  ;;  %v1133_v27 = vrot.slane %v103_v17, %v111_v11  ;;  %v1135_v28 = vrot.slane %v103_v17, %v115_v13  ;;  %v1038_v33 = vld [vmem:[%s1474_s1 + $0x70] sm:$0xff]   ;;  %v1156_v40 = vrot.slane %v103_v17, %v107_v18  ;;  %v62_v41 = vunpack.c.h.bf16 %v1144_v31  ;;  %v1162_v42 = vld [vmem:[%s1475_s0 + $0xa8] sm:$0xff] }
   0x8   :  { %920 = vmatprep.subr.bf16.mxu0 %v1030_v4  ;;  %1012 = vmatprep.subr.bf16.mxu1 %v1030_v4  ;;  %v49_v25 = vld [vmem:[%s1475_s0 + $0x9c] sm:$0xff]  ;;  %v1137_v29 = vrot.slane %v168_v23, %v111_v11  ;;  %v1139_v30 = vrot.slane %v168_v23, %v115_v13  ;;  %v1166_v45 = vrot.slane %v168_v23, %v107_v18  ;;  %v65_v46 = vunpack.c.h.bf16 %v1149_v32  ;;  %v1039_v51 = vld [vmem:[%s1474_s1 + $0x30] sm:$0xff]  }
   0x9   :  { %v94_v36 = vunpack.c.l.bf16 %v49_v25  ;;  %v95_v37 = vunpack.c.h.bf16 %v49_v25  ;;  %v121_v38 = vmul.f32 %v1133_v27, %v56_v20  ;;  %v124_v39 = vmul.f32 %v1133_v27, %v59_v22  ;;  %v1040_v56 = vld [vmem:[%s1474_s1 + $0x78] sm:$0xff]   ;;  %v1042_v15 = vld [vmem:[%s1474_s1 + $0x80] sm:$0xff]   ;;  %v31_v24 = vld [vmem:[%s1475_s0 + $0x30] sm:$0xff] }
   0xa   :  { %v157_v43 = vmul.f32 %v1133_v27, %v92_v35  ;;  %v120_v49 = vmul.f32 %v1156_v40, %v55_v19  ;;  %v123_v50 = vmul.f32 %v1156_v40, %v58_v21  ;;  %v156_v54 = vmul.f32 %v1156_v40, %v91_v34  ;;  %v53_v1 = vld [vmem:[%s1475_s0 + $0xb4] sm:$0xff] }
   0xb   :  { %921 = vmatpush3.bf16.msra.mxu0 %v1031_v6  ;;  %1020 = vmatpush3.bf16.msra.mxu1 %v1031_v6  ;;  %v160_v44 = vmul.f32 %v1133_v27, %v95_v37  ;;  %v186_v47 = vadd.f32 %v1137_v29, %v121_v38  ;;  %v189_v48 = vadd.f32 %v1137_v29, %v124_v39  ;;  %v98_v55 = vunpack.c.h.bf16 %v1162_v42  ;;  %v1041_v6 = vld [vmem:[%s1474_s1 + $0x38] sm:$0xff]   ;;  %v1043_v38 = vld [vmem:[%s1474_s1 + $0x88] sm:$0xff]  }
   0xc   :  { %922 = vmatprep.subr.bf16.mxu0 %v1032_v7  ;;  %1013 = vmatprep.subr.bf16.mxu1 %v1032_v7  ;;  %v222_v52 = vadd.f32 %v1137_v29, %v157_v43  ;;  %v185_v59 = vadd.f32 %v1166_v45, %v120_v49  ;;  %v188_v60 = vadd.f32 %v1166_v45, %v123_v50  ;;  %v101_v13 = vunpack.c.h.bf16 %v53_v1  ;;  %v24_v39 = vld [vmem:[%s1475_s0 + $0x8] ss:$12 sps:$4 sm:$0xff]  }
   0xd   :  { %v225_v53 = vadd.f32 %v1137_v29, %v160_v44  ;;  %v234_v57 = vmax.f32 %v186_v47, 0.0  ;;  %v237_v58 = vmax.f32 %v189_v48, 0.0  ;;  %v159_v63 = vmul.f32 %v1156_v40, %v94_v36 }
   0xe   :  { %v270_v61 = vmax.f32 %v222_v52, 0.0  ;;  %v221_v0 = vadd.f32 %v1166_v45, %v156_v54  ;;  %v233_v3 = vmax.f32 %v185_v59, 0.0  ;;  %v236_v4 = vmax.f32 %v188_v60, 0.0 }
   0xf   :  { %923 = vmatpush3.bf16.msra.mxu0 %v1033_v9  ;;  %1021 = vmatpush3.bf16.msra.mxu1 %v1033_v9  ;;  %v273_v62 = vmax.f32 %v225_v53, 0.0  ;;  %v282_v2 = vpack.c.bf16 %v237_v58, %v234_v57  ;;  %v127_v5 = vmul.f32 %v1133_v27, %v62_v41  ;;  %v224_v8 = vadd.f32 %v1166_v45, %v159_v63  ;;  %v28_v58 = vld [vmem:[%s1475_s0 + $0x20] ss:$12 sps:$4 sm:$0xff]  }
  0x10   :  { %924 = vmatprep.subr.bf16.mxu0 %v1034_v10  ;;  %1014 = vmatprep.subr.bf16.mxu1 %v1034_v10  ;;  %v269_v9 = vmax.f32 %v221_v0, 0.0  ;;  %v130_v10 = vmul.f32 %v1133_v27, %v65_v46  ;;  %v281_v11 = vpack.c.bf16 %v236_v4, %v233_v3  ;;  %v61_v18 = vunpack.c.l.bf16 %v1144_v31 }
  0x11   :  { %v300_v7 = vpack.c.bf16 %v273_v62, %v270_v61  ;;  %513 = vmatprep.mubr.bf16.mxu0 %v282_v2  ;;  %v272_v16 = vmax.f32 %v224_v8, 0.0  ;;  %v64_v19 = vunpack.c.l.bf16 %v1149_v32  ;;  %v166_v21 = vmul.f32 %v1133_v27, %v101_v13  ;;  %v33_v32 = vld [vmem:[%s1475_s0 + $0x3c] sm:$0xff] }
  0x12   :  { %v195_v17 = vadd.f32 %v1137_v29, %v130_v10  ;;  %v97_v23 = vunpack.c.l.bf16 %v1162_v42  ;;  %v100_v36 = vunpack.c.l.bf16 %v53_v1  ;;  %v68_v44 = vunpack.c.h.bf16 %v31_v24 }
  0x13   :  { %925 = vmatpush3.bf16.msra.mxu0 %v1035_v12  ;;  %1022 = vmatpush3.bf16.msra.mxu1 %v1035_v12  ;;  %v192_v12 = vadd.f32 %v1137_v29, %v127_v5  ;;  %v299_v25 = vpack.c.bf16 %v272_v16, %v269_v9  ;;  %v129_v31 = vmul.f32 %v1156_v40, %v64_v19  ;;  %v71_v49 = vunpack.c.h.bf16 %v33_v32 }
  0x14   :  { %926 = vmatprep.subr.bf16.mxu0 %v1036_v14  ;;  %1015 = vmatprep.subr.bf16.mxu1 %v1036_v14  ;;  %v163_v14 = vmul.f32 %v1133_v27, %v98_v55  ;;  %v231_v34 = vadd.f32 %v1137_v29, %v166_v21  ;;  %v162_v37 = vmul.f32 %v1156_v40, %v97_v23  ;;  %v57_v53 = vunpack.c.l.bf16 %v24_v39 }
  0x15   :  { %561 = vmatprep.mubr.bf16.mxu1 %v300_v7  ;;  %v240_v20 = vmax.f32 %v192_v12, 0.0  ;;  %v194_v43 = vadd.f32 %v1166_v45, %v129_v31  ;;  %v165_v47 = vmul.f32 %v1156_v40, %v100_v36  ;;  %v133_v52 = vmul.f32 %v1133_v27, %v68_v44  ;;  %v35_v7 = vld [vmem:[%s1475_s0 + $0x48] sm:$0xff]  ;;  %v37_v12 = vld [vmem:[%s1475_s0 + $0x54] sm:$0xff] }
  0x16   :  { %v228_v22 = vadd.f32 %v1137_v29, %v163_v14  ;;  %v279_v46 = vmax.f32 %v231_v34, 0.0  ;;  %v227_v48 = vadd.f32 %v1166_v45, %v162_v37  ;;  %v136_v57 = vmul.f32 %v1133_v27, %v71_v49 }
  0x17   :  { %927 = vmatpush3.bf16.msra.mxu0 %v1037_v26  ;;  %1023 = vmatpush3.bf16.msra.mxu1 %v1037_v26  ;;  %v243_v26 = vmax.f32 %v195_v17, 0.0  ;;  %v230_v55 = vadd.f32 %v1166_v45, %v165_v47  ;;  %v198_v60 = vadd.f32 %v1137_v29, %v133_v52  ;;  %v60_v61 = vunpack.c.h.bf16 %v24_v39  ;;  %v32_v17 = vld [vmem:[%s1475_s0 + $0x38] ss:$12 sps:$4 sm:$0xff]  }
  0x18   :  { %928 = vmatprep.subr.bf16.mxu0 %v1038_v33  ;;  %1016 = vmatprep.subr.bf16.mxu1 %v1038_v33  ;;  %v126_v33 = vmul.f32 %v1156_v40, %v61_v18  ;;  %v276_v35 = vmax.f32 %v228_v22, 0.0  ;;  %v122_v62 = vmul.f32 %v1135_v28, %v57_v53  ;;  %v201_v0 = vadd.f32 %v1137_v29, %v136_v57  ;;  %v39_v53 = vld [vmem:[%s1475_s0 + $0x60] sm:$0xff] }
  0x19   :  { %v285_v41 = vpack.c.bf16 %v243_v26, %v240_v20  ;;  %v278_v63 = vmax.f32 %v230_v55, 0.0  ;;  %v67_v1 = vunpack.c.l.bf16 %v31_v24  ;;  %v70_v2 = vunpack.c.l.bf16 %v33_v32 }
  0x1a   :  { %v191_v42 = vadd.f32 %v1166_v45, %v126_v33  ;;  %v303_v54 = vpack.c.bf16 %v279_v46, %v276_v35  ;;  %v246_v3 = vmax.f32 %v198_v60, 0.0  ;;  %v125_v4 = vmul.f32 %v1135_v28, %v60_v61 }
  0x1b   :  { %929 = vmatpush3.bf16.msra.mxu0 %v1039_v51  ;;  %1024 = vmatpush3.bf16.msra.mxu1 %v1039_v51  ;;  %v242_v51 = vmax.f32 %v194_v43, 0.0  ;;  %v187_v5 = vadd.f32 %v1139_v30, %v122_v62  ;;  %v249_v9 = vmax.f32 %v201_v0, 0.0  ;;  %v132_v10 = vmul.f32 %v1156_v40, %v67_v1 }
  0x1c   :  { %930 = vmatprep.subr.bf16.mxu0 %v1040_v56  ;;  %1017 = vmatprep.subr.bf16.mxu1 %v1040_v56  ;;  %v239_v50 = vmax.f32 %v191_v42, 0.0  ;;  %v275_v56 = vmax.f32 %v227_v48, 0.0  ;;  %v190_v13 = vadd.f32 %v1139_v30, %v125_v4  ;;  %v74_v21 = vunpack.c.h.bf16 %v35_v7 }
  0x1d   :  { %v235_v14 = vmax.f32 %v187_v5, 0.0  ;;  %v288_v18 = vpack.c.bf16 %v249_v9, %v246_v3  ;;  %v197_v19 = vadd.f32 %v1166_v45, %v132_v10  ;;  %v69_v32 = vunpack.c.l.bf16 %v32_v17 }
  0x1e   :  { %v284_v59 = vpack.c.bf16 %v242_v51, %v239_v50  ;;  %v302_v8 = vpack.c.bf16 %v278_v63, %v275_v56  ;;  %v238_v22 = vmax.f32 %v190_v13, 0.0  ;;  %v139_v31 = vmul.f32 %v1133_v27, %v74_v21  ;;  %v40_v63 = vld [vmem:[%s1475_s0 + $0x68] ss:$12 sps:$4 sm:$0xff]  }
  0x1f   :  { %931 = vmatpush3.bf16.msra.mxu0 %v1041_v6  ;;  %1025 = vmatpush3.bf16.msra.mxu1 %v1041_v6  ;;  %v63_v6 = vunpack.c.l.bf16 %v28_v58  ;;  %v245_v26 = vmax.f32 %v197_v19, 0.0  ;;  %v72_v42 = vunpack.c.h.bf16 %v32_v17  ;;  %v134_v43 = vmul.f32 %v1135_v28, %v69_v32  ;;  %v43_v32 = vld [vmem:[%s1475_s0 + $0x78] sm:$0xff] }
  0x20   :  { %990 = vmatprep.subr.bf16.mxu1 %v1042_v15  ;;  %v283_v34 = vpack.c.bf16 %v238_v22, %v235_v14  ;;  %v73_v47 = vunpack.c.l.bf16 %v35_v7  ;;  %v76_v48 = vunpack.c.l.bf16 %v37_v12  ;;  %v80_v3 = vunpack.c.h.bf16 %v39_v53 }
  0x21   :  { %v128_v16 = vmul.f32 %v1135_v28, %v63_v6  ;;  %v137_v50 = vmul.f32 %v1135_v28, %v72_v42  ;;  %v199_v51 = vadd.f32 %v1139_v30, %v134_v43  ;;  %v84_v19 = vunpack.c.h.bf16 %v40_v63 }
  0x22   :  { %514 = vmatmul.mubr.bf16.vlgmr.msra.gmra.mrb[0].mxu0 %v281_v11  ;;  %562 = vmatmul.mubr.bf16.vlgmr.msra.gmra.mrb[0].mxu1 %v299_v25  ;;  %v135_v11 = vmul.f32 %v1156_v40, %v70_v2  ;;  %v77_v25 = vunpack.c.h.bf16 %v37_v12  ;;  %v138_v56 = vmul.f32 %v1156_v40, %v73_v47  ;;  %v141_v57 = vmul.f32 %v1156_v40, %v76_v48 }
  0x23   :  { %521 = vmatprep.mubr.bf16.mxu0 %v285_v41  ;;  %991 = vmatpush3.bf16.msra.mxu1 %v1042_v15  ;;  %v66_v15 = vunpack.c.h.bf16 %v28_v58  ;;  %v193_v24 = vadd.f32 %v1139_v30, %v128_v16  ;;  %v204_v41 = vadd.f32 %v1137_v29, %v139_v31  ;;  %v41_v58 = vld [vmem:[%s1475_s0 + $0x6c] sm:$0xff]  ;;  %v247_v60 = vmax.f32 %v199_v51, 0.0 }
  0x24   :  { %992 = vmatprep.subr.bf16.mxu1 %v1043_v38  ;;  %569 = vmatprep.mubr.bf16.mxu1 %v303_v54  ;;  %v200_v20 = vadd.f32 %v1166_v45, %v135_v11  ;;  %v142_v37 = vmul.f32 %v1133_v27, %v77_v25  ;;  %v203_v1 = vadd.f32 %v1166_v45, %v138_v56  ;;  %v83_v7 = vunpack.c.h.bf16 %v41_v58  ;;  %v44_v16 = vld [vmem:[%s1475_s0 + $0x80] ss:$12 sps:$4 sm:$0xff]  }
  0x25   :  { %v131_v23 = vmul.f32 %v1135_v28, %v66_v15  ;;  %v241_v36 = vmax.f32 %v193_v24, 0.0  ;;  %v252_v49 = vmax.f32 %v204_v41, 0.0  ;;  %v206_v2 = vadd.f32 %v1166_v45, %v141_v57 }
  0x26   :  { %v248_v33 = vmax.f32 %v200_v20, 0.0  ;;  %v207_v46 = vadd.f32 %v1137_v29, %v142_v37  ;;  %v145_v10 = vmul.f32 %v1133_v27, %v80_v3  ;;  %v81_v11 = vunpack.c.l.bf16 %v40_v63 }
  0x27   :  { %993 = vmatpush3.bf16.msra.mxu1 %v1043_v38  ;;  %v196_v35 = vadd.f32 %v1139_v30, %v131_v23  ;;  %v36_v38 = vld [vmem:[%s1475_s0 + $0x50] ss:$12 sps:$4 sm:$0xff]   ;;  %v254_v9 = vmax.f32 %v206_v2, 0.0  ;;  %v148_v15 = vmul.f32 %v1133_v27, %v83_v7  ;;  %v79_v23 = vunpack.c.l.bf16 %v39_v53 }
  0x28   :  { %v287_v39 = vpack.c.bf16 %v248_v33, %v245_v26  ;;  %v75_v52 = vunpack.c.l.bf16 %v36_v38  ;;  %v255_v55 = vmax.f32 %v207_v46, 0.0  ;;  %v78_v61 = vunpack.c.h.bf16 %v36_v38  ;;  %v45_v38 = vld [vmem:[%s1475_s0 + $0x84] sm:$0xff] }
  0x29   :  { %v244_v44 = vmax.f32 %v196_v35, 0.0  ;;  %v146_v20 = vmul.f32 %v1135_v28, %v81_v11  ;;  %v213_v22 = vadd.f32 %v1137_v29, %v148_v15  ;;  %v82_v24 = vunpack.c.l.bf16 %v41_v58 }
  0x2a   :  { %522 = vmatmul.mubr.bf16.gmra.mrb[4].mxu0 %v284_v59  ;;  %570 = vmatmul.mubr.bf16.gmra.mrb[4].mxu1 %v302_v8  ;;  %v202_v59 = vadd.f32 %v1139_v30, %v137_v50  ;;  %v140_v62 = vmul.f32 %v1135_v28, %v75_v52  ;;  %v291_v0 = vpack.c.bf16 %v255_v55, %v252_v49  ;;  %v251_v8 = vmax.f32 %v203_v1, 0.0 }
  0x2b   :  { %529 = vmatprep.mubr.bf16.mxu0 %v288_v18  ;;  %994 = vmatprep.mubr.msk.bf16.mxu1 %vm456_vm0, %v283_v34  ;;  %v286_v54 = vpack.c.bf16 %v244_v44, %v241_v36  ;;  %v143_v5 = vmul.f32 %v1135_v28, %v78_v61  ;;  %v210_v18 = vadd.f32 %v1137_v29, %v145_v10  ;;  %v87_v31 = vunpack.c.l.bf16 %v44_v16  ;;  %v48_v44 = vld [vmem:[%s1475_s0 + $0x98] ss:$12 sps:$4 sm:$0xff]  }
  0x2c   :  { %v250_v4 = vmax.f32 %v202_v59, 0.0  ;;  %v205_v6 = vadd.f32 %v1139_v30, %v140_v62  ;;  %v290_v17 = vpack.c.bf16 %v254_v9, %v251_v8  ;;  %v149_v26 = vmul.f32 %v1135_v28, %v84_v19  ;;  %v52_v62 = vld [vmem:[%s1475_s0 + $0xb0] ss:$12 sps:$4 sm:$0xff]  }
  0x2d   :  { %v208_v13 = vadd.f32 %v1139_v30, %v143_v5  ;;  %v258_v25 = vmax.f32 %v210_v18, 0.0  ;;  %v211_v33 = vadd.f32 %v1139_v30, %v146_v20  ;;  %v261_v35 = vmax.f32 %v213_v22, 0.0 }
  0x2e   :  { %v289_v12 = vpack.c.bf16 %v250_v4, %v247_v60  ;;  %v253_v14 = vmax.f32 %v205_v6, 0.0  ;;  %v144_v36 = vmul.f32 %v1156_v40, %v79_v23  ;;  %v147_v37 = vmul.f32 %v1156_v40, %v82_v24 }
  0x2f   :  { %v256_v21 = vmax.f32 %v208_v13, 0.0  ;;  %v259_v41 = vmax.f32 %v211_v33, 0.0  ;;  %v90_v42 = vunpack.c.h.bf16 %v44_v16  ;;  %v152_v43 = vmul.f32 %v1135_v28, %v87_v31 }
  0x30   :  { %v294_v46 = vpack.c.bf16 %v261_v35, %v258_v25  ;;  %v209_v47 = vadd.f32 %v1166_v45, %v144_v36  ;;  %v212_v48 = vadd.f32 %v1166_v45, %v147_v37  ;;  %v86_v49 = vunpack.c.h.bf16 %v43_v32 }
  0x31   :  { %v292_v34 = vpack.c.bf16 %v256_v21, %v253_v14  ;;  %v155_v51 = vmul.f32 %v1135_v28, %v90_v42  ;;  %v217_v52 = vadd.f32 %v1139_v30, %v152_v43  ;;  %v89_v53 = vunpack.c.h.bf16 %v45_v38 }
  0x32   :  { %530 = vmatmul.mubr.bf16.gmra.mrb[8].mxu0 %v287_v39  ;;  %995 = vmatmul.mubr.msk.bf16.vlgmr.msra.gmra.mrb[8].mxu1 %vm456_vm0, %v286_v54  ;;  %v214_v39 = vadd.f32 %v1139_v30, %v149_v26  ;;  %v257_v54 = vmax.f32 %v209_v47, 0.0  ;;  %v260_v55 = vmax.f32 %v212_v48, 0.0  ;;  %v151_v56 = vmul.f32 %v1133_v27, %v86_v49 }
  0x33   :  { %537 = vmatprep.mubr.bf16.mxu0 %v291_v0  ;;  %998 = vmatprep.mubr.msk.bf16.mxu1 %vm456_vm0, %v289_v12  ;;  %v93_v57 = vunpack.c.l.bf16 %v48_v44  ;;  %v220_v59 = vadd.f32 %v1139_v30, %v155_v51  ;;  %v265_v60 = vmax.f32 %v217_v52, 0.0  ;;  %v154_v61 = vmul.f32 %v1133_v27, %v89_v53 }
  0x34   :  { %v262_v50 = vmax.f32 %v214_v39, 0.0  ;;  %v293_v63 = vpack.c.bf16 %v260_v55, %v257_v54  ;;  %v216_v0 = vadd.f32 %v1137_v29, %v151_v56  ;;  %v96_v1 = vunpack.c.h.bf16 %v48_v44 }
  0x35   :  { %v158_v2 = vmul.f32 %v1135_v28, %v93_v57  ;;  %v268_v3 = vmax.f32 %v220_v59, 0.0  ;;  %v219_v4 = vadd.f32 %v1137_v29, %v154_v61  ;;  %v85_v5 = vunpack.c.l.bf16 %v43_v32  ;;  %v1350_v57 = vld [vmem:[%s1478_s4] ss:$0 sm:$0xff] }
  0x36   :  { %v295_v58 = vpack.c.bf16 %v262_v50, %v259_v41  ;;  %v88_v6 = vunpack.c.l.bf16 %v45_v38  ;;  %v264_v7 = vmax.f32 %v216_v0, 0.0  ;;  %v161_v27 = vmul.f32 %v1135_v28, %v96_v1 }
  0x37   :  { %v223_v8 = vadd.f32 %v1139_v30, %v158_v2  ;;  %v99_v9 = vunpack.c.l.bf16 %v52_v62  ;;  %v298_v10 = vpack.c.bf16 %v268_v3, %v265_v60  ;;  %v267_v11 = vmax.f32 %v219_v4, 0.0 }
  0x38   :  { %v150_v12 = vmul.f32 %v1156_v40, %v85_v5  ;;  %v153_v13 = vmul.f32 %v1156_v40, %v88_v6  ;;  %v226_v14 = vadd.f32 %v1139_v30, %v161_v27  ;;  %v102_v16 = vunpack.c.h.bf16 %v52_v62 }
  0x39   :  { %v271_v15 = vmax.f32 %v223_v8, 0.0  ;;  %v164_v29 = vmul.f32 %v1135_v28, %v99_v9 }
  0x3a   :  { %538 = vmatmul.mubr.bf16.gmra.mrb[12].mxu0 %v290_v17  ;;  %999 = vmatmul.mubr.msk.bf16.gmra.mrb[12].mxu1 %vm456_vm0, %v292_v34  ;;  %v297_v17 = vpack.c.bf16 %v267_v11, %v264_v7  ;;  %v215_v18 = vadd.f32 %v1166_v45, %v150_v12  ;;  %v218_v19 = vadd.f32 %v1166_v45, %v153_v13  ;;  %v274_v20 = vmax.f32 %v226_v14, 0.0 }
  0x3b   :  { %545 = vmatprep.mubr.bf16.mxu0 %v294_v46  ;;  %1002 = vmatprep.mubr.msk.bf16.mxu1 %vm456_vm0, %v295_v58  ;;  %v167_v21 = vmul.f32 %v1135_v28, %v102_v16  ;;  %v229_v22 = vadd.f32 %v1139_v30, %v164_v29 }
  0x3c   :  { %v263_v40 = vmax.f32 %v215_v18, 0.0  ;;  %v266_v23 = vmax.f32 %v218_v19, 0.0  ;;  %v301_v24 = vpack.c.bf16 %v274_v20, %v271_v15 }
  0x3d   :  { %v232_v25 = vadd.f32 %v1139_v30, %v167_v21  ;;  %v277_v26 = vmax.f32 %v229_v22, 0.0 }
  0x3e   :  { %v296_v33 = vpack.c.bf16 %v266_v23, %v263_v40 }
  0x3f   :  { %v280_v31 = vmax.f32 %v232_v25, 0.0 }
  0x41   :  { %v304_v32 = vpack.c.bf16 %v280_v31, %v277_v26 }
  0x42   :  { %546 = vmatmul.mubr.bf16.gmra.mrb[16].mxu0 %v293_v63  ;;  %1003 = vmatmul.mubr.msk.bf16.gmra.mrb[16].mxu1 %vm456_vm0, %v298_v10 }
  0x43   :  { %553 = vmatprep.mubr.bf16.mxu0 %v297_v17  ;;  %1006 = vmatprep.mubr.msk.bf16.mxu1 %vm456_vm0, %v301_v24 }
  0x4a   :  { %554 = vmatmul.mubr.bf16.gmra.mrb[20].mxu0 %v296_v33  ;;  %1007 = vmatmul.mubr.msk.bf16.gmra.mrb[20].mxu1 %vm456_vm0, %v304_v32 }
  0xf5   :  { %v932_v45 = vpop.f32.mrb[0].mxu0  ;;  %v968_v34 = vpop.f32.mrb[0].mxu1 }
  0xf6   :  { %v933_v28 = vpop.f32.mrb[1].mxu0  ;;  %v969_v35 = vpop.f32.mrb[1].mxu1 }
  0xf7   :  { %v934_v36 = vadd.f32 %v933_v28, %v932_v45  ;;  %v935_v37 = vpop.f32.mrb[2].mxu0  ;;  %v1339_v38 = vadd.f32 %v969_v35, %v968_v34  ;;  %v971_v39 = vpop.f32.mrb[2].mxu1 }
  0xf8   :  { %v936_v41 = vpop.f32.mrb[3].mxu0  ;;  %v972_v30 = vpop.f32.mrb[3].mxu1 }
  0xf9   :  { %v937_v42 = vadd.f32 %v936_v41, %v935_v37  ;;  %v1341_v43 = vadd.f32 %v972_v30, %v971_v39  ;;  %v516_v62 = vadd.f32 %v934_v36, %v1350_v57 }
  0xfb   :  { %v519_v11 = vadd.f32 %v937_v42, %v1350_v57 }
  0xfd   :  { %v938_v44 = vpop.f32.mrb[4].mxu0  ;;  %v974_v46 = vpop.f32.mrb[4].mxu1 }
  0xfe   :  { %v939_v47 = vpop.f32.mrb[5].mxu0  ;;  %v975_v48 = vpop.f32.mrb[5].mxu1 }
  0xff   :  { %v940_v49 = vadd.f32 %v939_v47, %v938_v44  ;;  %v941_v50 = vpop.f32.mrb[6].mxu0  ;;  %v1343_v51 = vadd.f32 %v975_v48, %v974_v46  ;;  %v977_v52 = vpop.f32.mrb[6].mxu1 }
 0x100   :  { %v942_v53 = vpop.f32.mrb[7].mxu0  ;;  %v978_v54 = vpop.f32.mrb[7].mxu1 }
 0x101   :  { %v943_v55 = vadd.f32 %v942_v53, %v941_v50  ;;  %v1345_v56 = vadd.f32 %v978_v54, %v977_v52  ;;  %v524_v59 = vadd.f32 %v940_v49, %v1350_v57 }
 0x103   :  { %v527_v3 = vadd.f32 %v943_v55, %v1350_v57 }
 0x105   :  { %v944_v58 = vpop.f32.mrb[8].mxu0  ;;  %v996_v60 = vpop.f32.mrb[8].mxu1 }
 0x106   :  { %v945_v61 = vpop.f32.mrb[9].mxu0  ;;  %v621_v63 = vadd.f32 %v996_v60, %v524_v59  ;;  %v612_v1 = vpop.f32.mrb[9].mxu1 }
 0x107   :  { %v946_v0 = vadd.f32 %v945_v61, %v944_v58  ;;  %v947_v2 = vpop.f32.mrb[10].mxu0  ;;  %v613_v4 = vadd.f32 %v612_v1, %v516_v62  ;;  %v997_v5 = vpop.f32.mrb[10].mxu1 }
 0x108   :  { %v948_v6 = vpop.f32.mrb[11].mxu0  ;;  %v902_v7 = vpack.c.bf16 %v621_v63, %v621_v63  ;;  %v624_v27 = vadd.f32 %v997_v5, %v527_v3  ;;  %v615_v8 = vpop.f32.mrb[11].mxu1  ;;  %v716_v13 = vmul.f32 %v621_v63, %v621_v63  ;;  %v678_v26 = vsel %vm456_vm0, %v621_v63, 0.0 }
 0x109   :  { %v900_v9 = vpack.c.bf16 %v613_v4, %v613_v4  ;;  %v949_v10 = vadd.f32 %v948_v6, %v947_v2  ;;  %v714_v14 = vmul.f32 %v613_v4, %v613_v4  ;;  %v616_v15 = vadd.f32 %v615_v8, %v519_v11 }
 0x10a   :  { %835 = vst.msk [vmem:[%s1479_s5 + $0x8] sm:$0xf] %vm832_vm1, %v902_v7  ;;  %v903_v12 = vpack.c.bf16 %v624_v27, %v624_v27  ;;  %v675_v16 = vsel %vm456_vm0, %v613_v4, 0.0  ;;  %v717_v17 = vmul.f32 %v624_v27, %v624_v27  ;;  %v532_v24 = vadd.f32 %v946_v0, %v1350_v57 }
 0x10b   :  { %833 = vst.msk [vmem:[%s1479_s5] sm:$0xf] %vm832_vm1, %v900_v9  ;;  %v676_v18 = vsel %vm456_vm0, %v616_v15, 0.0  ;;  %v715_v19 = vmul.f32 %v616_v15, %v616_v15  ;;  %v901_v20 = vpack.c.bf16 %v616_v15, %v616_v15  ;;  %v733_v33 = vsel %vm456_vm0, %v716_v13, 0.0 }
 0x10c   :  { %836 = vst.msk [vmem:[%s1479_s5 + $0xc] sm:$0xf] %vm832_vm1, %v903_v12  ;;  %v677_v22 = vadd.f32 %v676_v18, %v675_v16  ;;  %v730_v31 = vsel %vm456_vm0, %v714_v14, 0.0  ;;  %v680_v41 = vsel %vm456_vm0, %v624_v27, 0.0  ;;  %v735_v30 = vsel %vm456_vm0, %v717_v17, 0.0 }
 0x10d   :  { %v950_v29 = vpop.f32.mrb[12].mxu0  ;;  %v1000_v40 = vpop.f32.mrb[12].mxu1  ;;  %v731_v32 = vsel %vm456_vm0, %v715_v19, 0.0  ;;  %834 = vst.msk [vmem:[%s1479_s5 + $0x4] sm:$0xf] %vm832_vm1, %v901_v20  ;;  %v535_v44 = vadd.f32 %v949_v10, %v1350_v57 }
 0x10e   :  { %v951_v21 = vpop.f32.mrb[13].mxu0  ;;  %v628_v45 = vpop.f32.mrb[13].mxu1  ;;  %v679_v28 = vadd.f32 %v678_v26, %v677_v22  ;;  %v732_v35 = vadd.f32 %v731_v32, %v730_v31 }
 0x10f   :  { %v952_v23 = vadd.f32 %v951_v21, %v950_v29  ;;  %v953_v25 = vpop.f32.mrb[14].mxu0  ;;  %v629_v37 = vadd.f32 %v628_v45, %v532_v24  ;;  %v1001_v39 = vpop.f32.mrb[14].mxu1 }
 0x110   :  { %v954_v34 = vpop.f32.mrb[15].mxu0  ;;  %v631_v46 = vpop.f32.mrb[15].mxu1  ;;  %v734_v47 = vadd.f32 %v733_v33, %v732_v35  ;;  %v681_v49 = vadd.f32 %v680_v41, %v679_v28 }
 0x111   :  { %v540_v36 = vadd.f32 %v952_v23, %v1350_v57  ;;  %v955_v42 = vadd.f32 %v954_v34, %v953_v25  ;;  %v682_v50 = vsel %vm456_vm0, %v629_v37, 0.0  ;;  %v718_v52 = vmul.f32 %v629_v37, %v629_v37 }
 0x112   :  { %v904_v53 = vpack.c.bf16 %v629_v37, %v629_v37  ;;  %v632_v55 = vadd.f32 %v631_v46, %v535_v44  ;;  %v683_v60 = vadd.f32 %v682_v50, %v681_v49  ;;  %v736_v61 = vadd.f32 %v735_v30, %v734_v47 }
 0x113   :  { %v637_v48 = vadd.f32 %v1000_v40, %v540_v36  ;;  %v543_v54 = vadd.f32 %v955_v42, %v1350_v57  ;;  %v737_v63 = vsel %vm456_vm0, %v718_v52, 0.0  ;;  %v572_v30 = vadd.f32 %v1343_v51, %v1350_v57 }
 0x114   :  { %837 = vst.msk [vmem:[%s1479_s5 + $0x10] sm:$0xf] %vm832_vm1, %v904_v53  ;;  %v684_v1 = vsel %vm456_vm0, %v632_v55, 0.0  ;;  %v738_v4 = vadd.f32 %v737_v63, %v736_v61  ;;  %v719_v6 = vmul.f32 %v632_v55, %v632_v55  ;;  %v905_v10 = vpack.c.bf16 %v632_v55, %v632_v55 }
 0x115   :  { %v720_v58 = vmul.f32 %v637_v48, %v637_v48  ;;  %v906_v59 = vpack.c.bf16 %v637_v48, %v637_v48  ;;  %v956_v62 = vpop.f32.mrb[16].mxu0  ;;  %v640_v0 = vadd.f32 %v1001_v39, %v543_v54  ;;  %v686_v2 = vsel %vm456_vm0, %v637_v48, 0.0  ;;  %v1004_v13 = vpop.f32.mrb[16].mxu1 }
 0x116   :  { %v957_v3 = vpop.f32.mrb[17].mxu0  ;;  %v685_v5 = vadd.f32 %v684_v1, %v683_v60  ;;  %v739_v15 = vsel %vm456_vm0, %v719_v6, 0.0  ;;  %v644_v29 = vpop.f32.mrb[17].mxu1  ;;  %838 = vst.msk [vmem:[%s1479_s5 + $0x14] sm:$0xf] %vm832_vm1, %v905_v10  ;;  %v564_v50 = vadd.f32 %v1339_v38, %v1350_v57  ;;  %v575_v60 = vadd.f32 %v1345_v56, %v1350_v57 }
 0x117   :  { %839 = vst.msk [vmem:[%s1479_s5 + $0x18] sm:$0xf] %vm832_vm1, %v906_v59  ;;  %v741_v7 = vsel %vm456_vm0, %v720_v58, 0.0  ;;  %v959_v27 = vpop.f32.mrb[18].mxu0  ;;  %v721_v8 = vmul.f32 %v640_v0, %v640_v0  ;;  %v907_v9 = vpack.c.bf16 %v640_v0, %v640_v0  ;;  %v958_v11 = vadd.f32 %v957_v3, %v956_v62  ;;  %v1005_v20 = vpop.f32.mrb[18].mxu1 }
 0x118   :  { %v960_v12 = vpop.f32.mrb[19].mxu0  ;;  %v687_v14 = vadd.f32 %v686_v2, %v685_v5  ;;  %v688_v17 = vsel %vm456_vm0, %v640_v0, 0.0  ;;  %v740_v18 = vadd.f32 %v739_v15, %v738_v4  ;;  %v647_v23 = vpop.f32.mrb[19].mxu1  ;;  %v567_v5 = vadd.f32 %v1341_v43, %v1350_v57 }
 0x119   :  { %v961_v16 = vadd.f32 %v960_v12, %v959_v27  ;;  %840 = vst.msk [vmem:[%s1479_s5 + $0x1c] sm:$0xf] %vm832_vm1, %v907_v9  ;;  %v548_v19 = vadd.f32 %v958_v11, %v1350_v57  ;;  %v743_v22 = vsel %vm456_vm0, %v721_v8, 0.0 }
 0x11a   :  { %v689_v21 = vadd.f32 %v688_v17, %v687_v14  ;;  %v742_v24 = vadd.f32 %v741_v7, %v740_v18 }
 0x11b   :  { %v551_v40 = vadd.f32 %v961_v16, %v1350_v57  ;;  %v645_v25 = vadd.f32 %v644_v29, %v548_v19 }
 0x11c   :  { %v744_v32 = vadd.f32 %v743_v22, %v742_v24 }
 0x11d   :  { %v648_v26 = vadd.f32 %v647_v23, %v551_v40  ;;  %v690_v33 = vsel %vm456_vm0, %v645_v25, 0.0  ;;  %v722_v31 = vmul.f32 %v645_v25, %v645_v25  ;;  %v908_v45 = vpack.c.bf16 %v645_v25, %v645_v25  ;;  %v962_v34 = vpop.f32.mrb[20].mxu0  ;;  %v1008_v49 = vpop.f32.mrb[20].mxu1 }
 0x11e   :  { %v691_v28 = vadd.f32 %v690_v33, %v689_v21  ;;  %v963_v39 = vpop.f32.mrb[21].mxu0  ;;  %v669_v53 = vadd.f32 %v1008_v49, %v572_v30  ;;  %v660_v51 = vpop.f32.mrb[21].mxu1 }
 0x11f   :  { %v692_v35 = vsel %vm456_vm0, %v648_v26, 0.0  ;;  %v723_v36 = vmul.f32 %v648_v26, %v648_v26  ;;  %v909_v37 = vpack.c.bf16 %v648_v26, %v648_v26  ;;  %v745_v41 = vsel %vm456_vm0, %v722_v31, 0.0  ;;  %841 = vst.msk [vmem:[%s1479_s5 + $0x20] sm:$0xf] %vm832_vm1, %v908_v45  ;;  %v965_v44 = vpop.f32.mrb[22].mxu0  ;;  %v1009_v61 = vpop.f32.mrb[22].mxu1 }
 0x120   :  { %v964_v42 = vadd.f32 %v963_v39, %v962_v34  ;;  %v746_v46 = vadd.f32 %v745_v41, %v744_v32  ;;  %v693_v47 = vadd.f32 %v692_v35, %v691_v28  ;;  %v966_v52 = vpop.f32.mrb[23].mxu0  ;;  %v661_v59 = vadd.f32 %v660_v51, %v564_v50  ;;  %v663_v0 = vpop.f32.mrb[23].mxu1 }
 0x121   :  { %v747_v48 = vsel %vm456_vm0, %v723_v36, 0.0  ;;  %842 = vst.msk [vmem:[%s1479_s5 + $0x24] sm:$0xf] %vm832_vm1, %v909_v37  ;;  %v967_v55 = vadd.f32 %v966_v52, %v965_v44  ;;  %v914_v62 = vpack.c.bf16 %v669_v53, %v669_v53  ;;  %v672_v2 = vadd.f32 %v1009_v61, %v575_v60 }
 0x122   :  { %v556_v54 = vadd.f32 %v964_v42, %v1350_v57  ;;  %v748_v58 = vadd.f32 %v747_v48, %v746_v46  ;;  %v912_v1 = vpack.c.bf16 %v661_v59, %v661_v59  ;;  %v664_v8 = vadd.f32 %v663_v0, %v567_v5 }
 0x123   :  { %847 = vst.msk [vmem:[%s1479_s5 + $0x38] sm:$0xf] %vm832_vm1, %v914_v62  ;;  %v915_v7 = vpack.c.bf16 %v672_v2, %v672_v2  ;;  %v559_v27 = vadd.f32 %v967_v55, %v1350_v57  ;;  %v726_v11 = vmul.f32 %v661_v59, %v661_v59  ;;  %v698_v15 = vsel %vm456_vm0, %v661_v59, 0.0 }
 0x124   :  { %v653_v63 = vadd.f32 %v1004_v13, %v556_v54  ;;  %845 = vst.msk [vmem:[%s1479_s5 + $0x30] sm:$0xf] %vm832_vm1, %v912_v1  ;;  %v913_v10 = vpack.c.bf16 %v664_v8, %v664_v8  ;;  %v727_v29 = vmul.f32 %v664_v8, %v664_v8  ;;  %v728_v19 = vmul.f32 %v669_v53, %v669_v53 }
 0x125   :  { %848 = vst.msk [vmem:[%s1479_s5 + $0x3c] sm:$0xf] %vm832_vm1, %v915_v7  ;;  %v656_v43 = vadd.f32 %v1005_v20, %v559_v27  ;;  %v753_v20 = vsel %vm456_vm0, %v726_v11, 0.0  ;;  %v700_v21 = vsel %vm456_vm0, %v664_v8, 0.0  ;;  %v702_v23 = vsel %vm456_vm0, %v669_v53, 0.0 }
 0x126   :  { %v694_v38 = vsel %vm456_vm0, %v653_v63, 0.0  ;;  %v724_v3 = vmul.f32 %v653_v63, %v653_v63  ;;  %v910_v4 = vpack.c.bf16 %v653_v63, %v653_v63  ;;  %846 = vst.msk [vmem:[%s1479_s5 + $0x34] sm:$0xf] %vm832_vm1, %v913_v10  ;;  %v729_v24 = vmul.f32 %v672_v2, %v672_v2 }
 0x127   :  { %v695_v6 = vadd.f32 %v694_v38, %v693_v47  ;;  %v696_v12 = vsel %vm456_vm0, %v656_v43, 0.0  ;;  %v725_v13 = vmul.f32 %v656_v43, %v656_v43  ;;  %v911_v14 = vpack.c.bf16 %v656_v43, %v656_v43 }
 0x128   :  { %v749_v56 = vsel %vm456_vm0, %v724_v3, 0.0  ;;  %843 = vst.msk [vmem:[%s1479_s5 + $0x28] sm:$0xf] %vm832_vm1, %v910_v4  ;;  %v755_v25 = vsel %vm456_vm0, %v727_v29, 0.0  ;;  %v757_v31 = vsel %vm456_vm0, %v728_v19, 0.0  ;;  %v704_v32 = vsel %vm456_vm0, %v672_v2, 0.0 }
 0x129   :  { %v750_v9 = vadd.f32 %v749_v56, %v748_v58  ;;  %v697_v57 = vadd.f32 %v696_v12, %v695_v6  ;;  %v751_v16 = vsel %vm456_vm0, %v725_v13, 0.0  ;;  %844 = vst.msk [vmem:[%s1479_s5 + $0x2c] sm:$0xf] %vm832_vm1, %v911_v14  ;;  %v759_v28 = vsel %vm456_vm0, %v729_v24, 0.0 }
 0x12b   :  { %v699_v17 = vadd.f32 %v698_v15, %v697_v57  ;;  %v752_v18 = vadd.f32 %v751_v16, %v750_v9 }
 0x12d   :  { %v701_v22 = vadd.f32 %v700_v21, %v699_v17  ;;  %v754_v40 = vadd.f32 %v753_v20, %v752_v18 }
 0x12f   :  { %v703_v26 = vadd.f32 %v702_v23, %v701_v22  ;;  %v756_v33 = vadd.f32 %v755_v25, %v754_v40 }
 0x131   :  { %v705_v45 = vadd.f32 %v704_v32, %v703_v26  ;;  %v758_v34 = vadd.f32 %v757_v31, %v756_v33 }
 0x133   :  { %v706_v35 = vrot.slane %v705_v45, 4  ;;  %v760_v36 = vadd.f32 %v759_v28, %v758_v34 }
 0x135   :  { %v707_v37 = vadd.f32 %v706_v35, %v705_v45  ;;  %v761_v39 = vrot.slane %v760_v36, 4 }
 0x137   :  { %v708_v41 = vrot.slane %v707_v37, 2  ;;  %v762_v30 = vadd.f32 %v761_v39, %v760_v36 }
 0x139   :  { %v709_v42 = vadd.f32 %v708_v41, %v707_v37  ;;  %v763_v44 = vrot.slane %v762_v30, 2 }
 0x13b   :  { %v710_v46 = vrot.slane %v709_v42, 1  ;;  %v764_v47 = vadd.f32 %v763_v44, %v762_v30 }
 0x13d   :  { %v711_v48 = vadd.f32 %v710_v46, %v709_v42  ;;  %v765_v49 = vrot.slane %v764_v47, 1 }
 0x13f   :  { %713 = vst.msk [vmem:[%s1480_s6] sm:$0x1] %vm712_vm2, %v711_v48  ;;  %v766_v50 = vadd.f32 %v765_v49, %v764_v47 }
 0x141   :  { %767 = vst.msk [vmem:[%s1480_s6 + $0x1] sm:$0x1] %vm712_vm2, %v766_v50 }

// kernel: squeeze.170
= control target key start
LH: loop header
LB: loop body
LE: loop exit
PB: predicated region body
PF: predicated region fallthrough
CT: control target
= control target key end

     0   :  { %s37_s8 = smov 104   ;;  %vm7_vm0 = vcmask 64512   ;;  %s38_s9 = smov 112   ;;  %s55_s0 = inlined_call_operand.vmem [shape: f32[32], index: 0, kind: input, shape index: {}]   ;;  %s56_s1 = inlined_call_operand.vmem [shape: f32[4,8], index: 1, kind: output, shape index: {}]  }
   0x1   :  { %v4_v0 = vld [vmem:[%s55_s0] sm:$0x1]  ;;  %s36_s0 = smov 120  }
   0x2   :  { %5 = vst [vmem:[#allocation1] sm:$0x1] %v4_v0 }
   0x9   :  { %v9_v1 = vld [vmem:[#allocation1] sm:$0x1]  }
   0xa   :  { %v21_v2 = vld [vmem:[#allocation1] sm:$0x1]   ;;  %10 = vrot.lane.b32.xlu0 %v9_v1, %s36_s0 }
   0xb   :  { %22 = vrot.lane.b32.xlu1 %v21_v2, %s37_s8  ;;  %v6_v3 = vld [vmem:[#allocation1] sm:$0x1]  }
   0xc   :  { %v15_v4 = vld [vmem:[#allocation1] sm:$0x1]   ;;  %8 = vst.msk [vmem:[#allocation0] sm:$0x1] %vm7_vm0, %v6_v3  }
   0xe   :  { %16 = vrot.lane.b32.xlu0 %v15_v4, %s38_s9 }
  0x7c   :  { %v11_v5 = vpop.permute.xlu0 %10  }
  0x7d   :  { %v23_v6 = vpop.permute.xlu1 %22   ;;  %14 = vst.msk [vmem:[#allocation0 + $0x1] sm:$0x1] %vm7_vm0, %v11_v5  }
  0x7e   :  { %26 = vst.msk [vmem:[#allocation0 + $0x3] sm:$0x1] %vm7_vm0, %v23_v6  }
  0x80   :  { %v17_v7 = vpop.permute.xlu0 %16  }
  0x81   :  { %20 = vst.msk [vmem:[#allocation0 + $0x2] sm:$0x1] %vm7_vm0, %v17_v7  }
  0x88   :  { %v30_v8 = vld [vmem:[#allocation0] sm:$0xf] }
  0x89   :  { %32 = vst [vmem:[%s56_s1] sm:$0xf] %v30_v8 }

// kernel: tile.152
= control target key start
LH: loop header
LB: loop body
LE: loop exit
PB: predicated region body
PF: predicated region fallthrough
CT: control target
= control target key end

     0   :  { %s28_s0 = inlined_call_operand.vmem [shape: f32[16], index: 0, kind: input, shape index: {}]   ;;  %s29_s1 = inlined_call_operand.vmem [shape: f32[9,16], index: 1, kind: output, shape index: {}]  }
   0x1   :  { %v4_v0 = vld [vmem:[%s28_s0] ss:$0 sm:$0xff] }
   0x2   :  { %5 = vst [vmem:[%s29_s1] sm:$0xff] %v4_v0  ;;  %8 = vst [vmem:[%s29_s1 + $0x8] sm:$0xff] %v4_v0 }

// kernel: tile.157
= control target key start
LH: loop header
LB: loop body
LE: loop exit
PB: predicated region body
PF: predicated region fallthrough
CT: control target
= control target key end

     0   :  { %s74_s10 = smov 112   ;;  %s75_s11 = smov 80   ;;  %vm4_vm0 = vcmask 130048   ;;  %vm10_vm1 = vcmask 1048448   ;;  %vm16_vm2 = vcmask 917248   ;;  %vm22_vm3 = vcmask 786048   ;;  %s121_s0 = inlined_call_operand.vmem [shape: f32[9,16], index: 0, kind: input, shape index: {}]   ;;  %s122_s1 = inlined_call_operand.vmem [shape: f32[1,144], index: 1, kind: output, shape index: {}]  }
   0x1   :  { %v59_v0 = vld [vmem:[%s121_s0 + $0x7] sm:$0x1]   ;;  %v61_v1 = vld [vmem:[%s121_s0 + $0x5] sm:$0x1]   ;;  %v60_v2 = vld [vmem:[%s121_s0 + $0x6] sm:$0x1]  }
   0x2   :  { %8 = vrot.lane.b32.xlu0 %v59_v0, %s74_s10  ;;  %20 = vrot.lane.b32.xlu1 %v61_v1, %s75_s11  ;;  %v62_v3 = vld [vmem:[%s121_s0 + $0x4] sm:$0x1]   ;;  %s2_s16 = smov 3  ;;  %s76_s19 = smov 96   ;;  %v63_v5 = vld [vmem:[%s121_s0 + $0x3] sm:$0x1]  }
   0x3   :  { %v3_v4 = vld [vmem:[%s121_s0] ss:$8 sm:%s2_s16]   ;;  %s77_s20 = smov 64   ;;  %v64_v6 = vld [vmem:[%s121_s0 + $0x2] sm:$0x1]   ;;  %s78_s25 = smov 48  }
   0x4   :  { %5 = vst.msk [vmem:[#allocation0] ss:$8 sm:$0x3] %vm4_vm0, %v3_v4   ;;  %s79_s26 = smov 32   ;;  %v65_v7 = vld [vmem:[%s121_s0 + $0x1] sm:$0x1]  }
   0x5   :  { %s80_s0 = smov 16   ;;  %vm28_vm4 = vcmask 654848   ;;  %vm34_vm5 = vcmask 523648   ;;  %vm40_vm6 = vcmask 392448   ;;  %vm46_vm7 = vcmask 261248  }
   0x6   :  { %14 = vrot.lane.b32.xlu0 %v60_v2, %s76_s19  ;;  %26 = vrot.lane.b32.xlu1 %v62_v3, %s77_s20 }
   0xa   :  { %32 = vrot.lane.b32.xlu0 %v63_v5, %s78_s25  ;;  %38 = vrot.lane.b32.xlu1 %v64_v6, %s79_s26 }
   0xb   :  { %v55_v8 = vld [vmem:[#allocation0 + $0x8] sm:$0x1] }
   0xc   :  { %66 = vst [vmem:[%s122_s1 + $0x1] sm:$0x1] %v55_v8 }
   0xe   :  { %44 = vrot.lane.b32.xlu0 %v65_v7, %s80_s0 }
  0x74   :  { %v9_v9 = vpop.permute.xlu0 %8   ;;  %v21_v10 = vpop.permute.xlu1 %20  }
  0x75   :  { %11 = vst.msk [vmem:[#allocation0] sm:$0x1] %vm10_vm1, %v9_v9  }
  0x78   :  { %v15_v11 = vpop.permute.xlu0 %14   ;;  %v27_v12 = vpop.permute.xlu1 %26  }
  0x79   :  { %17 = vst.msk [vmem:[#allocation0] sm:$0x1] %vm16_vm2, %v15_v11  }
  0x7a   :  { %23 = vst.msk [vmem:[#allocation0] sm:$0x1] %vm22_vm3, %v21_v10  }
  0x7b   :  { %29 = vst.msk [vmem:[#allocation0] sm:$0x1] %vm28_vm4, %v27_v12  }
  0x7c   :  { %v33_v13 = vpop.permute.xlu0 %32   ;;  %v39_v14 = vpop.permute.xlu1 %38  }
  0x7d   :  { %35 = vst.msk [vmem:[#allocation0] sm:$0x1] %vm34_vm5, %v33_v13  }
  0x7e   :  { %41 = vst.msk [vmem:[#allocation0] sm:$0x1] %vm40_vm6, %v39_v14  }
  0x80   :  { %v45_v15 = vpop.permute.xlu0 %44  }
  0x81   :  { %47 = vst.msk [vmem:[#allocation0] sm:$0x1] %vm46_vm7, %v45_v15  }
  0x88   :  { %v51_v16 = vld [vmem:[#allocation0] sm:$0x1] }
  0x89   :  { %53 = vst [vmem:[%s122_s1] sm:$0x1] %v51_v16 }

// kernel: tile.148
= control target key start
LH: loop header
LB: loop body
LE: loop exit
PB: predicated region body
PF: predicated region fallthrough
CT: control target
= control target key end

     0   :  { %s22_s0 = inlined_call_operand.vmem [shape: f32[3], index: 0, kind: input, shape index: {}]   ;;  %s23_s1 = inlined_call_operand.vmem [shape: f32[4,3], index: 1, kind: output, shape index: {}]  }
   0x1   :  { %v4_v0 = vld [vmem:[%s22_s0] ss:$0 sm:$0xff] }
   0x2   :  { %5 = vst [vmem:[%s23_s1] sm:$0xf] %v4_v0 }

// kernel: tile.159
= control target key start
LH: loop header
LB: loop body
LE: loop exit
PB: predicated region body
PF: predicated region fallthrough
CT: control target
= control target key end

     0   :  { %vm7_vm0 = vcmask 23552   ;;  %s37_s8 = smov 3   ;;  %s38_s9 = smov 6   ;;  %vm13_vm1 = vcmask 97352   ;;  %vm19_vm2 = vcmask 72752   ;;  %vm25_vm3 = vcmask 48152   ;;  %s55_s0 = inlined_call_operand.vmem [shape: f32[4,3], index: 0, kind: input, shape index: {}]   ;;  %s56_s1 = inlined_call_operand.vmem [shape: f32[1,12], index: 1, kind: output, shape index: {}]  }
   0x1   :  { %v4_v0 = vld [vmem:[%s55_s0] sm:$0xf]  ;;  %s36_s0 = smov 9  }
   0x2   :  { %5 = vst [vmem:[#allocation1] sm:$0xf] %v4_v0 }
   0x9   :  { %v10_v1 = vld [vmem:[#allocation1 + $0x3] sm:$0x1]   ;;  %v22_v2 = vld [vmem:[#allocation1 + $0x1] sm:$0x1]   ;;  %v6_v3 = vld [vmem:[#allocation1] sm:$0x1]  }
   0xa   :  { %11 = vrot.lane.b32.xlu0 %v10_v1, %s36_s0  ;;  %23 = vrot.lane.b32.xlu1 %v22_v2, %s37_s8  ;;  %v16_v4 = vld [vmem:[#allocation1 + $0x2] sm:$0x1]   ;;  %8 = vst.msk [vmem:[#allocation0] sm:$0x1] %vm7_vm0, %v6_v3  }
   0xe   :  { %17 = vrot.lane.b32.xlu0 %v16_v4, %s38_s9 }
  0x7c   :  { %v12_v5 = vpop.permute.xlu0 %11   ;;  %v24_v6 = vpop.permute.xlu1 %23  }
  0x7d   :  { %14 = vst.msk [vmem:[#allocation0] sm:$0x1] %vm13_vm1, %v12_v5  }
  0x80   :  { %v18_v7 = vpop.permute.xlu0 %17  }
  0x81   :  { %20 = vst.msk [vmem:[#allocation0] sm:$0x1] %vm19_vm2, %v18_v7  }
  0x82   :  { %26 = vst.msk [vmem:[#allocation0] sm:$0x1] %vm25_vm3, %v24_v6  }
  0x89   :  { %v30_v8 = vld [vmem:[#allocation0] sm:$0x1] }
  0x8a   :  { %32 = vst [vmem:[%s56_s1] sm:$0x1] %v30_v8 }

// kernel: unet_forward.19
= control target key start
LH: loop header
LB: loop body
LE: loop exit
PB: predicated region body
PF: predicated region fallthrough
CT: control target
= control target key end

     0   :  { %v218_v1 = vlaneseq  ;;  %v1857_v2 = vmov 0   ;;  %vm767_vm0 = vcmask 130048   ;;  %s3208_s0 = inlined_call_operand.vmem [shape: bf16[512,144], index: 0, kind: input, shape index: {}]   ;;  %s3209_s1 = inlined_call_operand.vmem [shape: bf16[144,12], index: 1, kind: input, shape index: {}]   ;;  %s3210_s2 = inlined_call_operand.vmem [shape: f32[1,144], index: 2, kind: input, shape index: {}]   ;;  %s3211_s3 = inlined_call_operand.vmem [shape: f32[1,144], index: 3, kind: input, shape index: {}]   ;;  %s3212_s4 = inlined_call_operand.vmem [shape: f32[1,12], index: 4, kind: input, shape index: {}]   ;;  %s3213_s5 = inlined_call_operand.vmem [shape: f32[512,12], index: 5, kind: output, shape index: {0}]   ;;  %s3214_s6 = inlined_call_operand.hbm [shape: f32[2,12], index: 6, kind: output, shape index: {1}]  }
   0x1   :  { %v1695_v0 = vld [vmem:[%s3209_s1] sm:$0xff]   ;;  %864 = vmatprep.subr.bf16.mxu0 %v1857_v2  ;;  %1675 = vmatprep.subr.bf16.mxu1 %v1857_v2  ;;  %v1696_v3 = vld [vmem:[%s3209_s1 + $0x8] sm:$0xff]   ;;  %v1697_v5 = vld [vmem:[%s3209_s1 + $0x10] sm:$0xff]  }
   0x2   :  { %865 = vmatpush1.bf16.msra.mxu0 %v1695_v0  ;;  %1684 = vmatpush1.bf16.msra.mxu1 %v1695_v0  ;;  %v219_v4 = vshrl.u32 %v218_v1, 7  ;;  %v1698_v8 = vld [vmem:[%s3209_s1 + $0x18] sm:$0xff]   ;;  %v24_v9 = vld [vmem:[%s3208_s0] sm:$0xff]  ;;  %v25_v10 = vld [vmem:[%s3208_s0 + $0x8] sm:$0xff] }
   0x3   :  { %866 = vmatprep.subr.bf16.mxu0 %v1857_v2  ;;  %1676 = vmatprep.subr.bf16.mxu1 %v1857_v2  ;;  %v216_v11 = vld [vmem:[%s3210_s2] sm:$0x3]  ;;  %v88_v12 = vunpack.c.l.bf16 %v24_v9  ;;  %v89_v13 = vunpack.c.h.bf16 %v24_v9  ;;  %v90_v14 = vunpack.c.l.bf16 %v25_v10  ;;  %v91_v15 = vunpack.c.h.bf16 %v25_v10  ;;  %v26_v17 = vld [vmem:[%s3208_s0 + $0x10] sm:$0xff]  ;;  %v27_v18 = vld [vmem:[%s3208_s0 + $0x18] sm:$0xff] }
   0x4   :  { %v220_v6 = vsub.s32 0, %v219_v4  ;;  %v224_v7 = vsub.s32 1, %v219_v4  ;;  %v356_v16 = vld [vmem:[%s3211_s3] sm:$0x3]  ;;  %v93_v22 = vunpack.c.h.bf16 %v26_v17  ;;  %v95_v23 = vunpack.c.h.bf16 %v27_v18  ;;  %v1700_v40 = vld [vmem:[%s3209_s1 + $0x28] sm:$0xff]   ;;  %v1701_v52 = vld [vmem:[%s3209_s1 + $0x30] sm:$0xff]  }
   0x5   :  { %v92_v24 = vunpack.c.l.bf16 %v26_v17  ;;  %v94_v25 = vunpack.c.l.bf16 %v27_v18  ;;  %v1699_v28 = vld [vmem:[%s3209_s1 + $0x20] sm:$0xff]   ;;  %v29_v44 = vld [vmem:[%s3208_s0 + $0x28] sm:$0xff]  ;;  %v30_v58 = vld [vmem:[%s3208_s0 + $0x30] sm:$0xff] }
   0x6   :  { %867 = vmatpush1.bf16.msra.mxu0 %v1696_v3  ;;  %1685 = vmatpush1.bf16.msra.mxu1 %v1696_v3  ;;  %v1931_v19 = vrot.slane %v216_v11, %v220_v6  ;;  %v1933_v20 = vrot.slane %v216_v11, %v224_v7  ;;  %v1935_v21 = vrot.slane %v356_v16, %v224_v7  ;;  %v28_v43 = vld [vmem:[%s3208_s0 + $0x20] sm:$0xff]  ;;  %v99_v51 = vunpack.c.h.bf16 %v29_v44  ;;  %v31_v59 = vld [vmem:[%s3208_s0 + $0x38] sm:$0xff]  ;;  %v33_v3 = vld [vmem:[%s3208_s0 + $0x48] sm:$0xff] }
   0x7   :  { %868 = vmatprep.subr.bf16.mxu0 %v1857_v2  ;;  %1677 = vmatprep.subr.bf16.mxu1 %v1857_v2  ;;  %v1943_v29 = vrot.slane %v356_v16, %v220_v6  ;;  %v97_v50 = vunpack.c.h.bf16 %v28_v43  ;;  %v96_v57 = vunpack.c.l.bf16 %v28_v43  ;;  %v98_v62 = vunpack.c.l.bf16 %v29_v44  ;;  %v32_v1 = vld [vmem:[%s3208_s0 + $0x40] sm:$0xff]  ;;  %v1702_v4 = vld [vmem:[%s3209_s1 + $0x38] sm:$0xff]  }
   0x8   :  { %v229_v26 = vmul.f32 %v1933_v20, %v89_v13  ;;  %v231_v27 = vmul.f32 %v1933_v20, %v91_v15  ;;  %v228_v30 = vmul.f32 %v1931_v19, %v88_v12  ;;  %v230_v31 = vmul.f32 %v1931_v19, %v90_v14  ;;  %v34_v12 = vld [vmem:[%s3208_s0 + $0x50] sm:$0xff]  ;;  %v35_v13 = vld [vmem:[%s3208_s0 + $0x58] sm:$0xff] }
   0x9   :  { %v233_v34 = vmul.f32 %v1933_v20, %v93_v22  ;;  %v235_v35 = vmul.f32 %v1933_v20, %v95_v23  ;;  %v232_v36 = vmul.f32 %v1931_v19, %v92_v24  ;;  %v234_v37 = vmul.f32 %v1931_v19, %v94_v25 }
   0xa   :  { %869 = vmatpush1.bf16.msra.mxu0 %v1697_v5  ;;  %1686 = vmatpush1.bf16.msra.mxu1 %v1697_v5  ;;  %v369_v32 = vadd.f32 %v1935_v21, %v229_v26  ;;  %v371_v33 = vadd.f32 %v1935_v21, %v231_v27  ;;  %v368_v41 = vadd.f32 %v1943_v29, %v228_v30  ;;  %v101_v6 = vunpack.c.h.bf16 %v30_v58 }
   0xb   :  { %870 = vmatprep.subr.bf16.mxu0 %v1857_v2  ;;  %1678 = vmatprep.subr.bf16.mxu1 %v1857_v2  ;;  %v370_v42 = vadd.f32 %v1943_v29, %v230_v31  ;;  %v373_v46 = vadd.f32 %v1935_v21, %v233_v34  ;;  %v375_v47 = vadd.f32 %v1935_v21, %v235_v35  ;;  %v103_v7 = vunpack.c.h.bf16 %v31_v59 }
   0xc   :  { %v497_v38 = vmax.f32 %v369_v32, 0.0  ;;  %v499_v39 = vmax.f32 %v371_v33, 0.0  ;;  %v372_v48 = vadd.f32 %v1943_v29, %v232_v36  ;;  %v374_v49 = vadd.f32 %v1943_v29, %v234_v37 }
   0xd   :  { %v496_v53 = vmax.f32 %v368_v41, 0.0  ;;  %v498_v54 = vmax.f32 %v370_v42, 0.0  ;;  %v501_v55 = vmax.f32 %v373_v46, 0.0  ;;  %v503_v56 = vmax.f32 %v375_v47, 0.0 }
   0xe   :  { %871 = vmatpush1.bf16.msra.mxu0 %v1698_v8  ;;  %1687 = vmatpush1.bf16.msra.mxu1 %v1698_v8  ;;  %v625_v45 = vpack.c.bf16 %v499_v39, %v497_v38  ;;  %v500_v60 = vmax.f32 %v372_v48, 0.0  ;;  %v502_v61 = vmax.f32 %v374_v49, 0.0  ;;  %v237_v63 = vmul.f32 %v1933_v20, %v97_v50 }
   0xf   :  { %872 = vmatprep.subr.bf16.mxu0 %v1857_v2  ;;  %1679 = vmatprep.subr.bf16.mxu1 %v1857_v2  ;;  %v239_v0 = vmul.f32 %v1933_v20, %v99_v51  ;;  %v624_v5 = vpack.c.bf16 %v498_v54, %v496_v53  ;;  %v627_v8 = vpack.c.bf16 %v503_v56, %v501_v55  ;;  %v100_v10 = vunpack.c.l.bf16 %v30_v58 }
  0x10   :  { %1643 = vmatprep.mubr.msk.bf16.mxu0 %vm767_vm0, %v625_v45  ;;  %v236_v9 = vmul.f32 %v1931_v19, %v96_v57  ;;  %v102_v11 = vunpack.c.l.bf16 %v31_v59 }
  0x12   :  { %873 = vmatpush1.bf16.msra.mxu0 %v1699_v28  ;;  %1688 = vmatpush1.bf16.msra.mxu1 %v1699_v28 }
  0x13   :  { %874 = vmatprep.subr.bf16.mxu0 %v1857_v2  ;;  %1680 = vmatprep.subr.bf16.mxu1 %v1857_v2 }
  0x16   :  { %875 = vmatpush1.bf16.msra.mxu0 %v1700_v40  ;;  %1689 = vmatpush1.bf16.msra.mxu1 %v1700_v40 }
  0x17   :  { %876 = vmatprep.subr.bf16.mxu0 %v1857_v2  ;;  %1681 = vmatprep.subr.bf16.mxu1 %v1857_v2 }
  0x1a   :  { %877 = vmatpush1.bf16.msra.mxu0 %v1701_v52 }
  0x1b   :  { %878 = vmatprep.subr.bf16.mxu0 %v1857_v2 }
  0x1c   :  { %12 = vsyncpa [#allocation3], 0  ;;  %v2003_v14 = vpack.c.bf16 %v502_v61, %v500_v60  ;;  %v238_v15 = vmul.f32 %v1931_v19, %v98_v62  ;;  %v105_v16 = vunpack.c.h.bf16 %v32_v1  ;;  %v107_v17 = vunpack.c.h.bf16 %v33_v3  ;;  %1690 = vmatpush1.bf16.msra.mxu1 %v1701_v52  ;;  %v1703_v25 = vld [vmem:[%s3209_s1 + $0x40] sm:$0xff]   ;;  %v37_v59 = vld [vmem:[%s3208_s0 + $0x68] sm:$0xff] }
  0x1d   :  { %v377_v18 = vadd.f32 %v1935_v21, %v237_v63  ;;  %v379_v22 = vadd.f32 %v1935_v21, %v239_v0  ;;  %v104_v23 = vunpack.c.l.bf16 %v32_v1  ;;  %v106_v24 = vunpack.c.l.bf16 %v33_v3  ;;  %1682 = vmatprep.subr.bf16.mxu1 %v1857_v2  ;;  %v36_v51 = vld [vmem:[%s3208_s0 + $0x60] sm:$0xff] }
  0x1e   :  { %879 = vmatpush1.bf16.msra.mxu0 %v1702_v4  ;;  %v241_v26 = vmul.f32 %v1933_v20, %v101_v6  ;;  %v243_v27 = vmul.f32 %v1933_v20, %v103_v7  ;;  %v109_v28 = vunpack.c.h.bf16 %v34_v12  ;;  %v111_v30 = vunpack.c.h.bf16 %v35_v13 }
  0x1f   :  { %880 = vmatprep.subr.bf16.mxu0 %v1857_v2  ;;  %v376_v31 = vadd.f32 %v1943_v29, %v236_v9  ;;  %v240_v32 = vmul.f32 %v1931_v19, %v100_v10  ;;  %v242_v33 = vmul.f32 %v1931_v19, %v102_v11  ;;  %v108_v34 = vunpack.c.l.bf16 %v34_v12  ;;  %v56_v10 = vld [vmem:[%s3208_s0 + $0x100] sm:$0xff] }
  0x20   :  { %v245_v35 = vmul.f32 %v1933_v20, %v105_v16  ;;  %v247_v36 = vmul.f32 %v1933_v20, %v107_v17  ;;  %v244_v37 = vmul.f32 %v1931_v19, %v104_v23  ;;  %v110_v38 = vunpack.c.l.bf16 %v35_v13  ;;  %1691 = vmatpush1.bf16.msra.mxu1 %v1702_v4  ;;  %v39_v16 = vld [vmem:[%s3208_s0 + $0x78] sm:$0xff] }
  0x21   :  { %v378_v39 = vadd.f32 %v1943_v29, %v238_v15  ;;  %v246_v40 = vmul.f32 %v1931_v19, %v106_v24  ;;  %v249_v41 = vmul.f32 %v1933_v20, %v109_v28  ;;  %v251_v42 = vmul.f32 %v1933_v20, %v111_v30  ;;  %1683 = vmatprep.subr.bf16.mxu1 %v1857_v2  ;;  %v38_v15 = vld [vmem:[%s3208_s0 + $0x70] sm:$0xff] }
  0x22   :  { %881 = vmatpush1.bf16.msra.mxu0 %v1703_v25  ;;  %v505_v43 = vmax.f32 %v377_v18, 0.0  ;;  %v507_v44 = vmax.f32 %v379_v22, 0.0  ;;  %v381_v45 = vadd.f32 %v1935_v21, %v241_v26  ;;  %v383_v46 = vadd.f32 %v1935_v21, %v243_v27  ;;  %v57_v27 = vld [vmem:[%s3208_s0 + $0x108] sm:$0xff] }
  0x23   :  { %v380_v47 = vadd.f32 %v1943_v29, %v240_v32  ;;  %v382_v48 = vadd.f32 %v1943_v29, %v242_v33  ;;  %v248_v49 = vmul.f32 %v1931_v19, %v108_v34  ;;  %v250_v50 = vmul.f32 %v1931_v19, %v110_v38 }
  0x24   :  { %v504_v2 = vmax.f32 %v376_v31, 0.0  ;;  %v385_v52 = vadd.f32 %v1935_v21, %v245_v35  ;;  %v387_v53 = vadd.f32 %v1935_v21, %v247_v36  ;;  %v384_v54 = vadd.f32 %v1943_v29, %v244_v37  ;;  %1692 = vmatpush1.bf16.msra.mxu1 %v1703_v25 }
  0x25   :  { %897 = vmatmul.mubr.bf16.vlgmr.msra.gmra.mrb[0].mxu0 %v624_v5  ;;  %v506_v55 = vmax.f32 %v378_v39, 0.0  ;;  %v386_v56 = vadd.f32 %v1943_v29, %v246_v40  ;;  %v389_v57 = vadd.f32 %v1935_v21, %v249_v41  ;;  %v391_v58 = vadd.f32 %v1935_v21, %v251_v42 }
  0x26   :  { %1644 = vmatprep.mubr.msk.bf16.mxu0 %vm767_vm0, %v627_v8  ;;  %v629_v60 = vpack.c.bf16 %v507_v44, %v505_v43  ;;  %v509_v61 = vmax.f32 %v381_v45, 0.0  ;;  %v511_v62 = vmax.f32 %v383_v46, 0.0  ;;  %v113_v63 = vunpack.c.h.bf16 %v36_v51 }
  0x27   :  { %v508_v0 = vmax.f32 %v380_v47, 0.0  ;;  %v510_v1 = vmax.f32 %v382_v48, 0.0  ;;  %v388_v3 = vadd.f32 %v1943_v29, %v248_v49  ;;  %v390_v4 = vadd.f32 %v1943_v29, %v250_v50 }
  0x28   :  { %v513_v5 = vmax.f32 %v385_v52, 0.0  ;;  %v515_v6 = vmax.f32 %v387_v53, 0.0  ;;  %v512_v7 = vmax.f32 %v384_v54, 0.0  ;;  %v115_v9 = vunpack.c.h.bf16 %v37_v59 }
  0x29   :  { %v514_v11 = vmax.f32 %v386_v56, 0.0  ;;  %v517_v8 = vmax.f32 %v389_v57, 0.0  ;;  %v519_v12 = vmax.f32 %v391_v58, 0.0  ;;  %v112_v13 = vunpack.c.l.bf16 %v36_v51  ;;  %v58_v56 = vld [vmem:[%s3208_s0 + $0x110] sm:$0xff]  ;;  %v59_v57 = vld [vmem:[%s3208_s0 + $0x118] sm:$0xff] }
  0x2a   :  { %v628_v17 = vpack.c.bf16 %v506_v55, %v504_v2  ;;  %v631_v18 = vpack.c.bf16 %v511_v62, %v509_v61  ;;  %v253_v22 = vmul.f32 %v1933_v20, %v113_v63  ;;  %v114_v23 = vunpack.c.l.bf16 %v37_v59 }
  0x2b   :  { %v2057_v24 = vpack.c.bf16 %v510_v1, %v508_v0  ;;  %v516_v25 = vmax.f32 %v388_v3, 0.0  ;;  %v518_v26 = vmax.f32 %v390_v4, 0.0  ;;  %v152_v28 = vunpack.c.l.bf16 %v56_v10  ;;  %v40_v3 = vld [vmem:[%s3208_s0 + $0x80] sm:$0xff] }
  0x2c   :  { %v2062_v30 = vpack.c.bf16 %v515_v6, %v513_v5  ;;  %v255_v31 = vmul.f32 %v1933_v20, %v115_v9  ;;  %v117_v32 = vunpack.c.h.bf16 %v38_v15  ;;  %v119_v33 = vunpack.c.h.bf16 %v39_v16 }
  0x2d   :  { %905 = vmatmul.mubr.bf16.gmra.mrb[4].mxu0 %v2003_v14  ;;  %v2066_v34 = vpack.c.bf16 %v514_v11, %v512_v7  ;;  %v2068_v35 = vpack.c.bf16 %v519_v12, %v517_v8  ;;  %v252_v36 = vmul.f32 %v1931_v19, %v112_v13  ;;  %v153_v37 = vunpack.c.h.bf16 %v56_v10  ;;  %v41_v12 = vld [vmem:[%s3208_s0 + $0x88] sm:$0xff] }
  0x2e   :  { %1645 = vmatprep.mubr.msk.bf16.mxu0 %vm767_vm0, %v629_v60  ;;  %v393_v38 = vadd.f32 %v1935_v21, %v253_v22  ;;  %v254_v39 = vmul.f32 %v1931_v19, %v114_v23  ;;  %v116_v40 = vunpack.c.l.bf16 %v38_v15  ;;  %v154_v41 = vunpack.c.l.bf16 %v57_v27 }
  0x2f   :  { %v2074_v42 = vpack.c.bf16 %v518_v26, %v516_v25  ;;  %v155_v43 = vunpack.c.h.bf16 %v57_v27  ;;  %v293_v14 = vmul.f32 %v1933_v20, %v153_v37  ;;  %v292_v44 = vmul.f32 %v1931_v19, %v152_v28 }
  0x30   :  { %v395_v45 = vadd.f32 %v1935_v21, %v255_v31  ;;  %v257_v46 = vmul.f32 %v1933_v20, %v117_v32  ;;  %v259_v47 = vmul.f32 %v1933_v20, %v119_v33  ;;  %v294_v48 = vmul.f32 %v1931_v19, %v154_v41  ;;  %v42_v32 = vld [vmem:[%s3208_s0 + $0x90] sm:$0xff] }
  0x31   :  { %v392_v49 = vadd.f32 %v1943_v29, %v252_v36  ;;  %v295_v50 = vmul.f32 %v1933_v20, %v155_v43  ;;  %v433_v51 = vadd.f32 %v1935_v21, %v293_v14  ;;  %v432_v2 = vadd.f32 %v1943_v29, %v292_v44  ;;  %v43_v44 = vld [vmem:[%s3208_s0 + $0x98] sm:$0xff] }
  0x32   :  { %v394_v52 = vadd.f32 %v1943_v29, %v254_v39  ;;  %v118_v53 = vunpack.c.l.bf16 %v39_v16  ;;  %v256_v54 = vmul.f32 %v1931_v19, %v116_v40  ;;  %v434_v55 = vadd.f32 %v1943_v29, %v294_v48  ;;  %v60_v39 = vld [vmem:[%s3208_s0 + $0x120] sm:$0xff] }
  0x33   :  { %v521_v58 = vmax.f32 %v393_v38, 0.0  ;;  %v435_v59 = vadd.f32 %v1935_v21, %v295_v50  ;;  %v561_v60 = vmax.f32 %v433_v51, 0.0  ;;  %v560_v61 = vmax.f32 %v432_v2, 0.0 }
  0x34   :  { %v523_v62 = vmax.f32 %v395_v45, 0.0  ;;  %v397_v63 = vadd.f32 %v1935_v21, %v257_v46  ;;  %v399_v0 = vadd.f32 %v1935_v21, %v259_v47  ;;  %v562_v1 = vmax.f32 %v434_v55, 0.0 }
  0x35   :  { %913 = vmatmul.mubr.bf16.gmra.mrb[8].mxu0 %v628_v17  ;;  %v520_v4 = vmax.f32 %v392_v49, 0.0  ;;  %v563_v5 = vmax.f32 %v435_v59, 0.0  ;;  %v157_v6 = vunpack.c.h.bf16 %v58_v56  ;;  %v159_v7 = vunpack.c.h.bf16 %v59_v57  ;;  %v61_v49 = vld [vmem:[%s3208_s0 + $0x128] sm:$0xff] }
  0x36   :  { %1646 = vmatprep.mubr.msk.bf16.mxu0 %vm767_vm0, %v631_v18  ;;  %v522_v9 = vmax.f32 %v394_v52, 0.0  ;;  %v258_v10 = vmul.f32 %v1931_v19, %v118_v53  ;;  %v2104_v11 = vadd.f32 %v1943_v29, %v256_v54  ;;  %v656_v8 = vpack.c.bf16 %v562_v1, %v560_v61 }
  0x37   :  { %v657_v13 = vpack.c.bf16 %v563_v5, %v561_v60  ;;  %v121_v15 = vunpack.c.h.bf16 %v40_v3  ;;  %v297_v16 = vmul.f32 %v1933_v20, %v157_v6  ;;  %v299_v17 = vmul.f32 %v1933_v20, %v159_v7 }
  0x38   :  { %v2111_v22 = vpack.c.bf16 %v523_v62, %v521_v58  ;;  %v525_v18 = vmax.f32 %v397_v63, 0.0  ;;  %v156_v23 = vunpack.c.l.bf16 %v58_v56  ;;  %v158_v25 = vunpack.c.l.bf16 %v59_v57 }
  0x39   :  { %v527_v26 = vmax.f32 %v399_v0, 0.0  ;;  %1659 = vmatprep.mubr.msk.bf16.mxu1 %vm767_vm0, %v657_v13  ;;  %v123_v27 = vunpack.c.h.bf16 %v41_v12  ;;  %v437_v28 = vadd.f32 %v1935_v21, %v297_v16  ;;  %v439_v31 = vadd.f32 %v1935_v21, %v299_v17  ;;  %v62_v13 = vld [vmem:[%s3208_s0 + $0x130] sm:$0xff] }
  0x3a   :  { %v2119_v33 = vpack.c.bf16 %v522_v9, %v520_v4  ;;  %1025 = vmatmul.mubr.bf16.vlgmr.msra.gmra.mrb[0].mxu1 %v656_v8  ;;  %v120_v36 = vunpack.c.l.bf16 %v40_v3  ;;  %v296_v37 = vmul.f32 %v1931_v19, %v156_v23  ;;  %v298_v38 = vmul.f32 %v1931_v19, %v158_v25 }
  0x3b   :  { %v2127_v40 = vadd.f32 %v1943_v29, %v258_v10  ;;  %v261_v41 = vmul.f32 %v1933_v20, %v121_v15  ;;  %v565_v43 = vmax.f32 %v437_v28, 0.0  ;;  %v567_v14 = vmax.f32 %v439_v31, 0.0  ;;  %v63_v28 = vld [vmem:[%s3208_s0 + $0x138] sm:$0xff] }
  0x3c   :  { %v122_v45 = vunpack.c.l.bf16 %v41_v12  ;;  %v436_v46 = vadd.f32 %v1943_v29, %v296_v37  ;;  %v438_v47 = vadd.f32 %v1943_v29, %v298_v38  ;;  %v125_v48 = vunpack.c.h.bf16 %v42_v32 }
  0x3d   :  { %921 = vmatmul.mubr.bf16.gmra.mrb[12].mxu0 %v2057_v24  ;;  %v524_v50 = vmax.f32 %v2104_v11, 0.0  ;;  %v263_v51 = vmul.f32 %v1933_v20, %v123_v27  ;;  %v659_v2 = vpack.c.bf16 %v567_v14, %v565_v43  ;;  %v161_v52 = vunpack.c.h.bf16 %v60_v39 }
  0x3e   :  { %1647 = vmatprep.mubr.msk.bf16.mxu0 %vm767_vm0, %v2062_v30  ;;  %v260_v53 = vmul.f32 %v1931_v19, %v120_v36  ;;  %v564_v54 = vmax.f32 %v436_v46, 0.0  ;;  %v566_v55 = vmax.f32 %v438_v47, 0.0  ;;  %v127_v56 = vunpack.c.h.bf16 %v43_v44 }
  0x3f   :  { %v2144_v57 = vpack.c.bf16 %v527_v26, %v525_v18  ;;  %v401_v58 = vadd.f32 %v1935_v21, %v261_v41  ;;  %1660 = vmatprep.mubr.msk.bf16.mxu1 %vm767_vm0, %v659_v2  ;;  %v163_v24 = vunpack.c.h.bf16 %v61_v49  ;;  %v301_v59 = vmul.f32 %v1933_v20, %v161_v52 }
  0x40   :  { %v262_v60 = vmul.f32 %v1931_v19, %v122_v45  ;;  %v658_v61 = vpack.c.bf16 %v566_v55, %v564_v54  ;;  %v265_v62 = vmul.f32 %v1933_v20, %v125_v48  ;;  %v160_v30 = vunpack.c.l.bf16 %v60_v39 }
  0x41   :  { %v124_v63 = vunpack.c.l.bf16 %v42_v32  ;;  %v303_v0 = vmul.f32 %v1933_v20, %v163_v24  ;;  %v441_v1 = vadd.f32 %v1935_v21, %v301_v59  ;;  %v162_v3 = vunpack.c.l.bf16 %v61_v49 }
  0x42   :  { %v403_v4 = vadd.f32 %v1935_v21, %v263_v51  ;;  %v400_v5 = vadd.f32 %v1943_v29, %v260_v53  ;;  %1033 = vmatmul.mubr.bf16.gmra.mrb[4].mxu1 %v658_v61  ;;  %v267_v6 = vmul.f32 %v1933_v20, %v127_v56  ;;  %v300_v7 = vmul.f32 %v1931_v19, %v160_v30 }
  0x43   :  { %v126_v9 = vunpack.c.l.bf16 %v43_v44  ;;  %v443_v10 = vadd.f32 %v1935_v21, %v303_v0  ;;  %v569_v8 = vmax.f32 %v441_v1, 0.0  ;;  %v302_v12 = vmul.f32 %v1931_v19, %v162_v3  ;;  %v46_v0 = vld [vmem:[%s3208_s0 + $0xb0] sm:$0xff] }
  0x44   :  { %v526_v15 = vmax.f32 %v2127_v40, 0.0  ;;  %v402_v16 = vadd.f32 %v1943_v29, %v262_v60  ;;  %v405_v17 = vadd.f32 %v1935_v21, %v265_v62  ;;  %v440_v18 = vadd.f32 %v1943_v29, %v300_v7  ;;  %v64_v62 = vld [vmem:[%s3208_s0 + $0x140] sm:$0xff] }
  0x45   :  { %929 = vmatmul.mubr.bf16.gmra.mrb[16].mxu0 %v2066_v34  ;;  %v529_v23 = vmax.f32 %v401_v58, 0.0  ;;  %v264_v25 = vmul.f32 %v1931_v19, %v124_v63  ;;  %v571_v26 = vmax.f32 %v443_v10, 0.0  ;;  %v442_v27 = vadd.f32 %v1943_v29, %v302_v12  ;;  %v44_v34 = vld [vmem:[%s3208_s0 + $0xa0] sm:$0xff] }
  0x46   :  { %1648 = vmatprep.mubr.msk.bf16.mxu0 %vm767_vm0, %v2068_v35  ;;  %v531_v31 = vmax.f32 %v403_v4, 0.0  ;;  %v407_v32 = vadd.f32 %v1935_v21, %v267_v6  ;;  %v568_v36 = vmax.f32 %v440_v18, 0.0  ;;  %v165_v37 = vunpack.c.h.bf16 %v62_v13  ;;  %v45_v35 = vld [vmem:[%s3208_s0 + $0xa8] sm:$0xff] }
  0x47   :  { %v528_v38 = vmax.f32 %v400_v5, 0.0  ;;  %v266_v39 = vmul.f32 %v1931_v19, %v126_v9  ;;  %v661_v40 = vpack.c.bf16 %v571_v26, %v569_v8  ;;  %v570_v41 = vmax.f32 %v442_v27, 0.0  ;;  %v47_v5 = vld [vmem:[%s3208_s0 + $0xb8] sm:$0xff]  ;;  %v65_v6 = vld [vmem:[%s3208_s0 + $0x148] sm:$0xff] }
  0x48   :  { %v530_v43 = vmax.f32 %v402_v16, 0.0  ;;  %v533_v14 = vmax.f32 %v405_v17, 0.0  ;;  %v167_v44 = vunpack.c.h.bf16 %v63_v28  ;;  %v305_v45 = vmul.f32 %v1933_v20, %v165_v37 }
  0x49   :  { %v2184_v46 = vadd.f32 %v1943_v29, %v264_v25  ;;  %1661 = vmatprep.mubr.msk.bf16.mxu1 %vm767_vm0, %v661_v40  ;;  %v660_v47 = vpack.c.bf16 %v570_v41, %v568_v36  ;;  %v129_v48 = vunpack.c.h.bf16 %v44_v34  ;;  %v164_v49 = vunpack.c.l.bf16 %v62_v13 }
  0x4a   :  { %v535_v51 = vmax.f32 %v407_v32, 0.0  ;;  %v307_v2 = vmul.f32 %v1933_v20, %v167_v44  ;;  %v445_v52 = vadd.f32 %v1935_v21, %v305_v45  ;;  %v166_v53 = vunpack.c.l.bf16 %v63_v28  ;;  %v66_v44 = vld [vmem:[%s3208_s0 + $0x150] sm:$0xff] }
  0x4b   :  { %v2191_v54 = vpack.c.bf16 %v526_v15, %v524_v50  ;;  %v406_v55 = vadd.f32 %v1943_v29, %v266_v39  ;;  %1041 = vmatmul.mubr.bf16.gmra.mrb[8].mxu1 %v660_v47  ;;  %v131_v56 = vunpack.c.h.bf16 %v45_v35  ;;  %v304_v58 = vmul.f32 %v1931_v19, %v164_v49 }
  0x4c   :  { %v2195_v24 = vpack.c.bf16 %v531_v31, %v529_v23  ;;  %v447_v59 = vadd.f32 %v1935_v21, %v307_v2  ;;  %v573_v60 = vmax.f32 %v445_v52, 0.0  ;;  %v306_v61 = vmul.f32 %v1931_v19, %v166_v53  ;;  %v67_v52 = vld [vmem:[%s3208_s0 + $0x158] sm:$0xff] }
  0x4d   :  { %937 = vmatmul.mubr.bf16.gmra.mrb[20].mxu0 %v2074_v42  ;;  %v2203_v11 = vpack.c.bf16 %v530_v43, %v528_v38  ;;  %v532_v50 = vmax.f32 %v2184_v46, 0.0  ;;  %v269_v30 = vmul.f32 %v1933_v20, %v129_v48  ;;  %v444_v63 = vadd.f32 %v1943_v29, %v304_v58 }
  0x4e   :  { %1649 = vmatprep.mubr.msk.bf16.mxu0 %vm767_vm0, %v2111_v22  ;;  %v2213_v1 = vpack.c.bf16 %v535_v51, %v533_v14  ;;  %v128_v3 = vunpack.c.l.bf16 %v44_v34  ;;  %v575_v4 = vmax.f32 %v447_v59, 0.0  ;;  %v446_v42 = vadd.f32 %v1943_v29, %v306_v61 }
  0x4f   :  { %v534_v7 = vmax.f32 %v406_v55, 0.0  ;;  %v271_v9 = vmul.f32 %v1933_v20, %v131_v56  ;;  %v572_v10 = vmax.f32 %v444_v63, 0.0  ;;  %v169_v8 = vunpack.c.h.bf16 %v64_v62  ;;  %v48_v56 = vld [vmem:[%s3208_s0 + $0xc0] sm:$0xff] }
  0x50   :  { %v130_v22 = vunpack.c.l.bf16 %v45_v35  ;;  %v663_v12 = vpack.c.bf16 %v575_v4, %v573_v60  ;;  %v574_v13 = vmax.f32 %v446_v42, 0.0  ;;  %v133_v15 = vunpack.c.h.bf16 %v46_v0 }
  0x51   :  { %v2224_v16 = vadd.f32 %v1935_v21, %v269_v30  ;;  %v135_v17 = vunpack.c.h.bf16 %v47_v5  ;;  %v171_v18 = vunpack.c.h.bf16 %v65_v6  ;;  %v309_v23 = vmul.f32 %v1933_v20, %v169_v8 }
  0x52   :  { %v268_v25 = vmul.f32 %v1931_v19, %v128_v3  ;;  %1662 = vmatprep.mubr.msk.bf16.mxu1 %vm767_vm0, %v663_v12  ;;  %v662_v26 = vpack.c.bf16 %v574_v13, %v572_v10  ;;  %v132_v27 = vunpack.c.l.bf16 %v46_v0  ;;  %v168_v28 = vunpack.c.l.bf16 %v64_v62 }
  0x53   :  { %v134_v31 = vunpack.c.l.bf16 %v47_v5  ;;  %v311_v32 = vmul.f32 %v1933_v20, %v171_v18  ;;  %v449_v36 = vadd.f32 %v1935_v21, %v309_v23  ;;  %v170_v34 = vunpack.c.l.bf16 %v65_v6 }
  0x54   :  { %v411_v37 = vadd.f32 %v1935_v21, %v271_v9  ;;  %v270_v38 = vmul.f32 %v1931_v19, %v130_v22  ;;  %1049 = vmatmul.mubr.bf16.gmra.mrb[12].mxu1 %v662_v26  ;;  %v273_v39 = vmul.f32 %v1933_v20, %v133_v15  ;;  %v308_v40 = vmul.f32 %v1931_v19, %v168_v28 }
  0x55   :  { %945 = vmatmul.mubr.bf16.gmra.mrb[24].mxu0 %v2119_v33  ;;  %v275_v41 = vmul.f32 %v1933_v20, %v135_v17  ;;  %v451_v43 = vadd.f32 %v1935_v21, %v311_v32  ;;  %v577_v14 = vmax.f32 %v449_v36, 0.0  ;;  %v310_v35 = vmul.f32 %v1931_v19, %v170_v34  ;;  %v69_v34 = vld [vmem:[%s3208_s0 + $0x168] sm:$0xff] }
  0x56   :  { %1650 = vmatprep.mubr.msk.bf16.mxu0 %vm767_vm0, %v2144_v57  ;;  %v2244_v45 = vpack.c.bf16 %v534_v7, %v532_v50  ;;  %v408_v46 = vadd.f32 %v1943_v29, %v268_v25  ;;  %v272_v33 = vmul.f32 %v1931_v19, %v132_v27  ;;  %v448_v47 = vadd.f32 %v1943_v29, %v308_v40  ;;  %v49_v50 = vld [vmem:[%s3208_s0 + $0xc8] sm:$0xff]  ;;  %v68_v25 = vld [vmem:[%s3208_s0 + $0x160] sm:$0xff]  ;;  %v50_v40 = vld [vmem:[%s3208_s0 + $0xd0] sm:$0xff] }
  0x57   :  { %v537_v48 = vmax.f32 %v2224_v16, 0.0  ;;  %v274_v49 = vmul.f32 %v1931_v19, %v134_v31  ;;  %v579_v51 = vmax.f32 %v451_v43, 0.0  ;;  %v450_v2 = vadd.f32 %v1943_v29, %v310_v35 }
  0x58   :  { %v539_v57 = vmax.f32 %v411_v37, 0.0  ;;  %v410_v53 = vadd.f32 %v1943_v29, %v270_v38  ;;  %v576_v55 = vmax.f32 %v448_v47, 0.0  ;;  %v173_v58 = vunpack.c.h.bf16 %v66_v44 }
  0x59   :  { %v413_v59 = vadd.f32 %v1935_v21, %v273_v39  ;;  %v415_v60 = vadd.f32 %v1935_v21, %v275_v41  ;;  %v665_v61 = vpack.c.bf16 %v579_v51, %v577_v14  ;;  %v578_v62 = vmax.f32 %v450_v2, 0.0 }
  0x5a   :  { %v536_v30 = vmax.f32 %v408_v46, 0.0  ;;  %v412_v63 = vadd.f32 %v1943_v29, %v272_v33  ;;  %v175_v0 = vunpack.c.h.bf16 %v67_v52  ;;  %v313_v3 = vmul.f32 %v1933_v20, %v173_v58  ;;  %v51_v46 = vld [vmem:[%s3208_s0 + $0xd8] sm:$0xff] }
  0x5b   :  { %v414_v4 = vadd.f32 %v1943_v29, %v274_v49  ;;  %1663 = vmatprep.mubr.msk.bf16.mxu1 %vm767_vm0, %v665_v61  ;;  %v664_v42 = vpack.c.bf16 %v578_v62, %v576_v55  ;;  %v137_v5 = vunpack.c.h.bf16 %v48_v56  ;;  %v172_v6 = vunpack.c.l.bf16 %v66_v44 }
  0x5c   :  { %v139_v7 = vunpack.c.h.bf16 %v49_v50  ;;  %v315_v9 = vmul.f32 %v1933_v20, %v175_v0  ;;  %v453_v10 = vadd.f32 %v1935_v21, %v313_v3  ;;  %v174_v8 = vunpack.c.l.bf16 %v67_v52 }
  0x5d   :  { %953 = vmatmul.mubr.bf16.gmra.mrb[28].mxu0 %v2191_v54  ;;  %v538_v22 = vmax.f32 %v410_v53, 0.0  ;;  %v541_v12 = vmax.f32 %v413_v59, 0.0  ;;  %v543_v13 = vmax.f32 %v415_v60, 0.0  ;;  %1057 = vmatmul.mubr.bf16.gmra.mrb[16].mxu1 %v664_v42  ;;  %v312_v15 = vmul.f32 %v1931_v19, %v172_v6  ;;  %v52_v42 = vld [vmem:[%s3208_s0 + $0xe0] sm:$0xff] }
  0x5e   :  { %1651 = vmatprep.mubr.msk.bf16.mxu0 %vm767_vm0, %v2195_v24  ;;  %v136_v16 = vunpack.c.l.bf16 %v48_v56  ;;  %v455_v17 = vadd.f32 %v1935_v21, %v315_v9  ;;  %v581_v18 = vmax.f32 %v453_v10, 0.0  ;;  %v314_v23 = vmul.f32 %v1931_v19, %v174_v8  ;;  %v71_v10 = vld [vmem:[%s3208_s0 + $0x178] sm:$0xff] }
  0x5f   :  { %v540_v54 = vmax.f32 %v412_v63, 0.0  ;;  %v542_v26 = vmax.f32 %v414_v4, 0.0  ;;  %v277_v27 = vmul.f32 %v1933_v20, %v137_v5  ;;  %v452_v28 = vadd.f32 %v1943_v29, %v312_v15  ;;  %v70_v63 = vld [vmem:[%s3208_s0 + $0x170] sm:$0xff] }
  0x60   :  { %v2281_v31 = vpack.c.bf16 %v539_v57, %v537_v48  ;;  %v279_v24 = vmul.f32 %v1933_v20, %v139_v7  ;;  %v583_v32 = vmax.f32 %v455_v17, 0.0  ;;  %v454_v36 = vadd.f32 %v1943_v29, %v314_v23 }
  0x61   :  { %v2288_v37 = vpack.c.bf16 %v538_v22, %v536_v30  ;;  %v2290_v38 = vpack.c.bf16 %v543_v13, %v541_v12  ;;  %v580_v39 = vmax.f32 %v452_v28, 0.0  ;;  %v177_v41 = vunpack.c.h.bf16 %v68_v25 }
  0x62   :  { %v138_v43 = vunpack.c.l.bf16 %v49_v50  ;;  %v276_v14 = vmul.f32 %v1931_v19, %v136_v16  ;;  %v667_v35 = vpack.c.bf16 %v583_v32, %v581_v18  ;;  %v582_v44 = vmax.f32 %v454_v36, 0.0  ;;  %v53_v18 = vld [vmem:[%s3208_s0 + $0xe8] sm:$0xff] }
  0x63   :  { %v2299_v33 = vpack.c.bf16 %v542_v26, %v540_v54  ;;  %v417_v47 = vadd.f32 %v1935_v21, %v277_v27  ;;  %v179_v48 = vunpack.c.h.bf16 %v69_v34  ;;  %v317_v49 = vmul.f32 %v1933_v20, %v177_v41 }
  0x64   :  { %v419_v51 = vadd.f32 %v1935_v21, %v279_v24  ;;  %1664 = vmatprep.mubr.msk.bf16.mxu1 %vm767_vm0, %v667_v35  ;;  %v666_v2 = vpack.c.bf16 %v582_v44, %v580_v39  ;;  %v141_v52 = vunpack.c.h.bf16 %v50_v40  ;;  %v176_v57 = vunpack.c.l.bf16 %v68_v25 }
  0x65   :  { %961 = vmatmul.mubr.bf16.gmra.mrb[32].mxu0 %v2203_v11  ;;  %v143_v53 = vunpack.c.h.bf16 %v51_v46  ;;  %v319_v55 = vmul.f32 %v1933_v20, %v179_v48  ;;  %v457_v56 = vadd.f32 %v1935_v21, %v317_v49  ;;  %v178_v58 = vunpack.c.l.bf16 %v69_v34  ;;  %v72_v48 = vld [vmem:[%s3208_s0 + $0x180] sm:$0xff] }
  0x66   :  { %1652 = vmatprep.mubr.msk.bf16.mxu0 %vm767_vm0, %v2213_v1  ;;  %v278_v59 = vmul.f32 %v1931_v19, %v138_v43  ;;  %v416_v60 = vadd.f32 %v1943_v29, %v276_v14  ;;  %1065 = vmatmul.mubr.bf16.gmra.mrb[20].mxu1 %v666_v2  ;;  %v316_v61 = vmul.f32 %v1931_v19, %v176_v57  ;;  %v140_v62 = vunpack.c.l.bf16 %v50_v40 }
  0x67   :  { %v459_v50 = vadd.f32 %v1935_v21, %v319_v55  ;;  %v585_v11 = vmax.f32 %v457_v56, 0.0  ;;  %v318_v30 = vmul.f32 %v1931_v19, %v178_v58  ;;  %v545_v0 = vmax.f32 %v417_v47, 0.0  ;;  %v73_v58 = vld [vmem:[%s3208_s0 + $0x188] sm:$0xff] }
  0x68   :  { %v547_v3 = vmax.f32 %v419_v51, 0.0  ;;  %v281_v1 = vmul.f32 %v1933_v20, %v141_v52  ;;  %v456_v4 = vadd.f32 %v1943_v29, %v316_v61  ;;  %v283_v5 = vmul.f32 %v1933_v20, %v143_v53 }
  0x69   :  { %v142_v6 = vunpack.c.l.bf16 %v51_v46  ;;  %v587_v7 = vmax.f32 %v459_v50, 0.0  ;;  %v458_v9 = vadd.f32 %v1943_v29, %v318_v30  ;;  %v418_v8 = vadd.f32 %v1943_v29, %v278_v59 }
  0x6a   :  { %v544_v22 = vmax.f32 %v416_v60, 0.0  ;;  %v584_v12 = vmax.f32 %v456_v4, 0.0  ;;  %v181_v13 = vunpack.c.h.bf16 %v70_v63  ;;  %v280_v15 = vmul.f32 %v1931_v19, %v140_v62 }
  0x6b   :  { %v669_v16 = vpack.c.bf16 %v587_v7, %v585_v11  ;;  %v586_v17 = vmax.f32 %v458_v9, 0.0  ;;  %v145_v23 = vunpack.c.h.bf16 %v52_v42  ;;  %v2333_v25 = vpack.c.bf16 %v547_v3, %v545_v0 }
  0x6c   :  { %v421_v54 = vadd.f32 %v1935_v21, %v281_v1  ;;  %v183_v26 = vunpack.c.h.bf16 %v71_v10  ;;  %v321_v27 = vmul.f32 %v1933_v20, %v181_v13  ;;  %v423_v28 = vadd.f32 %v1935_v21, %v283_v5  ;;  %v2378_v1 = vld [vmem:[%s3208_s0 + $0xf0] sm:$0xff] }
  0x6d   :  { %969 = vmatmul.mubr.bf16.gmra.mrb[36].mxu0 %v2244_v45  ;;  %v282_v24 = vmul.f32 %v1931_v19, %v142_v6  ;;  %1665 = vmatprep.mubr.msk.bf16.mxu1 %vm767_vm0, %v669_v16  ;;  %v668_v32 = vpack.c.bf16 %v586_v17, %v584_v12  ;;  %v180_v36 = vunpack.c.l.bf16 %v70_v63  ;;  %v147_v34 = vunpack.c.h.bf16 %v53_v18  ;;  %v74_v5 = vld [vmem:[%s3208_s0 + $0x190] sm:$0xff] }
  0x6e   :  { %1653 = vmatprep.mubr.msk.bf16.mxu0 %vm767_vm0, %v2281_v31  ;;  %v323_v39 = vmul.f32 %v1933_v20, %v183_v26  ;;  %v461_v40 = vadd.f32 %v1935_v21, %v321_v27  ;;  %v182_v41 = vunpack.c.l.bf16 %v71_v10  ;;  %v546_v43 = vmax.f32 %v418_v8, 0.0  ;;  %v75_v10 = vld [vmem:[%s3208_s0 + $0x198] sm:$0xff] }
  0x6f   :  { %v2346_v45 = vadd.f32 %v1943_v29, %v280_v15  ;;  %1073 = vmatmul.mubr.bf16.gmra.mrb[24].mxu1 %v668_v32  ;;  %v285_v14 = vmul.f32 %v1933_v20, %v145_v23  ;;  %v320_v35 = vmul.f32 %v1931_v19, %v180_v36  ;;  %v144_v44 = vunpack.c.l.bf16 %v52_v42 }
  0x70   :  { %v463_v46 = vadd.f32 %v1935_v21, %v323_v39  ;;  %v589_v47 = vmax.f32 %v461_v40, 0.0  ;;  %v322_v31 = vmul.f32 %v1931_v19, %v182_v41  ;;  %v549_v49 = vmax.f32 %v421_v54, 0.0 }
  0x71   :  { %v551_v51 = vmax.f32 %v423_v28, 0.0  ;;  %v2356_v2 = vadd.f32 %v1943_v29, %v282_v24  ;;  %v460_v52 = vadd.f32 %v1943_v29, %v320_v35  ;;  %v287_v57 = vmul.f32 %v1933_v20, %v147_v34  ;;  %v76_v28 = vld [vmem:[%s3208_s0 + $0x1a0] sm:$0xff] }
  0x72   :  { %v146_v53 = vunpack.c.l.bf16 %v53_v18  ;;  %v591_v55 = vmax.f32 %v463_v46, 0.0  ;;  %v462_v56 = vadd.f32 %v1943_v29, %v322_v31  ;;  %v2364_v59 = vpack.c.bf16 %v546_v43, %v544_v22 }
  0x73   :  { %v2367_v60 = vadd.f32 %v1935_v21, %v285_v14  ;;  %v588_v61 = vmax.f32 %v460_v52, 0.0  ;;  %v185_v62 = vunpack.c.h.bf16 %v72_v48  ;;  %v548_v50 = vmax.f32 %v2346_v45, 0.0  ;;  %v77_v14 = vld [vmem:[%s3208_s0 + $0x1a8] sm:$0xff] }
  0x74   :  { %v284_v11 = vmul.f32 %v1931_v19, %v144_v44  ;;  %v671_v30 = vpack.c.bf16 %v591_v55, %v589_v47  ;;  %v590_v63 = vmax.f32 %v462_v56, 0.0  ;;  %v2372_v0 = vpack.c.bf16 %v551_v51, %v549_v49  ;;  %v78_v56 = vld [vmem:[%s3208_s0 + $0x1b0] sm:$0xff] }
  0x75   :  { %977 = vmatmul.mubr.bf16.gmra.mrb[40].mxu0 %v2288_v37  ;;  %v550_v3 = vmax.f32 %v2356_v2, 0.0  ;;  %v187_v4 = vunpack.c.h.bf16 %v73_v58  ;;  %v325_v42 = vmul.f32 %v1933_v20, %v185_v62  ;;  %v2387_v37 = vadd.f32 %v1935_v21, %v287_v57 }
  0x76   :  { %1654 = vmatprep.mubr.msk.bf16.mxu0 %vm767_vm0, %v2290_v38  ;;  %v2390_v6 = vmul.f32 %v1931_v19, %v146_v53  ;;  %1666 = vmatprep.mubr.msk.bf16.mxu1 %vm767_vm0, %v671_v30  ;;  %v670_v7 = vpack.c.bf16 %v590_v63, %v588_v61  ;;  %v184_v9 = vunpack.c.l.bf16 %v72_v48  ;;  %v553_v8 = vmax.f32 %v2367_v60, 0.0  ;;  %v2400_v38 = vld [vmem:[%s3208_s0 + $0xf8] sm:$0xff] }
  0x77   :  { %v327_v22 = vmul.f32 %v1933_v20, %v187_v4  ;;  %v465_v12 = vadd.f32 %v1935_v21, %v325_v42  ;;  %v186_v13 = vunpack.c.l.bf16 %v73_v58  ;;  %v2405_v15 = vadd.f32 %v1943_v29, %v284_v11  ;;  %v83_v60 = vld [vmem:[%s3208_s0 + $0x1d8] sm:$0xff] }
  0x78   :  { %1081 = vmatmul.mubr.bf16.gmra.mrb[28].mxu1 %v670_v7  ;;  %v149_v16 = vunpack.c.h.bf16 %v2378_v1  ;;  %v324_v17 = vmul.f32 %v1931_v19, %v184_v9  ;;  %v189_v18 = vunpack.c.h.bf16 %v74_v5  ;;  %v191_v27 = vunpack.c.h.bf16 %v75_v10 }
  0x79   :  { %v467_v23 = vadd.f32 %v1935_v21, %v327_v22  ;;  %v593_v54 = vmax.f32 %v465_v12, 0.0  ;;  %v326_v26 = vmul.f32 %v1931_v19, %v186_v13  ;;  %v151_v24 = vunpack.c.h.bf16 %v2400_v38 }
  0x7a   :  { %v464_v32 = vadd.f32 %v1943_v29, %v324_v17  ;;  %v329_v36 = vmul.f32 %v1933_v20, %v189_v18  ;;  %v188_v34 = vunpack.c.l.bf16 %v74_v5  ;;  %v331_v41 = vmul.f32 %v1933_v20, %v191_v27  ;;  %v2447_v17 = vld [vmem:[%s3208_s0 + $0x1c0] sm:$0xff] }
  0x7b   :  { %v595_v39 = vmax.f32 %v467_v23, 0.0  ;;  %v466_v40 = vadd.f32 %v1943_v29, %v326_v26  ;;  %v190_v43 = vunpack.c.l.bf16 %v75_v10  ;;  %v193_v47 = vunpack.c.h.bf16 %v76_v28 }
  0x7c   :  { %v592_v35 = vmax.f32 %v464_v32, 0.0  ;;  %v469_v44 = vadd.f32 %v1935_v21, %v329_v36  ;;  %v328_v46 = vmul.f32 %v1931_v19, %v188_v34  ;;  %v471_v49 = vadd.f32 %v1935_v21, %v331_v41  ;;  %v81_v34 = vld [vmem:[%s3208_s0 + $0x1c8] sm:$0xff] }
  0x7d   :  { %985 = vmatmul.mubr.bf16.gmra.mrb[44].mxu0 %v2299_v33  ;;  %v673_v31 = vpack.c.bf16 %v595_v39, %v593_v54  ;;  %v594_v48 = vmax.f32 %v466_v40, 0.0  ;;  %v330_v51 = vmul.f32 %v1931_v19, %v190_v43  ;;  %v195_v53 = vunpack.c.h.bf16 %v77_v14 }
  0x7e   :  { %1655 = vmatprep.mubr.msk.bf16.mxu0 %vm767_vm0, %v2333_v25  ;;  %v597_v52 = vmax.f32 %v469_v44, 0.0  ;;  %v468_v57 = vadd.f32 %v1943_v29, %v328_v46  ;;  %v333_v55 = vmul.f32 %v1933_v20, %v193_v47  ;;  %v599_v58 = vmax.f32 %v471_v49, 0.0  ;;  %v79_v25 = vld [vmem:[%s3208_s0 + $0x1b8] sm:$0xff] }
  0x7f   :  { %1667 = vmatprep.mubr.msk.bf16.mxu1 %vm767_vm0, %v673_v31  ;;  %v672_v33 = vpack.c.bf16 %v594_v48, %v592_v35  ;;  %v470_v61 = vadd.f32 %v1943_v29, %v330_v51  ;;  %v192_v62 = vunpack.c.l.bf16 %v76_v28  ;;  %v335_v30 = vmul.f32 %v1933_v20, %v195_v53 }
  0x80   :  { %v596_v11 = vmax.f32 %v468_v57, 0.0  ;;  %v473_v63 = vadd.f32 %v1935_v21, %v333_v55  ;;  %v194_v4 = vunpack.c.l.bf16 %v77_v14  ;;  %v675_v42 = vpack.c.bf16 %v599_v58, %v597_v52 }
  0x81   :  { %1089 = vmatmul.mubr.bf16.gmra.mrb[32].mxu1 %v672_v33  ;;  %v598_v5 = vmax.f32 %v470_v61, 0.0  ;;  %v332_v7 = vmul.f32 %v1931_v19, %v192_v62  ;;  %v197_v9 = vunpack.c.h.bf16 %v78_v56  ;;  %v475_v10 = vadd.f32 %v1935_v21, %v335_v30 }
  0x82   :  { %v601_v22 = vmax.f32 %v473_v63, 0.0  ;;  %v334_v12 = vmul.f32 %v1931_v19, %v194_v4  ;;  %v199_v13 = vunpack.c.h.bf16 %v79_v25  ;;  %v289_v18 = vmul.f32 %v1933_v20, %v149_v16  ;;  %1668 = vmatprep.mubr.msk.bf16.mxu1 %vm767_vm0, %v675_v42 }
  0x83   :  { %v291_v23 = vmul.f32 %v1933_v20, %v151_v24  ;;  %v472_v54 = vadd.f32 %v1943_v29, %v332_v7  ;;  %v337_v26 = vmul.f32 %v1933_v20, %v197_v9  ;;  %v603_v27 = vmax.f32 %v475_v10, 0.0 }
  0x84   :  { %v474_v28 = vadd.f32 %v1943_v29, %v334_v12  ;;  %v339_v32 = vmul.f32 %v1933_v20, %v199_v13  ;;  %v196_v36 = vunpack.c.l.bf16 %v78_v56  ;;  %v555_v16 = vmax.f32 %v2387_v37, 0.0 }
  0x85   :  { %993 = vmatmul.mubr.bf16.gmra.mrb[48].mxu0 %v2364_v59  ;;  %v674_v24 = vpack.c.bf16 %v598_v5, %v596_v11  ;;  %v198_v39 = vunpack.c.l.bf16 %v79_v25  ;;  %v201_v40 = vunpack.c.h.bf16 %v2447_v17  ;;  %v426_v41 = vadd.f32 %v1943_v29, %v2390_v6 }
  0x86   :  { %1656 = vmatprep.mubr.msk.bf16.mxu0 %vm767_vm0, %v2372_v0  ;;  %v677_v43 = vpack.c.bf16 %v603_v27, %v601_v22  ;;  %v477_v14 = vadd.f32 %v1935_v21, %v337_v26  ;;  %v479_v35 = vadd.f32 %v1935_v21, %v339_v32  ;;  %v429_v44 = vadd.f32 %v1935_v21, %v289_v18  ;;  %v85_v26 = vld [vmem:[%s3208_s0 + $0x1e8] sm:$0xff] }
  0x87   :  { %v148_v59 = vunpack.c.l.bf16 %v2378_v1  ;;  %v150_v37 = vunpack.c.l.bf16 %v2400_v38  ;;  %v203_v46 = vunpack.c.h.bf16 %v81_v34  ;;  %v431_v47 = vadd.f32 %v1935_v21, %v291_v23 }
  0x88   :  { %v600_v31 = vmax.f32 %v472_v54, 0.0  ;;  %v602_v48 = vmax.f32 %v474_v28, 0.0  ;;  %v336_v0 = vmul.f32 %v1931_v19, %v196_v36  ;;  %v650_v6 = vpack.c.bf16 %v550_v3, %v548_v50  ;;  %v82_v3 = vld [vmem:[%s3208_s0 + $0x1d0] sm:$0xff]  ;;  %v84_v54 = vld [vmem:[%s3208_s0 + $0x1e0] sm:$0xff] }
  0x89   :  { %1097 = vmatmul.mubr.bf16.gmra.mrb[36].mxu1 %v674_v24  ;;  %v338_v49 = vmul.f32 %v1931_v19, %v198_v39  ;;  %v341_v51 = vmul.f32 %v1933_v20, %v201_v40  ;;  %v653_v1 = vpack.c.bf16 %v555_v16, %v553_v8  ;;  %v605_v38 = vmax.f32 %v477_v14, 0.0 }
  0x8a   :  { %1669 = vmatprep.mubr.msk.bf16.mxu1 %vm767_vm0, %v677_v43  ;;  %v607_v52 = vmax.f32 %v479_v35, 0.0  ;;  %v343_v57 = vmul.f32 %v1933_v20, %v203_v46  ;;  %v552_v53 = vmax.f32 %v2405_v15, 0.0  ;;  %v554_v45 = vmax.f32 %v426_v41, 0.0 }
  0x8b   :  { %v288_v2 = vmul.f32 %v1931_v19, %v148_v59  ;;  %v290_v50 = vmul.f32 %v1931_v19, %v150_v37  ;;  %v557_v8 = vmax.f32 %v429_v44, 0.0  ;;  %v559_v55 = vmax.f32 %v431_v47, 0.0 }
  0x8c   :  { %v676_v56 = vpack.c.bf16 %v602_v48, %v600_v31  ;;  %v476_v33 = vadd.f32 %v1943_v29, %v336_v0  ;;  %v478_v15 = vadd.f32 %v1943_v29, %v338_v49  ;;  %v481_v58 = vadd.f32 %v1935_v21, %v341_v51  ;;  %v87_v49 = vld [vmem:[%s3208_s0 + $0x1f8] sm:$0xff] }
  0x8d   :  { %1001 = vmatmul.mubr.bf16.gmra.mrb[52].mxu0 %v650_v6  ;;  %v200_v61 = vunpack.c.l.bf16 %v2447_v17  ;;  %v202_v62 = vunpack.c.l.bf16 %v81_v34  ;;  %v679_v25 = vpack.c.bf16 %v607_v52, %v605_v38  ;;  %v483_v11 = vadd.f32 %v1935_v21, %v343_v57  ;;  %v86_v6 = vld [vmem:[%s3208_s0 + $0x1f0] sm:$0xff] }
  0x8e   :  { %1657 = vmatprep.mubr.msk.bf16.mxu0 %vm767_vm0, %v653_v1  ;;  %v205_v30 = vunpack.c.h.bf16 %v82_v3  ;;  %v207_v63 = vunpack.c.h.bf16 %v83_v60  ;;  %v652_v4 = vpack.c.bf16 %v554_v45, %v552_v53  ;;  %v655_v42 = vpack.c.bf16 %v559_v55, %v557_v8 }
  0x8f   :  { %v428_v5 = vadd.f32 %v1943_v29, %v288_v2  ;;  %v430_v7 = vadd.f32 %v1943_v29, %v290_v50  ;;  %v604_v9 = vmax.f32 %v476_v33, 0.0  ;;  %v606_v10 = vmax.f32 %v478_v15, 0.0 }
  0x90   :  { %v340_v22 = vmul.f32 %v1931_v19, %v200_v61  ;;  %v342_v12 = vmul.f32 %v1931_v19, %v202_v62  ;;  %v609_v13 = vmax.f32 %v481_v58, 0.0  ;;  %v611_v17 = vmax.f32 %v483_v11, 0.0 }
  0x91   :  { %1105 = vmatmul.mubr.bf16.gmra.mrb[40].mxu1 %v676_v56  ;;  %v345_v18 = vmul.f32 %v1933_v20, %v205_v30  ;;  %v347_v23 = vmul.f32 %v1933_v20, %v207_v63  ;;  %v556_v27 = vmax.f32 %v428_v5, 0.0  ;;  %v558_v28 = vmax.f32 %v430_v7, 0.0 }
  0x92   :  { %1670 = vmatprep.mubr.msk.bf16.mxu1 %vm767_vm0, %v679_v25  ;;  %v204_v32 = vunpack.c.l.bf16 %v82_v3  ;;  %v206_v36 = vunpack.c.l.bf16 %v83_v60  ;;  %v678_v34 = vpack.c.bf16 %v606_v10, %v604_v9  ;;  %v480_v16 = vadd.f32 %v1943_v29, %v340_v22 }
  0x93   :  { %v482_v24 = vadd.f32 %v1943_v29, %v342_v12  ;;  %v209_v39 = vunpack.c.h.bf16 %v84_v54  ;;  %v681_v40 = vpack.c.bf16 %v611_v17, %v609_v13  ;;  %v485_v41 = vadd.f32 %v1935_v21, %v345_v18 }
  0x94   :  { %v487_v43 = vadd.f32 %v1935_v21, %v347_v23  ;;  %v211_v14 = vunpack.c.h.bf16 %v85_v26  ;;  %v344_v35 = vmul.f32 %v1931_v19, %v204_v32  ;;  %v346_v44 = vmul.f32 %v1931_v19, %v206_v36 }
  0x95   :  { %1009 = vmatmul.mubr.bf16.gmra.mrb[56].mxu0 %v652_v4  ;;  %v654_v59 = vpack.c.bf16 %v558_v28, %v556_v27  ;;  %v608_v37 = vmax.f32 %v480_v16, 0.0  ;;  %v610_v46 = vmax.f32 %v482_v24, 0.0  ;;  %v349_v47 = vmul.f32 %v1933_v20, %v209_v39 }
  0x96   :  { %1658 = vmatprep.mubr.msk.bf16.mxu0 %vm767_vm0, %v655_v42  ;;  %v613_v31 = vmax.f32 %v485_v41, 0.0  ;;  %v615_v48 = vmax.f32 %v487_v43, 0.0  ;;  %v351_v0 = vmul.f32 %v1933_v20, %v211_v14  ;;  %v484_v51 = vadd.f32 %v1943_v29, %v344_v35 }
  0x97   :  { %v486_v1 = vadd.f32 %v1943_v29, %v346_v44  ;;  %v680_v38 = vpack.c.bf16 %v610_v46, %v608_v37  ;;  %v489_v52 = vadd.f32 %v1935_v21, %v349_v47  ;;  %v208_v57 = vunpack.c.l.bf16 %v84_v54 }
  0x98   :  { %v210_v53 = vunpack.c.l.bf16 %v85_v26  ;;  %v683_v45 = vpack.c.bf16 %v615_v48, %v613_v31  ;;  %v491_v2 = vadd.f32 %v1935_v21, %v351_v0  ;;  %v213_v50 = vunpack.c.h.bf16 %v86_v6 }
  0x99   :  { %1113 = vmatmul.mubr.bf16.gmra.mrb[44].mxu1 %v678_v34  ;;  %v215_v3 = vunpack.c.h.bf16 %v87_v49  ;;  %v612_v60 = vmax.f32 %v484_v51, 0.0  ;;  %v614_v8 = vmax.f32 %v486_v1, 0.0  ;;  %v348_v55 = vmul.f32 %v1931_v19, %v208_v57 }
  0x9a   :  { %1671 = vmatprep.mubr.msk.bf16.mxu1 %vm767_vm0, %v681_v40  ;;  %v350_v56 = vmul.f32 %v1931_v19, %v210_v53  ;;  %v617_v33 = vmax.f32 %v489_v52, 0.0  ;;  %v619_v15 = vmax.f32 %v491_v2, 0.0  ;;  %v353_v58 = vmul.f32 %v1933_v20, %v213_v50 }
  0x9b   :  { %v355_v61 = vmul.f32 %v1933_v20, %v215_v3  ;;  %v682_v62 = vpack.c.bf16 %v614_v8, %v612_v60  ;;  %v488_v25 = vadd.f32 %v1943_v29, %v348_v55  ;;  %v212_v30 = vunpack.c.l.bf16 %v86_v6 }
  0x9c   :  { %v490_v11 = vadd.f32 %v1943_v29, %v350_v56  ;;  %v214_v63 = vunpack.c.l.bf16 %v87_v49  ;;  %v685_v4 = vpack.c.bf16 %v619_v15, %v617_v33  ;;  %v493_v42 = vadd.f32 %v1935_v21, %v353_v58 }
  0x9d   :  { %1017 = vmatmul.mubr.bf16.gmra.mrb[60].mxu0 %v654_v59  ;;  %v495_v5 = vadd.f32 %v1935_v21, %v355_v61  ;;  %v616_v7 = vmax.f32 %v488_v25, 0.0  ;;  %v352_v10 = vmul.f32 %v1931_v19, %v212_v30  ;;  %vm1153_vm1 = vcmask 97280  }
  0x9e   :  { %v618_v9 = vmax.f32 %v490_v11, 0.0  ;;  %v354_v22 = vmul.f32 %v1931_v19, %v214_v63  ;;  %v621_v20 = vmax.f32 %v493_v42, 0.0  ;;  %v2549_v19 = vld [vmem:[%s3212_s4] ss:$0 sm:$0xff]  ;;  %vm1287_vm2 = vcmask 90112  }
  0x9f   :  { %v623_v12 = vmax.f32 %v495_v5, 0.0  ;;  %v492_v17 = vadd.f32 %v1943_v29, %v352_v10 }
  0xa0   :  { %v684_v13 = vpack.c.bf16 %v618_v9, %v616_v7  ;;  %v494_v18 = vadd.f32 %v1943_v29, %v354_v22 }
  0xa1   :  { %1121 = vmatmul.mubr.bf16.gmra.mrb[48].mxu1 %v680_v38  ;;  %v687_v23 = vpack.c.bf16 %v623_v12, %v621_v20  ;;  %v620_v54 = vmax.f32 %v492_v17, 0.0 }
  0xa2   :  { %1672 = vmatprep.mubr.msk.bf16.mxu1 %vm767_vm0, %v683_v45  ;;  %v622_v21 = vmax.f32 %v494_v18, 0.0 }
  0xa4   :  { %v686_v26 = vpack.c.bf16 %v622_v21, %v620_v54 }
  0xa9   :  { %1129 = vmatmul.mubr.bf16.gmra.mrb[52].mxu1 %v682_v62 }
  0xaa   :  { %1673 = vmatprep.mubr.msk.bf16.mxu1 %vm767_vm0, %v685_v4 }
  0xb1   :  { %1137 = vmatmul.mubr.bf16.gmra.mrb[56].mxu1 %v684_v13 }
  0xb2   :  { %1674 = vmatprep.mubr.msk.bf16.mxu1 %vm767_vm0, %v687_v23 }
  0xb9   :  { %1145 = vmatmul.mubr.bf16.gmra.mrb[60].mxu1 %v686_v26 }
  0xf8   :  { %v898_v27 = vpop.f32.mrb[0].mxu0 }
  0xf9   :  { %v899_v28 = vadd.f32 %v2549_v19, %v898_v27  ;;  %v900_v32 = vpop.f32.mrb[1].mxu0 }
  0xfa   :  { %v901_v36 = vpop.f32.mrb[2].mxu0 }
  0xfb   :  { %v1289_v29 = vmul.f32 %v899_v28, %v899_v28  ;;  %1704 = vtanh.f32 %v899_v28  ;;  %v902_v34 = vadd.f32 %v2549_v19, %v901_v36  ;;  %v903_v16 = vpop.f32.mrb[3].mxu0  ;;  %v1154_v24 = vsel %vm1153_vm1, %v899_v28, 0.0 }
  0xfd   :  { %v1155_v39 = vsel %vm1153_vm1, %v902_v34, 0.0  ;;  %v1290_v40 = vmul.f32 %v902_v34, %v902_v34  ;;  %1706 = vtanh.f32 %v902_v34  ;;  %v1353_v43 = vsel %vm1153_vm1, %v1289_v29, 0.0 }
  0xfe   :  { %v1156_v41 = vadd.f32 %v1155_v39, %v1154_v24 }
  0xff   :  { %v1354_v14 = vsel %vm1153_vm1, %v1290_v40, 0.0 }
 0x100   :  { %v1355_v35 = vadd.f32 %v1354_v14, %v1353_v43  ;;  %v906_v44 = vpop.f32.mrb[4].mxu0 }
 0x101   :  { %v907_v59 = vadd.f32 %v2549_v19, %v906_v44  ;;  %v908_v37 = vpop.f32.mrb[5].mxu0 }
 0x102   :  { %v909_v46 = vpop.f32.mrb[6].mxu0 }
 0x103   :  { %v1157_v47 = vsel %vm1153_vm1, %v907_v59, 0.0  ;;  %v1291_v31 = vmul.f32 %v907_v59, %v907_v59  ;;  %1708 = vtanh.f32 %v907_v59  ;;  %v910_v48 = vadd.f32 %v2549_v19, %v909_v46  ;;  %v911_v0 = vpop.f32.mrb[7].mxu0 }
 0x104   :  { %v1158_v6 = vadd.f32 %v1157_v47, %v1156_v41 }
 0x105   :  { %v1705_v49 = vpop.eup %1704  ;;  %v1356_v51 = vsel %vm1153_vm1, %v1291_v31, 0.0  ;;  %v1159_v1 = vsel %vm1153_vm1, %v910_v48, 0.0  ;;  %v1292_v38 = vmul.f32 %v910_v48, %v910_v48  ;;  %1710 = vtanh.f32 %v910_v48 }
 0x106   :  { %1551 = vst.msk [vmem:[%s3213_s5] sm:$0xff] %vm1153_vm1, %v1705_v49  ;;  %v1357_v52 = vadd.f32 %v1356_v51, %v1355_v35  ;;  %v1160_v57 = vadd.f32 %v1159_v1, %v1158_v6 }
 0x107   :  { %v1707_v53 = vpop.eup %1706  ;;  %v1358_v45 = vsel %vm1153_vm1, %v1292_v38, 0.0 }
 0x108   :  { %1552 = vst.msk [vmem:[%s3213_s5 + $0x8] sm:$0xff] %vm1153_vm1, %v1707_v53  ;;  %v1359_v2 = vadd.f32 %v1358_v45, %v1357_v52  ;;  %v914_v50 = vpop.f32.mrb[8].mxu0 }
 0x109   :  { %v915_v3 = vadd.f32 %v2549_v19, %v914_v50  ;;  %v916_v60 = vpop.f32.mrb[9].mxu0 }
 0x10a   :  { %v917_v8 = vpop.f32.mrb[10].mxu0 }
 0x10b   :  { %v1161_v55 = vsel %vm1153_vm1, %v915_v3, 0.0  ;;  %v1293_v56 = vmul.f32 %v915_v3, %v915_v3  ;;  %1712 = vtanh.f32 %v915_v3  ;;  %v918_v33 = vadd.f32 %v2549_v19, %v917_v8  ;;  %v919_v15 = vpop.f32.mrb[11].mxu0 }
 0x10c   :  { %v1162_v58 = vadd.f32 %v1161_v55, %v1160_v57 }
 0x10d   :  { %v1709_v61 = vpop.eup %1708  ;;  %v1360_v62 = vsel %vm1153_vm1, %v1293_v56, 0.0  ;;  %v1163_v25 = vsel %vm1153_vm1, %v918_v33, 0.0  ;;  %v1294_v11 = vmul.f32 %v918_v33, %v918_v33  ;;  %1714 = vtanh.f32 %v918_v33  ;;  %v1026_v30 = vpop.f32.mrb[0].mxu1 }
 0x10e   :  { %1553 = vst.msk [vmem:[%s3213_s5 + $0x10] sm:$0xff] %vm1153_vm1, %v1709_v61  ;;  %v1361_v63 = vadd.f32 %v1360_v62, %v1359_v2  ;;  %v1164_v4 = vadd.f32 %v1163_v25, %v1162_v58  ;;  %v2581_v42 = vadd.f32 %v2549_v19, %v1026_v30  ;;  %v1028_v5 = vpop.f32.mrb[1].mxu1 }
 0x10f   :  { %v1711_v7 = vpop.eup %1710  ;;  %v1362_v9 = vsel %vm1153_vm1, %v1294_v11, 0.0  ;;  %v1029_v10 = vpop.f32.mrb[2].mxu1 }
 0x110   :  { %1554 = vst.msk [vmem:[%s3213_s5 + $0x18] sm:$0xff] %vm1153_vm1, %v1711_v7  ;;  %v1363_v22 = vadd.f32 %v1362_v9, %v1361_v63  ;;  %v922_v20 = vpop.f32.mrb[12].mxu0  ;;  %1716 = vtanh.f32 %v2581_v42  ;;  %v1031_v12 = vpop.f32.mrb[3].mxu1  ;;  %v2591_v18 = vadd.f32 %v2549_v19, %v1029_v10 }
 0x111   :  { %v923_v13 = vadd.f32 %v2549_v19, %v922_v20  ;;  %v924_v17 = vpop.f32.mrb[13].mxu0 }
 0x112   :  { %v925_v23 = vpop.f32.mrb[14].mxu0 }
 0x113   :  { %v1165_v54 = vsel %vm1153_vm1, %v923_v13, 0.0  ;;  %v1295_v21 = vmul.f32 %v923_v13, %v923_v13  ;;  %1718 = vtanh.f32 %v923_v13  ;;  %v926_v26 = vadd.f32 %v2549_v19, %v925_v23  ;;  %v927_v27 = vpop.f32.mrb[15].mxu0 }
 0x114   :  { %v1166_v28 = vadd.f32 %v1165_v54, %v1164_v4  ;;  %1720 = vtanh.f32 %v2591_v18 }
 0x115   :  { %v1713_v32 = vpop.eup %1712  ;;  %v1364_v36 = vsel %vm1153_vm1, %v1295_v21, 0.0  ;;  %v1167_v29 = vsel %vm1153_vm1, %v926_v26, 0.0  ;;  %v1296_v34 = vmul.f32 %v926_v26, %v926_v26  ;;  %1722 = vtanh.f32 %v926_v26  ;;  %v1034_v16 = vpop.f32.mrb[4].mxu1 }
 0x116   :  { %1555 = vst.msk [vmem:[%s3213_s5 + $0x20] sm:$0xff] %vm1153_vm1, %v1713_v32  ;;  %v1365_v24 = vadd.f32 %v1364_v36, %v1363_v22  ;;  %v1168_v39 = vadd.f32 %v1167_v29, %v1166_v28  ;;  %v2603_v40 = vadd.f32 %v2549_v19, %v1034_v16  ;;  %v1036_v41 = vpop.f32.mrb[5].mxu1 }
 0x117   :  { %v1715_v43 = vpop.eup %1714  ;;  %v1366_v14 = vsel %vm1153_vm1, %v1296_v34, 0.0  ;;  %v1037_v35 = vpop.f32.mrb[6].mxu1 }
 0x118   :  { %1556 = vst.msk [vmem:[%s3213_s5 + $0x28] sm:$0xff] %vm1153_vm1, %v1715_v43  ;;  %v1367_v44 = vadd.f32 %v1366_v14, %v1365_v24  ;;  %v930_v59 = vpop.f32.mrb[16].mxu0  ;;  %1724 = vtanh.f32 %v2603_v40  ;;  %v1039_v37 = vpop.f32.mrb[7].mxu1  ;;  %v2613_v31 = vadd.f32 %v2549_v19, %v1037_v35 }
 0x119   :  { %v931_v46 = vadd.f32 %v2549_v19, %v930_v59  ;;  %v932_v47 = vpop.f32.mrb[17].mxu0 }
 0x11a   :  { %v1717_v48 = vpop.eup %1716  ;;  %v933_v0 = vpop.f32.mrb[18].mxu0 }
 0x11b   :  { %v1169_v6 = vsel %vm1153_vm1, %v931_v46, 0.0  ;;  %v1297_v49 = vmul.f32 %v931_v46, %v931_v46  ;;  %1726 = vtanh.f32 %v931_v46  ;;  %v934_v51 = vadd.f32 %v2549_v19, %v933_v0  ;;  %v935_v1 = vpop.f32.mrb[19].mxu0  ;;  %1583 = vst.msk [vmem:[%s3213_s5 + $0x100] sm:$0xff] %vm1153_vm1, %v1717_v48 }
 0x11c   :  { %v1170_v38 = vadd.f32 %v1169_v6, %v1168_v39  ;;  %1728 = vtanh.f32 %v2613_v31 }
 0x11d   :  { %v1719_v52 = vpop.eup %1718  ;;  %v1368_v57 = vsel %vm1153_vm1, %v1297_v49, 0.0  ;;  %v1171_v53 = vsel %vm1153_vm1, %v934_v51, 0.0  ;;  %v1298_v45 = vmul.f32 %v934_v51, %v934_v51  ;;  %1730 = vtanh.f32 %v934_v51 }
 0x11e   :  { %v1721_v2 = vpop.eup %1720  ;;  %1557 = vst.msk [vmem:[%s3213_s5 + $0x30] sm:$0xff] %vm1153_vm1, %v1719_v52  ;;  %v1369_v50 = vadd.f32 %v1368_v57, %v1367_v44  ;;  %v1172_v3 = vadd.f32 %v1171_v53, %v1170_v38  ;;  %v1042_v60 = vpop.f32.mrb[8].mxu1 }
 0x11f   :  { %v1723_v8 = vpop.eup %1722  ;;  %v1370_v55 = vsel %vm1153_vm1, %v1298_v45, 0.0  ;;  %1584 = vst.msk [vmem:[%s3213_s5 + $0x108] sm:$0xff] %vm1153_vm1, %v1721_v2  ;;  %v2634_v56 = vadd.f32 %v2549_v19, %v1042_v60  ;;  %v1044_v33 = vpop.f32.mrb[9].mxu1 }
 0x120   :  { %1558 = vst.msk [vmem:[%s3213_s5 + $0x38] sm:$0xff] %vm1153_vm1, %v1723_v8  ;;  %v1371_v15 = vadd.f32 %v1370_v55, %v1369_v50  ;;  %v938_v58 = vpop.f32.mrb[20].mxu0  ;;  %v1045_v61 = vpop.f32.mrb[10].mxu1 }
 0x121   :  { %v939_v62 = vadd.f32 %v2549_v19, %v938_v58  ;;  %v940_v25 = vpop.f32.mrb[21].mxu0  ;;  %1732 = vtanh.f32 %v2634_v56  ;;  %v1047_v11 = vpop.f32.mrb[11].mxu1  ;;  %v2643_v4 = vadd.f32 %v2549_v19, %v1045_v61 }
 0x122   :  { %v1725_v30 = vpop.eup %1724  ;;  %v941_v63 = vpop.f32.mrb[22].mxu0 }
 0x123   :  { %v1173_v5 = vsel %vm1153_vm1, %v939_v62, 0.0  ;;  %v1299_v7 = vmul.f32 %v939_v62, %v939_v62  ;;  %1734 = vtanh.f32 %v939_v62  ;;  %v942_v9 = vadd.f32 %v2549_v19, %v941_v63  ;;  %v943_v10 = vpop.f32.mrb[23].mxu0  ;;  %1585 = vst.msk [vmem:[%s3213_s5 + $0x110] sm:$0xff] %vm1153_vm1, %v1725_v30 }
 0x124   :  { %v1174_v22 = vadd.f32 %v1173_v5, %v1172_v3 }
 0x125   :  { %v1727_v20 = vpop.eup %1726  ;;  %v1372_v12 = vsel %vm1153_vm1, %v1299_v7, 0.0  ;;  %v1175_v13 = vsel %vm1153_vm1, %v942_v9, 0.0  ;;  %v1300_v17 = vmul.f32 %v942_v9, %v942_v9  ;;  %1736 = vtanh.f32 %v942_v9 }
 0x126   :  { %v1729_v23 = vpop.eup %1728  ;;  %1559 = vst.msk [vmem:[%s3213_s5 + $0x40] sm:$0xff] %vm1153_vm1, %v1727_v20  ;;  %v1373_v54 = vadd.f32 %v1372_v12, %v1371_v15  ;;  %v1176_v21 = vadd.f32 %v1175_v13, %v1174_v22  ;;  %1738 = vtanh.f32 %v2643_v4 }
 0x127   :  { %v1731_v26 = vpop.eup %1730  ;;  %v1374_v27 = vsel %vm1153_vm1, %v1300_v17, 0.0  ;;  %1586 = vst.msk [vmem:[%s3213_s5 + $0x118] sm:$0xff] %vm1153_vm1, %v1729_v23  ;;  %v1050_v28 = vpop.f32.mrb[12].mxu1 }
 0x128   :  { %1560 = vst.msk [vmem:[%s3213_s5 + $0x48] sm:$0xff] %vm1153_vm1, %v1731_v26  ;;  %v1375_v32 = vadd.f32 %v1374_v27, %v1373_v54  ;;  %v946_v36 = vpop.f32.mrb[24].mxu0  ;;  %v2668_v29 = vadd.f32 %v2549_v19, %v1050_v28  ;;  %v1052_v34 = vpop.f32.mrb[13].mxu1 }
 0x129   :  { %v947_v16 = vadd.f32 %v2549_v19, %v946_v36  ;;  %v948_v24 = vpop.f32.mrb[25].mxu0  ;;  %v1053_v39 = vpop.f32.mrb[14].mxu1 }
 0x12a   :  { %v949_v41 = vpop.f32.mrb[26].mxu0  ;;  %1740 = vtanh.f32 %v2668_v29  ;;  %v2673_v43 = vadd.f32 %v2549_v19, %v1053_v39  ;;  %v1055_v14 = vpop.f32.mrb[15].mxu1 }
 0x12b   :  { %v1733_v35 = vpop.eup %1732  ;;  %v1177_v44 = vsel %vm1153_vm1, %v947_v16, 0.0  ;;  %v1301_v59 = vmul.f32 %v947_v16, %v947_v16  ;;  %1742 = vtanh.f32 %v947_v16  ;;  %v950_v37 = vadd.f32 %v2549_v19, %v949_v41  ;;  %v951_v46 = vpop.f32.mrb[27].mxu0 }
 0x12c   :  { %v1178_v47 = vadd.f32 %v1177_v44, %v1176_v21  ;;  %1587 = vst.msk [vmem:[%s3213_s5 + $0x120] sm:$0xff] %vm1153_vm1, %v1733_v35 }
 0x12d   :  { %v1735_v48 = vpop.eup %1734  ;;  %v1376_v0 = vsel %vm1153_vm1, %v1301_v59, 0.0  ;;  %v1179_v6 = vsel %vm1153_vm1, %v950_v37, 0.0  ;;  %v1302_v49 = vmul.f32 %v950_v37, %v950_v37  ;;  %1744 = vtanh.f32 %v950_v37 }
 0x12e   :  { %1561 = vst.msk [vmem:[%s3213_s5 + $0x50] sm:$0xff] %vm1153_vm1, %v1735_v48  ;;  %v1377_v51 = vadd.f32 %v1376_v0, %v1375_v32  ;;  %v1180_v1 = vadd.f32 %v1179_v6, %v1178_v47  ;;  %1746 = vtanh.f32 %v2673_v43 }
 0x12f   :  { %v1737_v38 = vpop.eup %1736  ;;  %v1378_v52 = vsel %vm1153_vm1, %v1302_v49, 0.0 }
 0x130   :  { %v1739_v57 = vpop.eup %1738  ;;  %1562 = vst.msk [vmem:[%s3213_s5 + $0x58] sm:$0xff] %vm1153_vm1, %v1737_v38  ;;  %v1379_v53 = vadd.f32 %v1378_v52, %v1377_v51  ;;  %v954_v45 = vpop.f32.mrb[28].mxu0 }
 0x131   :  { %v1058_v2 = vpop.f32.mrb[16].mxu1  ;;  %v955_v50 = vadd.f32 %v2549_v19, %v954_v45  ;;  %v956_v3 = vpop.f32.mrb[29].mxu0  ;;  %1588 = vst.msk [vmem:[%s3213_s5 + $0x128] sm:$0xff] %vm1153_vm1, %v1739_v57 }
 0x132   :  { %v2699_v60 = vadd.f32 %v2549_v19, %v1058_v2  ;;  %v1060_v8 = vpop.f32.mrb[17].mxu1  ;;  %v957_v55 = vpop.f32.mrb[30].mxu0 }
 0x133   :  { %v1061_v33 = vpop.f32.mrb[18].mxu1  ;;  %v1181_v15 = vsel %vm1153_vm1, %v955_v50, 0.0  ;;  %v1303_v58 = vmul.f32 %v955_v50, %v955_v50  ;;  %1748 = vtanh.f32 %v955_v50  ;;  %v958_v61 = vadd.f32 %v2549_v19, %v957_v55  ;;  %v959_v62 = vpop.f32.mrb[31].mxu0 }
 0x134   :  { %v1063_v25 = vpop.f32.mrb[19].mxu1  ;;  %v1741_v11 = vpop.eup %1740  ;;  %v1182_v30 = vadd.f32 %v1181_v15, %v1180_v1  ;;  %1750 = vtanh.f32 %v2699_v60  ;;  %v2715_v20 = vadd.f32 %v2549_v19, %v1061_v33 }
 0x135   :  { %v1743_v63 = vpop.eup %1742  ;;  %v1380_v5 = vsel %vm1153_vm1, %v1303_v58, 0.0  ;;  %v1183_v7 = vsel %vm1153_vm1, %v958_v61, 0.0  ;;  %v1304_v9 = vmul.f32 %v958_v61, %v958_v61  ;;  %1752 = vtanh.f32 %v958_v61  ;;  %1589 = vst.msk [vmem:[%s3213_s5 + $0x130] sm:$0xff] %vm1153_vm1, %v1741_v11 }
 0x136   :  { %1563 = vst.msk [vmem:[%s3213_s5 + $0x60] sm:$0xff] %vm1153_vm1, %v1743_v63  ;;  %v1381_v10 = vadd.f32 %v1380_v5, %v1379_v53  ;;  %v1184_v22 = vadd.f32 %v1183_v7, %v1182_v30  ;;  %1754 = vtanh.f32 %v2715_v20 }
 0x137   :  { %v1745_v12 = vpop.eup %1744  ;;  %v1382_v13 = vsel %vm1153_vm1, %v1304_v9, 0.0 }
 0x138   :  { %v1747_v17 = vpop.eup %1746  ;;  %1564 = vst.msk [vmem:[%s3213_s5 + $0x68] sm:$0xff] %vm1153_vm1, %v1745_v12  ;;  %v1383_v23 = vadd.f32 %v1382_v13, %v1381_v10  ;;  %v962_v54 = vpop.f32.mrb[32].mxu0 }
 0x139   :  { %v963_v21 = vadd.f32 %v2549_v19, %v962_v54  ;;  %v964_v26 = vpop.f32.mrb[33].mxu0  ;;  %1590 = vst.msk [vmem:[%s3213_s5 + $0x138] sm:$0xff] %vm1153_vm1, %v1747_v17  ;;  %v1066_v27 = vpop.f32.mrb[20].mxu1 }
 0x13a   :  { %v965_v28 = vpop.f32.mrb[34].mxu0  ;;  %v2729_v32 = vadd.f32 %v2549_v19, %v1066_v27  ;;  %v1068_v36 = vpop.f32.mrb[21].mxu1 }
 0x13b   :  { %v1185_v34 = vsel %vm1153_vm1, %v963_v21, 0.0  ;;  %v1305_v16 = vmul.f32 %v963_v21, %v963_v21  ;;  %1756 = vtanh.f32 %v963_v21  ;;  %v966_v24 = vadd.f32 %v2549_v19, %v965_v28  ;;  %v967_v39 = vpop.f32.mrb[35].mxu0  ;;  %v1069_v41 = vpop.f32.mrb[22].mxu1 }
 0x13c   :  { %v1186_v14 = vadd.f32 %v1185_v34, %v1184_v22  ;;  %1758 = vtanh.f32 %v2729_v32  ;;  %v1071_v35 = vpop.f32.mrb[23].mxu1  ;;  %v2741_v6 = vadd.f32 %v2549_v19, %v1069_v41 }
 0x13d   :  { %v1749_v44 = vpop.eup %1748  ;;  %v1384_v59 = vsel %vm1153_vm1, %v1305_v16, 0.0  ;;  %v1187_v37 = vsel %vm1153_vm1, %v966_v24, 0.0  ;;  %v1306_v46 = vmul.f32 %v966_v24, %v966_v24  ;;  %1760 = vtanh.f32 %v966_v24 }
 0x13e   :  { %v1751_v47 = vpop.eup %1750  ;;  %1565 = vst.msk [vmem:[%s3213_s5 + $0x70] sm:$0xff] %vm1153_vm1, %v1749_v44  ;;  %v1385_v48 = vadd.f32 %v1384_v59, %v1383_v23  ;;  %v1188_v0 = vadd.f32 %v1187_v37, %v1186_v14  ;;  %1762 = vtanh.f32 %v2741_v6 }
 0x13f   :  { %v1753_v49 = vpop.eup %1752  ;;  %v1386_v51 = vsel %vm1153_vm1, %v1306_v46, 0.0  ;;  %1591 = vst.msk [vmem:[%s3213_s5 + $0x140] sm:$0xff] %vm1153_vm1, %v1751_v47 }
 0x140   :  { %1566 = vst.msk [vmem:[%s3213_s5 + $0x78] sm:$0xff] %vm1153_vm1, %v1753_v49  ;;  %v1387_v1 = vadd.f32 %v1386_v51, %v1385_v48  ;;  %v970_v38 = vpop.f32.mrb[36].mxu0  ;;  %v1755_v53 = vpop.eup %1754 }
 0x141   :  { %v971_v52 = vadd.f32 %v2549_v19, %v970_v38  ;;  %v972_v57 = vpop.f32.mrb[37].mxu0  ;;  %1592 = vst.msk [vmem:[%s3213_s5 + $0x148] sm:$0xff] %vm1153_vm1, %v1755_v53 }
 0x142   :  { %v973_v45 = vpop.f32.mrb[38].mxu0  ;;  %v1074_v2 = vpop.f32.mrb[24].mxu1 }
 0x143   :  { %v1189_v50 = vsel %vm1153_vm1, %v971_v52, 0.0  ;;  %v1307_v3 = vmul.f32 %v971_v52, %v971_v52  ;;  %1764 = vtanh.f32 %v971_v52  ;;  %v974_v8 = vadd.f32 %v2549_v19, %v973_v45  ;;  %v975_v55 = vpop.f32.mrb[39].mxu0  ;;  %v1076_v33 = vpop.f32.mrb[25].mxu1 }
 0x144   :  { %v1190_v15 = vadd.f32 %v1189_v50, %v1188_v0  ;;  %v2761_v58 = vadd.f32 %v2549_v19, %v1074_v2  ;;  %v1077_v61 = vpop.f32.mrb[26].mxu1 }
 0x145   :  { %v1757_v62 = vpop.eup %1756  ;;  %v1388_v25 = vsel %vm1153_vm1, %v1307_v3, 0.0  ;;  %v1191_v11 = vsel %vm1153_vm1, %v974_v8, 0.0  ;;  %v1308_v30 = vmul.f32 %v974_v8, %v974_v8  ;;  %1766 = vtanh.f32 %v974_v8  ;;  %v1079_v63 = vpop.f32.mrb[27].mxu1 }
 0x146   :  { %v1759_v5 = vpop.eup %1758  ;;  %1567 = vst.msk [vmem:[%s3213_s5 + $0x80] sm:$0xff] %vm1153_vm1, %v1757_v62  ;;  %v1389_v7 = vadd.f32 %v1388_v25, %v1387_v1  ;;  %v1192_v9 = vadd.f32 %v1191_v11, %v1190_v15  ;;  %1768 = vtanh.f32 %v2761_v58  ;;  %v2776_v12 = vadd.f32 %v2549_v19, %v1077_v61 }
 0x147   :  { %v1761_v10 = vpop.eup %1760  ;;  %v1390_v22 = vsel %vm1153_vm1, %v1308_v30, 0.0  ;;  %1593 = vst.msk [vmem:[%s3213_s5 + $0x150] sm:$0xff] %vm1153_vm1, %v1759_v5 }
 0x148   :  { %1568 = vst.msk [vmem:[%s3213_s5 + $0x88] sm:$0xff] %vm1153_vm1, %v1761_v10  ;;  %v1391_v13 = vadd.f32 %v1390_v22, %v1389_v7  ;;  %v978_v17 = vpop.f32.mrb[40].mxu0  ;;  %1770 = vtanh.f32 %v2776_v12  ;;  %v1763_v21 = vpop.eup %1762 }
 0x149   :  { %v979_v23 = vadd.f32 %v2549_v19, %v978_v17  ;;  %v980_v54 = vpop.f32.mrb[41].mxu0  ;;  %1594 = vst.msk [vmem:[%s3213_s5 + $0x158] sm:$0xff] %vm1153_vm1, %v1763_v21 }
 0x14a   :  { %v981_v26 = vpop.f32.mrb[42].mxu0 }
 0x14b   :  { %v1193_v27 = vsel %vm1153_vm1, %v979_v23, 0.0  ;;  %v1309_v28 = vmul.f32 %v979_v23, %v979_v23  ;;  %1772 = vtanh.f32 %v979_v23  ;;  %v982_v36 = vadd.f32 %v2549_v19, %v981_v26  ;;  %v983_v34 = vpop.f32.mrb[43].mxu0  ;;  %v1082_v16 = vpop.f32.mrb[28].mxu1 }
 0x14c   :  { %v1194_v24 = vadd.f32 %v1193_v27, %v1192_v9  ;;  %v2791_v39 = vadd.f32 %v2549_v19, %v1082_v16  ;;  %v1084_v41 = vpop.f32.mrb[29].mxu1 }
 0x14d   :  { %v1765_v14 = vpop.eup %1764  ;;  %v1392_v35 = vsel %vm1153_vm1, %v1309_v28, 0.0  ;;  %v1195_v44 = vsel %vm1153_vm1, %v982_v36, 0.0  ;;  %v1310_v59 = vmul.f32 %v982_v36, %v982_v36  ;;  %1774 = vtanh.f32 %v982_v36  ;;  %v1085_v37 = vpop.f32.mrb[30].mxu1 }
 0x14e   :  { %1569 = vst.msk [vmem:[%s3213_s5 + $0x90] sm:$0xff] %vm1153_vm1, %v1765_v14  ;;  %v1393_v46 = vadd.f32 %v1392_v35, %v1391_v13  ;;  %v1196_v47 = vadd.f32 %v1195_v44, %v1194_v24  ;;  %v1087_v48 = vpop.f32.mrb[31].mxu1  ;;  %1776 = vtanh.f32 %v2791_v39  ;;  %v2802_v51 = vadd.f32 %v2549_v19, %v1085_v37 }
 0x14f   :  { %v1767_v0 = vpop.eup %1766  ;;  %v1394_v49 = vsel %vm1153_vm1, %v1310_v59, 0.0 }
 0x150   :  { %1570 = vst.msk [vmem:[%s3213_s5 + $0x98] sm:$0xff] %vm1153_vm1, %v1767_v0  ;;  %v1395_v1 = vadd.f32 %v1394_v49, %v1393_v46  ;;  %v986_v38 = vpop.f32.mrb[44].mxu0  ;;  %v1769_v52 = vpop.eup %1768  ;;  %1778 = vtanh.f32 %v2802_v51 }
 0x151   :  { %v987_v57 = vadd.f32 %v2549_v19, %v986_v38  ;;  %v988_v53 = vpop.f32.mrb[45].mxu0  ;;  %1595 = vst.msk [vmem:[%s3213_s5 + $0x160] sm:$0xff] %vm1153_vm1, %v1769_v52 }
 0x152   :  { %v989_v45 = vpop.f32.mrb[46].mxu0  ;;  %v1771_v2 = vpop.eup %1770 }
 0x153   :  { %v1197_v50 = vsel %vm1153_vm1, %v987_v57, 0.0  ;;  %v1311_v3 = vmul.f32 %v987_v57, %v987_v57  ;;  %1780 = vtanh.f32 %v987_v57  ;;  %v990_v8 = vadd.f32 %v2549_v19, %v989_v45  ;;  %v991_v55 = vpop.f32.mrb[47].mxu0  ;;  %1596 = vst.msk [vmem:[%s3213_s5 + $0x168] sm:$0xff] %vm1153_vm1, %v1771_v2 }
 0x154   :  { %v1198_v33 = vadd.f32 %v1197_v50, %v1196_v47  ;;  %v1090_v15 = vpop.f32.mrb[32].mxu1 }
 0x155   :  { %v1773_v61 = vpop.eup %1772  ;;  %v1396_v62 = vsel %vm1153_vm1, %v1311_v3, 0.0  ;;  %v1199_v25 = vsel %vm1153_vm1, %v990_v8, 0.0  ;;  %v1312_v11 = vmul.f32 %v990_v8, %v990_v8  ;;  %1782 = vtanh.f32 %v990_v8  ;;  %v1092_v30 = vpop.f32.mrb[33].mxu1 }
 0x156   :  { %1571 = vst.msk [vmem:[%s3213_s5 + $0xa0] sm:$0xff] %vm1153_vm1, %v1773_v61  ;;  %v1397_v63 = vadd.f32 %v1396_v62, %v1395_v1  ;;  %v1200_v5 = vadd.f32 %v1199_v25, %v1198_v33  ;;  %v2827_v7 = vadd.f32 %v2549_v19, %v1090_v15  ;;  %v1093_v9 = vpop.f32.mrb[34].mxu1 }
 0x157   :  { %v1775_v10 = vpop.eup %1774  ;;  %v1398_v22 = vsel %vm1153_vm1, %v1312_v11, 0.0  ;;  %v2831_v13 = vadd.f32 %v2549_v19, %v1093_v9  ;;  %v1095_v17 = vpop.f32.mrb[35].mxu1 }
 0x158   :  { %1572 = vst.msk [vmem:[%s3213_s5 + $0xa8] sm:$0xff] %vm1153_vm1, %v1775_v10  ;;  %v1399_v23 = vadd.f32 %v1398_v22, %v1397_v63  ;;  %v994_v54 = vpop.f32.mrb[48].mxu0  ;;  %1784 = vtanh.f32 %v2827_v7  ;;  %v1777_v21 = vpop.eup %1776 }
 0x159   :  { %v995_v26 = vadd.f32 %v2549_v19, %v994_v54  ;;  %v996_v27 = vpop.f32.mrb[49].mxu0  ;;  %1786 = vtanh.f32 %v2831_v13  ;;  %1597 = vst.msk [vmem:[%s3213_s5 + $0x170] sm:$0xff] %vm1153_vm1, %v1777_v21 }
 0x15a   :  { %v997_v28 = vpop.f32.mrb[50].mxu0  ;;  %v1779_v36 = vpop.eup %1778 }
 0x15b   :  { %v1201_v34 = vsel %vm1153_vm1, %v995_v26, 0.0  ;;  %v1313_v16 = vmul.f32 %v995_v26, %v995_v26  ;;  %1788 = vtanh.f32 %v995_v26  ;;  %v998_v24 = vadd.f32 %v2549_v19, %v997_v28  ;;  %v999_v41 = vpop.f32.mrb[51].mxu0  ;;  %1598 = vst.msk [vmem:[%s3213_s5 + $0x178] sm:$0xff] %vm1153_vm1, %v1779_v36 }
 0x15c   :  { %v1202_v14 = vadd.f32 %v1201_v34, %v1200_v5  ;;  %v1098_v35 = vpop.f32.mrb[36].mxu1 }
 0x15d   :  { %v1781_v44 = vpop.eup %1780  ;;  %v1400_v59 = vsel %vm1153_vm1, %v1313_v16, 0.0  ;;  %v1203_v37 = vsel %vm1153_vm1, %v998_v24, 0.0  ;;  %v1314_v46 = vmul.f32 %v998_v24, %v998_v24  ;;  %1790 = vtanh.f32 %v998_v24  ;;  %v1100_v47 = vpop.f32.mrb[37].mxu1 }
 0x15e   :  { %1573 = vst.msk [vmem:[%s3213_s5 + $0xb0] sm:$0xff] %vm1153_vm1, %v1781_v44  ;;  %v1401_v48 = vadd.f32 %v1400_v59, %v1399_v23  ;;  %v1204_v0 = vadd.f32 %v1203_v37, %v1202_v14  ;;  %v2857_v49 = vadd.f32 %v2549_v19, %v1098_v35  ;;  %v1101_v1 = vpop.f32.mrb[38].mxu1 }
 0x15f   :  { %v1783_v38 = vpop.eup %1782  ;;  %v1402_v52 = vsel %vm1153_vm1, %v1314_v46, 0.0  ;;  %v2861_v57 = vadd.f32 %v2549_v19, %v1101_v1  ;;  %v1103_v53 = vpop.f32.mrb[39].mxu1 }
 0x160   :  { %1574 = vst.msk [vmem:[%s3213_s5 + $0xb8] sm:$0xff] %vm1153_vm1, %v1783_v38  ;;  %v1403_v45 = vadd.f32 %v1402_v52, %v1401_v48  ;;  %v1002_v2 = vpop.f32.mrb[52].mxu0  ;;  %1792 = vtanh.f32 %v2857_v49 }
 0x161   :  { %v1003_v50 = vadd.f32 %v2549_v19, %v1002_v2  ;;  %v1004_v3 = vpop.f32.mrb[53].mxu0  ;;  %1794 = vtanh.f32 %v2861_v57 }
 0x162   :  { %v1785_v8 = vpop.eup %1784  ;;  %v1005_v55 = vpop.f32.mrb[54].mxu0 }
 0x163   :  { %v1787_v33 = vpop.eup %1786  ;;  %v1205_v15 = vsel %vm1153_vm1, %v1003_v50, 0.0  ;;  %v1315_v61 = vmul.f32 %v1003_v50, %v1003_v50  ;;  %1796 = vtanh.f32 %v1003_v50  ;;  %v1006_v62 = vadd.f32 %v2549_v19, %v1005_v55  ;;  %v1007_v25 = vpop.f32.mrb[55].mxu0  ;;  %1599 = vst.msk [vmem:[%s3213_s5 + $0x180] sm:$0xff] %vm1153_vm1, %v1785_v8 }
 0x164   :  { %v1206_v11 = vadd.f32 %v1205_v15, %v1204_v0  ;;  %1600 = vst.msk [vmem:[%s3213_s5 + $0x188] sm:$0xff] %vm1153_vm1, %v1787_v33  ;;  %v1106_v30 = vpop.f32.mrb[40].mxu1 }
 0x165   :  { %v1789_v63 = vpop.eup %1788  ;;  %v1404_v5 = vsel %vm1153_vm1, %v1315_v61, 0.0  ;;  %v1207_v9 = vsel %vm1153_vm1, %v1006_v62, 0.0  ;;  %v1316_v10 = vmul.f32 %v1006_v62, %v1006_v62  ;;  %1798 = vtanh.f32 %v1006_v62  ;;  %v1108_v22 = vpop.f32.mrb[41].mxu1 }
 0x166   :  { %1575 = vst.msk [vmem:[%s3213_s5 + $0xc0] sm:$0xff] %vm1153_vm1, %v1789_v63  ;;  %v1405_v17 = vadd.f32 %v1404_v5, %v1403_v45  ;;  %v1208_v23 = vadd.f32 %v1207_v9, %v1206_v11  ;;  %v2887_v54 = vadd.f32 %v2549_v19, %v1106_v30  ;;  %v1109_v21 = vpop.f32.mrb[42].mxu1 }
 0x167   :  { %v1791_v26 = vpop.eup %1790  ;;  %v1406_v27 = vsel %vm1153_vm1, %v1316_v10, 0.0  ;;  %v2891_v28 = vadd.f32 %v2549_v19, %v1109_v21  ;;  %v1111_v36 = vpop.f32.mrb[43].mxu1  ;;  %v1321_v21 = vmul.f32 %v2581_v42, %v2581_v42 }
 0x168   :  { %1576 = vst.msk [vmem:[%s3213_s5 + $0xc8] sm:$0xff] %vm1153_vm1, %v1791_v26  ;;  %v1407_v34 = vadd.f32 %v1406_v27, %v1405_v17  ;;  %v1010_v16 = vpop.f32.mrb[56].mxu0  ;;  %1800 = vtanh.f32 %v2887_v54 }
 0x169   :  { %v1011_v24 = vadd.f32 %v2549_v19, %v1010_v16  ;;  %v1012_v41 = vpop.f32.mrb[57].mxu0  ;;  %1802 = vtanh.f32 %v2891_v28 }
 0x16a   :  { %v1793_v14 = vpop.eup %1792  ;;  %v1013_v35 = vpop.f32.mrb[58].mxu0 }
 0x16b   :  { %v1795_v44 = vpop.eup %1794  ;;  %v1209_v59 = vsel %vm1153_vm1, %v1011_v24, 0.0  ;;  %v1317_v37 = vmul.f32 %v1011_v24, %v1011_v24  ;;  %1804 = vtanh.f32 %v1011_v24  ;;  %v1014_v46 = vadd.f32 %v2549_v19, %v1013_v35  ;;  %v1015_v47 = vpop.f32.mrb[59].mxu0  ;;  %1601 = vst.msk [vmem:[%s3213_s5 + $0x190] sm:$0xff] %vm1153_vm1, %v1793_v14 }
 0x16c   :  { %v1210_v48 = vadd.f32 %v1209_v59, %v1208_v23  ;;  %1602 = vst.msk [vmem:[%s3213_s5 + $0x198] sm:$0xff] %vm1153_vm1, %v1795_v44  ;;  %v1114_v0 = vpop.f32.mrb[44].mxu1  ;;  %v1322_v47 = vmul.f32 %v2591_v18, %v2591_v18 }
 0x16d   :  { %v1797_v1 = vpop.eup %1796  ;;  %v1408_v38 = vsel %vm1153_vm1, %v1317_v37, 0.0  ;;  %v1211_v52 = vsel %vm1153_vm1, %v1014_v46, 0.0  ;;  %v1318_v53 = vmul.f32 %v1014_v46, %v1014_v46  ;;  %1806 = vtanh.f32 %v1014_v46  ;;  %v1116_v45 = vpop.f32.mrb[45].mxu1 }
 0x16e   :  { %1577 = vst.msk [vmem:[%s3213_s5 + $0xd0] sm:$0xff] %vm1153_vm1, %v1797_v1  ;;  %v1409_v2 = vadd.f32 %v1408_v38, %v1407_v34  ;;  %v1212_v50 = vadd.f32 %v1211_v52, %v1210_v48  ;;  %v2917_v3 = vadd.f32 %v2549_v19, %v1114_v0  ;;  %v1117_v8 = vpop.f32.mrb[46].mxu1  ;;  %v1217_v46 = vsel %vm1153_vm1, %v2581_v42, 0.0 }
 0x16f   :  { %v1799_v55 = vpop.eup %1798  ;;  %v1410_v33 = vsel %vm1153_vm1, %v1318_v53, 0.0  ;;  %v2921_v15 = vadd.f32 %v2549_v19, %v1117_v8  ;;  %v1119_v61 = vpop.f32.mrb[47].mxu1  ;;  %v1416_v53 = vsel %vm1153_vm1, %v1321_v21, 0.0  ;;  %v1219_v42 = vsel %vm1153_vm1, %v2591_v18, 0.0 }
 0x170   :  { %1578 = vst.msk [vmem:[%s3213_s5 + $0xd8] sm:$0xff] %vm1153_vm1, %v1799_v55  ;;  %v1411_v62 = vadd.f32 %v1410_v33, %v1409_v2  ;;  %v1018_v25 = vpop.f32.mrb[60].mxu0  ;;  %1808 = vtanh.f32 %v2917_v3  ;;  %v1323_v45 = vmul.f32 %v2603_v40, %v2603_v40  ;;  %v1324_v2 = vmul.f32 %v2613_v31, %v2613_v31 }
 0x171   :  { %v1019_v11 = vadd.f32 %v2549_v19, %v1018_v25  ;;  %v1020_v30 = vpop.f32.mrb[61].mxu0  ;;  %1810 = vtanh.f32 %v2921_v15  ;;  %v1418_v33 = vsel %vm1153_vm1, %v1322_v47, 0.0  ;;  %v1221_v61 = vsel %vm1153_vm1, %v2603_v40, 0.0 }
 0x172   :  { %v1801_v63 = vpop.eup %1800  ;;  %v1021_v5 = vpop.f32.mrb[62].mxu0  ;;  %v1420_v30 = vsel %vm1153_vm1, %v1323_v45, 0.0  ;;  %v1325_v40 = vmul.f32 %v2634_v56, %v2634_v56  ;;  %v1329_v45 = vmul.f32 %v2699_v60, %v2699_v60 }
 0x173   :  { %v1803_v9 = vpop.eup %1802  ;;  %v1213_v10 = vsel %vm1153_vm1, %v1019_v11, 0.0  ;;  %v1319_v22 = vmul.f32 %v1019_v11, %v1019_v11  ;;  %1812 = vtanh.f32 %v1019_v11  ;;  %v1022_v17 = vadd.f32 %v2549_v19, %v1021_v5  ;;  %v1023_v23 = vpop.f32.mrb[63].mxu0  ;;  %1603 = vst.msk [vmem:[%s3213_s5 + $0x1a0] sm:$0xff] %vm1153_vm1, %v1801_v63  ;;  %v2991_v5 = vld [vmem:[%s3212_s4] ss:$0 sm:$0xff] }
 0x174   :  { %v1214_v26 = vadd.f32 %v1213_v10, %v1212_v50  ;;  %1604 = vst.msk [vmem:[%s3213_s5 + $0x1a8] sm:$0xff] %vm1153_vm1, %v1803_v9  ;;  %v1122_v27 = vpop.f32.mrb[48].mxu1  ;;  %v1223_v63 = vsel %vm1153_vm1, %v2613_v31, 0.0 }
 0x175   :  { %v1805_v36 = vpop.eup %1804  ;;  %v1412_v34 = vsel %vm1153_vm1, %v1319_v22, 0.0  ;;  %v1215_v16 = vsel %vm1153_vm1, %v1022_v17, 0.0  ;;  %v1320_v24 = vmul.f32 %v1022_v17, %v1022_v17  ;;  %1814 = vtanh.f32 %v1022_v17  ;;  %v1124_v41 = vpop.f32.mrb[49].mxu1 }
 0x176   :  { %1579 = vst.msk [vmem:[%s3213_s5 + $0xe0] sm:$0xff] %vm1153_vm1, %v1805_v36  ;;  %v1413_v14 = vadd.f32 %v1412_v34, %v1411_v62  ;;  %v1216_v35 = vadd.f32 %v1215_v16, %v1214_v26  ;;  %v2949_v44 = vadd.f32 %v2549_v19, %v1122_v27  ;;  %v1125_v59 = vpop.f32.mrb[50].mxu1  ;;  %v1422_v22 = vsel %vm1153_vm1, %v1324_v2, 0.0 }
 0x177   :  { %v1807_v37 = vpop.eup %1806  ;;  %v1414_v48 = vsel %vm1153_vm1, %v1320_v24, 0.0  ;;  %v2957_v0 = vadd.f32 %v2549_v19, %v1125_v59  ;;  %v1127_v1 = vpop.f32.mrb[51].mxu1  ;;  %v1225_v26 = vsel %vm1153_vm1, %v2634_v56, 0.0  ;;  %v1326_v27 = vmul.f32 %v2643_v4, %v2643_v4 }
 0x178   :  { %1580 = vst.msk [vmem:[%s3213_s5 + $0xe8] sm:$0xff] %vm1153_vm1, %v1807_v37  ;;  %v1218_v38 = vadd.f32 %v1217_v46, %v1216_v35  ;;  %v1415_v52 = vadd.f32 %v1414_v48, %v1413_v14  ;;  %1816 = vtanh.f32 %v2949_v44  ;;  %v1424_v41 = vsel %vm1153_vm1, %v1325_v40, 0.0 }
 0x179   :  { %1818 = vtanh.f32 %v2957_v0  ;;  %v1227_v56 = vsel %vm1153_vm1, %v2643_v4, 0.0  ;;  %v1327_v14 = vmul.f32 %v2668_v29, %v2668_v29  ;;  %v1328_v35 = vmul.f32 %v2673_v43, %v2673_v43 }
 0x17a   :  { %v1809_v19 = vpop.eup %1808  ;;  %v1220_v50 = vadd.f32 %v1219_v42, %v1218_v38  ;;  %v1417_v8 = vadd.f32 %v1416_v53, %v1415_v52  ;;  %v1426_v47 = vsel %vm1153_vm1, %v1326_v27, 0.0  ;;  %v1229_v48 = vsel %vm1153_vm1, %v2668_v29, 0.0 }
 0x17b   :  { %v1811_v55 = vpop.eup %1810  ;;  %1605 = vst.msk [vmem:[%s3213_s5 + $0x1b0] sm:$0xff] %vm1153_vm1, %v1809_v19  ;;  %v1428_v53 = vsel %vm1153_vm1, %v1327_v14, 0.0  ;;  %v1231_v42 = vsel %vm1153_vm1, %v2673_v43, 0.0  ;;  %v1430_v2 = vsel %vm1153_vm1, %v1328_v35, 0.0  ;;  %v1233_v43 = vsel %vm1153_vm1, %v2699_v60, 0.0 }
 0x17c   :  { %v1222_v18 = vadd.f32 %v1221_v61, %v1220_v50  ;;  %v1419_v62 = vadd.f32 %v1418_v33, %v1417_v8  ;;  %1606 = vst.msk [vmem:[%s3213_s5 + $0x1b8] sm:$0xff] %vm1153_vm1, %v1811_v55  ;;  %v1130_v25 = vpop.f32.mrb[52].mxu1  ;;  %v1330_v33 = vmul.f32 %v2715_v20, %v2715_v20  ;;  %v1331_v60 = vmul.f32 %v2729_v32, %v2729_v32 }
 0x17d   :  { %v1813_v11 = vpop.eup %1812  ;;  %v2994_v9 = vadd.f32 %v2991_v5, %v1130_v25  ;;  %v1132_v10 = vpop.f32.mrb[53].mxu1  ;;  %v1332_v40 = vmul.f32 %v2741_v6, %v2741_v6 }
 0x17e   :  { %1581 = vst.msk [vmem:[%s3213_s5 + $0xf0] sm:$0xff] %vm1153_vm1, %v1813_v11  ;;  %v1224_v31 = vadd.f32 %v1223_v63, %v1222_v18  ;;  %v1421_v17 = vadd.f32 %v1420_v30, %v1419_v62  ;;  %v1133_v23 = vpop.f32.mrb[54].mxu1  ;;  %v1432_v30 = vsel %vm1153_vm1, %v1329_v45, 0.0  ;;  %v1235_v63 = vsel %vm1153_vm1, %v2715_v20, 0.0 }
 0x17f   :  { %v1815_v21 = vpop.eup %1814  ;;  %1820 = vtanh.f32 %v2994_v9  ;;  %v3007_v36 = vadd.f32 %v2991_v5, %v1133_v23  ;;  %v1135_v34 = vpop.f32.mrb[55].mxu1  ;;  %v1237_v20 = vsel %vm1153_vm1, %v2729_v32, 0.0  ;;  %v1436_v27 = vsel %vm1153_vm1, %v1331_v60, 0.0 }
 0x180   :  { %v1226_v16 = vadd.f32 %v1225_v26, %v1224_v31  ;;  %v1423_v24 = vadd.f32 %v1422_v22, %v1421_v17  ;;  %1582 = vst.msk [vmem:[%s3213_s5 + $0xf8] sm:$0xff] %vm1153_vm1, %v1815_v21  ;;  %v1434_v17 = vsel %vm1153_vm1, %v1330_v33, 0.0  ;;  %v1239_v34 = vsel %vm1153_vm1, %v2741_v6, 0.0 }
 0x181   :  { %1822 = vtanh.f32 %v3007_v36  ;;  %v1245_v45 = vsel %vm1153_vm1, %v2791_v39, 0.0  ;;  %v1339_v60 = vmul.f32 %v2857_v49, %v2857_v49 }
 0x182   :  { %v1228_v59 = vadd.f32 %v1227_v56, %v1226_v16  ;;  %v1425_v37 = vadd.f32 %v1424_v41, %v1423_v24  ;;  %v1817_v46 = vpop.eup %1816  ;;  %v1333_v16 = vmul.f32 %v2761_v58, %v2761_v58  ;;  %v1438_v41 = vsel %vm1153_vm1, %v1332_v40, 0.0 }
 0x183   :  { %v1819_v1 = vpop.eup %1818  ;;  %1607 = vst.msk [vmem:[%s3213_s5 + $0x1c0] sm:$0xff] %vm1153_vm1, %v1817_v46 }
 0x184   :  { %v1230_v38 = vadd.f32 %v1229_v48, %v1228_v59  ;;  %v1427_v52 = vadd.f32 %v1426_v47, %v1425_v37  ;;  %v1138_v4 = vpop.f32.mrb[56].mxu1  ;;  %1608 = vst.msk [vmem:[%s3213_s5 + $0x1c8] sm:$0xff] %vm1153_vm1, %v1819_v1  ;;  %v1241_v59 = vsel %vm1153_vm1, %v2761_v58, 0.0  ;;  %v1334_v37 = vmul.f32 %v2776_v12, %v2776_v12 }
 0x185   :  { %v3038_v29 = vadd.f32 %v2991_v5, %v1138_v4  ;;  %v1140_v19 = vpop.f32.mrb[57].mxu1  ;;  %v1335_v58 = vmul.f32 %v2791_v39, %v2791_v39 }
 0x186   :  { %v1232_v50 = vadd.f32 %v1231_v42, %v1230_v38  ;;  %v1429_v8 = vadd.f32 %v1428_v53, %v1427_v52  ;;  %v1141_v55 = vpop.f32.mrb[58].mxu1  ;;  %v1440_v38 = vsel %vm1153_vm1, %v1333_v16, 0.0  ;;  %v1243_v52 = vsel %vm1153_vm1, %v2776_v12, 0.0 }
 0x187   :  { %1824 = vtanh.f32 %v3038_v29  ;;  %v3047_v61 = vadd.f32 %v2991_v5, %v1141_v55  ;;  %v1143_v18 = vpop.f32.mrb[59].mxu1  ;;  %v1442_v42 = vsel %vm1153_vm1, %v1334_v37, 0.0  ;;  %v1336_v12 = vmul.f32 %v2802_v51, %v2802_v51 }
 0x188   :  { %v1431_v62 = vadd.f32 %v1430_v2, %v1429_v8  ;;  %v1234_v25 = vadd.f32 %v1233_v43, %v1232_v50  ;;  %v1444_v50 = vsel %vm1153_vm1, %v1335_v58, 0.0  ;;  %v1247_v8 = vsel %vm1153_vm1, %v2802_v51, 0.0 }
 0x189   :  { %v1821_v11 = vpop.eup %1820  ;;  %1826 = vtanh.f32 %v3047_v61  ;;  %v1337_v55 = vmul.f32 %v2827_v7, %v2827_v7  ;;  %v1446_v33 = vsel %vm1153_vm1, %v1336_v12, 0.0  ;;  %v1249_v18 = vsel %vm1153_vm1, %v2827_v7, 0.0 }
 0x18a   :  { %v1236_v10 = vadd.f32 %v1235_v63, %v1234_v25  ;;  %v1433_v22 = vadd.f32 %v1432_v30, %v1431_v62  ;;  %1609 = vst.msk [vmem:[%s3213_s5 + $0x1d0] sm:$0xff] %vm1153_vm1, %v1821_v11  ;;  %v1338_v62 = vmul.f32 %v2831_v13, %v2831_v13  ;;  %v1251_v51 = vsel %vm1153_vm1, %v2831_v13, 0.0 }
 0x18b   :  { %v1823_v31 = vpop.eup %1822  ;;  %v1448_v63 = vsel %vm1153_vm1, %v1337_v55, 0.0  ;;  %v1257_v16 = vsel %vm1153_vm1, %v2887_v54, 0.0  ;;  %v1348_v55 = vmul.f32 %v3007_v36, %v3007_v36 }
 0x18c   :  { %v1238_v23 = vadd.f32 %v1237_v20, %v1236_v10  ;;  %v1435_v21 = vadd.f32 %v1434_v17, %v1433_v22  ;;  %1610 = vst.msk [vmem:[%s3213_s5 + $0x1d8] sm:$0xff] %vm1153_vm1, %v1823_v31  ;;  %v1146_v26 = vpop.f32.mrb[60].mxu1  ;;  %v1450_v22 = vsel %vm1153_vm1, %v1338_v62, 0.0  ;;  %v1253_v31 = vsel %vm1153_vm1, %v2857_v49, 0.0 }
 0x18d   :  { %v3074_v24 = vadd.f32 %v2991_v5, %v1146_v26  ;;  %v1148_v32 = vpop.f32.mrb[61].mxu1  ;;  %v1340_v17 = vmul.f32 %v2861_v57, %v2861_v57  ;;  %v1341_v26 = vmul.f32 %v2887_v54, %v2887_v54  ;;  %v1261_v54 = vsel %vm1153_vm1, %v2917_v3, 0.0 }
 0x18e   :  { %v1240_v56 = vadd.f32 %v1239_v34, %v1238_v23  ;;  %v1437_v14 = vadd.f32 %v1436_v27, %v1435_v21  ;;  %v1149_v35 = vpop.f32.mrb[62].mxu1  ;;  %v1452_v23 = vsel %vm1153_vm1, %v1339_v60, 0.0  ;;  %v1255_v21 = vsel %vm1153_vm1, %v2861_v57, 0.0 }
 0x18f   :  { %1828 = vtanh.f32 %v3074_v24  ;;  %v3083_v6 = vadd.f32 %v2991_v5, %v1149_v35  ;;  %v1151_v46 = vpop.f32.mrb[63].mxu1  ;;  %v1454_v34 = vsel %vm1153_vm1, %v1340_v17, 0.0  ;;  %v1342_v32 = vmul.f32 %v2891_v28, %v2891_v28 }
 0x190   :  { %v1242_v47 = vadd.f32 %v1241_v59, %v1240_v56  ;;  %v1439_v48 = vadd.f32 %v1438_v41, %v1437_v14  ;;  %v1456_v14 = vsel %vm1153_vm1, %v1341_v26, 0.0  ;;  %v1259_v57 = vsel %vm1153_vm1, %v2891_v28, 0.0 }
 0x191   :  { %v1825_v1 = vpop.eup %1824  ;;  %1830 = vtanh.f32 %v3083_v6  ;;  %v1343_v35 = vmul.f32 %v2917_v3, %v2917_v3  ;;  %v1458_v46 = vsel %vm1153_vm1, %v1342_v32, 0.0  ;;  %v1263_v28 = vsel %vm1153_vm1, %v2921_v15, 0.0 }
 0x192   :  { %v1244_v4 = vadd.f32 %v1243_v52, %v1242_v47  ;;  %v1441_v53 = vadd.f32 %v1440_v38, %v1439_v48  ;;  %1611 = vst.msk [vmem:[%s3213_s5 + $0x1e0] sm:$0xff] %vm1153_vm1, %v1825_v1  ;;  %v1344_v47 = vmul.f32 %v2921_v15, %v2921_v15  ;;  %v1345_v52 = vmul.f32 %v2949_v44, %v2949_v44 }
 0x193   :  { %v1827_v5 = vpop.eup %1826  ;;  %v1460_v38 = vsel %vm1153_vm1, %v1343_v35, 0.0  ;;  %v1265_v3 = vsel %vm1153_vm1, %v2949_v44, 0.0  ;;  %v1267_v15 = vsel %vm1153_vm1, %v2957_v0, 0.0  ;;  %v1269_v44 = vsel %vm1153_vm1, %v2994_v9, 0.0 }
 0x194   :  { %v1246_v19 = vadd.f32 %v1245_v45, %v1244_v4  ;;  %v1443_v2 = vadd.f32 %v1442_v42, %v1441_v53  ;;  %1612 = vst.msk [vmem:[%s3213_s5 + $0x1e8] sm:$0xff] %vm1153_vm1, %v1827_v5  ;;  %v1462_v53 = vsel %vm1153_vm1, %v1344_v47, 0.0  ;;  %v1346_v5 = vmul.f32 %v2957_v0, %v2957_v0 }
 0x195   :  { %v1464_v12 = vsel %vm1153_vm1, %v1345_v52, 0.0  ;;  %v1271_v0 = vsel %vm1153_vm1, %v3007_v36, 0.0  ;;  %v1352_v17 = vmul.f32 %v3083_v6, %v3083_v6 }
 0x196   :  { %v1248_v43 = vadd.f32 %v1247_v8, %v1246_v19  ;;  %v1445_v39 = vadd.f32 %v1444_v50, %v1443_v2  ;;  %v1347_v19 = vmul.f32 %v2994_v9, %v2994_v9  ;;  %v1466_v8 = vsel %vm1153_vm1, %v1346_v5, 0.0 }
 0x197   :  { %v1273_v9 = vsel %vm1153_vm1, %v3038_v29, 0.0 }
 0x198   :  { %v1250_v25 = vadd.f32 %v1249_v18, %v1248_v43  ;;  %v1447_v11 = vadd.f32 %v1446_v33, %v1445_v39  ;;  %v1468_v33 = vsel %vm1153_vm1, %v1347_v19, 0.0  ;;  %v1349_v18 = vmul.f32 %v3038_v29, %v3038_v29 }
 0x199   :  { %v1829_v30 = vpop.eup %1828 }
 0x19a   :  { %v1449_v40 = vadd.f32 %v1448_v63, %v1447_v11  ;;  %v1252_v10 = vadd.f32 %v1251_v51, %v1250_v25  ;;  %1613 = vst.msk [vmem:[%s3213_s5 + $0x1f0] sm:$0xff] %vm1153_vm1, %v1829_v30  ;;  %v1470_v11 = vsel %vm1153_vm1, %v1348_v55, 0.0  ;;  %v1350_v30 = vmul.f32 %v3047_v61, %v3047_v61 }
 0x19b   :  { %v1831_v7 = vpop.eup %1830  ;;  %v1351_v63 = vmul.f32 %v3074_v24, %v3074_v24  ;;  %v1472_v36 = vsel %vm1153_vm1, %v1349_v18, 0.0 }
 0x19c   :  { %v1451_v13 = vadd.f32 %v1450_v22, %v1449_v40  ;;  %v1254_v20 = vadd.f32 %v1253_v31, %v1252_v10  ;;  %1614 = vst.msk [vmem:[%s3213_s5 + $0x1f8] sm:$0xff] %vm1153_vm1, %v1831_v7  ;;  %v1275_v40 = vsel %vm1153_vm1, %v3047_v61, 0.0  ;;  %v1277_v10 = vsel %vm1153_vm1, %v3074_v24, 0.0  ;;  %s1858_s5 = smov [#allocation2]  }
 0x19d   :  { %v1474_v29 = vsel %vm1153_vm1, %v1350_v30, 0.0  ;;  %v1476_v31 = vsel %vm1153_vm1, %v1351_v63, 0.0  ;;  %v1478_v61 = vsel %vm1153_vm1, %v1352_v17, 0.0  ;;  %s1623_s28 = sshll.u32 %s1858_s5, 4  ;;  %s1624_s28 = int_to_ptr.vmem [resolvable:$true] %s1623_s28 }
 0x19e   :  { %v1453_v27 = vadd.f32 %v1452_v23, %v1451_v13  ;;  %v1256_v49 = vadd.f32 %v1255_v21, %v1254_v20  ;;  %v1279_v23 = vsel %vm1153_vm1, %v3083_v6, 0.0  ;;  %s1833_s29 = scalar_lea.vmem %s1624_s28, 32  ;;  %p1838_p1 = scmp.lt.s32.totalorder %s1624_s28, %s1624_s28 }
 0x19f   :  { %p1834_p0 = scmp.ne.s32.totalorder %s1624_s28, %s1833_s29  ;;  %p1839_p2 = scmp.lt.s32.totalorder %s1833_s29, %s1833_s29 }
 0x1a0   :  { %v1455_v41 = vadd.f32 %v1454_v34, %v1453_v27  ;;  %v1258_v56 = vadd.f32 %v1257_v16, %v1256_v49 }
 0x1a1   :  { %p1840_p3 = por %p1839_p2, %p1838_p1 }
 0x1a2   :  { %v1457_v59 = vadd.f32 %v1456_v14, %v1455_v41  ;;  %v1260_v37 = vadd.f32 %v1259_v57, %v1258_v56 }
 0x1a3   :  { %p1841_p4 = pnand %p1840_p3, %p1834_p0 }
 0x1a4   :  { %v1459_v48 = vadd.f32 %v1458_v46, %v1457_v59  ;;  %v1262_v1 = vadd.f32 %v1261_v54, %v1260_v37 }
 0x1a6   :  { %v1461_v58 = vadd.f32 %v1460_v38, %v1459_v48  ;;  %v1264_v4 = vadd.f32 %v1263_v28, %v1262_v1 }
 0x1a8   :  { %v1463_v42 = vadd.f32 %v1462_v53, %v1461_v58  ;;  %v1266_v45 = vadd.f32 %v1265_v3, %v1264_v4 }
 0x1aa   :  { %v1465_v2 = vadd.f32 %v1464_v12, %v1463_v42  ;;  %v1268_v50 = vadd.f32 %v1267_v15, %v1266_v45 }
 0x1ac   :  { %v1467_v43 = vadd.f32 %v1466_v8, %v1465_v2  ;;  %v1270_v39 = vadd.f32 %v1269_v44, %v1268_v50 }
 0x1ae   :  { %v1469_v62 = vadd.f32 %v1468_v33, %v1467_v43  ;;  %v1272_v25 = vadd.f32 %v1271_v0, %v1270_v39 }
 0x1b0   :  { %v1471_v51 = vadd.f32 %v1470_v11, %v1469_v62  ;;  %v1274_v60 = vadd.f32 %v1273_v9, %v1272_v25 }
 0x1b2   :  { %v1473_v7 = vadd.f32 %v1472_v36, %v1471_v51  ;;  %v1276_v22 = vadd.f32 %v1275_v40, %v1274_v60 }
 0x1b4   :  { %v1475_v13 = vadd.f32 %v1474_v29, %v1473_v7  ;;  %v1278_v20 = vadd.f32 %v1277_v10, %v1276_v22 }
 0x1b6   :  { %v1477_v21 = vadd.f32 %v1476_v31, %v1475_v13  ;;  %v1280_v26 = vadd.f32 %v1279_v23, %v1278_v20 }
 0x1b8   :  { %v1281_v27 = vrot.slane %v1280_v26, 4  ;;  %v1479_v24 = vadd.f32 %v1478_v61, %v1477_v21 }
 0x1ba   :  { %v1282_v49 = vadd.f32 %v1281_v27, %v1280_v26  ;;  %v1480_v34 = vrot.slane %v1479_v24, 4 }
 0x1bc   :  { %v1283_v16 = vrot.slane %v1282_v49, 2  ;;  %v1481_v32 = vadd.f32 %v1480_v34, %v1479_v24 }
 0x1be   :  { %v1284_v41 = vadd.f32 %v1283_v16, %v1282_v49  ;;  %v1482_v56 = vrot.slane %v1481_v32, 2 }
 0x1c0   :  { %v1285_v14 = vrot.slane %v1284_v41, 1  ;;  %v1483_v57 = vadd.f32 %v1482_v56, %v1481_v32 }
 0x1c2   :  { %v1286_v35 = vadd.f32 %v1285_v14, %v1284_v41  ;;  %v1484_v59 = vrot.slane %v1483_v57, 1 }
 0x1c4   :  { %1288 = vst.msk [vmem:[#allocation2] sm:$0x1] %vm1287_vm2, %v1286_v35  ;;  %v1485_v6 = vadd.f32 %v1484_v59, %v1483_v57 }
 0x1c6   :  { %1486 = vst.msk [vmem:[#allocation2 + $0x1] sm:$0x1] %vm1287_vm2, %v1485_v6 }
 0x1c7   :  { %1844 = shalt.err (!%p1841_p4)
}
 0x1c8   :  { %s1845_s8 = scalar_lea.hbm %s3214_s6, 32 }
 0x1c9   :  { %p1846_p5 = scmp.ne.s32.totalorder %s3214_s6, %s1845_s8  ;;  %p1849_p6 = scmp.lt.u32.totalorder %s1845_s8, %s3214_s6 }
 0x1cb   :  { %p1851_p7 = pnand %p1849_p6, %p1846_p5 }
 0x1cd   :  { %1854 = shalt.err (!%p1851_p7)
}
 0x1ce   :  { %1626 = dma.vmem_to_hbm [thread:$0]  %s1624_s28, 32, %s3214_s6, [#allocation3]  }
 0x1cf   :  { %1855 = dma.done.wait [#allocation3], 32  }
 0x1d0   :  { %1856 = vsyncadd [#allocation3], 4294967264 }
 0x1d1   :  { %1632 = vsyncpa [#allocation3], 1 }

</bundles_post_ra>
